<compile_context>
chip_gen: v5e
topology: v5e:2x2
jax: 0.10.0
libtpu: 0.0.40
codegen_flags: <defaults>
</compile_context>

<pallas_src>
import jax
import jax.numpy as jnp
from jax.experimental import pallas as pl
from jax.experimental.pallas import tpu as pltpu

G_DIM = 256
Z_SIZE = 100
GAME_STATE_DIM = 28          # assumption: z_size + game_state_dim = 128
IN_DIM = Z_SIZE + GAME_STATE_DIM
HEAD_PAD = 128               # final Linear padded from 1 -> 128 output lanes
BN_EPS = 1e-5


def generator_kernel(xy_ref,
                     w1_ref, b1_ref,
                     w2_ref, t2_ref,
                     w3_ref, t3_ref,
                     w4_ref, b4_ref,
                     out_ref):
    # block 1: Linear(128 -> 256) on the pre-concatenated bf16 input,
    # LeakyReLU(0.2), Dropout (eval: identity). bf16 matmul, f32 accumulate.
    h = jnp.dot(xy_ref[...], w1_ref[...],
                preferred_element_type=jnp.float32) + b1_ref[...]
    h = jnp.maximum(h, 0.2 * h)

    # block 2: Linear(256 -> 512) with eval-BN scale folded into the weights;
    # only the fused shift remains. LeakyReLU.
    h = jnp.dot(h.astype(jnp.bfloat16), w2_ref[...],
                preferred_element_type=jnp.float32) + t2_ref[...]
    h = jnp.maximum(h, 0.2 * h)

    # block 3: Linear(512 -> 1024) with folded eval-BN, LeakyReLU.
    h = jnp.dot(h.astype(jnp.bfloat16), w3_ref[...],
                preferred_element_type=jnp.float32) + t3_ref[...]
    h = jnp.maximum(h, 0.2 * h)

    # head: Linear(1024 -> 128 [zero-padded from 1]) + Sigmoid; lane-dense
    # bf16 store (only column 0 is meaningful).
    h = jnp.dot(h.astype(jnp.bfloat16), w4_ref[...],
                preferred_element_type=jnp.float32) + b4_ref[...]
    out_ref[...] = jax.nn.sigmoid(h).astype(out_ref.dtype)


def prepare_kernel_params(params):
    """f32 reference params -> kernel params (cast / BN-folded / padded)."""
    (w1, b1, w2, b2, s2, t2, w3, b3, s3, t3, w4, b4) = params

    # layer 1: single merged weight, bf16 for the MXU
    w1k = w1.astype(jnp.bfloat16)

    # fold eval-BN scale into the weight columns and the Linear bias into the
    # BN shift:  y = (x@w + b)*s + t  ==  x@(w*s) + (b*s + t)
    w2k = (w2 * s2).astype(jnp.bfloat16)
    t2k = b2 * s2 + t2
    w3k = (w3 * s3).astype(jnp.bfloat16)
    t3k = b3 * s3 + t3

    # pad the 1024->1 head to 1024->128 with zeros (lane-dense output)
    w4k = jnp.pad(w4, ((0, 0), (0, HEAD_PAD - w4.shape[1]))).astype(jnp.bfloat16)
    b4k = jnp.pad(b4, ((0, 0), (0, HEAD_PAD - b4.shape[1])))

    return (w1k, b1, w2k, t2k, w3k, t3k, w4k, b4k)


def generator_forward(x, y, params, *, tb=256):
    B = x.shape[0]
    assert B % tb == 0, "batch must be divisible by the batch tile"

    (w1, b1, w2, t2, w3, t3, w4, b4) = prepare_kernel_params(params)

    # single fused concat + cast in the wrapper (no split dot in the kernel)
    xy = jnp.concatenate([x, y], axis=1).astype(jnp.bfloat16)

    def full(a):
        # full-array block, constant index -> weights stay resident across grid
        return pl.BlockSpec(a.shape, lambda i: (0, 0))

    in_specs = [
        pl.BlockSpec((tb, IN_DIM), lambda i: (i, 0)),   # concatenated input, batch-tiled
        full(w1), full(b1),
        full(w2), full(t2),
        full(w3), full(t3),
        full(w4), full(b4),
    ]
    out_specs = pl.BlockSpec((tb, HEAD_PAD), lambda i: (i, 0))

    inputs = (xy, w1, b1, w2, t2, w3, t3, w4, b4)

    flops = 2 * B * (IN_DIM * G_DIM
                     + G_DIM * 2 * G_DIM
                     + 2 * G_DIM * 4 * G_DIM
                     + 4 * G_DIM * HEAD_PAD)
    bytes_accessed = (sum(int(a.size) * a.dtype.itemsize for a in inputs)
                      + B * HEAD_PAD * 2)          # bf16 output writeback
    cost = pl.CostEstimate(flops=flops,
                           transcendentals=B * HEAD_PAD,
                           bytes_accessed=bytes_accessed)

    out = pl.pallas_call(
        generator_kernel,
        out_shape=jax.ShapeDtypeStruct((B, HEAD_PAD), jnp.bfloat16),
        grid=(B // tb,),
        in_specs=in_specs,
        out_specs=out_specs,
        compiler_params=pltpu.CompilerParams(
            dimension_semantics=("parallel",),
            vmem_limit_bytes=32 * 1024 * 1024),
        cost_estimate=cost,
    )(*inputs)

    return out[:, :1]   # only column 0 is the real head output (bf16)


def init_params(key):
    """Deterministic f32 parameter init (PyTorch-style uniform bounds for Linear)."""
    def linear(k, fan_in, fan_out):
        kw, kb = jax.random.split(k)
        bound = 1.0 / jnp.sqrt(jnp.float32(fan_in))
        w = jax.random.uniform(kw, (fan_in, fan_out), jnp.float32, -bound, bound)
        b = jax.random.uniform(kb, (1, fan_out), jnp.float32, -bound, bound)
        return w, b

    def bn_folded(k, n):
        k1, k2, k3, k4 = jax.random.split(k, 4)
        gamma = 1.0 + 0.1 * jax.random.normal(k1, (1, n), jnp.float32)
        beta = 0.1 * jax.random.normal(k2, (1, n), jnp.float32)
        running_mean = 0.1 * jax.random.normal(k3, (1, n), jnp.float32)
        running_var = 1.0 + 0.1 * jnp.abs(jax.random.normal(k4, (1, n), jnp.float32))
        scale = gamma / jnp.sqrt(running_var + BN_EPS)
        shift = beta - running_mean * scale
        return scale, shift

    ks = jax.random.split(key, 6)
    w1, b1 = linear(ks[0], IN_DIM, G_DIM)
    w2, b2 = linear(ks[1], G_DIM, 2 * G_DIM)
    s2, t2 = bn_folded(ks[2], 2 * G_DIM)
    w3, b3 = linear(ks[3], 2 * G_DIM, 4 * G_DIM)
    s3, t3 = bn_folded(ks[4], 4 * G_DIM)
    w4, b4 = linear(ks[5], 4 * G_DIM, 1)
    return (w1, b1, w2, b2, s2, t2, w3, b3, s3, t3, w4, b4)


def generator_ref(x, y, params):
    """Pure-JAX f32 reference (eval-mode, unfolded params) for correctness check."""
    (w1, b1, w2, b2, s2, t2, w3, b3, s3, t3, w4, b4) = params
    h = jnp.concatenate([x, y], axis=1)
    h = h @ w1 + b1
    h = jnp.where(h > 0, h, 0.2 * h)
    h = h @ w2 + b2
    h = h * s2 + t2
    h = jnp.where(h > 0, h, 0.2 * h)
    h = h @ w3 + b3
    h = h * s3 + t3
    h = jnp.where(h > 0, h, 0.2 * h)
    h = h @ w4 + b4
    return jax.nn.sigmoid(h)


if __name__ == "__main__":
    key = jax.random.PRNGKey(0)
    k_params, k_z, k_state = jax.random.split(key, 3)

    B = 512   # 2 grid steps of tb=256 -> both v7x TensorCores get work
    params = init_params(k_params)
    # z ~ U(-1, 1) as in Generator.generate; game_state ~ N(0, 1)
    x = jax.random.uniform(k_z, (B, Z_SIZE), jnp.float32, -1.0, 1.0)
    y = jax.random.normal(k_state, (B, GAME_STATE_DIM), jnp.float32)

    out = generator_forward(x, y, params, tb=256)
    out = jax.block_until_ready(out)

    ref = generator_ref(x, y, params)
    assert out.shape == (B, 1)
    # bf16 matmul operands / bf16 output with f32 accumulation -> relaxed
    # tolerance post-sigmoid
    out_f32 = out.astype(jnp.float32)
    assert jnp.allclose(out_f32, ref, atol=2e-2, rtol=2e-2), (
        f"max abs diff {jnp.max(jnp.abs(out_f32 - ref))}")

    print("KERNEL_OK")
</pallas_src>

<mosaic_0001>
module attributes {stable_mosaic.version = 11 : i64} {
  func.func @generator_kernel(%arg0: i32, %arg1: memref<256x128xbf16, #tpu.memory_space<vmem>>, %arg2: memref<128x256xbf16, #tpu.memory_space<vmem>>, %arg3: memref<1x256xf32, #tpu.memory_space<vmem>>, %arg4: memref<256x512xbf16, #tpu.memory_space<vmem>>, %arg5: memref<1x512xf32, #tpu.memory_space<vmem>>, %arg6: memref<512x1024xbf16, #tpu.memory_space<vmem>>, %arg7: memref<1x1024xf32, #tpu.memory_space<vmem>>, %arg8: memref<1024x128xbf16, #tpu.memory_space<vmem>>, %arg9: memref<1x128xf32, #tpu.memory_space<vmem>>, %arg10: memref<256x128xbf16, #tpu.memory_space<vmem>>) attributes {dimension_semantics = [#tpu.dimension_semantics<parallel>], iteration_bounds = array<i64: 2>, scalar_prefetch = 0 : i64, scratch_operands = 0 : i64, tpu.core_type = #tpu.core_type<tc>, window_params = [{transform_indices = @transform_0, window_bounds = array<i64: 256, 128>}, {pipeline_mode = #tpu.pipeline_mode<synchronous>, transform_indices = @transform_1, window_bounds = array<i64: 128, 256>}, {pipeline_mode = #tpu.pipeline_mode<synchronous>, transform_indices = @transform_2, window_bounds = array<i64: 1, 256>}, {pipeline_mode = #tpu.pipeline_mode<synchronous>, transform_indices = @transform_3, window_bounds = array<i64: 256, 512>}, {pipeline_mode = #tpu.pipeline_mode<synchronous>, transform_indices = @transform_4, window_bounds = array<i64: 1, 512>}, {pipeline_mode = #tpu.pipeline_mode<synchronous>, transform_indices = @transform_5, window_bounds = array<i64: 512, 1024>}, {pipeline_mode = #tpu.pipeline_mode<synchronous>, transform_indices = @transform_6, window_bounds = array<i64: 1, 1024>}, {pipeline_mode = #tpu.pipeline_mode<synchronous>, transform_indices = @transform_7, window_bounds = array<i64: 1024, 128>}, {pipeline_mode = #tpu.pipeline_mode<synchronous>, transform_indices = @transform_8, window_bounds = array<i64: 1, 128>}, {transform_indices = @transform_9, window_bounds = array<i64: 256, 128>}]} {
    %c0 = arith.constant 0 : index
    %c0_0 = arith.constant 0 : index
    %0 = vector.load %arg1[%c0, %c0_0] : memref<256x128xbf16, #tpu.memory_space<vmem>>, vector<256x128xbf16>
    %c0_1 = arith.constant 0 : index
    %c0_2 = arith.constant 0 : index
    %1 = vector.load %arg2[%c0_1, %c0_2] : memref<128x256xbf16, #tpu.memory_space<vmem>>, vector<128x256xbf16>
    %cst = arith.constant dense<0.000000e+00> : vector<256x256xf32>
    %2 = tpu.matmul %0, %1, %cst {dimension_numbers = #tpu.dot_dimension_numbers<[1], [0], [0], [1], [0, 0, 1, 1], [], []>} : vector<256x128xbf16>, vector<128x256xbf16>, vector<256x256xf32> -> vector<256x256xf32>
    %c0_3 = arith.constant 0 : index
    %c0_4 = arith.constant 0 : index
    %3 = vector.load %arg3[%c0_3, %c0_4] : memref<1x256xf32, #tpu.memory_space<vmem>>, vector<1x256xf32>
    %4 = vector.broadcast %3 : vector<1x256xf32> to vector<256x256xf32>
    %5 = arith.addf %2, %4 : vector<256x256xf32>
    %cst_5 = arith.constant 2.000000e-01 : f32
    %6 = vector.broadcast %cst_5 : f32 to vector<256x256xf32>
    %7 = arith.mulf %6, %5 : vector<256x256xf32>
    %8 = arith.maximumf %5, %7 : vector<256x256xf32>
    %9 = arith.truncf %8 : vector<256x256xf32> to vector<256x256xbf16>
    %c0_6 = arith.constant 0 : index
    %c0_7 = arith.constant 0 : index
    %10 = vector.load %arg4[%c0_6, %c0_7] : memref<256x512xbf16, #tpu.memory_space<vmem>>, vector<256x512xbf16>
    %cst_8 = arith.constant dense<0.000000e+00> : vector<256x512xf32>
    %11 = tpu.matmul %9, %10, %cst_8 {dimension_numbers = #tpu.dot_dimension_numbers<[1], [0], [0], [1], [0, 0, 1, 1], [], []>} : vector<256x256xbf16>, vector<256x512xbf16>, vector<256x512xf32> -> vector<256x512xf32>
    %c0_9 = arith.constant 0 : index
    %c0_10 = arith.constant 0 : index
    %12 = vector.load %arg5[%c0_9, %c0_10] : memref<1x512xf32, #tpu.memory_space<vmem>>, vector<1x512xf32>
    %13 = vector.broadcast %12 : vector<1x512xf32> to vector<256x512xf32>
    %14 = arith.addf %11, %13 : vector<256x512xf32>
    %cst_11 = arith.constant 2.000000e-01 : f32
    %15 = vector.broadcast %cst_11 : f32 to vector<256x512xf32>
    %16 = arith.mulf %15, %14 : vector<256x512xf32>
    %17 = arith.maximumf %14, %16 : vector<256x512xf32>
    %18 = arith.truncf %17 : vector<256x512xf32> to vector<256x512xbf16>
    %c0_12 = arith.constant 0 : index
    %c0_13 = arith.constant 0 : index
    %19 = vector.load %arg6[%c0_12, %c0_13] : memref<512x1024xbf16, #tpu.memory_space<vmem>>, vector<512x1024xbf16>
    %cst_14 = arith.constant dense<0.000000e+00> : vector<256x1024xf32>
    %20 = tpu.matmul %18, %19, %cst_14 {dimension_numbers = #tpu.dot_dimension_numbers<[1], [0], [0], [1], [0, 0, 1, 1], [], []>} : vector<256x512xbf16>, vector<512x1024xbf16>, vector<256x1024xf32> -> vector<256x1024xf32>
    %c0_15 = arith.constant 0 : index
    %c0_16 = arith.constant 0 : index
    %21 = vector.load %arg7[%c0_15, %c0_16] : memref<1x1024xf32, #tpu.memory_space<vmem>>, vector<1x1024xf32>
    %22 = vector.broadcast %21 : vector<1x1024xf32> to vector<256x1024xf32>
    %23 = arith.addf %20, %22 : vector<256x1024xf32>
    %cst_17 = arith.constant 2.000000e-01 : f32
    %24 = vector.broadcast %cst_17 : f32 to vector<256x1024xf32>
    %25 = arith.mulf %24, %23 : vector<256x1024xf32>
    %26 = arith.maximumf %23, %25 : vector<256x1024xf32>
    %27 = arith.truncf %26 : vector<256x1024xf32> to vector<256x1024xbf16>
    %c0_18 = arith.constant 0 : index
    %c0_19 = arith.constant 0 : index
    %28 = vector.load %arg8[%c0_18, %c0_19] : memref<1024x128xbf16, #tpu.memory_space<vmem>>, vector<1024x128xbf16>
    %cst_20 = arith.constant dense<0.000000e+00> : vector<256x128xf32>
    %29 = tpu.matmul %27, %28, %cst_20 {dimension_numbers = #tpu.dot_dimension_numbers<[1], [0], [0], [1], [0, 0, 1, 1], [], []>} : vector<256x1024xbf16>, vector<1024x128xbf16>, vector<256x128xf32> -> vector<256x128xf32>
    %c0_21 = arith.constant 0 : index
    %c0_22 = arith.constant 0 : index
    %30 = vector.load %arg9[%c0_21, %c0_22] : memref<1x128xf32, #tpu.memory_space<vmem>>, vector<1x128xf32>
    %31 = vector.broadcast %30 : vector<1x128xf32> to vector<256x128xf32>
    %32 = arith.addf %29, %31 : vector<256x128xf32>
    %33 = arith.negf %32 : vector<256x128xf32>
    %34 = math.exp %33 : vector<256x128xf32>
    %cst_23 = arith.constant 1.000000e+00 : f32
    %35 = vector.broadcast %cst_23 : f32 to vector<256x128xf32>
    %36 = arith.addf %35, %34 : vector<256x128xf32>
    %37 = arith.divf %35, %36 : vector<256x128xf32>
    %38 = arith.truncf %37 : vector<256x128xf32> to vector<256x128xbf16>
    %c0_24 = arith.constant 0 : index
    %c0_25 = arith.constant 0 : index
    %39 = vector.load %arg10[%c0_24, %c0_25] : memref<256x128xbf16, #tpu.memory_space<vmem>>, vector<256x128xbf16>
    tpu.vector_store %arg10[%c0_24, %c0_25], %38 {strides = array<i32>} : memref<256x128xbf16, #tpu.memory_space<vmem>>, vector<256x128xbf16>,
    return
  }
  func.func @transform_0(%arg0: i32) -> (i32, i32) {
    %c0_i32 = arith.constant 0 : i32
    %c0_i32_0 = arith.constant 0 : i32
    return %arg0, %c0_i32 : i32, i32
  }
  func.func @transform_1(%arg0: i32) -> (i32, i32) {
    %c0_i32 = arith.constant 0 : i32
    %c0_i32_0 = arith.constant 0 : i32
    %c0_i32_1 = arith.constant 0 : i32
    return %c0_i32, %c0_i32_0 : i32, i32
  }
  func.func @transform_2(%arg0: i32) -> (i32, i32) {
    %c0_i32 = arith.constant 0 : i32
    %c0_i32_0 = arith.constant 0 : i32
    %c0_i32_1 = arith.constant 0 : i32
    return %c0_i32, %c0_i32_0 : i32, i32
  }
  func.func @transform_3(%arg0: i32) -> (i32, i32) {
    %c0_i32 = arith.constant 0 : i32
    %c0_i32_0 = arith.constant 0 : i32
    %c0_i32_1 = arith.constant 0 : i32
    return %c0_i32, %c0_i32_0 : i32, i32
  }
  func.func @transform_4(%arg0: i32) -> (i32, i32) {
    %c0_i32 = arith.constant 0 : i32
    %c0_i32_0 = arith.constant 0 : i32
    %c0_i32_1 = arith.constant 0 : i32
    return %c0_i32, %c0_i32_0 : i32, i32
  }
  func.func @transform_5(%arg0: i32) -> (i32, i32) {
    %c0_i32 = arith.constant 0 : i32
    %c0_i32_0 = arith.constant 0 : i32
    %c0_i32_1 = arith.constant 0 : i32
    return %c0_i32, %c0_i32_0 : i32, i32
  }
  func.func @transform_6(%arg0: i32) -> (i32, i32) {
    %c0_i32 = arith.constant 0 : i32
    %c0_i32_0 = arith.constant 0 : i32
    %c0_i32_1 = arith.constant 0 : i32
    return %c0_i32, %c0_i32_0 : i32, i32
  }
  func.func @transform_7(%arg0: i32) -> (i32, i32) {
    %c0_i32 = arith.constant 0 : i32
    %c0_i32_0 = arith.constant 0 : i32
    %c0_i32_1 = arith.constant 0 : i32
    return %c0_i32, %c0_i32_0 : i32, i32
  }
  func.func @transform_8(%arg0: i32) -> (i32, i32) {
    %c0_i32 = arith.constant 0 : i32
    %c0_i32_0 = arith.constant 0 : i32
    %c0_i32_1 = arith.constant 0 : i32
    return %c0_i32, %c0_i32_0 : i32, i32
  }
  func.func @transform_9(%arg0: i32) -> (i32, i32) {
    %c0_i32 = arith.constant 0 : i32
    %c0_i32_0 = arith.constant 0 : i32
    return %arg0, %c0_i32 : i32, i32
  }
}

</mosaic_0001>

<bundles_post_ra>
// kernel: tpu_custom_call.1
= control target key start
LH: loop header
LB: loop body
LE: loop exit
PB: predicated region body
PF: predicated region fallthrough
CT: control target
= control target key end

     0   :  { %s14987_s0 = inlined_call_operand.hbm [shape: bf16[512,128], index: 0, kind: input, shape index: {}]   ;;  %s14988_s1 = inlined_call_operand.hbm [shape: bf16[128,256], index: 1, kind: input, shape index: {}]   ;;  %s14989_s2 = inlined_call_operand.hbm [shape: f32[1,256], index: 2, kind: input, shape index: {}]   ;;  %s14990_s3 = inlined_call_operand.hbm [shape: bf16[256,512], index: 3, kind: input, shape index: {}]   ;;  %s14991_s4 = inlined_call_operand.hbm [shape: f32[1,512], index: 4, kind: input, shape index: {}]   ;;  %s14992_s5 = inlined_call_operand.hbm [shape: bf16[512,1024], index: 5, kind: input, shape index: {}]   ;;  %s14993_s6 = inlined_call_operand.hbm [shape: f32[1,1024], index: 6, kind: input, shape index: {}]   ;;  %s14994_s7 = inlined_call_operand.hbm [shape: bf16[1024,128], index: 7, kind: input, shape index: {}]   ;;  %s14995_s8 = inlined_call_operand.vmem [shape: f32[1,128], index: 8, kind: input, shape index: {}]   ;;  %s14996_s9 = inlined_call_operand.hbm [shape: bf16[512,128], index: 9, kind: output, shape index: {}]  }
   0x1   :  { %15098 = sst [smem:[#allocation154_spill]] %s14988_s1 }
   0x2   :  { %15099 = sst [smem:[#allocation155_spill]] %s14989_s2 }
   0x3   :  { %15100 = sst [smem:[#allocation156_spill]] %s14990_s3 }
   0x4   :  { %14 = vsyncpa [#allocation3], 0 }
   0x5   :  { %16 = vsyncpa [#allocation3 + $0x1], 0 }
   0x6   :  { %17 = vsyncpa [#allocation6], 0 }
   0x7   :  { %18 = vsyncpa [#allocation9], 0 }
   0x8   :  { %19 = vsyncpa [#allocation12], 0 }
   0x9   :  { %20 = vsyncpa [#allocation15], 0 }
   0xa   :  { %21 = vsyncpa [#allocation4], 0 }
   0xb   :  { %23 = vsyncpa [#allocation4 + $0x1], 0  ;;  %s12464_s30 = smov 0   ;;  %s12466_s10 = smov 0  }
   0xc   :  { %s12468_s11 = smov 0   ;;  %s12470_s12 = smov 0  }
   0xd LB: > { %s15101_s1 = sld [smem:[#allocation154_spill]]  ;;  %s12488_s16 = sadd.s32 4294967295, %s12395_s12   ;;  %s12395_s12 = sphi %s12470_s12, %s15628_s12   ;;  %s12391_s11 = sphi %s12468_s11, %s15627_s11   ;;  %s12387_s10 = sphi %s12466_s10, %s15626_s10   ;;  %s12383_s30 = sphi %s12464_s30, %s15625_s30  }
   0xe   : > { %p9558_p0 = scmp.ge.s32.totalorder %s12395_s12, 1  ;;  %p50_p1 = scmp.eq.s32.totalorder %s12488_s16, 0 }
   0xf   : > { %p254_p2 = scmp.lt.s32.totalorder %s12395_s12, 3  ;;  %s12397_s18 = smov [#allocation5]  }
  0x10   : > { %s267_s19 = sshll.u32 %s12397_s18, 4  ;;  %s15103_s3 = sld [smem:[#allocation156_spill]]  ;;  %s268_s19 = int_to_ptr.vmem [resolvable:$true] %s267_s19 }
  0x11   : > { %p12493_p3 = pnand %p9558_p0, %p254_p2  ;;  %s12398_s24 = smov [#allocation8]  }
  0x12   : > { %s293_s25 = sshll.u32 %s12398_s24, 4  ;;  %s12399_s26 = smov 128   ;;  %s294_s25 = int_to_ptr.vmem [resolvable:$true] %s293_s25 }
  0x13   : > { %s265_s15 = sshll.u32 %s15101_s1, 4  ;;  %p11842_p4 = pneg %p12493_p3  ;;  %s266_s15 = int_to_ptr.hbm [resolvable:$true] %s265_s15 }
  0x14   : > { %s12400_s27 = smov 8   ;;  %s12401_s28 = smov 256  }
  0x15   : > { %p12505_p6 = pnand %p11842_p4, %p50_p1  ;;  %s12402_s29 = smov 16  }
  0x16   : > { %s291_s22 = sshll.u32 %s15103_s3, 4  ;;  %s317_s18 = sshll.u32 %s14992_s5, 4  ;;  %s292_s22 = int_to_ptr.hbm [resolvable:$true] %s291_s22  ;;  %s318_s18 = int_to_ptr.hbm [resolvable:$true] %s317_s18 }
  0x17   : > { %11845 = dma.hbm_to_vmem [thread:$0]  (!%p12505_p6), %s266_s15, 2048, %s268_s19, [#allocation6], %s12399_s26, %s12399_s26, %s12400_s27  }
  0x18   : > { %11851 = dma.hbm_to_vmem [thread:$0]  (!%p12505_p6), %s292_s22, 8192, %s294_s25, [#allocation9], %s12401_s28, %s12401_s28, %s12402_s29  }
  0x19   : > { %s12403_s20 = smov [#allocation11]   ;;  %s15105_s2 = sld [smem:[#allocation155_spill]] }
  0x1a   : > { %s319_s21 = sshll.u32 %s12403_s20, 4  ;;  %s12404_s15 = smov 512   ;;  %s320_s21 = int_to_ptr.vmem [resolvable:$true] %s319_s21 }
  0x1b   : > { %s12405_s19 = smov 32   ;;  %s12406_s22 = smov [#allocation7]  }
  0x1c   : > { %11857 = dma.hbm_to_vmem [thread:$0]  (!%p12505_p6), %s318_s18, 32768, %s320_s21, [#allocation12], %s12404_s15, %s12404_s15, %s12405_s19  }
  0x1d   : > { %s282_s25 = sshll.u32 %s12406_s22, 4  ;;  %s306_s28 = sshll.u32 %s14991_s4, 4  ;;  %s283_s25 = int_to_ptr.vmem [resolvable:$true] %s282_s25  ;;  %s307_s28 = int_to_ptr.hbm [resolvable:$true] %s306_s28 }
  0x1e   : > { %s332_s13 = sshll.u32 %s14993_s6, 4  ;;  %s12407_s14 = smov [#allocation10]   ;;  %s333_s13 = int_to_ptr.hbm [resolvable:$true] %s332_s13 }
  0x1f   : > { %s280_s3 = sshll.u32 %s15105_s2, 4  ;;  %s308_s20 = sshll.u32 %s12407_s14, 4  ;;  %s281_s3 = int_to_ptr.hbm [resolvable:$true] %s280_s3  ;;  %s309_s20 = int_to_ptr.vmem [resolvable:$true] %s308_s20 }
  0x20   : > { %11848 = dma.hbm_to_vmem [thread:$0]  (!%p12505_p6), %s281_s3, 32, %s283_s25, [#allocation6]  }
  0x21   : > { %11854 = dma.hbm_to_vmem [thread:$0]  (!%p12505_p6), %s307_s28, 64, %s309_s20, [#allocation9]  }
  0x22   : > { %s12408_s18 = smov [#allocation13]   ;;  %s343_s15 = sshll.u32 %s14994_s7, 4  ;;  %s344_s15 = int_to_ptr.hbm [resolvable:$true] %s343_s15 }
  0x23   : > { %s334_s21 = sshll.u32 %s12408_s18, 4  ;;  %s12409_s19 = smov [#allocation14]   ;;  %s335_s21 = int_to_ptr.vmem [resolvable:$true] %s334_s21 }
  0x24   : > { %11860 = dma.hbm_to_vmem [thread:$0]  (!%p12505_p6), %s333_s13, 128, %s335_s21, [#allocation12]  }
  0x25   : > { %s345_s22 = sshll.u32 %s12409_s19, 4  ;;  %s14997_s25 = smov 64   ;;  %s346_s22 = int_to_ptr.vmem [resolvable:$true] %s345_s22 }
  0x26   : > { %s14998_s26 = smov 4   ;;  %s9557_s27 = sadd.s32 4294967294, %s12395_s12  }
  0x27   : > { %11863 = dma.hbm_to_vmem [thread:$0]  (!%p12505_p6), %s344_s15, 8192, %s346_s22, [#allocation15], %s14997_s25, %s14997_s25, %s14998_s26  }
  0x28   : > { %s12543_s28 = sadd.s32 1, %s12395_s12   ;;  %s36_s29 = sadd.s32 1, %s12391_s11 }
  0x29   : > { %s33_s1 = ssub.s32 %s12395_s12, %s12543_s28  ;;  %p43_p7 = scmp.ne.s32.totalorder %s12391_s11, %s12387_s10 }
  0x2a   : > { %p34_p8 = scmp.eq.s32.totalorder %s33_s1, 0  ;;  %p44_p9 = scmp.eq.s32.totalorder %s12395_s12, 0 }
  0x2b   : > { %p49_p10 = scmp.ne.s32.totalorder %s12387_s10, %s12383_s30  ;;  %p241_p11 = scmp.eq.s32.totalorder %s12488_s16, 1 }
  0x2c   : > { %s12555_s13 = scalar_select %p34_p8, %s12391_s11, %s36_s29  }
  0x2d   : > { %p12559_p12 = por %p50_p1, %p49_p10  ;;  %p12563_p13 = por %p241_p11, %p43_p7 }
  0x2e   : > { %p247_p0 = scmp.eq.s32.totalorder %s9557_s27, 1  ;;  %p45_p2 = por %p44_p9, %p43_p7 }
  0x2f   : > { %s362_s20 = sand.u32 1, %s12391_s11   ;;  %p11879_p6 = scmp.lt.s32.totalorder %s12395_s12, 2 }
  0x30   : > { %p12568_p4 = por %p247_p0, %p49_p10  ;;  %s9567_s21 = sshll.u32 %s362_s20, 7 }
  0x31   : > { %s11281_s3 = sshll.u32 %s12395_s12, 7  ;;  %s366_s29 = scalar_lea.vmem [#allocation2], %s9567_s21 }
  0x32   : > { %s371_s19 = scalar_lea.hbm %s14987_s0, %s11281_s3  ;;  %s374_s1 = sshll.u32 %s366_s29, 4  ;;  %s375_s1 = int_to_ptr.vmem [resolvable:$true] %s374_s1 }
  0x33   : > { %s372_s22 = sshll.u32 %s371_s19, 4  ;;  %p12577_p8 = pnand %p11879_p6, %p45_p2  ;;  %s373_s22 = int_to_ptr.hbm [resolvable:$true] %s372_s22 }
  0x34   : > { %s363_s25 = scalar_lea.sflag [#allocation3], %s362_s20  ;;  %s12283_s26 = sshra.s32 %s373_s22, 4  ;;  %s12284_s26 = int_to_ptr.hbm [resolvable:$true] %s12283_s26 }
  0x35   : > { %s12285_s2 = scalar_lea.hbm %s12284_s26, 128  ;;  %p12287_p9 = pneg %p12577_p8 }
  0x36   : > { %p12286_p7 = scmp.ne.s32.totalorder %s12284_s26, %s12285_s2  ;;  %s12290_s21 = scalar_lea.hbm %s14987_s0, 256 }
  0x37   : > { %p12291_p0 = scmp.lt.s32.totalorder %s12284_s26, %s14987_s0  ;;  %p12292_p2 = scmp.lt.s32.totalorder %s12290_s21, %s12285_s2 }
  0x38   : > { %p12288_p10 = pnand %p12287_p9, %p12286_p7 }
  0x39   : > { %p12293_p6 = por %p12292_p2, %p12291_p0 }
  0x3a   : > { %p12289_p11 = pneg %p12288_p10 }
  0x3c   : > { %p12294_p5 = pnand %p12293_p6, %p12289_p11 }
  0x3e   : > { %12297 = shalt.err (!%p12294_p5)
}
  0x3f   : > { %s15110_s20 = smov 4   ;;  %s15111_s29 = smov 64  }
  0x40   : > { %11867 = dma.hbm_to_vmem [thread:$0]  (!%p12577_p8), %s373_s22, 2048, %s375_s1, %s363_s25, %s15111_s29, %s15111_s29, %s15110_s20  }
  0x41   : > { %386 = sbr.rel (%p12493_p3) target bundleno = 3496 (0xda8), region = 56 }
  0x46   : > { %s12597_s3 = sand.u32 1, %s12387_s10  }
  0x47   : > { %s9571_s2 = sshll.u32 %s12597_s3, 7  ;;  %s389_s26 = scalar_lea.sflag [#allocation3], %s12597_s3 }
  0x48   : > { %s12603_s24 = scalar_lea.vmem [#allocation2], %s9571_s2 }
  0x49   : > { %12358 = dma.done.wait (%p12559_p12), %s389_s26, 2048  }
  0x4a   : > { %12360 = vsyncadd (%p12559_p12), %s389_s26, 4294965248 }
  0x4b   : > { %12362 = dma.done.wait (%p50_p1), [#allocation6], 2080  }
  0x4c   : > { %12364 = vsyncadd (%p50_p1), [#allocation6], 4294965216 }
  0x4d   : > { %12366 = dma.done.wait (%p50_p1), [#allocation9], 8256  }
  0x4e   : > { %12368 = vsyncadd (%p50_p1), [#allocation9], 4294959040 }
  0x4f   : > { %12370 = dma.done.wait (%p50_p1), [#allocation12], 32896  }
  0x50   : > { %12372 = vsyncadd (%p50_p1), [#allocation12], 4294934400 }
  0x51   : > { %12374 = dma.done.wait (%p50_p1), [#allocation15], 8192  }
  0x52   : > { %12376 = vsyncadd (%p50_p1), [#allocation15], 4294959104  ;;  %v9702_v0 = vld [vmem:[#allocation5 + $0x70] sm:$0xf]  ;;  %v11313_v1 = vld [vmem:[#allocation5 + $0x74] sm:$0xf0] }
  0x53   : > { %v11312_v2 = vld [vmem:[#allocation5 + $0x74] sm:$0xf]  ;;  %v9703_v3 = vor.u32 %v11313_v1, %v9702_v0  ;;  %v9704_v4 = vld [vmem:[#allocation5 + $0x78] sm:$0xf0]  ;;  %v9694_v5 = vld [vmem:[#allocation5 + $0x60] sm:$0xf] }
  0x54   : > { %v11311_v6 = vld [vmem:[#allocation5 + $0x64] sm:$0xf0]  ;;  %v9707_v7 = vor.u32 %v11312_v2, %v9704_v4  ;;  %v11310_v8 = vld [vmem:[#allocation5 + $0x64] sm:$0xf]  ;;  %v9696_v9 = vld [vmem:[#allocation5 + $0x68] sm:$0xf0] }
  0x55   : > { %695 = vmatpush.bf16.msra.mxu0 %v9703_v3  ;;  %11794 = vmatpush.bf16.msra.mxu2 %v9703_v3  ;;  %v9695_v10 = vor.u32 %v11311_v6, %v9694_v5  ;;  %v9699_v11 = vor.u32 %v11310_v8, %v9696_v9  ;;  %v9686_v12 = vld [vmem:[#allocation5 + $0x50] sm:$0xf]  ;;  %v11309_v13 = vld [vmem:[#allocation5 + $0x54] sm:$0xf0]  ;;  %v11308_v14 = vld [vmem:[#allocation5 + $0x54] sm:$0xf] }
  0x56   : > { %784 = vmatpush.bf16.msra.mxu1 %v9707_v7  ;;  %11802 = vmatpush.bf16.msra.mxu3 %v9707_v7  ;;  %v9688_v15 = vld [vmem:[#allocation5 + $0x58] sm:$0xf0]  ;;  %v9687_v16 = vor.u32 %v11309_v13, %v9686_v12  ;;  %v9678_v18 = vld [vmem:[#allocation5 + $0x40] sm:$0xf]  ;;  %v11307_v19 = vld [vmem:[#allocation5 + $0x44] sm:$0xf0] }
  0x57   : > { %v9691_v17 = vor.u32 %v11308_v14, %v9688_v15  ;;  %v11306_v20 = vld [vmem:[#allocation5 + $0x44] sm:$0xf]  ;;  %v9680_v21 = vld [vmem:[#allocation5 + $0x48] sm:$0xf0]  ;;  %v9679_v22 = vor.u32 %v11307_v19, %v9678_v18  ;;  %v9670_v24 = vld [vmem:[#allocation5 + $0x30] sm:$0xf] }
  0x58   : > { %v9683_v23 = vor.u32 %v11306_v20, %v9680_v21  ;;  %v11305_v25 = vld [vmem:[#allocation5 + $0x34] sm:$0xf0]  ;;  %v11304_v26 = vld [vmem:[#allocation5 + $0x34] sm:$0xf]  ;;  %v9672_v27 = vld [vmem:[#allocation5 + $0x38] sm:$0xf0] }
  0x59   : > { %696 = vmatpush.bf16.msra.mxu0 %v9695_v10  ;;  %11795 = vmatpush.bf16.msra.mxu2 %v9695_v10  ;;  %v9671_v28 = vor.u32 %v11305_v25, %v9670_v24  ;;  %v9675_v29 = vor.u32 %v11304_v26, %v9672_v27  ;;  %v9662_v30 = vld [vmem:[#allocation5 + $0x20] sm:$0xf]  ;;  %v11303_v31 = vld [vmem:[#allocation5 + $0x24] sm:$0xf0]  ;;  %v11302_v32 = vld [vmem:[#allocation5 + $0x24] sm:$0xf] }
  0x5a   : > { %785 = vmatpush.bf16.msra.mxu1 %v9699_v11  ;;  %11803 = vmatpush.bf16.msra.mxu3 %v9699_v11  ;;  %v9664_v33 = vld [vmem:[#allocation5 + $0x28] sm:$0xf0]  ;;  %v9663_v34 = vor.u32 %v11303_v31, %v9662_v30  ;;  %v9654_v36 = vld [vmem:[#allocation5 + $0x10] sm:$0xf]  ;;  %v11301_v37 = vld [vmem:[#allocation5 + $0x14] sm:$0xf0] }
  0x5b   : > { %v9667_v35 = vor.u32 %v11302_v32, %v9664_v33  ;;  %v11300_v38 = vld [vmem:[#allocation5 + $0x14] sm:$0xf]  ;;  %v9656_v39 = vld [vmem:[#allocation5 + $0x18] sm:$0xf0]  ;;  %v9655_v40 = vor.u32 %v11301_v37, %v9654_v36  ;;  %v9646_v42 = vld [vmem:[#allocation5] sm:$0xf] }
  0x5c   : > { %v9659_v41 = vor.u32 %v11300_v38, %v9656_v39  ;;  %v11299_v43 = vld [vmem:[#allocation5 + $0x4] sm:$0xf0]  ;;  %v11298_v44 = vld [vmem:[#allocation5 + $0x4] sm:$0xf]  ;;  %v9648_v45 = vld [vmem:[#allocation5 + $0x8] sm:$0xf0] }
  0x5d   : > { %697 = vmatpush.bf16.msra.mxu0 %v9687_v16  ;;  %11796 = vmatpush.bf16.msra.mxu2 %v9687_v16  ;;  %v9822_v46 = vld [vmem:[#allocation8 + $0xe0] sm:$0xf]  ;;  %v11344_v47 = vld [vmem:[#allocation8 + $0xec] sm:$0xf0]  ;;  %v9647_v50 = vor.u32 %v11299_v43, %v9646_v42  ;;  %v9651_v51 = vor.u32 %v11298_v44, %v9648_v45  ;;  %v11342_v53 = vld [vmem:[#allocation8 + $0xe4] sm:$0xf] }
  0x5e   : > { %786 = vmatpush.bf16.msra.mxu1 %v9691_v17  ;;  %11804 = vmatpush.bf16.msra.mxu3 %v9691_v17  ;;  %v9950_v48 = vld [vmem:[#allocation8 + $0x1e0] sm:$0xf]  ;;  %v11376_v49 = vld [vmem:[#allocation8 + $0x1ec] sm:$0xf0]  ;;  %v9823_v54 = vor.u32 %v11344_v47, %v9822_v46  ;;  %v9824_v56 = vld [vmem:[#allocation8 + $0xf0] sm:$0xf0] }
  0x5f   : > { %v11282_v52 = vld [vmem:[%s12603_s24] sm:$0xff]  ;;  %v9951_v55 = vor.u32 %v11376_v49, %v9950_v48  ;;  %v9952_v58 = vld [vmem:[#allocation8 + $0x1f0] sm:$0xf0]  ;;  %v11340_v61 = vld [vmem:[#allocation8 + $0xcc] sm:$0xf0]  ;;  %v9827_v62 = vor.u32 %v11342_v53, %v9824_v56  ;;  %s14562_s23 = scalar_lea.vmem [#allocation16], %s9571_s2 }
  0x60   : > { %v11374_v57 = vld [vmem:[#allocation8 + $0x1e4] sm:$0xf]  ;;  %v9806_v60 = vld [vmem:[#allocation8 + $0xc0] sm:$0xf]  ;;  %v11372_v2 = vld [vmem:[#allocation8 + $0x1cc] sm:$0xf0] }
  0x61   : > { %698 = vmatpush.bf16.msra.mxu0 %v9679_v22  ;;  %11797 = vmatpush.bf16.msra.mxu2 %v9679_v22  ;;  %v11290_v59 = vld [vmem:[%s12603_s24 + $0x40] sm:$0xff]  ;;  %v9955_v63 = vor.u32 %v11374_v57, %v9952_v58  ;;  %v9807_v0 = vor.u32 %v11340_v61, %v9806_v60  ;;  %v9808_v5 = vld [vmem:[#allocation8 + $0xd0] sm:$0xf0]  ;;  %v11336_v10 = vld [vmem:[#allocation8 + $0xac] sm:$0xf0]  ;;  %s11698_s22 = sshll.u32 %s12488_s16, 7 }
  0x62   : > { %787 = vmatpush.bf16.msra.mxu1 %v9683_v23  ;;  %11805 = vmatpush.bf16.msra.mxu3 %v9683_v23  ;;  %v9934_v1 = vld [vmem:[#allocation8 + $0x1c0] sm:$0xf]  ;;  %v11338_v4 = vld [vmem:[#allocation8 + $0xc4] sm:$0xf]  ;;  %v9936_v8 = vld [vmem:[#allocation8 + $0x1d0] sm:$0xf0]  ;;  %s9413_s21 = scalar_lea.hbm %s14996_s9, %s11698_s22 }
  0x63   : > { %v9935_v3 = vor.u32 %v11372_v2, %v9934_v1  ;;  %v11370_v6 = vld [vmem:[#allocation8 + $0x1c4] sm:$0xf]  ;;  %v9811_v7 = vor.u32 %v11338_v4, %v9808_v5  ;;  %v9790_v9 = vld [vmem:[#allocation8 + $0xa0] sm:$0xf]  ;;  %v11368_v16 = vld [vmem:[#allocation8 + $0x1ac] sm:$0xf0] }
  0x64   : > { %v9939_v11 = vor.u32 %v11370_v6, %v9936_v8  ;;  %v9791_v12 = vor.u32 %v11336_v10, %v9790_v9  ;;  %v11283_v13 = vld [vmem:[%s12603_s24 + $0x8] sm:$0xff]  ;;  %v9918_v15 = vld [vmem:[#allocation8 + $0x1a0] sm:$0xf]  ;;  %v9792_v19 = vld [vmem:[#allocation8 + $0xb0] sm:$0xf0]  ;;  %s9414_s16 = sshll.u32 %s14562_s23, 4  ;;  %s9415_s16 = int_to_ptr.vmem [resolvable:$true] %s9414_s16 }
  0x65   : > { %699 = vmatpush.bf16.msra.mxu0 %v9671_v28  ;;  %11798 = vmatpush.bf16.msra.mxu2 %v9671_v28  ;;  %v11291_v14 = vld [vmem:[%s12603_s24 + $0x48] sm:$0xff]  ;;  %v9919_v17 = vor.u32 %v11368_v16, %v9918_v15  ;;  %v9920_v22 = vld [vmem:[#allocation8 + $0x1b0] sm:$0xf0]  ;;  %v9774_v23 = vld [vmem:[#allocation8 + $0x80] sm:$0xf]  ;;  %s9416_s15 = sshll.u32 %s9413_s21, 4  ;;  %s9417_s15 = int_to_ptr.hbm [resolvable:$true] %s9416_s15 }
  0x66   : > { %788 = vmatpush.bf16.msra.mxu1 %v9675_v29  ;;  %11806 = vmatpush.bf16.msra.mxu3 %v9675_v29  ;;  %v11334_v18 = vld [vmem:[#allocation8 + $0xa4] sm:$0xf]  ;;  %v11332_v24 = vld [vmem:[#allocation8 + $0x8c] sm:$0xf0]  ;;  %v9902_v29 = vld [vmem:[#allocation8 + $0x180] sm:$0xf] }
  0x67   : > { %v11366_v20 = vld [vmem:[#allocation8 + $0x1a4] sm:$0xf]  ;;  %v9795_v21 = vor.u32 %v11334_v18, %v9792_v19  ;;  %v9775_v26 = vor.u32 %v11332_v24, %v9774_v23  ;;  %v11284_v27 = vld [vmem:[%s12603_s24 + $0x10] sm:$0xff]  ;;  %v9758_v37 = vld [vmem:[#allocation8 + $0x60] sm:$0xf]  ;;  %s9402_s19 = scalar_lea.sflag [#allocation4], %s12597_s3 }
  0x68   : > { %v9923_v25 = vor.u32 %v11366_v20, %v9920_v22  ;;  %v11292_v28 = vld [vmem:[%s12603_s24 + $0x50] sm:$0xff]  ;;  %v11330_v32 = vld [vmem:[#allocation8 + $0x84] sm:$0xf]  ;;  %v11293_v42 = vld [vmem:[%s12603_s24 + $0x58] sm:$0xff]  ;;  %s12327_s20 = sshra.s32 %s9417_s15, 4  ;;  %s12328_s20 = int_to_ptr.hbm [resolvable:$true] %s12327_s20 }
  0x69   : > { %700 = vmatpush.bf16.msra.mxu0 %v9663_v34  ;;  %11799 = vmatpush.bf16.msra.mxu2 %v9663_v34  ;;  %v11364_v30 = vld [vmem:[#allocation8 + $0x18c] sm:$0xf0]  ;;  %v9776_v33 = vld [vmem:[#allocation8 + $0x90] sm:$0xf0]  ;;  %v11362_v34 = vld [vmem:[#allocation8 + $0x184] sm:$0xf]  ;;  %p12334_p12 = scmp.lt.s32.totalorder %s12328_s20, %s14996_s9 }
  0x6a   : > { %789 = vmatpush.bf16.msra.mxu1 %v9667_v35  ;;  %11807 = vmatpush.bf16.msra.mxu3 %v9667_v35  ;;  %v9903_v31 = vor.u32 %v11364_v30, %v9902_v29  ;;  %v9779_v35 = vor.u32 %v11330_v32, %v9776_v33  ;;  %v9904_v36 = vld [vmem:[#allocation8 + $0x190] sm:$0xf0]  ;;  %v11328_v38 = vld [vmem:[#allocation8 + $0x6c] sm:$0xf0]  ;;  %v9886_v43 = vld [vmem:[#allocation8 + $0x160] sm:$0xf] }
  0x6b   : > { %v9907_v39 = vor.u32 %v11362_v34, %v9904_v36  ;;  %v11360_v44 = vld [vmem:[#allocation8 + $0x16c] sm:$0xf0]  ;;  %v11326_v46 = vld [vmem:[#allocation8 + $0x64] sm:$0xf]  ;;  %v9760_v47 = vld [vmem:[#allocation8 + $0x70] sm:$0xf0] }
  0x6c   : > { %v9887_v45 = vor.u32 %v11360_v44, %v9886_v43  ;;  %v11358_v48 = vld [vmem:[#allocation8 + $0x164] sm:$0xf]  ;;  %v9763_v49 = vor.u32 %v11326_v46, %v9760_v47  ;;  %v9870_v57 = vld [vmem:[#allocation8 + $0x140] sm:$0xf]  ;;  %v11356_v58 = vld [vmem:[#allocation8 + $0x14c] sm:$0xf0] }
  0x6d   : > { %701 = vmatpush.bf16.msra.mxu0 %v9655_v40  ;;  %11800 = vmatpush.bf16.msra.mxu2 %v9655_v40  ;;  %v9759_v40 = vor.u32 %v11328_v38, %v9758_v37  ;;  %v11294_v56 = vld [vmem:[%s12603_s24 + $0x60] sm:$0xff]  ;;  %v9744_v61 = vld [vmem:[#allocation8 + $0x50] sm:$0xf0]  ;;  %v11320_v2 = vld [vmem:[#allocation8 + $0x2c] sm:$0xf0]  ;;  %s12329_s29 = scalar_lea.hbm %s12328_s20, 128 }
  0x6e   : > { %790 = vmatpush.bf16.msra.mxu1 %v9659_v41  ;;  %11808 = vmatpush.bf16.msra.mxu3 %v9659_v41  ;;  %v11285_v41 = vld [vmem:[%s12603_s24 + $0x18] sm:$0xff]  ;;  %v11322_v60 = vld [vmem:[#allocation8 + $0x44] sm:$0xf]  ;;  %v9726_v1 = vld [vmem:[#allocation8 + $0x20] sm:$0xf]  ;;  %p12330_p1 = scmp.ne.s32.totalorder %s12328_s20, %s12329_s29 }
  0x6f   : > { %v9727_v4 = vor.u32 %v11320_v2, %v9726_v1  ;;  %v11287_v5 = vld [vmem:[%s12603_s24 + $0x28] sm:$0xff]  ;;  %v11352_v8 = vld [vmem:[#allocation8 + $0x12c] sm:$0xf0]  ;;  %v9710_v18 = vld [vmem:[#allocation8] sm:$0xf] }
  0x70   : > { %v11295_v6 = vld [vmem:[%s12603_s24 + $0x68] sm:$0xff]  ;;  %v11288_v16 = vld [vmem:[%s12603_s24 + $0x30] sm:$0xff]  ;;  %v9838_v20 = vld [vmem:[#allocation8 + $0x100] sm:$0xf]  ;;  %p12331_p3 = pnand %p12330_p1, %p12563_p13 }
  0x71   : > { %702 = vmatpush.bf16.msra.mxu0 %v9647_v50  ;;  %11801 = vmatpush.bf16.msra.mxu2 %v9647_v50  ;;  %v9888_v50 = vld [vmem:[#allocation8 + $0x170] sm:$0xf0]  ;;  %v11318_v10 = vld [vmem:[#allocation8 + $0x24] sm:$0xf]  ;;  %v11316_v19 = vld [vmem:[#allocation8 + $0xc] sm:$0xf0] }
  0x72   : > { %791 = vmatpush.bf16.msra.mxu1 %v9651_v51  ;;  %11809 = vmatpush.bf16.msra.mxu3 %v9651_v51  ;;  %v9742_v51 = vld [vmem:[#allocation8 + $0x40] sm:$0xf]  ;;  %v9891_v53 = vor.u32 %v11358_v48, %v9888_v50  ;;  %v11348_v22 = vld [vmem:[#allocation8 + $0x10c] sm:$0xf0]  ;;  %v11314_v24 = vld [vmem:[#allocation8 + $0x4] sm:$0xf]  ;;  %p12332_p5 = pneg %p12331_p3 }
  0x73   : > { %v9839_v23 = vor.u32 %v11348_v22, %v9838_v20  ;;  %v11289_v30 = vld [vmem:[%s12603_s24 + $0x38] sm:$0xff]  ;;  %v9830_v32 = vld [vmem:[#allocation8 + $0xe8] sm:$0xf]  ;;  %v513_v38 = vld [vmem:[#allocation7] sm:$0x3] }
  0x74   : > { %703 = vmatmul.bf16.vlgmr.msra.gmra.mxu0 %v11282_v52  ;;  %743 = vmatmul.bf16.vlgmr.msra.gmra.mxu2 %v11290_v59  ;;  %v11345_v33 = vld [vmem:[#allocation8 + $0xf4] sm:$0xf0]  ;;  %v9958_v34 = vld [vmem:[#allocation8 + $0x1e8] sm:$0xf]  ;;  %v12641_v43 = vperm.slane %v513_v38, 0  ;;  %v12643_v47 = vperm.slane %v513_v38, 1 }
  0x75   : > { %1427 = vmatpush.bf16.msrb.mxu2 %v9823_v54  ;;  %792 = vmatmul.bf16.vlgmr.msra.gmra.mxu1 %v11282_v52  ;;  %v11324_v52 = vld [vmem:[#allocation8 + $0x4c] sm:$0xf0]  ;;  %v11377_v36 = vld [vmem:[#allocation8 + $0x1f4] sm:$0xf0]  ;;  %v9960_v46 = vld [vmem:[#allocation8 + $0x1f8] sm:$0xf0] }
  0x76   : > { %1516 = vmatpush.bf16.msrb.mxu3 %v9951_v55  ;;  %1605 = vmatpush.bf16.msrb.mxu0 %v9827_v62  ;;  %v9743_v54 = vor.u32 %v11324_v52, %v9742_v51  ;;  %v11286_v55 = vld [vmem:[%s12603_s24 + $0x20] sm:$0xff]  ;;  %v9959_v37 = vor.u32 %v11377_v36, %v9958_v34  ;;  %v11339_v34 = vld [vmem:[#allocation8 + $0xcc] sm:$0xf] }
  0x77   : > { %832 = vmatmul.bf16.vlgmr.msra.gmra.mxu3 %v11290_v59  ;;  %1694 = vmatpush.bf16.msrb.mxu1 %v9955_v63  ;;  %v9871_v59 = vor.u32 %v11356_v58, %v9870_v57  ;;  %v11354_v62 = vld [vmem:[#allocation8 + $0x144] sm:$0xf]  ;;  %v9747_v63 = vor.u32 %v11322_v60, %v9744_v61  ;;  %v11371_v36 = vld [vmem:[#allocation8 + $0x1cc] sm:$0xf] }
  0x79   : > { %1428 = vmatpush.bf16.msrb.mxu2 %v9807_v0  ;;  %v9872_v0 = vld [vmem:[#allocation8 + $0x150] sm:$0xf0] }
  0x7a   : > { %1517 = vmatpush.bf16.msrb.mxu3 %v9935_v3  ;;  %1606 = vmatpush.bf16.msrb.mxu0 %v9811_v7  ;;  %v9875_v3 = vor.u32 %v11354_v62, %v9872_v0  ;;  %v9854_v7 = vld [vmem:[#allocation8 + $0x120] sm:$0xf] }
  0x7b   : > { %1695 = vmatpush.bf16.msrb.mxu1 %v9939_v11  ;;  %v9855_v9 = vor.u32 %v11352_v8, %v9854_v7  ;;  %v9728_v11 = vld [vmem:[#allocation8 + $0x30] sm:$0xf0] }
  0x7d   : > { %1429 = vmatpush.bf16.msrb.mxu2 %v9791_v12  ;;  %v11350_v12 = vld [vmem:[#allocation8 + $0x124] sm:$0xf] }
  0x7e   : > { %1518 = vmatpush.bf16.msrb.mxu3 %v9919_v17  ;;  %1607 = vmatpush.bf16.msrb.mxu0 %v9795_v21  ;;  %v11296_v17 = vld [vmem:[%s12603_s24 + $0x70] sm:$0xff]  ;;  %v9711_v21 = vor.u32 %v11316_v19, %v9710_v18 }
  0x7f   : > { %1696 = vmatpush.bf16.msrb.mxu1 %v9923_v25  ;;  %v9712_v25 = vld [vmem:[#allocation8 + $0x10] sm:$0xf0] }
  0x81   : > { %1430 = vmatpush.bf16.msrb.mxu2 %v9775_v26  ;;  %v11346_v26 = vld [vmem:[#allocation8 + $0x104] sm:$0xf] }
  0x82   : > { %1519 = vmatpush.bf16.msrb.mxu3 %v9903_v31  ;;  %1608 = vmatpush.bf16.msrb.mxu0 %v9779_v35  ;;  %v11297_v31 = vld [vmem:[%s12603_s24 + $0x78] sm:$0xff]  ;;  %v9831_v35 = vor.u32 %v11345_v33, %v9830_v32  ;;  %s12333_s24 = scalar_lea.hbm %s14996_s9, 256 }
  0x83   : > { %1697 = vmatpush.bf16.msrb.mxu1 %v9907_v39  ;;  %p12335_p8 = scmp.lt.s32.totalorder %s12333_s24, %s12329_s29 }
  0x84   : > { %708 = vmatmul.bf16.gmra.mxu0 %v11283_v13  ;;  %748 = vmatmul.bf16.gmra.mxu2 %v11291_v14 }
  0x85   : > { %797 = vmatmul.bf16.gmra.mxu1 %v11283_v13  ;;  %1431 = vmatpush.bf16.msrb.mxu2 %v9759_v40  ;;  %v9731_v13 = vor.u32 %v11318_v10, %v9728_v11  ;;  %v11343_v40 = vld [vmem:[#allocation8 + $0xec] sm:$0xf]  ;;  %v9814_v10 = vld [vmem:[#allocation8 + $0xc8] sm:$0xf]  ;;  %v11341_v11 = vld [vmem:[#allocation8 + $0xd4] sm:$0xf0]  ;;  %p12336_p7 = por %p12335_p8, %p12334_p12 }
  0x86   : > { %1520 = vmatpush.bf16.msrb.mxu3 %v9887_v45  ;;  %1609 = vmatpush.bf16.msrb.mxu0 %v9763_v49 }
  0x87   : > { %837 = vmatmul.bf16.gmra.mxu3 %v11291_v14  ;;  %1698 = vmatpush.bf16.msrb.mxu1 %v9891_v53  ;;  %v9856_v14 = vld [vmem:[#allocation8 + $0x130] sm:$0xf0]  ;;  %p12337_p9 = pnand %p12336_p7, %p12332_p5 }
  0x88   : > { %v9859_v15 = vor.u32 %v11350_v12, %v9856_v14  ;;  %v9942_v12 = vld [vmem:[#allocation8 + $0x1c8] sm:$0xf]  ;;  %v9815_v14 = vor.u32 %v11341_v11, %v9814_v10 }
  0x89   : > { %1432 = vmatpush.bf16.msrb.mxu2 %v9743_v54  ;;  %v9798_v11 = vld [vmem:[#allocation8 + $0xa8] sm:$0xf] }
  0x8a   : > { %1521 = vmatpush.bf16.msrb.mxu3 %v9871_v59  ;;  %1610 = vmatpush.bf16.msrb.mxu0 %v9747_v63 }
  0x8b   : > { %1699 = vmatpush.bf16.msrb.mxu1 %v9875_v3 }
  0x8d   : > { %1433 = vmatpush.bf16.msrb.mxu2 %v9727_v4 }
  0x8e   : > { %1522 = vmatpush.bf16.msrb.mxu3 %v9855_v9  ;;  %1611 = vmatpush.bf16.msrb.mxu0 %v9731_v13 }
  0x8f   : > { %1700 = vmatpush.bf16.msrb.mxu1 %v9859_v15  ;;  %v11373_v15 = vld [vmem:[#allocation8 + $0x1d4] sm:$0xf0] }
  0x91   : > { %1434 = vmatpush.bf16.msrb.mxu2 %v9711_v21 }
  0x92   : > { %1523 = vmatpush.bf16.msrb.mxu3 %v9839_v23 }
  0x94   : > { %713 = vmatmul.bf16.gmra.mxu0 %v11284_v27  ;;  %753 = vmatmul.bf16.gmra.mxu2 %v11292_v28 }
  0x95   : > { %802 = vmatmul.bf16.gmra.mxu1 %v11284_v27  ;;  %v9715_v27 = vor.u32 %v11314_v24, %v9712_v25  ;;  %1783 = vmatpush.bf16.msra.mxu2 %v9831_v35  ;;  %v9816_v35 = vld [vmem:[#allocation8 + $0xd8] sm:$0xf0] }
  0x96   : > { %1872 = vmatpush.bf16.msra.mxu3 %v9959_v37  ;;  %v9819_v38 = vor.u32 %v11339_v34, %v9816_v35 }
  0x97   : > { %842 = vmatmul.bf16.gmra.mxu3 %v11292_v28  ;;  %v9840_v28 = vld [vmem:[#allocation8 + $0x110] sm:$0xf0]  ;;  %1612 = vmatpush.bf16.msrb.mxu0 %v9715_v27 }
  0x98   : > { %v9843_v29 = vor.u32 %v11346_v26, %v9840_v28 }
  0x99   : > { %1784 = vmatpush.bf16.msra.mxu2 %v9815_v14  ;;  %v9926_v14 = vld [vmem:[#allocation8 + $0x1a8] sm:$0xf] }
  0x9a   : > { %1701 = vmatpush.bf16.msrb.mxu1 %v9843_v29 }
  0xa4   : > { %718 = vmatmul.bf16.gmra.mxu0 %v11285_v41  ;;  %758 = vmatmul.bf16.gmra.mxu2 %v11293_v42 }
  0xa5   : > { %807 = vmatmul.bf16.gmra.mxu1 %v11285_v41  ;;  %v9832_v41 = vld [vmem:[#allocation8 + $0xf8] sm:$0xf0] }
  0xa6   : > { %v9835_v45 = vor.u32 %v11343_v40, %v9832_v41 }
  0xa7   : > { %847 = vmatmul.bf16.gmra.mxu3 %v11293_v42  ;;  %v11375_v42 = vld [vmem:[#allocation8 + $0x1ec] sm:$0xf] }
  0xa8   : > { %v9963_v48 = vor.u32 %v11375_v42, %v9960_v46  ;;  %1961 = vmatpush.bf16.msra.mxu0 %v9835_v45 }
  0xaa   : > { %2050 = vmatpush.bf16.msra.mxu1 %v9963_v48 }
  0xac   : > { %1962 = vmatpush.bf16.msra.mxu0 %v9819_v38 }
  0xb4   : > { %723 = vmatmul.bf16.gmra.mxu0 %v11286_v55  ;;  %763 = vmatmul.bf16.gmra.mxu2 %v11294_v56 }
  0xb5   : > { %812 = vmatmul.bf16.gmra.mxu1 %v11286_v55 }
  0xb7   : > { %852 = vmatmul.bf16.gmra.mxu3 %v11294_v56 }
  0xc4   : > { %728 = vmatmul.bf16.gmra.mxu0 %v11287_v5  ;;  %768 = vmatmul.bf16.gmra.mxu2 %v11295_v6 }
  0xc5   : > { %817 = vmatmul.bf16.gmra.mxu1 %v11287_v5 }
  0xc7   : > { %857 = vmatmul.bf16.gmra.mxu3 %v11295_v6 }
  0xd4   : > { %733 = vmatmul.bf16.gmra.mxu0 %v11288_v16  ;;  %773 = vmatmul.bf16.gmra.mxu2 %v11296_v17 }
  0xd5   : > { %822 = vmatmul.bf16.gmra.mxu1 %v11288_v16 }
  0xd7   : > { %862 = vmatmul.bf16.gmra.mxu3 %v11296_v17  ;;  %v9943_v17 = vor.u32 %v11373_v15, %v9942_v12  ;;  %v11337_v12 = vld [vmem:[#allocation8 + $0xb4] sm:$0xf0] }
  0xd9   : > { %1873 = vmatpush.bf16.msra.mxu3 %v9943_v17  ;;  %v11369_v17 = vld [vmem:[#allocation8 + $0x1b4] sm:$0xf0] }
  0xe4   : > { %738 = vmatmul.bf16.gmra.mxu0 %v11289_v30  ;;  %778 = vmatmul.bf16.gmra.mxu2 %v11297_v31 }
  0xe5   : > { %827 = vmatmul.bf16.gmra.mxu1 %v11289_v30 }
  0xe7   : > { %867 = vmatmul.bf16.gmra.mxu3 %v11297_v31 }
  0xf1   : > { %v704_v39 = vpop.f32.mrf.mxu0 }
  0xf2   : > { %v793_v44 = vpop.f32.mrf.mxu1  ;;  %v705_v49 = vadd.f32 %v704_v39, %v12641_v43  ;;  %v9944_v39 = vld [vmem:[#allocation8 + $0x1d8] sm:$0xf0] }
  0xf3   : > { %v794_v50 = vadd.f32 %v793_v44, %v12643_v47  ;;  %v9947_v40 = vor.u32 %v11371_v36, %v9944_v39 }
  0xf4   : > { %v873_v54 = vmul.f32 0.2, %v705_v49 }
  0xf5   : > { %v874_v57 = vmul.f32 0.2, %v794_v50  ;;  %2051 = vmatpush.bf16.msra.mxu1 %v9947_v40  ;;  %v11335_v40 = vld [vmem:[#allocation8 + $0xac] sm:$0xf] }
  0xf6   : > { %v937_v61 = vmax.f32 %v705_v49, %v873_v54 }
  0xf7   : > { %v12647_v51 = vpop.f32.mrf.mxu2  ;;  %v938_v63 = vmax.f32 %v794_v50, %v874_v57 }
  0xf9   : > { %v706_v53 = vpop.f32.mrf.mxu0 }
  0xfa   : > { %v12649_v52 = vpop.f32.mrf.mxu3  ;;  %v707_v55 = vadd.f32 %v706_v53, %v12641_v43  ;;  %v795_v56 = vpop.f32.mrf.mxu1 }
  0xfb   : > { %v796_v58 = vadd.f32 %v795_v56, %v12643_v47 }
  0xfc   : > { %v875_v59 = vmul.f32 0.2, %v707_v55 }
  0xfd   : > { %v876_v60 = vmul.f32 0.2, %v796_v58 }
  0xfe   : > { %v939_v62 = vmax.f32 %v707_v55, %v875_v59 }
  0xff   : > { %v940_v0 = vmax.f32 %v796_v58, %v876_v60  ;;  %v12653_v1 = vpop.f32.mrf.mxu2 }
 0x100   : > { %v12655_v2 = vpack.c.bf16 %v939_v62, %v937_v61 }
 0x101   : > { %v12659_v4 = vpack.c.bf16 %v940_v0, %v938_v63  ;;  %v709_v5 = vpop.f32.mrf.mxu0 }
 0x102   : > { %v12657_v3 = vpop.f32.mrf.mxu3  ;;  %v798_v6 = vpop.f32.mrf.mxu1  ;;  %1435 = vmatmul.bf16.vlgmr.msrb.gmra.mxu2 %v12655_v2  ;;  %1613 = vmatmul.bf16.vlgmr.msrb.gmra.mxu0 %v12655_v2  ;;  %v710_v7 = vadd.f32 %v709_v5, %v12641_v43 }
 0x103   : > { %1524 = vmatmul.bf16.vlgmr.msrb.gmra.mxu3 %v12659_v4  ;;  %1702 = vmatmul.bf16.vlgmr.msrb.gmra.mxu1 %v12659_v4  ;;  %v799_v8 = vadd.f32 %v798_v6, %v12643_v47 }
 0x104   : > { %v877_v18 = vmul.f32 0.2, %v710_v7 }
 0x105   : > { %v878_v21 = vmul.f32 0.2, %v799_v8 }
 0x106   : > { %v941_v25 = vmax.f32 %v710_v7, %v877_v18 }
 0x107   : > { %v12667_v9 = vpop.f32.mrf.mxu2  ;;  %v942_v27 = vmax.f32 %v799_v8, %v878_v21 }
 0x109   : > { %v711_v16 = vpop.f32.mrf.mxu0 }
 0x10a   : > { %v12669_v13 = vpop.f32.mrf.mxu3  ;;  %v712_v19 = vadd.f32 %v711_v16, %v12641_v43  ;;  %v800_v20 = vpop.f32.mrf.mxu1  ;;  %v9799_v16 = vor.u32 %v11337_v12, %v9798_v11 }
 0x10b   : > { %v801_v22 = vadd.f32 %v800_v20, %v12643_v47 }
 0x10c   : > { %v879_v23 = vmul.f32 0.2, %v712_v19  ;;  %1785 = vmatpush.bf16.msra.mxu2 %v9799_v16 }
 0x10d   : > { %v880_v24 = vmul.f32 0.2, %v801_v22 }
 0x10e   : > { %v943_v26 = vmax.f32 %v712_v19, %v879_v23  ;;  %v9927_v19 = vor.u32 %v11369_v17, %v9926_v14 }
 0x10f   : > { %v944_v28 = vmax.f32 %v801_v22, %v880_v24  ;;  %v12673_v29 = vpop.f32.mrf.mxu2 }
 0x110   : > { %v12675_v30 = vpack.c.bf16 %v943_v26, %v941_v25  ;;  %1874 = vmatpush.bf16.msra.mxu3 %v9927_v19 }
 0x111   : > { %v12679_v32 = vpack.c.bf16 %v944_v28, %v942_v27  ;;  %v714_v33 = vpop.f32.mrf.mxu0 }
 0x112   : > { %v12677_v31 = vpop.f32.mrf.mxu3  ;;  %v803_v37 = vpop.f32.mrf.mxu1  ;;  %1440 = vmatmul.bf16.gmra.mxu2 %v12675_v30  ;;  %1618 = vmatmul.bf16.gmra.mxu0 %v12675_v30  ;;  %v715_v41 = vadd.f32 %v714_v33, %v12641_v43 }
 0x113   : > { %1529 = vmatmul.bf16.gmra.mxu3 %v12679_v32  ;;  %1707 = vmatmul.bf16.gmra.mxu1 %v12679_v32  ;;  %v804_v42 = vadd.f32 %v803_v37, %v12643_v47 }
 0x114   : > { %v881_v48 = vmul.f32 0.2, %v715_v41 }
 0x115   : > { %v882_v53 = vmul.f32 0.2, %v804_v42 }
 0x116   : > { %v945_v57 = vmax.f32 %v715_v41, %v881_v48  ;;  %v9800_v41 = vld [vmem:[#allocation8 + $0xb8] sm:$0xf0] }
 0x117   : > { %v12687_v44 = vpop.f32.mrf.mxu2  ;;  %v946_v59 = vmax.f32 %v804_v42, %v882_v53  ;;  %v11367_v42 = vld [vmem:[#allocation8 + $0x1ac] sm:$0xf]  ;;  %v9803_v48 = vor.u32 %v11335_v40, %v9800_v41 }
 0x119   : > { %v716_v46 = vpop.f32.mrf.mxu0  ;;  %1963 = vmatpush.bf16.msra.mxu0 %v9803_v48 }
 0x11a   : > { %v12689_v45 = vpop.f32.mrf.mxu3  ;;  %v717_v49 = vadd.f32 %v716_v46, %v12641_v43  ;;  %v805_v50 = vpop.f32.mrf.mxu1 }
 0x11b   : > { %v806_v54 = vadd.f32 %v805_v50, %v12643_v47 }
 0x11c   : > { %v883_v55 = vmul.f32 0.2, %v717_v49 }
 0x11d   : > { %v884_v56 = vmul.f32 0.2, %v806_v54 }
 0x11e   : > { %v947_v58 = vmax.f32 %v717_v49, %v883_v55  ;;  %v9928_v49 = vld [vmem:[#allocation8 + $0x1b8] sm:$0xf0] }
 0x11f   : > { %v948_v60 = vmax.f32 %v806_v54, %v884_v56  ;;  %v12693_v61 = vpop.f32.mrf.mxu2  ;;  %v9931_v50 = vor.u32 %v11367_v42, %v9928_v49 }
 0x120   : > { %v12695_v62 = vpack.c.bf16 %v947_v58, %v945_v57 }
 0x121   : > { %v12699_v0 = vpack.c.bf16 %v948_v60, %v946_v59  ;;  %v719_v5 = vpop.f32.mrf.mxu0  ;;  %2052 = vmatpush.bf16.msra.mxu1 %v9931_v50 }
 0x122   : > { %v12697_v63 = vpop.f32.mrf.mxu3  ;;  %v808_v6 = vpop.f32.mrf.mxu1  ;;  %1445 = vmatmul.bf16.gmra.mxu2 %v12695_v62  ;;  %1623 = vmatmul.bf16.gmra.mxu0 %v12695_v62  ;;  %v720_v7 = vadd.f32 %v719_v5, %v12641_v43 }
 0x123   : > { %1534 = vmatmul.bf16.gmra.mxu3 %v12699_v0  ;;  %1712 = vmatmul.bf16.gmra.mxu1 %v12699_v0  ;;  %v809_v8 = vadd.f32 %v808_v6, %v12643_v47 }
 0x124   : > { %v885_v20 = vmul.f32 0.2, %v720_v7 }
 0x125   : > { %v886_v23 = vmul.f32 0.2, %v809_v8 }
 0x126   : > { %v949_v27 = vmax.f32 %v720_v7, %v885_v20 }
 0x127   : > { %v12707_v10 = vpop.f32.mrf.mxu2  ;;  %v950_v33 = vmax.f32 %v809_v8, %v886_v23 }
 0x129   : > { %v721_v18 = vpop.f32.mrf.mxu0 }
 0x12a   : > { %v12709_v15 = vpop.f32.mrf.mxu3  ;;  %v722_v21 = vadd.f32 %v721_v18, %v12641_v43  ;;  %v810_v22 = vpop.f32.mrf.mxu1 }
 0x12b   : > { %v811_v24 = vadd.f32 %v810_v22, %v12643_v47 }
 0x12c   : > { %v887_v25 = vmul.f32 0.2, %v722_v21 }
 0x12d   : > { %v888_v26 = vmul.f32 0.2, %v811_v24 }
 0x12e   : > { %v951_v28 = vmax.f32 %v722_v21, %v887_v25  ;;  %v9782_v25 = vld [vmem:[#allocation8 + $0x88] sm:$0xf] }
 0x12f   : > { %v952_v34 = vmax.f32 %v811_v24, %v888_v26  ;;  %v12713_v35 = vpop.f32.mrf.mxu2  ;;  %v11333_v26 = vld [vmem:[#allocation8 + $0x94] sm:$0xf0] }
 0x130   : > { %v12715_v36 = vpack.c.bf16 %v951_v28, %v949_v27  ;;  %v9910_v27 = vld [vmem:[#allocation8 + $0x188] sm:$0xf]  ;;  %v9783_v28 = vor.u32 %v11333_v26, %v9782_v25 }
 0x131   : > { %v12719_v38 = vpack.c.bf16 %v952_v34, %v950_v33  ;;  %v724_v39 = vpop.f32.mrf.mxu0  ;;  %v11365_v33 = vld [vmem:[#allocation8 + $0x194] sm:$0xf0] }
 0x132   : > { %15112 = vst [vmem:[#allocation23_spill] sm:$0xff] %v12715_v36  ;;  %v12717_v37 = vpop.f32.mrf.mxu3  ;;  %v813_v46 = vpop.f32.mrf.mxu1  ;;  %1450 = vmatmul.bf16.gmra.mxu2 %v12715_v36  ;;  %1628 = vmatmul.bf16.gmra.mxu0 %v12715_v36  ;;  %v725_v53 = vadd.f32 %v724_v39, %v12641_v43  ;;  %v9911_v39 = vor.u32 %v11365_v33, %v9910_v27 }
 0x133   : > { %15113 = vst [vmem:[#allocation24_spill] sm:$0xff] %v12719_v38  ;;  %1539 = vmatmul.bf16.gmra.mxu3 %v12719_v38  ;;  %1717 = vmatmul.bf16.gmra.mxu1 %v12719_v38  ;;  %v814_v54 = vadd.f32 %v813_v46, %v12643_v47 }
 0x134   : > { %v889_v58 = vmul.f32 0.2, %v725_v53  ;;  %1786 = vmatpush.bf16.msra.mxu2 %v9783_v28  ;;  %1875 = vmatpush.bf16.msra.mxu3 %v9911_v39 }
 0x135   : > { %v890_v5 = vmul.f32 0.2, %v814_v54 }
 0x136   : > { %v953_v11 = vmax.f32 %v725_v53, %v889_v58 }
 0x137   : > { %v12727_v55 = vpop.f32.mrf.mxu2  ;;  %v954_v14 = vmax.f32 %v814_v54, %v890_v5 }
 0x139   : > { %v726_v57 = vpop.f32.mrf.mxu0 }
 0x13a   : > { %v12729_v56 = vpop.f32.mrf.mxu3  ;;  %v727_v59 = vadd.f32 %v726_v57, %v12641_v43  ;;  %v815_v60 = vpop.f32.mrf.mxu1 }
 0x13b   : > { %v816_v6 = vadd.f32 %v815_v60, %v12643_v47 }
 0x13c   : > { %v891_v7 = vmul.f32 0.2, %v727_v59 }
 0x13d   : > { %v892_v8 = vmul.f32 0.2, %v816_v6 }
 0x13e   : > { %v955_v12 = vmax.f32 %v727_v59, %v891_v7 }
 0x13f   : > { %v956_v16 = vmax.f32 %v816_v6, %v892_v8  ;;  %v12737_v20 = vpop.f32.mrf.mxu2  ;;  %v11331_v8 = vld [vmem:[#allocation8 + $0x8c] sm:$0xf] }
 0x140   : > { %v12733_v17 = vpack.c.bf16 %v955_v12, %v953_v11  ;;  %v9784_v11 = vld [vmem:[#allocation8 + $0x98] sm:$0xf0]  ;;  %v11363_v12 = vld [vmem:[#allocation8 + $0x18c] sm:$0xf] }
 0x141   : > { %v12735_v18 = vpack.c.bf16 %v956_v16, %v954_v14  ;;  %v729_v19 = vpop.f32.mrf.mxu0  ;;  %v9787_v16 = vor.u32 %v11331_v8, %v9784_v11 }
 0x142   : > { %15114 = vst [vmem:[#allocation25_spill] sm:$0xff] %v12733_v17  ;;  %v818_v21 = vpop.f32.mrf.mxu1  ;;  %1455 = vmatmul.bf16.gmra.mxu2 %v12733_v17  ;;  %1633 = vmatmul.bf16.gmra.mxu0 %v12733_v17  ;;  %v12741_v22 = vpop.f32.mrf.mxu3  ;;  %v730_v23 = vadd.f32 %v729_v19, %v12641_v43  ;;  %v9912_v19 = vld [vmem:[#allocation8 + $0x198] sm:$0xf0] }
 0x143   : > { %15115 = vst [vmem:[#allocation26_spill] sm:$0xff] %v12735_v18  ;;  %1544 = vmatmul.bf16.gmra.mxu3 %v12735_v18  ;;  %1722 = vmatmul.bf16.gmra.mxu1 %v12735_v18  ;;  %v819_v24 = vadd.f32 %v818_v21, %v12643_v47  ;;  %v9915_v21 = vor.u32 %v11363_v12, %v9912_v19  ;;  %v9766_v12 = vld [vmem:[#allocation8 + $0x68] sm:$0xf] }
 0x144   : > { %v893_v40 = vmul.f32 0.2, %v730_v23  ;;  %1964 = vmatpush.bf16.msra.mxu0 %v9787_v16  ;;  %v9894_v16 = vld [vmem:[#allocation8 + $0x168] sm:$0xf] }
 0x145   : > { %v894_v46 = vmul.f32 0.2, %v819_v24  ;;  %2053 = vmatpush.bf16.msra.mxu1 %v9915_v21 }
 0x146   : > { %v957_v57 = vmax.f32 %v730_v23, %v893_v40 }
 0x147   : > { %v12749_v49 = vpop.f32.mrf.mxu2  ;;  %v958_v59 = vmax.f32 %v819_v24, %v894_v46 }
 0x149   : > { %v731_v34 = vpop.f32.mrf.mxu0 }
 0x14a   : > { %v732_v41 = vadd.f32 %v731_v34, %v12641_v43  ;;  %v820_v42 = vpop.f32.mrf.mxu1  ;;  %v12751_v53 = vpop.f32.mrf.mxu3 }
 0x14b   : > { %v821_v48 = vadd.f32 %v820_v42, %v12643_v47 }
 0x14c   : > { %v895_v50 = vmul.f32 0.2, %v732_v41 }
 0x14d   : > { %v896_v54 = vmul.f32 0.2, %v821_v48 }
 0x14e   : > { %v959_v58 = vmax.f32 %v732_v41, %v895_v50 }
 0x14f   : > { %v960_v60 = vmax.f32 %v821_v48, %v896_v54  ;;  %v12761_v23 = vpop.f32.mrf.mxu2 }
 0x150   : > { %v12753_v5 = vpack.c.bf16 %v959_v58, %v957_v57 }
 0x151   : > { %v12755_v6 = vpack.c.bf16 %v960_v60, %v958_v59  ;;  %v734_v7 = vpop.f32.mrf.mxu0 }
 0x152   : > { %15116 = vst [vmem:[#allocation27_spill] sm:$0xff] %v12753_v5  ;;  %v823_v14 = vpop.f32.mrf.mxu1  ;;  %1460 = vmatmul.bf16.gmra.mxu2 %v12753_v5  ;;  %1638 = vmatmul.bf16.gmra.mxu0 %v12753_v5  ;;  %v735_v24 = vadd.f32 %v734_v7, %v12641_v43  ;;  %v12764_v25 = vpop.f32.mrf.mxu3 }
 0x153   : > { %15117 = vst [vmem:[#allocation28_spill] sm:$0xff] %v12755_v6  ;;  %1549 = vmatmul.bf16.gmra.mxu3 %v12755_v6  ;;  %1727 = vmatmul.bf16.gmra.mxu1 %v12755_v6  ;;  %v824_v26 = vadd.f32 %v823_v14, %v12643_v47  ;;  %v11329_v14 = vld [vmem:[#allocation8 + $0x74] sm:$0xf0] }
 0x154   : > { %v897_v28 = vmul.f32 0.2, %v735_v24  ;;  %v9767_v21 = vor.u32 %v11329_v14, %v9766_v12  ;;  %v11327_v14 = vld [vmem:[#allocation8 + $0x6c] sm:$0xf] }
 0x155   : > { %v898_v39 = vmul.f32 0.2, %v824_v26 }
 0x156   : > { %v961_v46 = vmax.f32 %v735_v24, %v897_v28  ;;  %v11361_v24 = vld [vmem:[#allocation8 + $0x174] sm:$0xf0]  ;;  %1787 = vmatpush.bf16.msra.mxu2 %v9767_v21 }
 0x157   : > { %v962_v50 = vmax.f32 %v824_v26, %v898_v39  ;;  %v12769_v57 = vpop.f32.mrf.mxu2  ;;  %v9895_v26 = vor.u32 %v11361_v24, %v9894_v16  ;;  %v9768_v16 = vld [vmem:[#allocation8 + $0x78] sm:$0xf0] }
 0x158   : > { %v9771_v24 = vor.u32 %v11327_v14, %v9768_v16 }
 0x159   : > { %v736_v27 = vpop.f32.mrf.mxu0  ;;  %1876 = vmatpush.bf16.msra.mxu3 %v9895_v26 }
 0x15a   : > { %v737_v33 = vadd.f32 %v736_v27, %v12641_v43  ;;  %v825_v34 = vpop.f32.mrf.mxu1  ;;  %v12773_v59 = vpop.f32.mrf.mxu3  ;;  %1965 = vmatpush.bf16.msra.mxu0 %v9771_v24 }
 0x15b   : > { %v826_v40 = vadd.f32 %v825_v34, %v12643_v47 }
 0x15c   : > { %v899_v41 = vmul.f32 0.2, %v737_v33 }
 0x15d   : > { %v900_v42 = vmul.f32 0.2, %v826_v40 }
 0x15e   : > { %v963_v48 = vmax.f32 %v737_v33, %v899_v41 }
 0x15f   : > { %v964_v54 = vmax.f32 %v826_v40, %v900_v42  ;;  %v12783_v27 = vpop.f32.mrf.mxu2 }
 0x160   : > { %v12771_v58 = vpack.c.bf16 %v963_v48, %v961_v46 }
 0x161   : > { %v12775_v60 = vpack.c.bf16 %v964_v54, %v962_v50  ;;  %v739_v7 = vpop.f32.mrf.mxu0 }
 0x162   : > { %15118 = vst [vmem:[#allocation29_spill] sm:$0xff] %v12771_v58  ;;  %v828_v8 = vpop.f32.mrf.mxu1  ;;  %1465 = vmatmul.bf16.gmra.mxu2 %v12771_v58  ;;  %1643 = vmatmul.bf16.gmra.mxu0 %v12771_v58  ;;  %v740_v11 = vadd.f32 %v739_v7, %v12641_v43  ;;  %v12785_v34 = vpop.f32.mrf.mxu3 }
 0x163   : > { %15119 = vst [vmem:[#allocation30_spill] sm:$0xff] %v12775_v60  ;;  %1554 = vmatmul.bf16.gmra.mxu3 %v12775_v60  ;;  %1732 = vmatmul.bf16.gmra.mxu1 %v12775_v60  ;;  %v829_v19 = vadd.f32 %v828_v8, %v12643_v47 }
 0x164   : > { %v901_v33 = vmul.f32 0.2, %v740_v11 }
 0x165   : > { %v902_v41 = vmul.f32 0.2, %v829_v19 }
 0x166   : > { %v965_v50 = vmax.f32 %v740_v11, %v901_v33  ;;  %v745_v11 = vadd.f32 %v12647_v51, %v12641_v43  ;;  %v834_v33 = vadd.f32 %v12649_v52, %v12643_v47  ;;  %v1097_v51 = vld [vmem:[#allocation10] sm:$0xf] }
 0x167   : > { %v966_v7 = vmax.f32 %v829_v19, %v902_v41  ;;  %v12795_v26 = vpop.f32.mrf.mxu2  ;;  %v747_v19 = vadd.f32 %v12653_v1, %v12641_v43  ;;  %v9896_v41 = vld [vmem:[#allocation8 + $0x178] sm:$0xf0] }
 0x169   : > { %v741_v28 = vpop.f32.mrf.mxu0 }
 0x16a   : > { %v742_v39 = vadd.f32 %v741_v28, %v12641_v43  ;;  %v830_v40 = vpop.f32.mrf.mxu1  ;;  %v12803_v28 = vpop.f32.mrf.mxu3 }
 0x16b   : > { %v831_v42 = vadd.f32 %v830_v40, %v12643_v47  ;;  %v11359_v40 = vld [vmem:[#allocation8 + $0x16c] sm:$0xf] }
 0x16c   : > { %v903_v46 = vmul.f32 0.2, %v742_v39 }
 0x16d   : > { %v904_v48 = vmul.f32 0.2, %v831_v42 }
 0x16e   : > { %v967_v54 = vmax.f32 %v742_v39, %v903_v46  ;;  %v836_v39 = vadd.f32 %v12657_v3, %v12643_v47  ;;  %v905_v46 = vmul.f32 0.2, %v745_v11 }
 0x16f   : > { %v968_v8 = vmax.f32 %v831_v42, %v904_v48  ;;  %v9899_v42 = vor.u32 %v11359_v40, %v9896_v41  ;;  %v907_v48 = vmul.f32 0.2, %v747_v19  ;;  %v12811_v24 = vpop.f32.mrf.mxu2 }
 0x170   : > { %v12789_v12 = vpack.c.bf16 %v967_v54, %v965_v50  ;;  %v906_v50 = vmul.f32 0.2, %v834_v33  ;;  %v908_v54 = vmul.f32 0.2, %v836_v39 }
 0x171   : > { %v12791_v21 = vpack.c.bf16 %v968_v8, %v966_v7  ;;  %2054 = vmatpush.bf16.msra.mxu1 %v9899_v42  ;;  %v969_v7 = vmax.f32 %v745_v11, %v905_v46  ;;  %v971_v1 = vmax.f32 %v747_v19, %v907_v48  ;;  %v12809_v8 = vperm.slane %v1097_v51, 1 }
 0x172   : > { %15120 = vst [vmem:[#allocation31_spill] sm:$0xff] %v12789_v12  ;;  %1470 = vmatmul.bf16.gmra.mxu2 %v12789_v12  ;;  %1648 = vmatmul.bf16.gmra.mxu0 %v12789_v12  ;;  %v970_v14 = vmax.f32 %v834_v33, %v906_v50  ;;  %v972_v16 = vmax.f32 %v836_v39, %v908_v54  ;;  %v12813_v52 = vpop.f32.mrf.mxu3  ;;  %v12822_v11 = vperm.slane %v1097_v51, 0  ;;  %v9750_v54 = vld [vmem:[#allocation8 + $0x48] sm:$0xf]  ;;  %v11325_v51 = vld [vmem:[#allocation8 + $0x54] sm:$0xf0] }
 0x173   : > { %15121 = vst [vmem:[#allocation32_spill] sm:$0xff] %v12791_v21  ;;  %1559 = vmatmul.bf16.gmra.mxu3 %v12791_v21  ;;  %1737 = vmatmul.bf16.gmra.mxu1 %v12791_v21  ;;  %v12815_v21 = vpack.c.bf16 %v971_v1, %v969_v7  ;;  %v750_v19 = vadd.f32 %v12667_v9, %v12641_v43  ;;  %v9878_v9 = vld [vmem:[#allocation8 + $0x148] sm:$0xf] }
 0x174   : > { %v12818_v12 = vpack.c.bf16 %v972_v16, %v970_v14  ;;  %v752_v33 = vadd.f32 %v12673_v29, %v12641_v43  ;;  %v839_v39 = vadd.f32 %v12669_v13, %v12643_v47  ;;  %v841_v42 = vadd.f32 %v12677_v31, %v12643_v47  ;;  %v11357_v16 = vld [vmem:[#allocation8 + $0x154] sm:$0xf0] }
 0x175   : > { %15122 = vst [vmem:[#allocation33_spill] sm:$0xff] %v12815_v21  ;;  %v909_v7 = vmul.f32 0.2, %v750_v19  ;;  %v9751_v14 = vor.u32 %v11325_v51, %v9750_v54  ;;  %v9879_v13 = vor.u32 %v11357_v16, %v9878_v9 }
 0x176   : > { %15123 = vst [vmem:[#allocation34_spill] sm:$0xff] %v12818_v12  ;;  %v911_v1 = vmul.f32 0.2, %v752_v33 }
 0x177   : > { %1788 = vmatpush.bf16.msra.mxu2 %v9751_v14  ;;  %1877 = vmatpush.bf16.msra.mxu3 %v9879_v13 }
 0x178   : > { %v975_v6 = vmax.f32 %v752_v33, %v911_v1  ;;  %v11323_v33 = vld [vmem:[#allocation8 + $0x4c] sm:$0xf] }
 0x17f   : > { %v1614_v3 = vpop.f32.mrf.mxu0 }
 0x180   : > { %v1615_v40 = vadd.f32 %v1614_v3, %v12809_v8  ;;  %v1703_v41 = vpop.f32.mrf.mxu1 }
 0x182   : > { %v1704_v60 = vadd.f32 %v1703_v41, %v1615_v40  ;;  %1475 = vmatmul.bf16.gmra.mxu2 %v12815_v21  ;;  %1653 = vmatmul.bf16.gmra.mxu0 %v12815_v21  ;;  %v912_v21 = vmul.f32 0.2, %v841_v42 }
 0x183   : > { %1564 = vmatmul.bf16.gmra.mxu3 %v12818_v12  ;;  %1742 = vmatmul.bf16.gmra.mxu1 %v12818_v12  ;;  %v910_v12 = vmul.f32 0.2, %v839_v39 }
 0x184   : > { %v2140_v31 = vmul.f32 0.2, %v1704_v60  ;;  %v976_v17 = vmax.f32 %v841_v42, %v912_v21 }
 0x185   : > { %v1436_v46 = vpop.f32.mrf.mxu2  ;;  %v974_v18 = vmax.f32 %v839_v39, %v910_v12 }
 0x186   : > { %v1437_v48 = vadd.f32 %v1436_v46, %v12822_v11  ;;  %v1525_v50 = vpop.f32.mrf.mxu3  ;;  %v973_v46 = vmax.f32 %v750_v19, %v909_v7  ;;  %v2268_v36 = vmax.f32 %v1704_v60, %v2140_v31  ;;  %v9752_v7 = vld [vmem:[#allocation8 + $0x58] sm:$0xf0] }
 0x187   : > { %v1616_v29 = vpop.f32.mrf.mxu0  ;;  %v12842_v12 = vpack.c.bf16 %v976_v17, %v974_v18  ;;  %v9755_v21 = vor.u32 %v11323_v33, %v9752_v7  ;;  %v844_v18 = vadd.f32 %v12689_v45, %v12643_v47 }
 0x188   : > { %v1526_v3 = vadd.f32 %v1525_v50, %v1437_v48  ;;  %v1617_v40 = vadd.f32 %v1616_v29, %v12809_v8  ;;  %v1705_v41 = vpop.f32.mrf.mxu1  ;;  %v12837_v51 = vpack.c.bf16 %v975_v6, %v973_v46 }
 0x189   : > { %1966 = vmatpush.bf16.msra.mxu0 %v9755_v21  ;;  %v914_v45 = vmul.f32 0.2, %v844_v18 }
 0x18a   : > { %v1706_v58 = vadd.f32 %v1705_v41, %v1617_v40  ;;  %v2139_v29 = vmul.f32 0.2, %v1526_v3  ;;  %v9880_v41 = vld [vmem:[#allocation8 + $0x158] sm:$0xf0] }
 0x18b   : > { %v978_v33 = vmax.f32 %v844_v18, %v914_v45  ;;  %v851_v45 = vadd.f32 %v12717_v37, %v12643_v47 }
 0x18c   : > { %v2144_v5 = vmul.f32 0.2, %v1706_v58  ;;  %v2267_v6 = vmax.f32 %v1526_v3, %v2139_v29 }
 0x18d   : > { %v1438_v38 = vpop.f32.mrf.mxu2 }
 0x18e   : > { %v2272_v54 = vmax.f32 %v1706_v58, %v2144_v5  ;;  %v1439_v48 = vadd.f32 %v1438_v38, %v12822_v11  ;;  %v1527_v50 = vpop.f32.mrf.mxu3  ;;  %v755_v38 = vadd.f32 %v12687_v44, %v12641_v43  ;;  %v846_v58 = vadd.f32 %v12697_v63, %v12643_v47 }
 0x18f   : > { %v1619_v9 = vpop.f32.mrf.mxu0 }
 0x190   : > { %v12839_v16 = vpack.c.bf16 %v2272_v54, %v2268_v36  ;;  %v1528_v14 = vadd.f32 %v1527_v50, %v1439_v48  ;;  %v1620_v40 = vadd.f32 %v1619_v9, %v12809_v8  ;;  %v1708_v19 = vpop.f32.mrf.mxu1  ;;  %v757_v36 = vadd.f32 %v12693_v61, %v12641_v43  ;;  %v11355_v61 = vld [vmem:[#allocation8 + $0x14c] sm:$0xf] }
 0x191   : > { %v913_v13 = vmul.f32 0.2, %v755_v38  ;;  %v9883_v3 = vor.u32 %v11355_v61, %v9880_v41  ;;  %v916_v9 = vmul.f32 0.2, %v846_v58 }
 0x192   : > { %15124 = vst [vmem:[#allocation35_spill] sm:$0xff] %v12839_v16  ;;  %v2143_v60 = vmul.f32 0.2, %v1528_v14  ;;  %v1709_v5 = vadd.f32 %v1708_v19, %v1620_v40  ;;  %1480 = vmatmul.bf16.gmra.mxu2 %v12837_v51  ;;  %1658 = vmatmul.bf16.gmra.mxu0 %v12837_v51  ;;  %v915_v31 = vmul.f32 0.2, %v757_v36 }
 0x193   : > { %1569 = vmatmul.bf16.gmra.mxu3 %v12842_v12  ;;  %1747 = vmatmul.bf16.gmra.mxu1 %v12842_v12  ;;  %v980_v7 = vmax.f32 %v846_v58, %v916_v9 }
 0x194   : > { %v2271_v17 = vmax.f32 %v1528_v14, %v2143_v60  ;;  %2055 = vmatpush.bf16.msra.mxu1 %v9883_v3  ;;  %v2148_v63 = vmul.f32 0.2, %v1709_v5  ;;  %v977_v14 = vmax.f32 %v755_v38, %v913_v13  ;;  %v979_v40 = vmax.f32 %v757_v36, %v915_v31 }
 0x195   : > { %v1441_v39 = vpop.f32.mrf.mxu2  ;;  %v12866_v36 = vpack.c.bf16 %v980_v7, %v978_v33  ;;  %v762_v13 = vadd.f32 %v12713_v35, %v12641_v43  ;;  %v11321_v35 = vld [vmem:[#allocation8 + $0x34] sm:$0xf0] }
 0x196   : > { %v12856_v42 = vpack.c.bf16 %v2271_v17, %v2267_v6  ;;  %v1442_v44 = vadd.f32 %v1441_v39, %v12822_v11  ;;  %v1530_v1 = vpop.f32.mrf.mxu3  ;;  %v2276_v60 = vmax.f32 %v1709_v5, %v2148_v63  ;;  %v760_v5 = vadd.f32 %v12707_v10, %v12641_v43 }
 0x197   : > { %v1621_v46 = vpop.f32.mrf.mxu0  ;;  %v919_v33 = vmul.f32 0.2, %v762_v13 }
 0x198   : > { %15125 = vst [vmem:[#allocation36_spill] sm:$0xff] %v12856_v42  ;;  %v1531_v54 = vadd.f32 %v1530_v1, %v1442_v44  ;;  %v1622_v48 = vadd.f32 %v1621_v46, %v12809_v8  ;;  %v1710_v50 = vpop.f32.mrf.mxu1  ;;  %v12861_v44 = vpack.c.bf16 %v979_v40, %v977_v14  ;;  %v9734_v14 = vld [vmem:[#allocation8 + $0x28] sm:$0xf] }
 0x199   : > { %v9862_v40 = vld [vmem:[#allocation8 + $0x128] sm:$0xf] }
 0x19a   : > { %v1711_v29 = vadd.f32 %v1710_v50, %v1622_v48  ;;  %v2147_v61 = vmul.f32 0.2, %v1531_v54  ;;  %v849_v50 = vadd.f32 %v12709_v15, %v12643_v47 }
 0x19c   : > { %v2152_v19 = vmul.f32 0.2, %v1711_v29  ;;  %v2275_v31 = vmax.f32 %v1531_v54, %v2147_v61  ;;  %v9735_v54 = vor.u32 %v11321_v35, %v9734_v14  ;;  %v918_v37 = vmul.f32 0.2, %v849_v50 }
 0x19d   : > { %v1443_v21 = vpop.f32.mrf.mxu2 }
 0x19e   : > { %v2280_v6 = vmax.f32 %v1711_v29, %v2152_v19  ;;  %v1444_v17 = vadd.f32 %v1443_v21, %v12822_v11  ;;  %v1532_v39 = vpop.f32.mrf.mxu3  ;;  %v917_v19 = vmul.f32 0.2, %v760_v5  ;;  %v11353_v21 = vld [vmem:[#allocation8 + $0x134] sm:$0xf0]  ;;  %1789 = vmatpush.bf16.msra.mxu2 %v9735_v54 }
 0x19f   : > { %v1624_v1 = vpop.f32.mrf.mxu0 }
 0x1a0   : > { %v12863_v41 = vpack.c.bf16 %v2280_v6, %v2276_v60  ;;  %v1533_v46 = vadd.f32 %v1532_v39, %v1444_v17  ;;  %v1625_v3 = vadd.f32 %v1624_v1, %v12809_v8  ;;  %v1713_v38 = vpop.f32.mrf.mxu1  ;;  %v9863_v17 = vor.u32 %v11353_v21, %v9862_v40 }
 0x1a1   : > { %v920_v39 = vmul.f32 0.2, %v851_v45 }
 0x1a2   : > { %v2151_v18 = vmul.f32 0.2, %v1533_v46  ;;  %v1714_v58 = vadd.f32 %v1713_v38, %v1625_v3  ;;  %1485 = vmatmul.bf16.gmra.mxu2 %v12861_v44  ;;  %1663 = vmatmul.bf16.gmra.mxu0 %v12861_v44  ;;  %v983_v3 = vmax.f32 %v762_v13, %v919_v33  ;;  %v11319_v13 = vld [vmem:[#allocation8 + $0x2c] sm:$0xf] }
 0x1a3   : > { %1574 = vmatmul.bf16.gmra.mxu3 %v12866_v36  ;;  %1752 = vmatmul.bf16.gmra.mxu1 %v12866_v36 }
 0x1a4   : > { %v2279_v48 = vmax.f32 %v1533_v46, %v2151_v18  ;;  %v2156_v1 = vmul.f32 0.2, %v1714_v58  ;;  %1878 = vmatpush.bf16.msra.mxu3 %v9863_v17  ;;  %v981_v46 = vmax.f32 %v760_v5, %v917_v19  ;;  %v982_v18 = vmax.f32 %v849_v50, %v918_v37  ;;  %v9736_v19 = vld [vmem:[#allocation8 + $0x38] sm:$0xf0] }
 0x1a5   : > { %v1446_v9 = vpop.f32.mrf.mxu2  ;;  %v767_v17 = vadd.f32 %v12737_v20, %v12641_v43  ;;  %v11351_v20 = vld [vmem:[#allocation8 + $0x12c] sm:$0xf] }
 0x1a6   : > { %v12880_v63 = vpack.c.bf16 %v2279_v48, %v2275_v31  ;;  %v1447_v10 = vadd.f32 %v1446_v9, %v12822_v11  ;;  %v1535_v29 = vpop.f32.mrf.mxu3  ;;  %v984_v31 = vmax.f32 %v851_v45, %v920_v39  ;;  %v2284_v9 = vmax.f32 %v1714_v58, %v2156_v1 }
 0x1a7   : > { %v1626_v7 = vpop.f32.mrf.mxu0  ;;  %v12885_v35 = vpack.c.bf16 %v983_v3, %v981_v46  ;;  %v9739_v45 = vor.u32 %v11319_v13, %v9736_v19  ;;  %v854_v1 = vadd.f32 %v12729_v56, %v12643_v47 }
 0x1a8   : > { %v1536_v60 = vadd.f32 %v1535_v29, %v1447_v10  ;;  %v1627_v15 = vadd.f32 %v1626_v7, %v12809_v8  ;;  %v1715_v6 = vpop.f32.mrf.mxu1  ;;  %v12890_v50 = vpack.c.bf16 %v984_v31, %v982_v18  ;;  %v9864_v18 = vld [vmem:[#allocation8 + $0x138] sm:$0xf0] }
 0x1a9   : > { %1967 = vmatpush.bf16.msra.mxu0 %v9739_v45  ;;  %v922_v56 = vmul.f32 0.2, %v854_v1 }
 0x1aa   : > { %v1716_v61 = vadd.f32 %v1715_v6, %v1627_v15  ;;  %v2155_v7 = vmul.f32 0.2, %v1536_v60  ;;  %v765_v6 = vadd.f32 %v12727_v55, %v12641_v43 }
 0x1ab   : > { %v986_v13 = vmax.f32 %v854_v1, %v922_v56  ;;  %v861_v56 = vadd.f32 %v12764_v25, %v12643_v47 }
 0x1ac   : > { %v2160_v38 = vmul.f32 0.2, %v1716_v61  ;;  %v2283_v37 = vmax.f32 %v1536_v60, %v2155_v7  ;;  %v921_v31 = vmul.f32 0.2, %v765_v6  ;;  %v9867_v60 = vor.u32 %v11351_v20, %v9864_v18 }
 0x1ad   : > { %v1448_v48 = vpop.f32.mrf.mxu2 }
 0x1ae   : > { %v2288_v14 = vmax.f32 %v1716_v61, %v2160_v38  ;;  %v1449_v10 = vadd.f32 %v1448_v48, %v12822_v11  ;;  %v1537_v29 = vpop.f32.mrf.mxu3  ;;  %v856_v61 = vadd.f32 %v12741_v22, %v12643_v47  ;;  %v923_v48 = vmul.f32 0.2, %v767_v17  ;;  %2056 = vmatpush.bf16.msra.mxu1 %v9867_v60 }
 0x1af   : > { %v1629_v40 = vpop.f32.mrf.mxu0 }
 0x1b0   : > { %v12887_v21 = vpack.c.bf16 %v2288_v14, %v2284_v9  ;;  %v1538_v54 = vadd.f32 %v1537_v29, %v1449_v10  ;;  %v1630_v15 = vadd.f32 %v1629_v40, %v12809_v8  ;;  %v1718_v5 = vpop.f32.mrf.mxu1  ;;  %v924_v40 = vmul.f32 0.2, %v856_v61 }
 0x1b2   : > { %15126 = vst [vmem:[#allocation37_spill] sm:$0xff] %v12887_v21  ;;  %v2159_v58 = vmul.f32 0.2, %v1538_v54  ;;  %v1719_v33 = vadd.f32 %v1718_v5, %v1630_v15  ;;  %1490 = vmatmul.bf16.gmra.mxu2 %v12885_v35  ;;  %1668 = vmatmul.bf16.gmra.mxu0 %v12885_v35  ;;  %v987_v15 = vmax.f32 %v767_v17, %v923_v48 }
 0x1b3   : > { %1579 = vmatmul.bf16.gmra.mxu3 %v12890_v50  ;;  %1757 = vmatmul.bf16.gmra.mxu1 %v12890_v50  ;;  %v988_v19 = vmax.f32 %v856_v61, %v924_v40 }
 0x1b4   : > { %v2287_v39 = vmax.f32 %v1538_v54, %v2159_v58  ;;  %v2164_v22 = vmul.f32 0.2, %v1719_v33  ;;  %v985_v54 = vmax.f32 %v765_v6, %v921_v31  ;;  %v772_v31 = vadd.f32 %v12761_v23, %v12641_v43  ;;  %v11317_v23 = vld [vmem:[#allocation8 + $0x14] sm:$0xf0] }
 0x1b5   : > { %v1451_v46 = vpop.f32.mrf.mxu2  ;;  %v12914_v17 = vpack.c.bf16 %v988_v19, %v986_v13 }
 0x1b6   : > { %v12904_v3 = vpack.c.bf16 %v2287_v39, %v2283_v37  ;;  %v1452_v55 = vadd.f32 %v1451_v46, %v12822_v11  ;;  %v1540_v38 = vpop.f32.mrf.mxu3  ;;  %v2292_v58 = vmax.f32 %v1719_v33, %v2164_v22  ;;  %v770_v33 = vadd.f32 %v12749_v49, %v12641_v43 }
 0x1b7   : > { %v1631_v9 = vpop.f32.mrf.mxu0  ;;  %v927_v13 = vmul.f32 0.2, %v772_v31 }
 0x1b8   : > { %15127 = vst [vmem:[#allocation38_spill] sm:$0xff] %v12904_v3  ;;  %v1541_v14 = vadd.f32 %v1540_v38, %v1452_v55  ;;  %v1632_v10 = vadd.f32 %v1631_v9, %v12809_v8  ;;  %v1720_v29 = vpop.f32.mrf.mxu1  ;;  %v12909_v55 = vpack.c.bf16 %v987_v15, %v985_v54  ;;  %v9718_v54 = vld [vmem:[#allocation8 + $0x8] sm:$0xf] }
 0x1b9   : > { %v9846_v15 = vld [vmem:[#allocation8 + $0x108] sm:$0xf] }
 0x1ba   : > { %v1721_v7 = vadd.f32 %v1720_v29, %v1632_v10  ;;  %v2163_v20 = vmul.f32 0.2, %v1541_v14  ;;  %v859_v29 = vadd.f32 %v12751_v53, %v12643_v47 }
 0x1bc   : > { %v2168_v5 = vmul.f32 0.2, %v1721_v7  ;;  %v2291_v48 = vmax.f32 %v1541_v14, %v2163_v20  ;;  %v9719_v14 = vor.u32 %v11317_v23, %v9718_v54  ;;  %v926_v25 = vmul.f32 0.2, %v859_v29 }
 0x1bd   : > { %v1453_v45 = vpop.f32.mrf.mxu2 }
 0x1be   : > { %v2296_v37 = vmax.f32 %v1721_v7, %v2168_v5  ;;  %v1454_v39 = vadd.f32 %v1453_v45, %v12822_v11  ;;  %v1542_v46 = vpop.f32.mrf.mxu3  ;;  %v925_v5 = vmul.f32 0.2, %v770_v33  ;;  %v11349_v45 = vld [vmem:[#allocation8 + $0x114] sm:$0xf0]  ;;  %1790 = vmatpush.bf16.msra.mxu2 %v9719_v14 }
 0x1bf   : > { %v1634_v38 = vpop.f32.mrf.mxu0 }
 0x1c0   : > { %v12911_v18 = vpack.c.bf16 %v2296_v37, %v2292_v58  ;;  %v1543_v9 = vadd.f32 %v1542_v46, %v1454_v39  ;;  %v1635_v60 = vadd.f32 %v1634_v38, %v12809_v8  ;;  %v1723_v6 = vpop.f32.mrf.mxu1  ;;  %v9847_v39 = vor.u32 %v11349_v45, %v9846_v15 }
 0x1c1   : > { %v928_v46 = vmul.f32 0.2, %v861_v56 }
 0x1c2   : > { %v2167_v1 = vmul.f32 0.2, %v1543_v9  ;;  %v1724_v61 = vadd.f32 %v1723_v6, %v1635_v60  ;;  %1495 = vmatmul.bf16.gmra.mxu2 %v12909_v55  ;;  %1673 = vmatmul.bf16.gmra.mxu0 %v12909_v55  ;;  %v991_v60 = vmax.f32 %v772_v31, %v927_v13  ;;  %v11315_v31 = vld [vmem:[#allocation8 + $0xc] sm:$0xf] }
 0x1c3   : > { %1584 = vmatmul.bf16.gmra.mxu3 %v12914_v17  ;;  %1762 = vmatmul.bf16.gmra.mxu1 %v12914_v17 }
 0x1c4   : > { %v2295_v10 = vmax.f32 %v1543_v9, %v2167_v1  ;;  %v2172_v38 = vmul.f32 0.2, %v1724_v61  ;;  %1879 = vmatpush.bf16.msra.mxu3 %v9847_v39  ;;  %v989_v9 = vmax.f32 %v770_v33, %v925_v5  ;;  %v990_v1 = vmax.f32 %v859_v29, %v926_v25  ;;  %v9720_v5 = vld [vmem:[#allocation8 + $0x18] sm:$0xf0] }
 0x1c5   : > { %v1456_v40 = vpop.f32.mrf.mxu2  ;;  %v777_v39 = vadd.f32 %v12783_v27, %v12641_v43  ;;  %v11347_v27 = vld [vmem:[#allocation8 + $0x10c] sm:$0xf] }
 0x1c6   : > { %v12928_v22 = vpack.c.bf16 %v2295_v10, %v2291_v48  ;;  %v1457_v49 = vadd.f32 %v1456_v40, %v12822_v11  ;;  %v1545_v7 = vpop.f32.mrf.mxu3  ;;  %v992_v48 = vmax.f32 %v861_v56, %v928_v46  ;;  %v2300_v40 = vmax.f32 %v1724_v61, %v2172_v38 }
 0x1c7   : > { %v1636_v19 = vpop.f32.mrf.mxu0  ;;  %v12933_v23 = vpack.c.bf16 %v991_v60, %v989_v9  ;;  %v9723_v56 = vor.u32 %v11315_v31, %v9720_v5  ;;  %v864_v38 = vadd.f32 %v12773_v59, %v12643_v47 }
 0x1c8   : > { %v1546_v58 = vadd.f32 %v1545_v7, %v1457_v49  ;;  %v1637_v53 = vadd.f32 %v1636_v19, %v12809_v8  ;;  %v1725_v37 = vpop.f32.mrf.mxu1  ;;  %v12938_v29 = vpack.c.bf16 %v992_v48, %v990_v1  ;;  %v9848_v1 = vld [vmem:[#allocation8 + $0x118] sm:$0xf0] }
 0x1c9   : > { %1968 = vmatpush.bf16.msra.mxu0 %v9723_v56  ;;  %v930_v59 = vmul.f32 0.2, %v864_v38 }
 0x1ca   : > { %v1726_v20 = vadd.f32 %v1725_v37, %v1637_v53  ;;  %v2171_v19 = vmul.f32 0.2, %v1546_v58  ;;  %v775_v37 = vadd.f32 %v12769_v57, %v12641_v43 }
 0x1cb   : > { %v994_v31 = vmax.f32 %v864_v38, %v930_v59  ;;  %v871_v59 = vadd.f32 %v12813_v52, %v12643_v47 }
 0x1cc   : > { %v2176_v6 = vmul.f32 0.2, %v1726_v20  ;;  %v2299_v25 = vmax.f32 %v1546_v58, %v2171_v19  ;;  %v929_v48 = vmul.f32 0.2, %v775_v37  ;;  %v9851_v58 = vor.u32 %v11347_v27, %v9848_v1 }
 0x1cd   : > { %v1458_v10 = vpop.f32.mrf.mxu2  ;;  %v936_v52 = vmul.f32 0.2, %v871_v59 }
 0x1ce   : > { %v2304_v54 = vmax.f32 %v1726_v20, %v2176_v6  ;;  %v1459_v49 = vadd.f32 %v1458_v10, %v12822_v11  ;;  %v1547_v7 = vpop.f32.mrf.mxu3  ;;  %v866_v20 = vadd.f32 %v12785_v34, %v12643_v47  ;;  %v931_v10 = vmul.f32 0.2, %v777_v39  ;;  %2057 = vmatpush.bf16.msra.mxu1 %v9851_v58 }
 0x1cf   : > { %v1639_v15 = vpop.f32.mrf.mxu0 }
 0x1d0   : > { %v12935_v45 = vpack.c.bf16 %v2304_v54, %v2300_v40  ;;  %v1548_v14 = vadd.f32 %v1547_v7, %v1459_v49  ;;  %v1640_v53 = vadd.f32 %v1639_v15, %v12809_v8  ;;  %v1728_v33 = vpop.f32.mrf.mxu1  ;;  %v932_v15 = vmul.f32 0.2, %v866_v20 }
 0x1d2   : > { %15128 = vst [vmem:[#allocation39_spill] sm:$0xff] %v12935_v45  ;;  %v2175_v61 = vmul.f32 0.2, %v1548_v14  ;;  %v1729_v13 = vadd.f32 %v1728_v33, %v1640_v53  ;;  %1500 = vmatmul.bf16.gmra.mxu2 %v12933_v23  ;;  %1678 = vmatmul.bf16.gmra.mxu0 %v12933_v23  ;;  %v995_v53 = vmax.f32 %v777_v39, %v931_v10 }
 0x1d3   : > { %1589 = vmatmul.bf16.gmra.mxu3 %v12938_v29  ;;  %1767 = vmatmul.bf16.gmra.mxu1 %v12938_v29  ;;  %v996_v5 = vmax.f32 %v866_v20, %v932_v15 }
 0x1d4   : > { %v2303_v46 = vmax.f32 %v1548_v14, %v2175_v61  ;;  %v2180_v34 = vmul.f32 0.2, %v1729_v13  ;;  %v993_v14 = vmax.f32 %v775_v37, %v929_v48  ;;  %v782_v48 = vadd.f32 %v12811_v24, %v12641_v43  ;;  %v10446_v24 = vld [vmem:[#allocation11 + $0x3c0] sm:$0xf] }
 0x1d5   : > { %v1461_v9 = vpop.f32.mrf.mxu2  ;;  %v12962_v39 = vpack.c.bf16 %v996_v5, %v994_v31  ;;  %v11502_v5 = vld [vmem:[#allocation11 + $0x3dc] sm:$0xf0] }
 0x1d6   : > { %v12952_v60 = vpack.c.bf16 %v2303_v46, %v2299_v25  ;;  %v1462_v57 = vadd.f32 %v1461_v9, %v12822_v11  ;;  %v1550_v6 = vpop.f32.mrf.mxu3  ;;  %v2308_v61 = vmax.f32 %v1729_v13, %v2180_v34  ;;  %v780_v13 = vadd.f32 %v12795_v26, %v12641_v43  ;;  %v11438_v43 = vld [vmem:[#allocation11 + $0x1dc] sm:$0xf0] }
 0x1d7   : > { %v1641_v40 = vpop.f32.mrf.mxu0 }
 0x1d8   : > { %15129 = vst [vmem:[#allocation40_spill] sm:$0xff] %v12952_v60  ;;  %v1551_v54 = vadd.f32 %v1550_v6, %v1462_v57  ;;  %v1642_v49 = vadd.f32 %v1641_v40, %v12809_v8  ;;  %v1730_v7 = vpop.f32.mrf.mxu1  ;;  %v12957_v57 = vpack.c.bf16 %v995_v53, %v993_v14  ;;  %v10190_v14 = vld [vmem:[#allocation11 + $0x1c0] sm:$0xf]  ;;  %v933_v53 = vmul.f32 0.2, %v780_v13 }
 0x1da   : > { %v1731_v19 = vadd.f32 %v1730_v7, %v1642_v49  ;;  %v2179_v27 = vmul.f32 0.2, %v1551_v54  ;;  %v869_v7 = vadd.f32 %v12803_v28, %v12643_v47 }
 0x1dc   : > { %v2184_v33 = vmul.f32 0.2, %v1731_v19  ;;  %v2307_v10 = vmax.f32 %v1551_v54, %v2179_v27  ;;  %v10191_v54 = vor.u32 %v11438_v43, %v10190_v14  ;;  %v934_v47 = vmul.f32 0.2, %v869_v7 }
 0x1dd   : > { %v1463_v56 = vpop.f32.mrf.mxu2 }
 0x1de   : > { %v2312_v25 = vmax.f32 %v1731_v19, %v2184_v33  ;;  %v1464_v46 = vadd.f32 %v1463_v56, %v12822_v11  ;;  %v1552_v9 = vpop.f32.mrf.mxu3  ;;  %v935_v33 = vmul.f32 0.2, %v782_v48  ;;  %4013 = vmatpush.bf16.msrb.mxu2 %v10191_v54 }
 0x1df   : > { %v1644_v6 = vpop.f32.mrf.mxu0 }
 0x1e0   : > { %v12959_v1 = vpack.c.bf16 %v2312_v25, %v2308_v61  ;;  %v1553_v40 = vadd.f32 %v1552_v9, %v1464_v46  ;;  %v1645_v58 = vadd.f32 %v1644_v6, %v12809_v8  ;;  %v1733_v37 = vpop.f32.mrf.mxu1  ;;  %v10447_v25 = vor.u32 %v11502_v5, %v10446_v24 }
 0x1e1   : > { %v997_v6 = vmax.f32 %v780_v13, %v933_v53  ;;  %v999_v27 = vmax.f32 %v782_v48, %v935_v33  ;;  %v10702_v48 = vld [vmem:[#allocation11 + $0x5c0] sm:$0xf] }
 0x1e2   : > { %v2183_v38 = vmul.f32 0.2, %v1553_v40  ;;  %v1734_v20 = vadd.f32 %v1733_v37, %v1645_v58  ;;  %1505 = vmatmul.bf16.gmra.mxu2 %v12957_v57  ;;  %1683 = vmatmul.bf16.gmra.mxu0 %v12957_v57  ;;  %v998_v58 = vmax.f32 %v869_v7, %v934_v47  ;;  %v1000_v37 = vmax.f32 %v871_v59, %v936_v52  ;;  %v11566_v53 = vld [vmem:[#allocation11 + $0x5dc] sm:$0xf0] }
 0x1e3   : > { %1594 = vmatmul.bf16.gmra.mxu3 %v12962_v39  ;;  %1772 = vmatmul.bf16.gmra.mxu1 %v12962_v39  ;;  %v10703_v59 = vor.u32 %v11566_v53, %v10702_v48 }
 0x1e4   : > { %v2311_v49 = vmax.f32 %v1553_v40, %v2183_v38  ;;  %v2188_v46 = vmul.f32 0.2, %v1734_v20  ;;  %4102 = vmatpush.bf16.msrb.mxu3 %v10447_v25  ;;  %v12986_v7 = vpack.c.bf16 %v1000_v37, %v998_v58 }
 0x1e5   : > { %v1466_v15 = vpop.f32.mrf.mxu2  ;;  %4191 = vmatpush.bf16.msrb.mxu0 %v10703_v59 }
 0x1e6   : > { %v12976_v34 = vpack.c.bf16 %v2311_v49, %v2307_v10  ;;  %v1467_v26 = vadd.f32 %v1466_v15, %v12822_v11  ;;  %v1555_v19 = vpop.f32.mrf.mxu3  ;;  %v2316_v10 = vmax.f32 %v1734_v20, %v2188_v46  ;;  %v10958_v46 = vld [vmem:[#allocation11 + $0x7c0] sm:$0xf] }
 0x1e7   : > { %v1646_v31 = vpop.f32.mrf.mxu0 }
 0x1e8   : > { %v1556_v56 = vadd.f32 %v1555_v19, %v1467_v26  ;;  %v1647_v28 = vadd.f32 %v1646_v31, %v12809_v8  ;;  %v1735_v61 = vpop.f32.mrf.mxu1  ;;  %v12981_v19 = vpack.c.bf16 %v999_v27, %v997_v6 }
 0x1ea   : > { %v1736_v9 = vadd.f32 %v1735_v61, %v1647_v28  ;;  %v2187_v43 = vmul.f32 0.2, %v1556_v56 }
 0x1ec   : > { %v2192_v40 = vmul.f32 0.2, %v1736_v9  ;;  %v2315_v5 = vmax.f32 %v1556_v56, %v2187_v43 }
 0x1ed   : > { %v1468_v38 = vpop.f32.mrf.mxu2 }
 0x1ee   : > { %v2320_v49 = vmax.f32 %v1736_v9, %v2192_v40  ;;  %v1469_v15 = vadd.f32 %v1468_v38, %v12822_v11  ;;  %v1557_v26 = vpop.f32.mrf.mxu3  ;;  %v11630_v9 = vld [vmem:[#allocation11 + $0x7dc] sm:$0xf0] }
 0x1ef   : > { %v1649_v14 = vpop.f32.mrf.mxu0  ;;  %v10959_v27 = vor.u32 %v11630_v9, %v10958_v46  ;;  %v10158_v9 = vld [vmem:[#allocation11 + $0x180] sm:$0xf] }
 0x1f0   : > { %v12983_v24 = vpack.c.bf16 %v2320_v49, %v2316_v10  ;;  %v1558_v31 = vadd.f32 %v1557_v26, %v1469_v15  ;;  %v1650_v54 = vadd.f32 %v1649_v14, %v12809_v8  ;;  %v1738_v13 = vpop.f32.mrf.mxu1 }
 0x1f1   : > { %4280 = vmatpush.bf16.msrb.mxu1 %v10959_v27  ;;  %v10414_v27 = vld [vmem:[#allocation11 + $0x380] sm:$0xf] }
 0x1f2   : > { %15130 = vst [vmem:[#allocation41_spill] sm:$0xff] %v12983_v24  ;;  %v2191_v20 = vmul.f32 0.2, %v1558_v31  ;;  %v1739_v33 = vadd.f32 %v1738_v13, %v1650_v54  ;;  %1510 = vmatmul.bf16.gmra.mxu2 %v12981_v19  ;;  %1688 = vmatmul.bf16.gmra.mxu0 %v12981_v19 }
 0x1f3   : > { %1599 = vmatmul.bf16.gmra.mxu3 %v12986_v7  ;;  %1777 = vmatmul.bf16.gmra.mxu1 %v12986_v7 }
 0x1f4   : > { %v2319_v28 = vmax.f32 %v1558_v31, %v2191_v20  ;;  %v2196_v38 = vmul.f32 0.2, %v1739_v33 }
 0x1f5   : > { %v1471_v61 = vpop.f32.mrf.mxu2 }
 0x1f6   : > { %v12992_v25 = vpack.c.bf16 %v2319_v28, %v2315_v5  ;;  %v1472_v47 = vadd.f32 %v1471_v61, %v12822_v11  ;;  %v1560_v52 = vpop.f32.mrf.mxu3  ;;  %v2324_v15 = vmax.f32 %v1739_v33, %v2196_v38  ;;  %v11494_v38 = vld [vmem:[#allocation11 + $0x39c] sm:$0xf0] }
 0x1f7   : > { %v1651_v6 = vpop.f32.mrf.mxu0 }
 0x1f8   : > { %15131 = vst [vmem:[#allocation42_spill] sm:$0xff] %v12992_v25  ;;  %v1561_v40 = vadd.f32 %v1560_v52, %v1472_v47  ;;  %v1652_v58 = vadd.f32 %v1651_v6, %v12809_v8  ;;  %v1740_v37 = vpop.f32.mrf.mxu1  ;;  %v11430_v6 = vld [vmem:[#allocation11 + $0x19c] sm:$0xf0] }
 0x1fa   : > { %v1741_v10 = vadd.f32 %v1740_v37, %v1652_v58  ;;  %v2195_v54 = vmul.f32 0.2, %v1561_v40  ;;  %v10159_v37 = vor.u32 %v11430_v6, %v10158_v9 }
 0x1fc   : > { %v2200_v56 = vmul.f32 0.2, %v1741_v10  ;;  %v2323_v33 = vmax.f32 %v1561_v40, %v2195_v54  ;;  %4014 = vmatpush.bf16.msrb.mxu2 %v10159_v37 }
 0x1fd   : > { %v1473_v49 = vpop.f32.mrf.mxu2 }
 0x1fe   : > { %v2328_v26 = vmax.f32 %v1741_v10, %v2200_v56  ;;  %v1474_v14 = vadd.f32 %v1473_v49, %v12822_v11  ;;  %v1562_v43 = vpop.f32.mrf.mxu3  ;;  %v10415_v49 = vor.u32 %v11494_v38, %v10414_v27 }
 0x1ff   : > { %v1654_v31 = vpop.f32.mrf.mxu0 }
 0x200   : > { %v12997_v13 = vpack.c.bf16 %v2328_v26, %v2324_v15  ;;  %v1563_v48 = vadd.f32 %v1562_v43, %v1474_v14  ;;  %v1655_v53 = vadd.f32 %v1654_v31, %v12809_v8  ;;  %v1743_v59 = vpop.f32.mrf.mxu1  ;;  %4103 = vmatpush.bf16.msrb.mxu3 %v10415_v49  ;;  %v11622_v49 = vld [vmem:[#allocation11 + $0x79c] sm:$0xf0] }
 0x202   : > { %v2199_v20 = vmul.f32 0.2, %v1563_v48  ;;  %v1744_v5 = vadd.f32 %v1743_v59, %v1655_v53  ;;  %1791 = vmatmul.bf16.vlgmr.msra.gmra.mxu2 %v12655_v2  ;;  %1969 = vmatmul.bf16.vlgmr.msra.gmra.mxu0 %v12655_v2 }
 0x203   : > { %1880 = vmatmul.bf16.vlgmr.msra.gmra.mxu3 %v12659_v4  ;;  %2058 = vmatmul.bf16.vlgmr.msra.gmra.mxu1 %v12659_v4 }
 0x204   : > { %v2327_v28 = vmax.f32 %v1563_v48, %v2199_v20  ;;  %v2204_v4 = vmul.f32 0.2, %v1744_v5 }
 0x205   : > { %v1476_v61 = vpop.f32.mrf.mxu2 }
 0x206   : > { %v13004_v47 = vpack.c.bf16 %v2327_v28, %v2323_v33  ;;  %v1477_v52 = vadd.f32 %v1476_v61, %v12822_v11  ;;  %v1565_v46 = vpop.f32.mrf.mxu3  ;;  %v2332_v14 = vmax.f32 %v1744_v5, %v2204_v4  ;;  %v10670_v61 = vld [vmem:[#allocation11 + $0x580] sm:$0xf] }
 0x207   : > { %v1656_v58 = vpop.f32.mrf.mxu0 }
 0x208   : > { %v1566_v10 = vadd.f32 %v1565_v46, %v1477_v52  ;;  %v1657_v2 = vadd.f32 %v1656_v58, %v12809_v8  ;;  %v1745_v56 = vpop.f32.mrf.mxu1  ;;  %v11558_v52 = vld [vmem:[#allocation11 + $0x59c] sm:$0xf0] }
 0x209   : > { %v10671_v46 = vor.u32 %v11558_v52, %v10670_v61 }
 0x20a   : > { %v1746_v40 = vadd.f32 %v1745_v56, %v1657_v2  ;;  %v2203_v53 = vmul.f32 0.2, %v1566_v10  ;;  %v10926_v56 = vld [vmem:[#allocation11 + $0x780] sm:$0xf] }
 0x20b   : > { %4192 = vmatpush.bf16.msrb.mxu0 %v10671_v46 }
 0x20c   : > { %v2208_v15 = vmul.f32 0.2, %v1746_v40  ;;  %v2331_v5 = vmax.f32 %v1566_v10, %v2203_v53 }
 0x20d   : > { %v1478_v26 = vpop.f32.mrf.mxu2 }
 0x20e   : > { %v2336_v43 = vmax.f32 %v1746_v40, %v2208_v15  ;;  %v1479_v31 = vadd.f32 %v1478_v26, %v12822_v11  ;;  %v1567_v54 = vpop.f32.mrf.mxu3  ;;  %v10927_v40 = vor.u32 %v11622_v49, %v10926_v56  ;;  %v10126_v49 = vld [vmem:[#allocation11 + $0x140] sm:$0xf] }
 0x20f   : > { %v1659_v48 = vpop.f32.mrf.mxu0 }
 0x210   : > { %v13009_v59 = vpack.c.bf16 %v2336_v43, %v2332_v14  ;;  %v1568_v20 = vadd.f32 %v1567_v54, %v1479_v31  ;;  %v1660_v33 = vadd.f32 %v1659_v48, %v12809_v8  ;;  %v1748_v28 = vpop.f32.mrf.mxu1  ;;  %4281 = vmatpush.bf16.msrb.mxu1 %v10927_v40  ;;  %v10382_v40 = vld [vmem:[#allocation11 + $0x340] sm:$0xf] }
 0x212   : > { %15132 = vst [vmem:[#allocation43_spill] sm:$0xff] %v13009_v59  ;;  %v2207_v9 = vmul.f32 0.2, %v1568_v20  ;;  %v1749_v6 = vadd.f32 %v1748_v28, %v1660_v33  ;;  %1796 = vmatmul.bf16.gmra.mxu2 %v12675_v30  ;;  %1974 = vmatmul.bf16.gmra.mxu0 %v12675_v30 }
 0x213   : > { %1885 = vmatmul.bf16.gmra.mxu3 %v12679_v32  ;;  %2063 = vmatmul.bf16.gmra.mxu1 %v12679_v32 }
 0x214   : > { %v2335_v27 = vmax.f32 %v1568_v20, %v2207_v9  ;;  %v2212_v14 = vmul.f32 0.2, %v1749_v6 }
 0x215   : > { %v1481_v58 = vpop.f32.mrf.mxu2 }
 0x216   : > { %v13016_v37 = vpack.c.bf16 %v2335_v27, %v2331_v5  ;;  %v1482_v38 = vadd.f32 %v1481_v58, %v12822_v11  ;;  %v1570_v2 = vpop.f32.mrf.mxu3  ;;  %v2340_v31 = vmax.f32 %v1749_v6, %v2212_v14  ;;  %v11486_v14 = vld [vmem:[#allocation11 + $0x35c] sm:$0xf0] }
 0x217   : > { %v1661_v4 = vpop.f32.mrf.mxu0 }
 0x218   : > { %15133 = vst [vmem:[#allocation44_spill] sm:$0xff] %v13016_v37  ;;  %v1571_v15 = vadd.f32 %v1570_v2, %v1482_v38  ;;  %v1662_v30 = vadd.f32 %v1661_v4, %v12809_v8  ;;  %v1750_v26 = vpop.f32.mrf.mxu1  ;;  %v11422_v4 = vld [vmem:[#allocation11 + $0x15c] sm:$0xf0] }
 0x21a   : > { %v1751_v32 = vadd.f32 %v1750_v26, %v1662_v30  ;;  %v2211_v33 = vmul.f32 0.2, %v1571_v15  ;;  %v10127_v26 = vor.u32 %v11422_v4, %v10126_v49 }
 0x21c   : > { %v2216_v10 = vmul.f32 0.2, %v1751_v32  ;;  %v2339_v6 = vmax.f32 %v1571_v15, %v2211_v33  ;;  %4015 = vmatpush.bf16.msrb.mxu2 %v10127_v26 }
 0x21d   : > { %v1483_v43 = vpop.f32.mrf.mxu2 }
 0x21e   : > { %v2344_v54 = vmax.f32 %v1751_v32, %v2216_v10  ;;  %v1484_v48 = vadd.f32 %v1483_v43, %v12822_v11  ;;  %v1572_v53 = vpop.f32.mrf.mxu3  ;;  %v10383_v43 = vor.u32 %v11486_v14, %v10382_v40  ;;  %v15136_v40 = vld [vmem:[#allocation23_spill] sm:$0xff] }
 0x21f   : > { %v1664_v20 = vpop.f32.mrf.mxu0 }
 0x220   : > { %v13021_v28 = vpack.c.bf16 %v2344_v54, %v2340_v31  ;;  %v1573_v61 = vadd.f32 %v1572_v53, %v1484_v48  ;;  %v1665_v52 = vadd.f32 %v1664_v20, %v12809_v8  ;;  %v1753_v46 = vpop.f32.mrf.mxu1  ;;  %4104 = vmatpush.bf16.msrb.mxu3 %v10383_v43 }
 0x222   : > { %15134 = vst [vmem:[#allocation45_spill] sm:$0xff] %v13021_v28  ;;  %v2215_v9 = vmul.f32 0.2, %v1573_v61  ;;  %v1754_v5 = vadd.f32 %v1753_v46, %v1665_v52  ;;  %1801 = vmatmul.bf16.gmra.mxu2 %v12695_v62  ;;  %1979 = vmatmul.bf16.gmra.mxu0 %v12695_v62 }
 0x223   : > { %1890 = vmatmul.bf16.gmra.mxu3 %v12699_v0  ;;  %2068 = vmatmul.bf16.gmra.mxu1 %v12699_v0 }
 0x224   : > { %v2343_v27 = vmax.f32 %v1573_v61, %v2215_v9  ;;  %v2220_v0 = vmul.f32 0.2, %v1754_v5 }
 0x225   : > { %v1486_v58 = vpop.f32.mrf.mxu2 }
 0x226   : > { %v13028_v38 = vpack.c.bf16 %v2343_v27, %v2339_v6  ;;  %v1487_v2 = vadd.f32 %v1486_v58, %v12822_v11  ;;  %v1575_v56 = vpop.f32.mrf.mxu3  ;;  %v2348_v48 = vmax.f32 %v1754_v5, %v2220_v0  ;;  %v10638_v58 = vld [vmem:[#allocation11 + $0x540] sm:$0xf]  ;;  %v15137_v5 = vld [vmem:[#allocation24_spill] sm:$0xff] }
 0x227   : > { %v1666_v30 = vpop.f32.mrf.mxu0  ;;  %v10894_v0 = vld [vmem:[#allocation11 + $0x740] sm:$0xf] }
 0x228   : > { %v1576_v32 = vadd.f32 %v1575_v56, %v1487_v2  ;;  %v1667_v62 = vadd.f32 %v1666_v30, %v12809_v8  ;;  %v1755_v10 = vpop.f32.mrf.mxu1  ;;  %v11550_v2 = vld [vmem:[#allocation11 + $0x55c] sm:$0xf0] }
 0x229   : > { %v10639_v56 = vor.u32 %v11550_v2, %v10638_v58 }
 0x22a   : > { %v1756_v15 = vadd.f32 %v1755_v10, %v1667_v62  ;;  %v2219_v52 = vmul.f32 0.2, %v1576_v32 }
 0x22b   : > { %4193 = vmatpush.bf16.msrb.mxu0 %v10639_v56 }
 0x22c   : > { %v2224_v31 = vmul.f32 0.2, %v1756_v15  ;;  %v2347_v30 = vmax.f32 %v1576_v32, %v2219_v52 }
 0x22d   : > { %v1488_v54 = vpop.f32.mrf.mxu2 }
 0x22e   : > { %v2352_v53 = vmax.f32 %v1756_v15, %v2224_v31  ;;  %v1489_v20 = vadd.f32 %v1488_v54, %v12822_v11  ;;  %v1577_v33 = vpop.f32.mrf.mxu3  ;;  %v11614_v15 = vld [vmem:[#allocation11 + $0x75c] sm:$0xf0] }
 0x22f   : > { %v1669_v61 = vpop.f32.mrf.mxu0  ;;  %v10895_v54 = vor.u32 %v11614_v15, %v10894_v0 }
 0x230   : > { %v13033_v46 = vpack.c.bf16 %v2352_v53, %v2348_v48  ;;  %v1578_v9 = vadd.f32 %v1577_v33, %v1489_v20  ;;  %v1670_v6 = vadd.f32 %v1669_v61, %v12809_v8  ;;  %v1758_v27 = vpop.f32.mrf.mxu1 }
 0x231   : > { %4282 = vmatpush.bf16.msrb.mxu1 %v10895_v54 }
 0x232   : > { %15135 = vst [vmem:[#allocation46_spill] sm:$0xff] %v13033_v46  ;;  %v2223_v49 = vmul.f32 0.2, %v1578_v9  ;;  %v1759_v4 = vadd.f32 %v1758_v27, %v1670_v6  ;;  %1806 = vmatmul.bf16.gmra.mxu2 %v15136_v40  ;;  %1984 = vmatmul.bf16.gmra.mxu0 %v15136_v40 }
 0x233   : > { %1895 = vmatmul.bf16.gmra.mxu3 %v15137_v5  ;;  %2073 = vmatmul.bf16.gmra.mxu1 %v15137_v5 }
 0x234   : > { %v2351_v26 = vmax.f32 %v1578_v9, %v2223_v49  ;;  %v2228_v33 = vmul.f32 0.2, %v1759_v4 }
 0x235   : > { %v1491_v14 = vpop.f32.mrf.mxu2 }
 0x236   : > { %v13040_v62 = vpack.c.bf16 %v2351_v26, %v2347_v30  ;;  %v1492_v10 = vadd.f32 %v1491_v14, %v12822_v11  ;;  %v1580_v43 = vpop.f32.mrf.mxu3  ;;  %v2356_v9 = vmax.f32 %v1759_v4, %v2228_v33  ;;  %v11414_v33 = vld [vmem:[#allocation11 + $0x11c] sm:$0xf0] }
 0x237   : > { %v1671_v31 = vpop.f32.mrf.mxu0 }
 0x238   : > { %15138 = vst [vmem:[#allocation23_spill] sm:$0xff] %v13040_v62  ;;  %v1581_v48 = vadd.f32 %v1580_v43, %v1492_v10  ;;  %v1672_v53 = vadd.f32 %v1671_v31, %v12809_v8  ;;  %v1760_v20 = vpop.f32.mrf.mxu1  ;;  %v15139_v10 = vld [vmem:[#allocation25_spill] sm:$0xff]  ;;  %v15140_v43 = vld [vmem:[#allocation26_spill] sm:$0xff] }
 0x23a   : > { %v1761_v61 = vadd.f32 %v1760_v20, %v1672_v53  ;;  %v2227_v56 = vmul.f32 0.2, %v1581_v48  ;;  %v10094_v20 = vld [vmem:[#allocation11 + $0x100] sm:$0xf] }
 0x23c   : > { %v2232_v32 = vmul.f32 0.2, %v1761_v61  ;;  %v2355_v4 = vmax.f32 %v1581_v48, %v2227_v56 }
 0x23d   : > { %v1493_v52 = vpop.f32.mrf.mxu2 }
 0x23e   : > { %v2360_v6 = vmax.f32 %v1761_v61, %v2232_v32  ;;  %v1494_v27 = vadd.f32 %v1493_v52, %v12822_v11  ;;  %v1582_v58 = vpop.f32.mrf.mxu3  ;;  %v10350_v61 = vld [vmem:[#allocation11 + $0x300] sm:$0xf]  ;;  %v10095_v52 = vor.u32 %v11414_v33, %v10094_v20 }
 0x23f   : > { %v1674_v2 = vpop.f32.mrf.mxu0  ;;  %v10606_v33 = vld [vmem:[#allocation11 + $0x500] sm:$0xf] }
 0x240   : > { %v13045_v49 = vpack.c.bf16 %v2360_v6, %v2356_v9  ;;  %v1583_v40 = vadd.f32 %v1582_v58, %v1494_v27  ;;  %v1675_v5 = vadd.f32 %v1674_v2, %v12809_v8  ;;  %v1763_v30 = vpop.f32.mrf.mxu1  ;;  %v11478_v9 = vld [vmem:[#allocation11 + $0x31c] sm:$0xf0]  ;;  %4016 = vmatpush.bf16.msrb.mxu2 %v10095_v52 }
 0x241   : > { %v10351_v2 = vor.u32 %v11478_v9, %v10350_v61  ;;  %v11542_v61 = vld [vmem:[#allocation11 + $0x51c] sm:$0xf0] }
 0x242   : > { %v2231_v26 = vmul.f32 0.2, %v1583_v40  ;;  %v1764_v14 = vadd.f32 %v1763_v30, %v1675_v5  ;;  %1811 = vmatmul.bf16.gmra.mxu2 %v15139_v10  ;;  %1989 = vmatmul.bf16.gmra.mxu0 %v15139_v10 }
 0x243   : > { %1900 = vmatmul.bf16.gmra.mxu3 %v15140_v43  ;;  %2078 = vmatmul.bf16.gmra.mxu1 %v15140_v43 }
 0x244   : > { %v2359_v0 = vmax.f32 %v1583_v40, %v2231_v26  ;;  %v2236_v48 = vmul.f32 0.2, %v1764_v14  ;;  %4105 = vmatpush.bf16.msrb.mxu3 %v10351_v2 }
 0x245   : > { %v1496_v15 = vpop.f32.mrf.mxu2 }
 0x246   : > { %v13052_v31 = vpack.c.bf16 %v2359_v0, %v2355_v4  ;;  %v1497_v54 = vadd.f32 %v1496_v15, %v12822_v11  ;;  %v1585_v53 = vpop.f32.mrf.mxu3  ;;  %v2364_v30 = vmax.f32 %v1764_v14, %v2236_v48  ;;  %v15143_v14 = vld [vmem:[#allocation28_spill] sm:$0xff] }
 0x247   : > { %v1676_v32 = vpop.f32.mrf.mxu0 }
 0x248   : > { %v1586_v6 = vadd.f32 %v1585_v53, %v1497_v54  ;;  %v1677_v27 = vadd.f32 %v1676_v32, %v12809_v8  ;;  %v1765_v58 = vpop.f32.mrf.mxu1  ;;  %v10607_v32 = vor.u32 %v11542_v61, %v10606_v33 }
 0x24a   : > { %v1766_v56 = vadd.f32 %v1765_v58, %v1677_v27  ;;  %v2235_v0 = vmul.f32 0.2, %v1586_v6  ;;  %v15142_v27 = vld [vmem:[#allocation27_spill] sm:$0xff]  ;;  %4194 = vmatpush.bf16.msrb.mxu0 %v10607_v32 }
 0x24c   : > { %v2240_v40 = vmul.f32 0.2, %v1766_v56  ;;  %v2363_v58 = vmax.f32 %v1586_v6, %v2235_v0 }
 0x24d   : > { %v1498_v5 = vpop.f32.mrf.mxu2 }
 0x24e   : > { %v2368_v26 = vmax.f32 %v1766_v56, %v2240_v40  ;;  %v1499_v10 = vadd.f32 %v1498_v5, %v12822_v11  ;;  %v1587_v43 = vpop.f32.mrf.mxu3 }
 0x24f   : > { %v1679_v4 = vpop.f32.mrf.mxu0 }
 0x250   : > { %v13057_v15 = vpack.c.bf16 %v2368_v26, %v2364_v30  ;;  %v1588_v54 = vadd.f32 %v1587_v43, %v1499_v10  ;;  %v1680_v53 = vadd.f32 %v1679_v4, %v12809_v8  ;;  %v1768_v20 = vpop.f32.mrf.mxu1  ;;  %v10862_v30 = vld [vmem:[#allocation11 + $0x700] sm:$0xf] }
 0x251   : > { %v11606_v26 = vld [vmem:[#allocation11 + $0x71c] sm:$0xf0] }
 0x252   : > { %15141 = vst [vmem:[#allocation24_spill] sm:$0xff] %v13057_v15  ;;  %v2239_v52 = vmul.f32 0.2, %v1588_v54  ;;  %v1769_v9 = vadd.f32 %v1768_v20, %v1680_v53  ;;  %1816 = vmatmul.bf16.gmra.mxu2 %v15142_v27  ;;  %1994 = vmatmul.bf16.gmra.mxu0 %v15142_v27  ;;  %v10863_v43 = vor.u32 %v11606_v26, %v10862_v30 }
 0x253   : > { %1905 = vmatmul.bf16.gmra.mxu3 %v15143_v14  ;;  %2083 = vmatmul.bf16.gmra.mxu1 %v15143_v14 }
 0x254   : > { %v2367_v2 = vmax.f32 %v1588_v54, %v2239_v52  ;;  %4283 = vmatpush.bf16.msrb.mxu1 %v10863_v43  ;;  %v2244_v33 = vmul.f32 0.2, %v1769_v9  ;;  %v15146_v43 = vld [vmem:[#allocation30_spill] sm:$0xff] }
 0x255   : > { %v1501_v48 = vpop.f32.mrf.mxu2 }
 0x256   : > { %v13064_v56 = vpack.c.bf16 %v2367_v2, %v2363_v58  ;;  %v1502_v40 = vadd.f32 %v1501_v48, %v12822_v11  ;;  %v1590_v5 = vpop.f32.mrf.mxu3  ;;  %v2372_v54 = vmax.f32 %v1769_v9, %v2244_v33 }
 0x257   : > { %v1681_v10 = vpop.f32.mrf.mxu0 }
 0x258   : > { %v1591_v4 = vadd.f32 %v1590_v5, %v1502_v40  ;;  %v1682_v53 = vadd.f32 %v1681_v10, %v12809_v8  ;;  %v1770_v20 = vpop.f32.mrf.mxu1  ;;  %v15145_v10 = vld [vmem:[#allocation29_spill] sm:$0xff] }
 0x25a   : > { %v1771_v61 = vadd.f32 %v1770_v20, %v1682_v53  ;;  %v2243_v58 = vmul.f32 0.2, %v1591_v4 }
 0x25c   : > { %v2248_v6 = vmul.f32 0.2, %v1771_v61  ;;  %v2371_v9 = vmax.f32 %v1591_v4, %v2243_v58 }
 0x25d   : > { %v1503_v0 = vpop.f32.mrf.mxu2 }
 0x25e   : > { %v2376_v32 = vmax.f32 %v1771_v61, %v2248_v6  ;;  %v1504_v52 = vadd.f32 %v1503_v0, %v12822_v11  ;;  %v1592_v27 = vpop.f32.mrf.mxu3  ;;  %v10062_v0 = vld [vmem:[#allocation11 + $0xc0] sm:$0xf] }
 0x25f   : > { %v1684_v14 = vpop.f32.mrf.mxu0 }
 0x260   : > { %v13069_v2 = vpack.c.bf16 %v2376_v32, %v2372_v54  ;;  %v1593_v48 = vadd.f32 %v1592_v27, %v1504_v52  ;;  %v1685_v40 = vadd.f32 %v1684_v14, %v12809_v8  ;;  %v1773_v5 = vpop.f32.mrf.mxu1  ;;  %v11406_v54 = vld [vmem:[#allocation11 + $0xdc] sm:$0xf0] }
 0x261   : > { %v10318_v32 = vld [vmem:[#allocation11 + $0x2c0] sm:$0xf]  ;;  %v10063_v27 = vor.u32 %v11406_v54, %v10062_v0 }
 0x262   : > { %15144 = vst [vmem:[#allocation25_spill] sm:$0xff] %v13069_v2  ;;  %v2247_v30 = vmul.f32 0.2, %v1593_v48  ;;  %v1774_v26 = vadd.f32 %v1773_v5, %v1685_v40  ;;  %1821 = vmatmul.bf16.gmra.mxu2 %v15145_v10  ;;  %1999 = vmatmul.bf16.gmra.mxu0 %v15145_v10  ;;  %v11470_v14 = vld [vmem:[#allocation11 + $0x2dc] sm:$0xf0] }
 0x263   : > { %1910 = vmatmul.bf16.gmra.mxu3 %v15146_v43  ;;  %2088 = vmatmul.bf16.gmra.mxu1 %v15146_v43  ;;  %v10319_v2 = vor.u32 %v11470_v14, %v10318_v32  ;;  %v10574_v32 = vld [vmem:[#allocation11 + $0x4c0] sm:$0xf] }
 0x264   : > { %v2375_v53 = vmax.f32 %v1593_v48, %v2247_v30  ;;  %4017 = vmatpush.bf16.msrb.mxu2 %v10063_v27  ;;  %v2252_v4 = vmul.f32 0.2, %v1774_v26 }
 0x265   : > { %v1506_v20 = vpop.f32.mrf.mxu2  ;;  %4106 = vmatpush.bf16.msrb.mxu3 %v10319_v2 }
 0x266   : > { %v13076_v33 = vpack.c.bf16 %v2375_v53, %v2371_v9  ;;  %v1507_v61 = vadd.f32 %v1506_v20, %v12822_v11  ;;  %v1595_v6 = vpop.f32.mrf.mxu3  ;;  %v2380_v43 = vmax.f32 %v1774_v26, %v2252_v4  ;;  %v15150_v26 = vld [vmem:[#allocation32_spill] sm:$0xff] }
 0x267   : > { %v1686_v52 = vpop.f32.mrf.mxu0 }
 0x268   : > { %15147 = vst [vmem:[#allocation26_spill] sm:$0xff] %v13076_v33  ;;  %v1596_v40 = vadd.f32 %v1595_v6, %v1507_v61  ;;  %v1687_v5 = vadd.f32 %v1686_v52, %v12809_v8  ;;  %v1775_v10 = vpop.f32.mrf.mxu1  ;;  %v11534_v52 = vld [vmem:[#allocation11 + $0x4dc] sm:$0xf0] }
 0x269   : > { %v10575_v27 = vor.u32 %v11534_v52, %v10574_v32 }
 0x26a   : > { %v1776_v58 = vadd.f32 %v1775_v10, %v1687_v5  ;;  %v2251_v15 = vmul.f32 0.2, %v1596_v40  ;;  %v15149_v5 = vld [vmem:[#allocation31_spill] sm:$0xff] }
 0x26b   : > { %4195 = vmatpush.bf16.msrb.mxu0 %v10575_v27 }
 0x26c   : > { %v2256_v48 = vmul.f32 0.2, %v1776_v58  ;;  %v2379_v10 = vmax.f32 %v1596_v40, %v2251_v15  ;;  %v12066_v40 = vld [vmem:[#allocation10] sm:$0xf] }
 0x26d   : > { %v1508_v30 = vpop.f32.mrf.mxu2 }
 0x26e   : > { %v2384_v9 = vmax.f32 %v1776_v58, %v2256_v48  ;;  %v1509_v53 = vadd.f32 %v1508_v30, %v12822_v11  ;;  %v1597_v20 = vpop.f32.mrf.mxu3 }
 0x26f   : > { %v1689_v33 = vpop.f32.mrf.mxu0 }
 0x270   : > { %v13081_v0 = vpack.c.bf16 %v2384_v9, %v2380_v43  ;;  %v1598_v61 = vadd.f32 %v1597_v20, %v1509_v53  ;;  %v1690_v6 = vadd.f32 %v1689_v33, %v12809_v8  ;;  %v1778_v54 = vpop.f32.mrf.mxu1  ;;  %v10830_v43 = vld [vmem:[#allocation11 + $0x6c0] sm:$0xf] }
 0x271   : > { %v11598_v9 = vld [vmem:[#allocation11 + $0x6dc] sm:$0xf0] }
 0x272   : > { %15148 = vst [vmem:[#allocation27_spill] sm:$0xff] %v13081_v0  ;;  %v2255_v14 = vmul.f32 0.2, %v1598_v61  ;;  %v1779_v2 = vadd.f32 %v1778_v54, %v1690_v6  ;;  %1826 = vmatmul.bf16.gmra.mxu2 %v15149_v5  ;;  %2004 = vmatmul.bf16.gmra.mxu0 %v15149_v5  ;;  %v10831_v20 = vor.u32 %v11598_v9, %v10830_v43 }
 0x273   : > { %1915 = vmatmul.bf16.gmra.mxu3 %v15150_v26  ;;  %2093 = vmatmul.bf16.gmra.mxu1 %v15150_v26 }
 0x274   : > { %v2383_v4 = vmax.f32 %v1598_v61, %v2255_v14  ;;  %4284 = vmatpush.bf16.msrb.mxu1 %v10831_v20  ;;  %v2260_v52 = vmul.f32 0.2, %v1779_v2  ;;  %v13092_v61 = vperm.slane %v12066_v40, 3  ;;  %v15153_v20 = vld [vmem:[#allocation33_spill] sm:$0xff] }
 0x275   : > { %v1511_v58 = vpop.f32.mrf.mxu2 }
 0x276   : > { %v13088_v48 = vpack.c.bf16 %v2383_v4, %v2379_v10  ;;  %v1512_v33 = vadd.f32 %v1511_v58, %v12822_v11  ;;  %v1600_v30 = vpop.f32.mrf.mxu3  ;;  %v2388_v14 = vmax.f32 %v1779_v2, %v2260_v52  ;;  %v15154_v2 = vld [vmem:[#allocation34_spill] sm:$0xff] }
 0x277   : > { %v1691_v53 = vpop.f32.mrf.mxu0 }
 0x278   : > { %15151 = vst [vmem:[#allocation28_spill] sm:$0xff] %v13088_v48  ;;  %v1601_v6 = vadd.f32 %v1600_v30, %v1512_v33  ;;  %v1692_v54 = vadd.f32 %v1691_v53, %v12809_v8  ;;  %v1780_v32 = vpop.f32.mrf.mxu1 }
 0x27a   : > { %v1781_v5 = vadd.f32 %v1780_v32, %v1692_v54  ;;  %v2259_v0 = vmul.f32 0.2, %v1601_v6  ;;  %v13100_v54 = vperm.slane %v12066_v40, 2 }
 0x27c   : > { %v2264_v15 = vmul.f32 0.2, %v1781_v5 }
 0x27d   : > { %v1513_v27 = vpop.f32.mrf.mxu2 }
 0x27e   : > { %v2392_v26 = vmax.f32 %v1781_v5, %v2264_v15  ;;  %v1514_v10 = vadd.f32 %v1513_v27, %v12822_v11  ;;  %v1602_v4 = vpop.f32.mrf.mxu3  ;;  %v2387_v11 = vmax.f32 %v1601_v6, %v2259_v0 }
 0x27f   : > { %v1970_v58 = vpop.f32.mrf.mxu0 }
 0x280   : > { %v13095_v43 = vpack.c.bf16 %v2392_v26, %v2388_v14  ;;  %v1603_v33 = vadd.f32 %v1602_v4, %v1514_v10  ;;  %v1971_v8 = vadd.f32 %v1970_v58, %v13092_v61  ;;  %v2059_v30 = vpop.f32.mrf.mxu1  ;;  %v10030_v14 = vld [vmem:[#allocation11 + $0x80] sm:$0xf] }
 0x281   : > { %v11398_v26 = vld [vmem:[#allocation11 + $0x9c] sm:$0xf0] }
 0x282   : > { %15152 = vst [vmem:[#allocation29_spill] sm:$0xff] %v13095_v43  ;;  %v2263_v9 = vmul.f32 0.2, %v1603_v33  ;;  %v2060_v53 = vadd.f32 %v2059_v30, %v1971_v8  ;;  %1831 = vmatmul.bf16.gmra.mxu2 %v15153_v20  ;;  %2009 = vmatmul.bf16.gmra.mxu0 %v15153_v20  ;;  %v10286_v10 = vld [vmem:[#allocation11 + $0x280] sm:$0xf]  ;;  %v10031_v58 = vor.u32 %v11398_v26, %v10030_v14 }
 0x283   : > { %1920 = vmatmul.bf16.gmra.mxu3 %v15154_v2  ;;  %2098 = vmatmul.bf16.gmra.mxu1 %v15154_v2  ;;  %v11462_v8 = vld [vmem:[#allocation11 + $0x29c] sm:$0xf0] }
 0x284   : > { %v2391_v32 = vmax.f32 %v1603_v33, %v2263_v9  ;;  %v10287_v43 = vor.u32 %v11462_v8, %v10286_v10  ;;  %4018 = vmatpush.bf16.msrb.mxu2 %v10031_v58  ;;  %v2142_v0 = vmul.f32 0.2, %v2060_v53  ;;  %v10542_v10 = vld [vmem:[#allocation11 + $0x480] sm:$0xf] }
 0x285   : > { %v1792_v52 = vpop.f32.mrf.mxu2 }
 0x286   : > { %v13104_v5 = vpack.c.bf16 %v2391_v32, %v2387_v11  ;;  %v1793_v15 = vadd.f32 %v1792_v52, %v13100_v54  ;;  %v1881_v27 = vpop.f32.mrf.mxu3  ;;  %4107 = vmatpush.bf16.msrb.mxu3 %v10287_v43  ;;  %v2270_v2 = vmax.f32 %v2060_v53, %v2142_v0 }
 0x287   : > { %v1972_v4 = vpop.f32.mrf.mxu0 }
 0x288   : > { %15155 = vst [vmem:[#allocation30_spill] sm:$0xff] %v13104_v5  ;;  %v1882_v40 = vadd.f32 %v1881_v27, %v1793_v15  ;;  %v1973_v30 = vadd.f32 %v1972_v4, %v13092_v61  ;;  %v2061_v20 = vpop.f32.mrf.mxu1  ;;  %v11526_v4 = vld [vmem:[#allocation11 + $0x49c] sm:$0xf0] }
 0x289   : > { %v10543_v58 = vor.u32 %v11526_v4, %v10542_v10 }
 0x28a   : > { %v2062_v6 = vadd.f32 %v2061_v20, %v1973_v30  ;;  %v2141_v48 = vmul.f32 0.2, %v1882_v40 }
 0x28b   : > { %4196 = vmatpush.bf16.msrb.mxu0 %v10543_v58 }
 0x28c   : > { %v2146_v33 = vmul.f32 0.2, %v2062_v6  ;;  %v2269_v53 = vmax.f32 %v1882_v40, %v2141_v48 }
 0x28d   : > { %v1794_v9 = vpop.f32.mrf.mxu2 }
 0x28e   : > { %v2274_v11 = vmax.f32 %v2062_v6, %v2146_v33  ;;  %v1795_v32 = vadd.f32 %v1794_v9, %v13100_v54  ;;  %v1883_v52 = vpop.f32.mrf.mxu3  ;;  %v10798_v33 = vld [vmem:[#allocation11 + $0x680] sm:$0xf] }
 0x28f   : > { %v1975_v5 = vpop.f32.mrf.mxu0  ;;  %v11590_v9 = vld [vmem:[#allocation11 + $0x69c] sm:$0xf0] }
 0x290   : > { %v13109_v14 = vpack.c.bf16 %v2274_v11, %v2270_v2  ;;  %v1884_v15 = vadd.f32 %v1883_v52, %v1795_v32  ;;  %v1976_v27 = vadd.f32 %v1975_v5, %v13092_v61  ;;  %v2064_v26 = vpop.f32.mrf.mxu1  ;;  %v10799_v11 = vor.u32 %v11590_v9, %v10798_v33 }
 0x292   : > { %15156 = vst [vmem:[#allocation31_spill] sm:$0xff] %v13109_v14  ;;  %v2145_v8 = vmul.f32 0.2, %v1884_v15  ;;  %v2065_v43 = vadd.f32 %v2064_v26, %v1976_v27  ;;  %1836 = vmatmul.bf16.gmra.mxu2 %v12837_v51  ;;  %2014 = vmatmul.bf16.gmra.mxu0 %v12837_v51 }
 0x293   : > { %1925 = vmatmul.bf16.gmra.mxu3 %v12842_v12  ;;  %2103 = vmatmul.bf16.gmra.mxu1 %v12842_v12 }
 0x294   : > { %v2273_v30 = vmax.f32 %v1884_v15, %v2145_v8  ;;  %4285 = vmatpush.bf16.msrb.mxu1 %v10799_v11  ;;  %v2150_v27 = vmul.f32 0.2, %v2065_v43 }
 0x295   : > { %v1797_v20 = vpop.f32.mrf.mxu2 }
 0x296   : > { %v13116_v0 = vpack.c.bf16 %v2273_v30, %v2269_v53  ;;  %v1798_v5 = vadd.f32 %v1797_v20, %v13100_v54  ;;  %v1886_v6 = vpop.f32.mrf.mxu3  ;;  %v2278_v15 = vmax.f32 %v2065_v43, %v2150_v27  ;;  %v9998_v27 = vld [vmem:[#allocation11 + $0x40] sm:$0xf] }
 0x297   : > { %v1977_v2 = vpop.f32.mrf.mxu0 }
 0x298   : > { %15157 = vst [vmem:[#allocation32_spill] sm:$0xff] %v13116_v0  ;;  %v1887_v32 = vadd.f32 %v1886_v6, %v1798_v5  ;;  %v1978_v51 = vadd.f32 %v1977_v2, %v13092_v61  ;;  %v2066_v52 = vpop.f32.mrf.mxu1 }
 0x29a   : > { %v2067_v12 = vadd.f32 %v2066_v52, %v1978_v51  ;;  %v2149_v8 = vmul.f32 0.2, %v1887_v32 }
 0x29c   : > { %v2154_v48 = vmul.f32 0.2, %v2067_v12  ;;  %v2277_v43 = vmax.f32 %v1887_v32, %v2149_v8 }
 0x29d   : > { %v1799_v40 = vpop.f32.mrf.mxu2 }
 0x29e   : > { %v2282_v26 = vmax.f32 %v2067_v12, %v2154_v48  ;;  %v1800_v10 = vadd.f32 %v1799_v40, %v13100_v54  ;;  %v1888_v4 = vpop.f32.mrf.mxu3  ;;  %v11390_v12 = vld [vmem:[#allocation11 + $0x5c] sm:$0xf0] }
 0x29f   : > { %v1980_v58 = vpop.f32.mrf.mxu0  ;;  %v10254_v48 = vld [vmem:[#allocation11 + $0x240] sm:$0xf] }
 0x2a0   : > { %v13121_v53 = vpack.c.bf16 %v2282_v26, %v2278_v15  ;;  %v1889_v30 = vadd.f32 %v1888_v4, %v1800_v10  ;;  %v1981_v20 = vadd.f32 %v1980_v58, %v13092_v61  ;;  %v2069_v5 = vpop.f32.mrf.mxu1  ;;  %v9999_v15 = vor.u32 %v11390_v12, %v9998_v27  ;;  %v11454_v26 = vld [vmem:[#allocation11 + $0x25c] sm:$0xf0] }
 0x2a1   : > { %v10255_v58 = vor.u32 %v11454_v26, %v10254_v48  ;;  %v10510_v48 = vld [vmem:[#allocation11 + $0x440] sm:$0xf] }
 0x2a2   : > { %15158 = vst [vmem:[#allocation33_spill] sm:$0xff] %v13121_v53  ;;  %v2153_v6 = vmul.f32 0.2, %v1889_v30  ;;  %v2070_v33 = vadd.f32 %v2069_v5, %v1981_v20  ;;  %1841 = vmatmul.bf16.gmra.mxu2 %v12861_v44  ;;  %2019 = vmatmul.bf16.gmra.mxu0 %v12861_v44 }
 0x2a3   : > { %1930 = vmatmul.bf16.gmra.mxu3 %v12866_v36  ;;  %2108 = vmatmul.bf16.gmra.mxu1 %v12866_v36 }
 0x2a4   : > { %v2281_v9 = vmax.f32 %v1889_v30, %v2153_v6  ;;  %4019 = vmatpush.bf16.msrb.mxu2 %v9999_v15  ;;  %v2158_v36 = vmul.f32 0.2, %v2070_v33  ;;  %4108 = vmatpush.bf16.msrb.mxu3 %v10255_v58 }
 0x2a5   : > { %v1802_v2 = vpop.f32.mrf.mxu2 }
 0x2a6   : > { %v13128_v11 = vpack.c.bf16 %v2281_v9, %v2277_v43  ;;  %v1803_v51 = vadd.f32 %v1802_v2, %v13100_v54  ;;  %v1891_v52 = vpop.f32.mrf.mxu3  ;;  %v2286_v20 = vmax.f32 %v2070_v33, %v2158_v36 }
 0x2a7   : > { %v1982_v40 = vpop.f32.mrf.mxu0 }
 0x2a8   : > { %v1892_v10 = vadd.f32 %v1891_v52, %v1803_v51  ;;  %v1983_v44 = vadd.f32 %v1982_v40, %v13092_v61  ;;  %v2071_v4 = vpop.f32.mrf.mxu1  ;;  %v11518_v40 = vld [vmem:[#allocation11 + $0x45c] sm:$0xf0] }
 0x2a9   : > { %v10511_v15 = vor.u32 %v11518_v40, %v10510_v48 }
 0x2aa   : > { %v2072_v32 = vadd.f32 %v2071_v4, %v1983_v44  ;;  %v2157_v2 = vmul.f32 0.2, %v1892_v10 }
 0x2ab   : > { %4197 = vmatpush.bf16.msrb.mxu0 %v10511_v15 }
 0x2ac   : > { %v2162_v8 = vmul.f32 0.2, %v2072_v32  ;;  %v2285_v33 = vmax.f32 %v1892_v10, %v2157_v2 }
 0x2ad   : > { %v1804_v30 = vpop.f32.mrf.mxu2 }
 0x2ae   : > { %v2290_v5 = vmax.f32 %v2072_v32, %v2162_v8  ;;  %v1805_v6 = vadd.f32 %v1804_v30, %v13100_v54  ;;  %v1893_v43 = vpop.f32.mrf.mxu3  ;;  %v10766_v30 = vld [vmem:[#allocation11 + $0x640] sm:$0xf] }
 0x2af   : > { %v1985_v9 = vpop.f32.mrf.mxu0 }
 0x2b0   : > { %v13133_v27 = vpack.c.bf16 %v2290_v5, %v2286_v20  ;;  %v1894_v51 = vadd.f32 %v1893_v43, %v1805_v6  ;;  %v1986_v52 = vadd.f32 %v1985_v9, %v13092_v61  ;;  %v2074_v12 = vpop.f32.mrf.mxu1  ;;  %v11582_v20 = vld [vmem:[#allocation11 + $0x65c] sm:$0xf0] }
 0x2b1   : > { %v10767_v6 = vor.u32 %v11582_v20, %v10766_v30 }
 0x2b2   : > { %15159 = vst [vmem:[#allocation34_spill] sm:$0xff] %v13133_v27  ;;  %v2161_v26 = vmul.f32 0.2, %v1894_v51  ;;  %v2075_v44 = vadd.f32 %v2074_v12, %v1986_v52  ;;  %1846 = vmatmul.bf16.gmra.mxu2 %v12885_v35  ;;  %2024 = vmatmul.bf16.gmra.mxu0 %v12885_v35 }
 0x2b3   : > { %1935 = vmatmul.bf16.gmra.mxu3 %v12890_v50  ;;  %2113 = vmatmul.bf16.gmra.mxu1 %v12890_v50 }
 0x2b4   : > { %v2289_v4 = vmax.f32 %v1894_v51, %v2161_v26  ;;  %4286 = vmatpush.bf16.msrb.mxu1 %v10767_v6  ;;  %v2166_v52 = vmul.f32 0.2, %v2075_v44 }
 0x2b5   : > { %v1807_v58 = vpop.f32.mrf.mxu2 }
 0x2b6   : > { %v13140_v36 = vpack.c.bf16 %v2289_v4, %v2285_v33  ;;  %v1808_v32 = vadd.f32 %v1807_v58, %v13100_v54  ;;  %v1896_v8 = vpop.f32.mrf.mxu3  ;;  %v2294_v51 = vmax.f32 %v2075_v44, %v2166_v52  ;;  %v9966_v52 = vld [vmem:[#allocation11] sm:$0xf] }
 0x2b7   : > { %v1987_v5 = vpop.f32.mrf.mxu0 }
 0x2b8   : > { %15160 = vst [vmem:[#allocation47_spill] sm:$0xff] %v13140_v36  ;;  %v1897_v43 = vadd.f32 %v1896_v8, %v1808_v32  ;;  %v1988_v35 = vadd.f32 %v1987_v5, %v13092_v61  ;;  %v2076_v9 = vpop.f32.mrf.mxu1 }
 0x2ba   : > { %v2077_v50 = vadd.f32 %v2076_v9, %v1988_v35  ;;  %v2165_v26 = vmul.f32 0.2, %v1897_v43 }
 0x2bc   : > { %v2170_v10 = vmul.f32 0.2, %v2077_v50  ;;  %v2293_v44 = vmax.f32 %v1897_v43, %v2165_v26 }
 0x2bd   : > { %v1809_v2 = vpop.f32.mrf.mxu2 }
 0x2be   : > { %v2298_v12 = vmax.f32 %v2077_v50, %v2170_v10  ;;  %v1810_v48 = vadd.f32 %v1809_v2, %v13100_v54  ;;  %v1898_v40 = vpop.f32.mrf.mxu3  ;;  %v11382_v50 = vld [vmem:[#allocation11 + $0x1c] sm:$0xf0] }
 0x2bf   : > { %v1990_v15 = vpop.f32.mrf.mxu0  ;;  %v10222_v10 = vld [vmem:[#allocation11 + $0x200] sm:$0xf] }
 0x2c0   : > { %v13145_v33 = vpack.c.bf16 %v2298_v12, %v2294_v51  ;;  %v1899_v4 = vadd.f32 %v1898_v40, %v1810_v48  ;;  %v1991_v58 = vadd.f32 %v1990_v15, %v13092_v61  ;;  %v2079_v32 = vpop.f32.mrf.mxu1  ;;  %v9967_v51 = vor.u32 %v11382_v50, %v9966_v52  ;;  %v11446_v12 = vld [vmem:[#allocation11 + $0x21c] sm:$0xf0] }
 0x2c1   : > { %v10223_v15 = vor.u32 %v11446_v12, %v10222_v10  ;;  %v10478_v10 = vld [vmem:[#allocation11 + $0x400] sm:$0xf] }
 0x2c2   : > { %15161 = vst [vmem:[#allocation48_spill] sm:$0xff] %v13145_v33  ;;  %v2169_v8 = vmul.f32 0.2, %v1899_v4  ;;  %v2080_v30 = vadd.f32 %v2079_v32, %v1991_v58  ;;  %1851 = vmatmul.bf16.gmra.mxu2 %v12909_v55  ;;  %2029 = vmatmul.bf16.gmra.mxu0 %v12909_v55 }
 0x2c3   : > { %1940 = vmatmul.bf16.gmra.mxu3 %v12914_v17  ;;  %2118 = vmatmul.bf16.gmra.mxu1 %v12914_v17 }
 0x2c4   : > { %v2297_v20 = vmax.f32 %v1899_v4, %v2169_v8  ;;  %4020 = vmatpush.bf16.msrb.mxu2 %v9967_v51  ;;  %v2174_v17 = vmul.f32 0.2, %v2080_v30  ;;  %4109 = vmatpush.bf16.msrb.mxu3 %v10223_v15 }
 0x2c5   : > { %v1812_v5 = vpop.f32.mrf.mxu2 }
 0x2c6   : > { %v13152_v6 = vpack.c.bf16 %v2297_v20, %v2293_v44  ;;  %v1813_v35 = vadd.f32 %v1812_v5, %v13100_v54  ;;  %v1901_v9 = vpop.f32.mrf.mxu3  ;;  %v2302_v58 = vmax.f32 %v2080_v30, %v2174_v17 }
 0x2c7   : > { %v1992_v2 = vpop.f32.mrf.mxu0 }
 0x2c8   : > { %v1902_v48 = vadd.f32 %v1901_v9, %v1813_v35  ;;  %v1993_v55 = vadd.f32 %v1992_v2, %v13092_v61  ;;  %v2081_v40 = vpop.f32.mrf.mxu1  ;;  %v11510_v2 = vld [vmem:[#allocation11 + $0x41c] sm:$0xf0] }
 0x2c9   : > { %v10479_v51 = vor.u32 %v11510_v2, %v10478_v10 }
 0x2ca   : > { %v2082_v43 = vadd.f32 %v2081_v40, %v1993_v55  ;;  %v2173_v5 = vmul.f32 0.2, %v1902_v48 }
 0x2cb   : > { %4198 = vmatpush.bf16.msrb.mxu0 %v10479_v51 }
 0x2cc   : > { %v2178_v26 = vmul.f32 0.2, %v2082_v43  ;;  %v2301_v30 = vmax.f32 %v1902_v48, %v2173_v5 }
 0x2cd   : > { %v1814_v4 = vpop.f32.mrf.mxu2 }
 0x2ce   : > { %v2306_v32 = vmax.f32 %v2082_v43, %v2178_v26  ;;  %v1815_v8 = vadd.f32 %v1814_v4, %v13100_v54  ;;  %v1903_v44 = vpop.f32.mrf.mxu3  ;;  %v10734_v4 = vld [vmem:[#allocation11 + $0x600] sm:$0xf] }
 0x2cf   : > { %v1995_v20 = vpop.f32.mrf.mxu0 }
 0x2d0   : > { %v13157_v52 = vpack.c.bf16 %v2306_v32, %v2302_v58  ;;  %v1904_v35 = vadd.f32 %v1903_v44, %v1815_v8  ;;  %v1996_v9 = vadd.f32 %v1995_v20, %v13092_v61  ;;  %v2084_v50 = vpop.f32.mrf.mxu1  ;;  %v11574_v58 = vld [vmem:[#allocation11 + $0x61c] sm:$0xf0] }
 0x2d1   : > { %v10735_v8 = vor.u32 %v11574_v58, %v10734_v4 }
 0x2d2   : > { %15162 = vst [vmem:[#allocation49_spill] sm:$0xff] %v13157_v52  ;;  %v2177_v12 = vmul.f32 0.2, %v1904_v35  ;;  %v2085_v55 = vadd.f32 %v2084_v50, %v1996_v9  ;;  %1856 = vmatmul.bf16.gmra.mxu2 %v12933_v23  ;;  %2034 = vmatmul.bf16.gmra.mxu0 %v12933_v23 }
 0x2d3   : > { %1945 = vmatmul.bf16.gmra.mxu3 %v12938_v29  ;;  %2123 = vmatmul.bf16.gmra.mxu1 %v12938_v29 }
 0x2d4   : > { %v2305_v40 = vmax.f32 %v1904_v35, %v2177_v12  ;;  %4287 = vmatpush.bf16.msrb.mxu1 %v10735_v8  ;;  %v2182_v9 = vmul.f32 0.2, %v2085_v55 }
 0x2d5   : > { %v1817_v15 = vpop.f32.mrf.mxu2 }
 0x2d6   : > { %v13164_v17 = vpack.c.bf16 %v2305_v40, %v2301_v30  ;;  %v1818_v43 = vadd.f32 %v1817_v15, %v13100_v54  ;;  %v1906_v26 = vpop.f32.mrf.mxu3  ;;  %v2310_v35 = vmax.f32 %v2085_v55, %v2182_v9  ;;  %v11434_v9 = vld [vmem:[#allocation11 + $0x1c4] sm:$0xf] }
 0x2d7   : > { %v1997_v32 = vpop.f32.mrf.mxu0 }
 0x2d8   : > { %15163 = vst [vmem:[#allocation50_spill] sm:$0xff] %v13164_v17  ;;  %v1907_v44 = vadd.f32 %v1906_v26, %v1818_v43  ;;  %v1998_v23 = vadd.f32 %v1997_v32, %v13092_v61  ;;  %v2086_v20 = vpop.f32.mrf.mxu1 }
 0x2da   : > { %v2087_v29 = vadd.f32 %v2086_v20, %v1998_v23  ;;  %v2181_v12 = vmul.f32 0.2, %v1907_v44 }
 0x2dc   : > { %v2186_v48 = vmul.f32 0.2, %v2087_v29  ;;  %v2309_v55 = vmax.f32 %v1907_v44, %v2181_v12 }
 0x2dd   : > { %v1819_v5 = vpop.f32.mrf.mxu2 }
 0x2de   : > { %v2314_v50 = vmax.f32 %v2087_v29, %v2186_v48  ;;  %v1820_v10 = vadd.f32 %v1819_v5, %v13100_v54  ;;  %v1908_v2 = vpop.f32.mrf.mxu3  ;;  %v10192_v29 = vld [vmem:[#allocation11 + $0x1e0] sm:$0xf0] }
 0x2df   : > { %v2000_v51 = vpop.f32.mrf.mxu0  ;;  %v11498_v48 = vld [vmem:[#allocation11 + $0x3c4] sm:$0xf] }
 0x2e0   : > { %v13169_v30 = vpack.c.bf16 %v2314_v50, %v2310_v35  ;;  %v1909_v40 = vadd.f32 %v1908_v2, %v1820_v10  ;;  %v2001_v15 = vadd.f32 %v2000_v51, %v13092_v61  ;;  %v2089_v43 = vpop.f32.mrf.mxu1  ;;  %v10195_v35 = vor.u32 %v11434_v9, %v10192_v29  ;;  %v10448_v50 = vld [vmem:[#allocation11 + $0x3e0] sm:$0xf0] }
 0x2e1   : > { %v10451_v51 = vor.u32 %v11498_v48, %v10448_v50  ;;  %v11562_v48 = vld [vmem:[#allocation11 + $0x5c4] sm:$0xf] }
 0x2e2   : > { %15164 = vst [vmem:[#allocation51_spill] sm:$0xff] %v13169_v30  ;;  %v2185_v26 = vmul.f32 0.2, %v1909_v40  ;;  %v2090_v4 = vadd.f32 %v2089_v43, %v2001_v15  ;;  %1861 = vmatmul.bf16.gmra.mxu2 %v12957_v57  ;;  %2039 = vmatmul.bf16.gmra.mxu0 %v12957_v57 }
 0x2e3   : > { %1950 = vmatmul.bf16.gmra.mxu3 %v12962_v39  ;;  %2128 = vmatmul.bf16.gmra.mxu1 %v12962_v39 }
 0x2e4   : > { %v2313_v58 = vmax.f32 %v1909_v40, %v2185_v26  ;;  %4369 = vmatpush.bf16.msra.mxu2 %v10195_v35  ;;  %v2190_v39 = vmul.f32 0.2, %v2090_v4  ;;  %4458 = vmatpush.bf16.msra.mxu3 %v10451_v51 }
 0x2e5   : > { %v1822_v32 = vpop.f32.mrf.mxu2 }
 0x2e6   : > { %v13176_v8 = vpack.c.bf16 %v2313_v58, %v2309_v55  ;;  %v1823_v23 = vadd.f32 %v1822_v32, %v13100_v54  ;;  %v1911_v20 = vpop.f32.mrf.mxu3  ;;  %v2318_v15 = vmax.f32 %v2090_v4, %v2190_v39 }
 0x2e7   : > { %v2002_v5 = vpop.f32.mrf.mxu0 }
 0x2e8   : > { %v1912_v10 = vadd.f32 %v1911_v20, %v1823_v23  ;;  %v2003_v57 = vadd.f32 %v2002_v5, %v13092_v61  ;;  %v2091_v2 = vpop.f32.mrf.mxu1  ;;  %v10704_v5 = vld [vmem:[#allocation11 + $0x5e0] sm:$0xf0] }
 0x2e9   : > { %v10707_v35 = vor.u32 %v11562_v48, %v10704_v5 }
 0x2ea   : > { %v2092_v44 = vadd.f32 %v2091_v2, %v2003_v57  ;;  %v2189_v32 = vmul.f32 0.2, %v1912_v10 }
 0x2eb   : > { %4547 = vmatpush.bf16.msra.mxu0 %v10707_v35 }
 0x2ec   : > { %v2194_v12 = vmul.f32 0.2, %v2092_v44  ;;  %v2317_v4 = vmax.f32 %v1912_v10, %v2189_v32 }
 0x2ed   : > { %v1824_v40 = vpop.f32.mrf.mxu2 }
 0x2ee   : > { %v2322_v43 = vmax.f32 %v2092_v44, %v2194_v12  ;;  %v1825_v26 = vadd.f32 %v1824_v40, %v13100_v54  ;;  %v1913_v55 = vpop.f32.mrf.mxu3  ;;  %v11626_v40 = vld [vmem:[#allocation11 + $0x7c4] sm:$0xf] }
 0x2ef   : > { %v2005_v58 = vpop.f32.mrf.mxu0 }
 0x2f0   : > { %v13181_v9 = vpack.c.bf16 %v2322_v43, %v2318_v15  ;;  %v1914_v23 = vadd.f32 %v1913_v55, %v1825_v26  ;;  %v2006_v20 = vadd.f32 %v2005_v58, %v13092_v61  ;;  %v2094_v29 = vpop.f32.mrf.mxu1  ;;  %v10960_v15 = vld [vmem:[#allocation11 + $0x7e0] sm:$0xf0] }
 0x2f1   : > { %v10963_v26 = vor.u32 %v11626_v40, %v10960_v15 }
 0x2f2   : > { %15165 = vst [vmem:[#allocation52_spill] sm:$0xff] %v13181_v9  ;;  %v2193_v50 = vmul.f32 0.2, %v1914_v23  ;;  %v2095_v57 = vadd.f32 %v2094_v29, %v2006_v20  ;;  %1866 = vmatmul.bf16.gmra.mxu2 %v12981_v19  ;;  %2044 = vmatmul.bf16.gmra.mxu0 %v12981_v19 }
 0x2f3   : > { %1955 = vmatmul.bf16.gmra.mxu3 %v12986_v7  ;;  %2133 = vmatmul.bf16.gmra.mxu1 %v12986_v7 }
 0x2f4   : > { %v2321_v2 = vmax.f32 %v1914_v23, %v2193_v50  ;;  %4636 = vmatpush.bf16.msra.mxu1 %v10963_v26  ;;  %v2198_v20 = vmul.f32 0.2, %v2095_v57 }
 0x2f5   : > { %v1827_v51 = vpop.f32.mrf.mxu2 }
 0x2f6   : > { %v13188_v39 = vpack.c.bf16 %v2321_v2, %v2317_v4  ;;  %v1828_v44 = vadd.f32 %v1827_v51, %v13100_v54  ;;  %v1916_v12 = vpop.f32.mrf.mxu3  ;;  %v2326_v23 = vmax.f32 %v2095_v57, %v2198_v20  ;;  %v11426_v20 = vld [vmem:[#allocation11 + $0x184] sm:$0xf] }
 0x2f7   : > { %v2007_v43 = vpop.f32.mrf.mxu0 }
 0x2f8   : > { %15166 = vst [vmem:[#allocation53_spill] sm:$0xff] %v13188_v39  ;;  %v1917_v55 = vadd.f32 %v1916_v12, %v1828_v44  ;;  %v2008_v19 = vadd.f32 %v2007_v43, %v13092_v61  ;;  %v2096_v58 = vpop.f32.mrf.mxu1 }
 0x2fa   : > { %v2097_v7 = vadd.f32 %v2096_v58, %v2008_v19  ;;  %v2197_v50 = vmul.f32 0.2, %v1917_v55 }
 0x2fc   : > { %v2202_v10 = vmul.f32 0.2, %v2097_v7  ;;  %v2325_v57 = vmax.f32 %v1917_v55, %v2197_v50 }
 0x2fd   : > { %v1829_v32 = vpop.f32.mrf.mxu2 }
 0x2fe   : > { %v2330_v29 = vmax.f32 %v2097_v7, %v2202_v10  ;;  %v1830_v48 = vadd.f32 %v1829_v32, %v13100_v54  ;;  %v1918_v5 = vpop.f32.mrf.mxu3  ;;  %v10160_v7 = vld [vmem:[#allocation11 + $0x1a0] sm:$0xf0] }
 0x2ff   : > { %v2010_v35 = vpop.f32.mrf.mxu0  ;;  %v11490_v10 = vld [vmem:[#allocation11 + $0x384] sm:$0xf] }
 0x300   : > { %v13193_v4 = vpack.c.bf16 %v2330_v29, %v2326_v23  ;;  %v1919_v2 = vadd.f32 %v1918_v5, %v1830_v48  ;;  %v2011_v51 = vadd.f32 %v2010_v35, %v13092_v61  ;;  %v2099_v44 = vpop.f32.mrf.mxu1  ;;  %v10163_v23 = vor.u32 %v11426_v20, %v10160_v7  ;;  %v10416_v29 = vld [vmem:[#allocation11 + $0x3a0] sm:$0xf0] }
 0x302   : > { %v2201_v12 = vmul.f32 0.2, %v1919_v2  ;;  %v2100_v40 = vadd.f32 %v2099_v44, %v2011_v51  ;;  %4021 = vmatmul.bf16.vlgmr.msrb.gmra.mxu2 %v12856_v42  ;;  %4199 = vmatmul.bf16.vlgmr.msrb.gmra.mxu0 %v13116_v0  ;;  %v10419_v51 = vor.u32 %v11490_v10, %v10416_v29  ;;  %v11554_v10 = vld [vmem:[#allocation11 + $0x584] sm:$0xf] }
 0x303   : > { %4110 = vmatmul.bf16.vlgmr.msrb.gmra.mxu3 %v12839_v16  ;;  %4288 = vmatmul.bf16.vlgmr.msrb.gmra.mxu1 %v13109_v14 }
 0x304   : > { %v2329_v15 = vmax.f32 %v1919_v2, %v2201_v12  ;;  %4370 = vmatpush.bf16.msra.mxu2 %v10163_v23  ;;  %v2206_v55 = vmul.f32 0.2, %v2100_v40  ;;  %4459 = vmatpush.bf16.msra.mxu3 %v10419_v51 }
 0x305   : > { %v1832_v43 = vpop.f32.mrf.mxu2 }
 0x306   : > { %v13200_v26 = vpack.c.bf16 %v2329_v15, %v2325_v57  ;;  %v1833_v19 = vadd.f32 %v1832_v43, %v13100_v54  ;;  %v1921_v58 = vpop.f32.mrf.mxu3  ;;  %v2334_v12 = vmax.f32 %v2100_v40, %v2206_v55 }
 0x307   : > { %v2012_v32 = vpop.f32.mrf.mxu0 }
 0x308   : > { %v1922_v48 = vadd.f32 %v1921_v58, %v1833_v19  ;;  %v2013_v5 = vadd.f32 %v2012_v32, %v13092_v61  ;;  %v2101_v35 = vpop.f32.mrf.mxu1  ;;  %v10672_v32 = vld [vmem:[#allocation11 + $0x5a0] sm:$0xf0] }
 0x309   : > { %v10675_v23 = vor.u32 %v11554_v10, %v10672_v32 }
 0x30a   : > { %v2102_v50 = vadd.f32 %v2101_v35, %v2013_v5  ;;  %v2205_v16 = vmul.f32 0.2, %v1922_v48 }
 0x30b   : > { %4548 = vmatpush.bf16.msra.mxu0 %v10675_v23 }
 0x30c   : > { %v2210_v2 = vmul.f32 0.2, %v2102_v50  ;;  %v2333_v40 = vmax.f32 %v1922_v48, %v2205_v16 }
 0x30d   : > { %v1834_v44 = vpop.f32.mrf.mxu2 }
 0x30e   : > { %v2338_v57 = vmax.f32 %v2102_v50, %v2210_v2  ;;  %v1835_v15 = vadd.f32 %v1834_v44, %v13100_v54  ;;  %v1923_v43 = vpop.f32.mrf.mxu3  ;;  %v11618_v2 = vld [vmem:[#allocation11 + $0x784] sm:$0xf] }
 0x30f   : > { %v2015_v14 = vpop.f32.mrf.mxu0  ;;  %v10928_v44 = vld [vmem:[#allocation11 + $0x7a0] sm:$0xf0] }
 0x310   : > { %v13205_v20 = vpack.c.bf16 %v2338_v57, %v2334_v12  ;;  %v1924_v19 = vadd.f32 %v1923_v43, %v1835_v15  ;;  %v2016_v58 = vadd.f32 %v2015_v14, %v13092_v61  ;;  %v2104_v7 = vpop.f32.mrf.mxu1  ;;  %v10931_v57 = vor.u32 %v11618_v2, %v10928_v44 }
 0x312   : > { %15167 = vst [vmem:[#allocation54_spill] sm:$0xff] %v13205_v20  ;;  %v2209_v29 = vmul.f32 0.2, %v1924_v19  ;;  %v2105_v5 = vadd.f32 %v2104_v7, %v2016_v58  ;;  %4026 = vmatmul.bf16.gmra.mxu2 %v12880_v63  ;;  %4204 = vmatmul.bf16.gmra.mxu0 %v13128_v11 }
 0x313   : > { %4115 = vmatmul.bf16.gmra.mxu3 %v12863_v41  ;;  %4293 = vmatmul.bf16.gmra.mxu1 %v13121_v53 }
 0x314   : > { %v2337_v35 = vmax.f32 %v1924_v19, %v2209_v29  ;;  %4637 = vmatpush.bf16.msra.mxu1 %v10931_v57  ;;  %v2214_v7 = vmul.f32 0.2, %v2105_v5 }
 0x315   : > { %v1837_v51 = vpop.f32.mrf.mxu2 }
 0x316   : > { %v13212_v55 = vpack.c.bf16 %v2337_v35, %v2333_v40  ;;  %v1838_v14 = vadd.f32 %v1837_v51, %v13100_v54  ;;  %v1926_v50 = vpop.f32.mrf.mxu3  ;;  %v2342_v19 = vmax.f32 %v2105_v5, %v2214_v7 }
 0x317   : > { %v2017_v12 = vpop.f32.mrf.mxu0 }
 0x318   : > { %15168 = vst [vmem:[#allocation55_spill] sm:$0xff] %v13212_v55  ;;  %v1927_v15 = vadd.f32 %v1926_v50, %v1838_v14  ;;  %v2018_v43 = vadd.f32 %v2017_v12, %v13092_v61  ;;  %v2106_v58 = vpop.f32.mrf.mxu1 }
 0x31a   : > { %v2107_v10 = vadd.f32 %v2106_v58, %v2018_v43  ;;  %v2213_v35 = vmul.f32 0.2, %v1927_v15 }
 0x31c   : > { %v2218_v16 = vmul.f32 0.2, %v2107_v10  ;;  %v2341_v5 = vmax.f32 %v1927_v15, %v2213_v35 }
 0x31d   : > { %v1839_v48 = vpop.f32.mrf.mxu2 }
 0x31e   : > { %v2346_v32 = vmax.f32 %v2107_v10, %v2218_v16  ;;  %v1840_v23 = vadd.f32 %v1839_v48, %v13100_v54  ;;  %v1928_v29 = vpop.f32.mrf.mxu3  ;;  %v11418_v10 = vld [vmem:[#allocation11 + $0x144] sm:$0xf] }
 0x31f   : > { %v2020_v40 = vpop.f32.mrf.mxu0  ;;  %v10128_v16 = vld [vmem:[#allocation11 + $0x160] sm:$0xf0] }
 0x320   : > { %v13217_v51 = vpack.c.bf16 %v2346_v32, %v2342_v19  ;;  %v1929_v53 = vadd.f32 %v1928_v29, %v1840_v23  ;;  %v2021_v14 = vadd.f32 %v2020_v40, %v13092_v61  ;;  %v2109_v50 = vpop.f32.mrf.mxu1  ;;  %v11482_v48 = vld [vmem:[#allocation11 + $0x344] sm:$0xf]  ;;  %v10131_v32 = vor.u32 %v11418_v10, %v10128_v16 }
 0x321   : > { %v10384_v23 = vld [vmem:[#allocation11 + $0x360] sm:$0xf0] }
 0x322   : > { %15169 = vst [vmem:[#allocation56_spill] sm:$0xff] %v13217_v51  ;;  %v2217_v2 = vmul.f32 0.2, %v1929_v53  ;;  %v2110_v44 = vadd.f32 %v2109_v50, %v2021_v14  ;;  %4031 = vmatmul.bf16.gmra.mxu2 %v12904_v3  ;;  %4209 = vmatmul.bf16.gmra.mxu0 %v13140_v36  ;;  %v10387_v50 = vor.u32 %v11482_v48, %v10384_v23  ;;  %v11546_v48 = vld [vmem:[#allocation11 + $0x544] sm:$0xf] }
 0x323   : > { %4120 = vmatmul.bf16.gmra.mxu3 %v12887_v21  ;;  %4298 = vmatmul.bf16.gmra.mxu1 %v13133_v27 }
 0x324   : > { %v2345_v12 = vmax.f32 %v1929_v53, %v2217_v2  ;;  %4371 = vmatpush.bf16.msra.mxu2 %v10131_v32  ;;  %v2222_v15 = vmul.f32 0.2, %v2110_v44  ;;  %4460 = vmatpush.bf16.msra.mxu3 %v10387_v50 }
 0x325   : > { %v1842_v57 = vpop.f32.mrf.mxu2 }
 0x326   : > { %v13224_v43 = vpack.c.bf16 %v2345_v12, %v2341_v5  ;;  %v1843_v58 = vadd.f32 %v1842_v57, %v13100_v54  ;;  %v1931_v7 = vpop.f32.mrf.mxu3  ;;  %v2350_v5 = vmax.f32 %v2110_v44, %v2222_v15 }
 0x327   : > { %v2022_v19 = vpop.f32.mrf.mxu0 }
 0x328   : > { %v1932_v29 = vadd.f32 %v1931_v7, %v1843_v58  ;;  %v2023_v40 = vadd.f32 %v2022_v19, %v13092_v61  ;;  %v2111_v14 = vpop.f32.mrf.mxu1  ;;  %v10640_v19 = vld [vmem:[#allocation11 + $0x560] sm:$0xf0] }
 0x329   : > { %v10643_v32 = vor.u32 %v11546_v48, %v10640_v19 }
 0x32a   : > { %v2112_v53 = vadd.f32 %v2111_v14, %v2023_v40  ;;  %v2221_v36 = vmul.f32 0.2, %v1932_v29 }
 0x32b   : > { %4549 = vmatpush.bf16.msra.mxu0 %v10643_v32 }
 0x32c   : > { %v2226_v35 = vmul.f32 0.2, %v2112_v53  ;;  %v2349_v44 = vmax.f32 %v1932_v29, %v2221_v36 }
 0x32d   : > { %v1844_v2 = vpop.f32.mrf.mxu2 }
 0x32e   : > { %v2354_v12 = vmax.f32 %v2112_v53, %v2226_v35  ;;  %v1845_v57 = vadd.f32 %v1844_v2, %v13100_v54  ;;  %v1933_v27 = vpop.f32.mrf.mxu3  ;;  %v11610_v53 = vld [vmem:[#allocation11 + $0x744] sm:$0xf] }
 0x32f   : > { %v2025_v21 = vpop.f32.mrf.mxu0  ;;  %v10896_v35 = vld [vmem:[#allocation11 + $0x760] sm:$0xf0] }
 0x330   : > { %v13229_v10 = vpack.c.bf16 %v2354_v12, %v2350_v5  ;;  %v1934_v58 = vadd.f32 %v1933_v27, %v1845_v57  ;;  %v2026_v7 = vadd.f32 %v2025_v21, %v13092_v61  ;;  %v2114_v16 = vpop.f32.mrf.mxu1  ;;  %v10899_v5 = vor.u32 %v11610_v53, %v10896_v35 }
 0x332   : > { %15170 = vst [vmem:[#allocation57_spill] sm:$0xff] %v13229_v10  ;;  %v2225_v23 = vmul.f32 0.2, %v1934_v58  ;;  %v2115_v40 = vadd.f32 %v2114_v16, %v2026_v7  ;;  %4036 = vmatmul.bf16.gmra.mxu2 %v12928_v22  ;;  %4214 = vmatmul.bf16.gmra.mxu0 %v13152_v6 }
 0x333   : > { %4125 = vmatmul.bf16.gmra.mxu3 %v12911_v18  ;;  %4303 = vmatmul.bf16.gmra.mxu1 %v13145_v33 }
 0x334   : > { %v2353_v14 = vmax.f32 %v1934_v58, %v2225_v23  ;;  %4638 = vmatpush.bf16.msra.mxu1 %v10899_v5  ;;  %v2230_v16 = vmul.f32 0.2, %v2115_v40 }
 0x335   : > { %v1847_v27 = vpop.f32.mrf.mxu2 }
 0x336   : > { %v13236_v50 = vpack.c.bf16 %v2353_v14, %v2349_v44  ;;  %v1848_v21 = vadd.f32 %v1847_v27, %v13100_v54  ;;  %v1936_v15 = vpop.f32.mrf.mxu3  ;;  %v2358_v58 = vmax.f32 %v2115_v40, %v2230_v16 }
 0x337   : > { %v2027_v2 = vpop.f32.mrf.mxu0 }
 0x338   : > { %15171 = vst [vmem:[#allocation58_spill] sm:$0xff] %v13236_v50  ;;  %v1937_v12 = vadd.f32 %v1936_v15, %v1848_v21  ;;  %v2028_v57 = vadd.f32 %v2027_v2, %v13092_v61  ;;  %v2116_v7 = vpop.f32.mrf.mxu1 }
 0x33a   : > { %v2117_v48 = vadd.f32 %v2116_v7, %v2028_v57  ;;  %v2229_v14 = vmul.f32 0.2, %v1937_v12 }
 0x33c   : > { %v2234_v36 = vmul.f32 0.2, %v2117_v48  ;;  %v2357_v40 = vmax.f32 %v1937_v12, %v2229_v14 }
 0x33d   : > { %v1849_v29 = vpop.f32.mrf.mxu2 }
 0x33e   : > { %v2362_v19 = vmax.f32 %v2117_v48, %v2234_v36  ;;  %v1850_v32 = vadd.f32 %v1849_v29, %v13100_v54  ;;  %v1938_v23 = vpop.f32.mrf.mxu3  ;;  %v11410_v48 = vld [vmem:[#allocation11 + $0x104] sm:$0xf] }
 0x33f   : > { %v2030_v44 = vpop.f32.mrf.mxu0  ;;  %v10096_v36 = vld [vmem:[#allocation11 + $0x120] sm:$0xf0] }
 0x340   : > { %v13241_v27 = vpack.c.bf16 %v2362_v19, %v2358_v58  ;;  %v1939_v33 = vadd.f32 %v1938_v23, %v1850_v32  ;;  %v2031_v21 = vadd.f32 %v2030_v44, %v13092_v61  ;;  %v2119_v15 = vpop.f32.mrf.mxu1  ;;  %v11474_v29 = vld [vmem:[#allocation11 + $0x304] sm:$0xf]  ;;  %v10099_v19 = vor.u32 %v11410_v48, %v10096_v36 }
 0x341   : > { %v10352_v32 = vld [vmem:[#allocation11 + $0x320] sm:$0xf0] }
 0x342   : > { %v2233_v53 = vmul.f32 0.2, %v1939_v33  ;;  %v2120_v35 = vadd.f32 %v2119_v15, %v2031_v21  ;;  %4041 = vmatmul.bf16.gmra.mxu2 %v12952_v60  ;;  %4219 = vmatmul.bf16.gmra.mxu0 %v13164_v17  ;;  %v10355_v15 = vor.u32 %v11474_v29, %v10352_v32  ;;  %v11538_v29 = vld [vmem:[#allocation11 + $0x504] sm:$0xf] }
 0x343   : > { %4130 = vmatmul.bf16.gmra.mxu3 %v12935_v45  ;;  %4308 = vmatmul.bf16.gmra.mxu1 %v13157_v52 }
 0x344   : > { %v2361_v2 = vmax.f32 %v1939_v33, %v2233_v53  ;;  %4372 = vmatpush.bf16.msra.mxu2 %v10099_v19  ;;  %v2238_v12 = vmul.f32 0.2, %v2120_v35  ;;  %4461 = vmatpush.bf16.msra.mxu3 %v10355_v15 }
 0x345   : > { %v1852_v5 = vpop.f32.mrf.mxu2 }
 0x346   : > { %v13248_v57 = vpack.c.bf16 %v2361_v2, %v2357_v40  ;;  %v1853_v7 = vadd.f32 %v1852_v5, %v13100_v54  ;;  %v1941_v16 = vpop.f32.mrf.mxu3  ;;  %v2366_v40 = vmax.f32 %v2120_v35, %v2238_v12 }
 0x347   : > { %v2032_v58 = vpop.f32.mrf.mxu0 }
 0x348   : > { %v1942_v23 = vadd.f32 %v1941_v16, %v1853_v7  ;;  %v2033_v44 = vadd.f32 %v2032_v58, %v13092_v61  ;;  %v2121_v21 = vpop.f32.mrf.mxu1  ;;  %v10608_v58 = vld [vmem:[#allocation11 + $0x520] sm:$0xf0] }
 0x349   : > { %v10611_v19 = vor.u32 %v11538_v29, %v10608_v58 }
 0x34a   : > { %v2122_v33 = vadd.f32 %v2121_v21, %v2033_v44  ;;  %v2237_v17 = vmul.f32 0.2, %v1942_v23 }
 0x34b   : > { %4550 = vmatpush.bf16.msra.mxu0 %v10611_v19 }
 0x34c   : > { %v2242_v14 = vmul.f32 0.2, %v2122_v33  ;;  %v2365_v35 = vmax.f32 %v1942_v23, %v2237_v17 }
 0x34d   : > { %v1854_v53 = vpop.f32.mrf.mxu2 }
 0x34e   : > { %v2370_v2 = vmax.f32 %v2122_v33, %v2242_v14  ;;  %v1855_v5 = vadd.f32 %v1854_v53, %v13100_v54  ;;  %v1943_v52 = vpop.f32.mrf.mxu3  ;;  %v11602_v33 = vld [vmem:[#allocation11 + $0x704] sm:$0xf] }
 0x34f   : > { %v2035_v45 = vpop.f32.mrf.mxu0  ;;  %v10864_v14 = vld [vmem:[#allocation11 + $0x720] sm:$0xf0] }
 0x350   : > { %v13253_v48 = vpack.c.bf16 %v2370_v2, %v2366_v40  ;;  %v1944_v7 = vadd.f32 %v1943_v52, %v1855_v5  ;;  %v2036_v16 = vadd.f32 %v2035_v45, %v13092_v61  ;;  %v2124_v36 = vpop.f32.mrf.mxu1  ;;  %v10867_v40 = vor.u32 %v11602_v33, %v10864_v14 }
 0x352   : > { %15172 = vst [vmem:[#allocation59_spill] sm:$0xff] %v13253_v48  ;;  %v2241_v32 = vmul.f32 0.2, %v1944_v7  ;;  %v2125_v44 = vadd.f32 %v2124_v36, %v2036_v16  ;;  %4046 = vmatmul.bf16.gmra.mxu2 %v12976_v34  ;;  %4224 = vmatmul.bf16.gmra.mxu0 %v13176_v8 }
 0x353   : > { %4135 = vmatmul.bf16.gmra.mxu3 %v12959_v1  ;;  %4313 = vmatmul.bf16.gmra.mxu1 %v13169_v30 }
 0x354   : > { %v2369_v21 = vmax.f32 %v1944_v7, %v2241_v32  ;;  %4639 = vmatpush.bf16.msra.mxu1 %v10867_v40  ;;  %v2246_v36 = vmul.f32 0.2, %v2125_v44 }
 0x355   : > { %v1857_v52 = vpop.f32.mrf.mxu2 }
 0x356   : > { %v13260_v15 = vpack.c.bf16 %v2369_v21, %v2365_v35  ;;  %v1858_v45 = vadd.f32 %v1857_v52, %v13100_v54  ;;  %v1946_v12 = vpop.f32.mrf.mxu3  ;;  %v2374_v7 = vmax.f32 %v2125_v44, %v2246_v36 }
 0x357   : > { %v2037_v53 = vpop.f32.mrf.mxu0 }
 0x358   : > { %v1947_v2 = vadd.f32 %v1946_v12, %v1858_v45  ;;  %v2038_v5 = vadd.f32 %v2037_v53, %v13092_v61  ;;  %v2126_v16 = vpop.f32.mrf.mxu1 }
 0x35a   : > { %v2127_v29 = vadd.f32 %v2126_v16, %v2038_v5  ;;  %v2245_v21 = vmul.f32 0.2, %v1947_v2 }
 0x35c   : > { %v2250_v17 = vmul.f32 0.2, %v2127_v29  ;;  %v2373_v44 = vmax.f32 %v1947_v2, %v2245_v21 }
 0x35d   : > { %v1859_v23 = vpop.f32.mrf.mxu2 }
 0x35e   : > { %v2378_v58 = vmax.f32 %v2127_v29, %v2250_v17  ;;  %v1860_v19 = vadd.f32 %v1859_v23, %v13100_v54  ;;  %v1948_v32 = vpop.f32.mrf.mxu3  ;;  %v11402_v29 = vld [vmem:[#allocation11 + $0xc4] sm:$0xf] }
 0x35f   : > { %v2040_v35 = vpop.f32.mrf.mxu0  ;;  %v10064_v17 = vld [vmem:[#allocation11 + $0xe0] sm:$0xf0] }
 0x360   : > { %v13265_v52 = vpack.c.bf16 %v2378_v58, %v2374_v7  ;;  %v1949_v30 = vadd.f32 %v1948_v32, %v1860_v19  ;;  %v2041_v45 = vadd.f32 %v2040_v35, %v13092_v61  ;;  %v2129_v12 = vpop.f32.mrf.mxu1  ;;  %v11466_v23 = vld [vmem:[#allocation11 + $0x2c4] sm:$0xf]  ;;  %v10067_v58 = vor.u32 %v11402_v29, %v10064_v17 }
 0x361   : > { %v10320_v19 = vld [vmem:[#allocation11 + $0x2e0] sm:$0xf0] }
 0x362   : > { %15173 = vst [vmem:[#allocation60_spill] sm:$0xff] %v13265_v52  ;;  %v2249_v33 = vmul.f32 0.2, %v1949_v30  ;;  %v2130_v14 = vadd.f32 %v2129_v12, %v2041_v45  ;;  %4051 = vmatmul.bf16.gmra.mxu2 %v12992_v25  ;;  %4229 = vmatmul.bf16.gmra.mxu0 %v13188_v39  ;;  %v10323_v12 = vor.u32 %v11466_v23, %v10320_v19  ;;  %v11530_v23 = vld [vmem:[#allocation11 + $0x4c4] sm:$0xf] }
 0x363   : > { %4140 = vmatmul.bf16.gmra.mxu3 %v12983_v24  ;;  %4318 = vmatmul.bf16.gmra.mxu1 %v13181_v9 }
 0x364   : > { %v2377_v53 = vmax.f32 %v1949_v30, %v2249_v33  ;;  %4373 = vmatpush.bf16.msra.mxu2 %v10067_v58  ;;  %v2254_v2 = vmul.f32 0.2, %v2130_v14  ;;  %4462 = vmatpush.bf16.msra.mxu3 %v10323_v12 }
 0x365   : > { %v1862_v40 = vpop.f32.mrf.mxu2 }
 0x366   : > { %v13272_v5 = vpack.c.bf16 %v2377_v53, %v2373_v44  ;;  %v1863_v16 = vadd.f32 %v1862_v40, %v13100_v54  ;;  %v1951_v36 = vpop.f32.mrf.mxu3  ;;  %v2382_v44 = vmax.f32 %v2130_v14, %v2254_v2 }
 0x367   : > { %v2042_v7 = vpop.f32.mrf.mxu0 }
 0x368   : > { %v1952_v32 = vadd.f32 %v1951_v36, %v1863_v16  ;;  %v2043_v35 = vadd.f32 %v2042_v7, %v13092_v61  ;;  %v2131_v45 = vpop.f32.mrf.mxu1  ;;  %v10576_v7 = vld [vmem:[#allocation11 + $0x4e0] sm:$0xf0] }
 0x369   : > { %v10579_v58 = vor.u32 %v11530_v23, %v10576_v7 }
 0x36a   : > { %v2132_v30 = vadd.f32 %v2131_v45, %v2043_v35  ;;  %v2253_v39 = vmul.f32 0.2, %v1952_v32 }
 0x36b   : > { %4551 = vmatpush.bf16.msra.mxu0 %v10579_v58 }
 0x36c   : > { %v2258_v21 = vmul.f32 0.2, %v2132_v30  ;;  %v2381_v14 = vmax.f32 %v1952_v32, %v2253_v39 }
 0x36d   : > { %v1864_v33 = vpop.f32.mrf.mxu2 }
 0x36e   : > { %v2386_v53 = vmax.f32 %v2132_v30, %v2258_v21  ;;  %v1865_v40 = vadd.f32 %v1864_v33, %v13100_v54  ;;  %v1953_v9 = vpop.f32.mrf.mxu3 }
 0x36f   : > { %v2045_v24 = vpop.f32.mrf.mxu0 }
 0x370   : > { %v13277_v29 = vpack.c.bf16 %v2386_v53, %v2382_v44  ;;  %v1954_v16 = vadd.f32 %v1953_v9, %v1865_v40  ;;  %v2046_v36 = vadd.f32 %v2045_v24, %v13092_v61  ;;  %v2134_v17 = vpop.f32.mrf.mxu1 }
 0x372   : > { %15174 = vst [vmem:[#allocation61_spill] sm:$0xff] %v13277_v29  ;;  %v2257_v19 = vmul.f32 0.2, %v1954_v16  ;;  %v2135_v35 = vadd.f32 %v2134_v17, %v2046_v36  ;;  %4056 = vmatmul.bf16.gmra.mxu2 %v13004_v47  ;;  %4234 = vmatmul.bf16.gmra.mxu0 %v13200_v26  ;;  %v11594_v36 = vld [vmem:[#allocation11 + $0x6c4] sm:$0xf] }
 0x373   : > { %4145 = vmatmul.bf16.gmra.mxu3 %v12997_v13  ;;  %4323 = vmatmul.bf16.gmra.mxu1 %v13193_v4  ;;  %v10832_v17 = vld [vmem:[#allocation11 + $0x6e0] sm:$0xf0] }
 0x374   : > { %v2385_v45 = vmax.f32 %v1954_v16, %v2257_v19  ;;  %v2262_v53 = vmul.f32 0.2, %v2135_v35  ;;  %v10835_v23 = vor.u32 %v11594_v36, %v10832_v17  ;;  %v11394_v17 = vld [vmem:[#allocation11 + $0x84] sm:$0xf] }
 0x375   : > { %v1867_v9 = vpop.f32.mrf.mxu2 }
 0x376   : > { %v13284_v12 = vpack.c.bf16 %v2385_v45, %v2381_v14  ;;  %v1868_v24 = vadd.f32 %v1867_v9, %v13100_v54  ;;  %v1956_v2 = vpop.f32.mrf.mxu3  ;;  %4640 = vmatpush.bf16.msra.mxu1 %v10835_v23  ;;  %v2390_v32 = vmax.f32 %v2135_v35, %v2262_v53  ;;  %v2715_v45 = vld [vmem:[#allocation13] sm:$0xff] }
 0x377   : > { %v2047_v30 = vpop.f32.mrf.mxu0  ;;  %v10032_v23 = vld [vmem:[#allocation11 + $0xa0] sm:$0xf0] }
 0x378   : > { %15175 = vst [vmem:[#allocation62_spill] sm:$0xff] %v13284_v12  ;;  %v1957_v21 = vadd.f32 %v1956_v2, %v1868_v24  ;;  %v2048_v33 = vadd.f32 %v2047_v30, %v13092_v61  ;;  %v2136_v44 = vpop.f32.mrf.mxu1 }
 0x37a   : > { %v2137_v40 = vadd.f32 %v2136_v44, %v2048_v33  ;;  %v2261_v9 = vmul.f32 0.2, %v1957_v21  ;;  %v13293_v33 = vperm.slane %v2715_v45, 0 }
 0x37c   : > { %v2266_v7 = vmul.f32 0.2, %v2137_v40 }
 0x37d   : > { %v1869_v39 = vpop.f32.mrf.mxu2 }
 0x37e   : > { %v2394_v16 = vmax.f32 %v2137_v40, %v2266_v7  ;;  %v1870_v58 = vadd.f32 %v1869_v39, %v13100_v54  ;;  %v1958_v19 = vpop.f32.mrf.mxu3  ;;  %v2389_v54 = vmax.f32 %v1957_v21, %v2261_v9  ;;  %v11458_v7 = vld [vmem:[#allocation11 + $0x284] sm:$0xf] }
 0x37f   : > { %v4200_v14 = vpop.f32.mrf.mxu0 }
 0x380   : > { %v13289_v24 = vpack.c.bf16 %v2394_v16, %v2390_v32  ;;  %v1959_v61 = vadd.f32 %v1958_v19, %v1870_v58  ;;  %v4289_v2 = vpop.f32.mrf.mxu1  ;;  %v10035_v32 = vor.u32 %v11394_v17, %v10032_v23  ;;  %v10288_v16 = vld [vmem:[#allocation11 + $0x2a0] sm:$0xf0] }
 0x381   : > { %v10291_v45 = vor.u32 %v11458_v7, %v10288_v16  ;;  %v11586_v7 = vld [vmem:[#allocation11 + $0x684] sm:$0xf] }
 0x382   : > { %v2265_v30 = vmul.f32 0.2, %v1959_v61  ;;  %4061 = vmatmul.bf16.gmra.mxu2 %v13016_v37  ;;  %4239 = vmatmul.bf16.gmra.mxu0 %v13212_v55 }
 0x383   : > { %4150 = vmatmul.bf16.gmra.mxu3 %v13009_v59  ;;  %4328 = vmatmul.bf16.gmra.mxu1 %v13205_v20 }
 0x384   : > { %v2393_v35 = vmax.f32 %v1959_v61, %v2265_v30  ;;  %4374 = vmatpush.bf16.msra.mxu2 %v10035_v32  ;;  %4463 = vmatpush.bf16.msra.mxu3 %v10291_v45  ;;  %v10800_v32 = vld [vmem:[#allocation11 + $0x6a0] sm:$0xf0] }
 0x385   : > { %v4022_v44 = vpop.f32.mrf.mxu2 }
 0x386   : > { %v13297_v53 = vpack.c.bf16 %v2393_v35, %v2389_v54  ;;  %v4023_v40 = vadd.f32 %v4022_v44, %v13293_v33  ;;  %v4111_v36 = vpop.f32.mrf.mxu3  ;;  %v11522_v54 = vld [vmem:[#allocation11 + $0x484] sm:$0xf] }
 0x387   : > { %v4202_v39 = vpop.f32.mrf.mxu0  ;;  %v10544_v35 = vld [vmem:[#allocation11 + $0x4a0] sm:$0xf0] }
 0x388   : > { %v4112_v58 = vadd.f32 %v4111_v36, %v4023_v40  ;;  %v4291_v19 = vpop.f32.mrf.mxu1  ;;  %v10547_v20 = vor.u32 %v11522_v54, %v10544_v35 }
 0x38a   : > { %v4201_v59 = vadd.f32 %v4200_v14, %v4112_v58  ;;  %4552 = vmatpush.bf16.msra.mxu0 %v10547_v20  ;;  %v10803_v20 = vor.u32 %v11586_v7, %v10800_v32 }
 0x38c   : > { %v4290_v21 = vadd.f32 %v4289_v2, %v4201_v59  ;;  %4641 = vmatpush.bf16.msra.mxu1 %v10803_v20  ;;  %v10256_v20 = vld [vmem:[#allocation11 + $0x260] sm:$0xf0] }
 0x38d   : > { %v4024_v9 = vpop.f32.mrf.mxu2 }
 0x38e   : > { %v4025_v61 = vadd.f32 %v4024_v9, %v13293_v33  ;;  %v4113_v30 = vpop.f32.mrf.mxu3  ;;  %v6861_v59 = vmul.f32 0.2, %v4290_v21 }
 0x38f   : > { %v4205_v44 = vpop.f32.mrf.mxu0 }
 0x390   : > { %v4114_v55 = vadd.f32 %v4113_v30, %v4025_v61  ;;  %v4294_v37 = vpop.f32.mrf.mxu1 }
 0x392   : > { %v4203_v17 = vadd.f32 %v4202_v39, %v4114_v55  ;;  %4066 = vmatmul.bf16.gmra.mxu2 %v13028_v38  ;;  %4244 = vmatmul.bf16.gmra.mxu0 %v13224_v43  ;;  %v7117_v55 = vmax.f32 %v4290_v21, %v6861_v59 }
 0x393   : > { %4155 = vmatmul.bf16.gmra.mxu3 %v13021_v28  ;;  %4333 = vmatmul.bf16.gmra.mxu1 %v13217_v51 }
 0x394   : > { %v4292_v14 = vadd.f32 %v4291_v19, %v4203_v17 }
 0x395   : > { %v4027_v2 = vpop.f32.mrf.mxu2 }
 0x396   : > { %v6869_v40 = vmul.f32 0.2, %v4292_v14  ;;  %v4028_v36 = vadd.f32 %v4027_v2, %v13293_v33  ;;  %v4116_v23 = vpop.f32.mrf.mxu3 }
 0x397   : > { %v4207_v16 = vpop.f32.mrf.mxu0 }
 0x398   : > { %v7125_v39 = vmax.f32 %v4292_v14, %v6869_v40  ;;  %v4117_v58 = vadd.f32 %v4116_v23, %v4028_v36  ;;  %v4296_v45 = vpop.f32.mrf.mxu1  ;;  %v11386_v36 = vld [vmem:[#allocation11 + $0x44] sm:$0xf] }
 0x399   : > { %v10000_v23 = vld [vmem:[#allocation11 + $0x60] sm:$0xf0] }
 0x39a   : > { %v13306_v9 = vpack.c.bf16 %v7125_v39, %v7117_v55  ;;  %v4206_v61 = vadd.f32 %v4205_v44, %v4117_v58  ;;  %v10003_v32 = vor.u32 %v11386_v36, %v10000_v23 }
 0x39c   : > { %15176 = vst [vmem:[#allocation63_spill] sm:$0xff] %v13306_v9  ;;  %v4295_v30 = vadd.f32 %v4294_v37, %v4206_v61  ;;  %4375 = vmatpush.bf16.msra.mxu2 %v10003_v32  ;;  %v11514_v9 = vld [vmem:[#allocation11 + $0x444] sm:$0xf] }
 0x39d   : > { %v4029_v54 = vpop.f32.mrf.mxu2 }
 0x39e   : > { %v4030_v19 = vadd.f32 %v4029_v54, %v13293_v33  ;;  %v4118_v35 = vpop.f32.mrf.mxu3  ;;  %v6877_v21 = vmul.f32 0.2, %v4295_v30 }
 0x39f   : > { %v4210_v17 = vpop.f32.mrf.mxu0 }
 0x3a0   : > { %v4119_v2 = vadd.f32 %v4118_v35, %v4030_v19  ;;  %v4299_v51 = vpop.f32.mrf.mxu1  ;;  %v7133_v61 = vmax.f32 %v4295_v30, %v6877_v21 }
 0x3a2   : > { %v4208_v28 = vadd.f32 %v4207_v16, %v4119_v2  ;;  %4071 = vmatmul.bf16.gmra.mxu2 %v13040_v62  ;;  %4249 = vmatmul.bf16.gmra.mxu0 %v13236_v50  ;;  %v11450_v16 = vld [vmem:[#allocation11 + $0x244] sm:$0xf] }
 0x3a3   : > { %4160 = vmatmul.bf16.gmra.mxu3 %v13033_v46  ;;  %4338 = vmatmul.bf16.gmra.mxu1 %v13229_v10  ;;  %v10259_v58 = vor.u32 %v11450_v16, %v10256_v20  ;;  %v10512_v10 = vld [vmem:[#allocation11 + $0x460] sm:$0xf0] }
 0x3a4   : > { %v4297_v59 = vadd.f32 %v4296_v45, %v4208_v28  ;;  %v10515_v23 = vor.u32 %v11514_v9, %v10512_v10  ;;  %v11578_v10 = vld [vmem:[#allocation11 + $0x644] sm:$0xf] }
 0x3a5   : > { %v4032_v44 = vpop.f32.mrf.mxu2  ;;  %4464 = vmatpush.bf16.msra.mxu3 %v10259_v58  ;;  %v10768_v9 = vld [vmem:[#allocation11 + $0x660] sm:$0xf0] }
 0x3a6   : > { %v6885_v37 = vmul.f32 0.2, %v4297_v59  ;;  %v4033_v14 = vadd.f32 %v4032_v44, %v13293_v33  ;;  %v4121_v40 = vpop.f32.mrf.mxu3  ;;  %4553 = vmatpush.bf16.msra.mxu0 %v10515_v23  ;;  %v10771_v16 = vor.u32 %v11578_v10, %v10768_v9 }
 0x3a7   : > { %v4212_v7 = vpop.f32.mrf.mxu0 }
 0x3a8   : > { %v4122_v55 = vadd.f32 %v4121_v40, %v4033_v14  ;;  %v4301_v39 = vpop.f32.mrf.mxu1  ;;  %v7141_v54 = vmax.f32 %v4297_v59, %v6885_v37  ;;  %4642 = vmatpush.bf16.msra.mxu1 %v10771_v16  ;;  %v10224_v16 = vld [vmem:[#allocation11 + $0x220] sm:$0xf0] }
 0x3aa   : > { %v4211_v19 = vadd.f32 %v4210_v17, %v4122_v55  ;;  %v13314_v28 = vpack.c.bf16 %v7141_v54, %v7133_v61 }
 0x3ac   : > { %15177 = vst [vmem:[#allocation64_spill] sm:$0xff] %v13314_v28  ;;  %v4300_v45 = vadd.f32 %v4299_v51, %v4211_v19  ;;  %v10480_v28 = vld [vmem:[#allocation11 + $0x420] sm:$0xf0] }
 0x3ad   : > { %v4034_v35 = vpop.f32.mrf.mxu2 }
 0x3ae   : > { %v4035_v2 = vadd.f32 %v4034_v35, %v13293_v33  ;;  %v4123_v44 = vpop.f32.mrf.mxu3  ;;  %v6893_v51 = vmul.f32 0.2, %v4300_v45 }
 0x3af   : > { %v4215_v36 = vpop.f32.mrf.mxu0 }
 0x3b0   : > { %v4124_v46 = vadd.f32 %v4123_v44, %v4035_v2  ;;  %v4304_v14 = vpop.f32.mrf.mxu1  ;;  %v7149_v20 = vmax.f32 %v4300_v45, %v6893_v51 }
 0x3b2   : > { %v4213_v40 = vadd.f32 %v4212_v7, %v4124_v46  ;;  %4076 = vmatmul.bf16.gmra.mxu2 %v13052_v31  ;;  %4254 = vmatmul.bf16.gmra.mxu0 %v13248_v57 }
 0x3b3   : > { %4165 = vmatmul.bf16.gmra.mxu3 %v13045_v49  ;;  %4343 = vmatmul.bf16.gmra.mxu1 %v13241_v27 }
 0x3b4   : > { %v4302_v30 = vadd.f32 %v4301_v39, %v4213_v40 }
 0x3b5   : > { %v4037_v17 = vpop.f32.mrf.mxu2 }
 0x3b6   : > { %v6901_v21 = vmul.f32 0.2, %v4302_v30  ;;  %v4038_v59 = vadd.f32 %v4037_v17, %v13293_v33  ;;  %v4126_v37 = vpop.f32.mrf.mxu3  ;;  %v15179_v17 = vld [vmem:[#allocation24_spill] sm:$0xff] }
 0x3b7   : > { %v4217_v32 = vpop.f32.mrf.mxu0 }
 0x3b8   : > { %v4127_v46 = vadd.f32 %v4126_v37, %v4038_v59  ;;  %v4306_v7 = vpop.f32.mrf.mxu1  ;;  %v7157_v55 = vmax.f32 %v4302_v30, %v6901_v21  ;;  %v11378_v59 = vld [vmem:[#allocation11 + $0x4] sm:$0xf] }
 0x3b9   : > { %v9968_v37 = vld [vmem:[#allocation11 + $0x20] sm:$0xf0] }
 0x3ba   : > { %v4216_v58 = vadd.f32 %v4215_v36, %v4127_v46  ;;  %v13322_v61 = vpack.c.bf16 %v7157_v55, %v7149_v20  ;;  %v9971_v9 = vor.u32 %v11378_v59, %v9968_v37 }
 0x3bc   : > { %15178 = vst [vmem:[#allocation65_spill] sm:$0xff] %v13322_v61  ;;  %v4305_v54 = vadd.f32 %v4304_v14, %v4216_v58  ;;  %4376 = vmatpush.bf16.msra.mxu2 %v9971_v9  ;;  %v11506_v61 = vld [vmem:[#allocation11 + $0x404] sm:$0xf] }
 0x3bd   : > { %v4039_v19 = vpop.f32.mrf.mxu2  ;;  %v10483_v37 = vor.u32 %v11506_v61, %v10480_v28  ;;  %v11570_v28 = vld [vmem:[#allocation11 + $0x604] sm:$0xf] }
 0x3be   : > { %v4040_v39 = vadd.f32 %v4039_v19, %v13293_v33  ;;  %v4128_v35 = vpop.f32.mrf.mxu3  ;;  %v6909_v45 = vmul.f32 0.2, %v4305_v54  ;;  %v10736_v61 = vld [vmem:[#allocation11 + $0x620] sm:$0xf0] }
 0x3bf   : > { %v4220_v2 = vpop.f32.mrf.mxu0  ;;  %4554 = vmatpush.bf16.msra.mxu0 %v10483_v37 }
 0x3c0   : > { %v4129_v44 = vadd.f32 %v4128_v35, %v4040_v39  ;;  %v4309_v23 = vpop.f32.mrf.mxu1  ;;  %v7165_v58 = vmax.f32 %v4305_v54, %v6909_v45  ;;  %v15181_v54 = vld [vmem:[#allocation26_spill] sm:$0xff] }
 0x3c2   : > { %v4218_v40 = vadd.f32 %v4217_v32, %v4129_v44  ;;  %4081 = vmatmul.bf16.gmra.mxu2 %v13064_v56  ;;  %4259 = vmatmul.bf16.gmra.mxu0 %v13260_v15  ;;  %v11442_v32 = vld [vmem:[#allocation11 + $0x204] sm:$0xf] }
 0x3c3   : > { %4170 = vmatmul.bf16.gmra.mxu3 %v15179_v17  ;;  %4348 = vmatmul.bf16.gmra.mxu1 %v13253_v48  ;;  %v10227_v55 = vor.u32 %v11442_v32, %v10224_v16 }
 0x3c4   : > { %v4307_v36 = vadd.f32 %v4306_v7, %v4218_v40 }
 0x3c5   : > { %v4042_v51 = vpop.f32.mrf.mxu2  ;;  %4465 = vmatpush.bf16.msra.mxu3 %v10227_v55 }
 0x3c6   : > { %v6917_v14 = vmul.f32 0.2, %v4307_v36  ;;  %v4043_v30 = vadd.f32 %v4042_v51, %v13293_v33  ;;  %v4131_v21 = vpop.f32.mrf.mxu3 }
 0x3c7   : > { %v4222_v10 = vpop.f32.mrf.mxu0 }
 0x3c8   : > { %v4132_v46 = vadd.f32 %v4131_v21, %v4043_v30  ;;  %v4311_v20 = vpop.f32.mrf.mxu1  ;;  %v7173_v19 = vmax.f32 %v4307_v36, %v6917_v14 }
 0x3ca   : > { %v4221_v39 = vadd.f32 %v4220_v2, %v4132_v46  ;;  %v13330_v7 = vpack.c.bf16 %v7173_v19, %v7165_v58  ;;  %v15182_v2 = vld [vmem:[#allocation25_spill] sm:$0xff]  ;;  %v10739_v46 = vor.u32 %v11570_v28, %v10736_v61  ;;  %v11439_v28 = vld [vmem:[#allocation11 + $0x1e4] sm:$0xf0] }
 0x3cc   : > { %15180 = vst [vmem:[#allocation24_spill] sm:$0xff] %v13330_v7  ;;  %v4310_v35 = vadd.f32 %v4309_v23, %v4221_v39  ;;  %4643 = vmatpush.bf16.msra.mxu1 %v10739_v46 }
 0x3cd   : > { %v4044_v44 = vpop.f32.mrf.mxu2 }
 0x3ce   : > { %v4045_v40 = vadd.f32 %v4044_v44, %v13293_v33  ;;  %v4133_v51 = vpop.f32.mrf.mxu3  ;;  %v6925_v23 = vmul.f32 0.2, %v4310_v35 }
 0x3cf   : > { %v4225_v59 = vpop.f32.mrf.mxu0 }
 0x3d0   : > { %v4134_v48 = vadd.f32 %v4133_v51, %v4045_v40  ;;  %v4314_v30 = vpop.f32.mrf.mxu1  ;;  %v7181_v55 = vmax.f32 %v4310_v35, %v6925_v23 }
 0x3d2   : > { %v4223_v21 = vadd.f32 %v4222_v10, %v4134_v48  ;;  %4086 = vmatmul.bf16.gmra.mxu2 %v15181_v54  ;;  %4264 = vmatmul.bf16.gmra.mxu0 %v13272_v5 }
 0x3d3   : > { %4175 = vmatmul.bf16.gmra.mxu3 %v15182_v2  ;;  %4353 = vmatmul.bf16.gmra.mxu1 %v13265_v52  ;;  %v15184_v52 = vld [vmem:[#allocation28_spill] sm:$0xff] }
 0x3d4   : > { %v4312_v45 = vadd.f32 %v4311_v20, %v4223_v21 }
 0x3d5   : > { %v4047_v36 = vpop.f32.mrf.mxu2 }
 0x3d6   : > { %v6933_v14 = vmul.f32 0.2, %v4312_v45  ;;  %v4048_v9 = vadd.f32 %v4047_v36, %v13293_v33  ;;  %v4136_v32 = vpop.f32.mrf.mxu3 }
 0x3d7   : > { %v4227_v16 = vpop.f32.mrf.mxu0 }
 0x3d8   : > { %v4137_v48 = vadd.f32 %v4136_v32, %v4048_v9  ;;  %v4316_v10 = vpop.f32.mrf.mxu1  ;;  %v7189_v58 = vmax.f32 %v4312_v45, %v6933_v14  ;;  %v15185_v9 = vld [vmem:[#allocation27_spill] sm:$0xff] }
 0x3d9   : > { %v10198_v32 = vld [vmem:[#allocation11 + $0x1c8] sm:$0xf] }
 0x3da   : > { %v4226_v19 = vadd.f32 %v4225_v59, %v4137_v48  ;;  %v13338_v39 = vpack.c.bf16 %v7189_v58, %v7181_v55  ;;  %v10199_v46 = vor.u32 %v11439_v28, %v10198_v32  ;;  %v11503_v48 = vld [vmem:[#allocation11 + $0x3e4] sm:$0xf0] }
 0x3dc   : > { %15183 = vst [vmem:[#allocation26_spill] sm:$0xff] %v13338_v39  ;;  %v4315_v44 = vadd.f32 %v4314_v30, %v4226_v19  ;;  %4725 = vmatpush.bf16.msrb.mxu2 %v10199_v46 }
 0x3dd   : > { %v4049_v40 = vpop.f32.mrf.mxu2 }
 0x3de   : > { %v4050_v20 = vadd.f32 %v4049_v40, %v13293_v33  ;;  %v4138_v51 = vpop.f32.mrf.mxu3  ;;  %v6941_v35 = vmul.f32 0.2, %v4315_v44 }
 0x3df   : > { %v4230_v37 = vpop.f32.mrf.mxu0 }
 0x3e0   : > { %v4139_v21 = vadd.f32 %v4138_v51, %v4050_v20  ;;  %v4319_v36 = vpop.f32.mrf.mxu1  ;;  %v7197_v40 = vmax.f32 %v4315_v44, %v6941_v35  ;;  %v15187_v44 = vld [vmem:[#allocation30_spill] sm:$0xff] }
 0x3e2   : > { %v4228_v7 = vadd.f32 %v4227_v16, %v4139_v21  ;;  %4091 = vmatmul.bf16.gmra.mxu2 %v15184_v52  ;;  %4269 = vmatmul.bf16.gmra.mxu0 %v13284_v12  ;;  %v10454_v16 = vld [vmem:[#allocation11 + $0x3c8] sm:$0xf] }
 0x3e3   : > { %4180 = vmatmul.bf16.gmra.mxu3 %v15185_v9  ;;  %4358 = vmatmul.bf16.gmra.mxu1 %v13277_v29  ;;  %v10455_v19 = vor.u32 %v11503_v48, %v10454_v16  ;;  %v10710_v29 = vld [vmem:[#allocation11 + $0x5c8] sm:$0xf] }
 0x3e4   : > { %v4317_v59 = vadd.f32 %v4316_v10, %v4228_v7  ;;  %v11567_v9 = vld [vmem:[#allocation11 + $0x5e4] sm:$0xf0] }
 0x3e5   : > { %v4052_v23 = vpop.f32.mrf.mxu2  ;;  %4814 = vmatpush.bf16.msrb.mxu3 %v10455_v19  ;;  %v10711_v28 = vor.u32 %v11567_v9, %v10710_v29  ;;  %v10966_v29 = vld [vmem:[#allocation11 + $0x7c8] sm:$0xf] }
 0x3e6   : > { %v6949_v30 = vmul.f32 0.2, %v4317_v59  ;;  %v4053_v45 = vadd.f32 %v4052_v23, %v13293_v33  ;;  %v4141_v14 = vpop.f32.mrf.mxu3 }
 0x3e7   : > { %v4232_v61 = vpop.f32.mrf.mxu0  ;;  %4903 = vmatpush.bf16.msrb.mxu0 %v10711_v28 }
 0x3e8   : > { %v4142_v55 = vadd.f32 %v4141_v14, %v4053_v45  ;;  %v4321_v58 = vpop.f32.mrf.mxu1  ;;  %v7205_v20 = vmax.f32 %v4317_v59, %v6949_v30 }
 0x3ea   : > { %v4231_v51 = vadd.f32 %v4230_v37, %v4142_v55  ;;  %v13346_v7 = vpack.c.bf16 %v7205_v20, %v7197_v40  ;;  %v15188_v37 = vld [vmem:[#allocation29_spill] sm:$0xff] }
 0x3ec   : > { %15186 = vst [vmem:[#allocation25_spill] sm:$0xff] %v13346_v7  ;;  %v4320_v10 = vadd.f32 %v4319_v36, %v4231_v51 }
 0x3ed   : > { %v4054_v21 = vpop.f32.mrf.mxu2 }
 0x3ee   : > { %v4055_v23 = vadd.f32 %v4054_v21, %v13293_v33  ;;  %v4143_v39 = vpop.f32.mrf.mxu3  ;;  %v6957_v36 = vmul.f32 0.2, %v4320_v10 }
 0x3ef   : > { %v4235_v32 = vpop.f32.mrf.mxu0 }
 0x3f0   : > { %v4144_v12 = vadd.f32 %v4143_v39, %v4055_v23  ;;  %v4324_v45 = vpop.f32.mrf.mxu1  ;;  %v11631_v39 = vld [vmem:[#allocation11 + $0x7e4] sm:$0xf0]  ;;  %v7213_v55 = vmax.f32 %v4320_v10, %v6957_v36 }
 0x3f1   : > { %v10967_v48 = vor.u32 %v11631_v39, %v10966_v29  ;;  %v15191_v10 = vld [vmem:[#allocation31_spill] sm:$0xff] }
 0x3f2   : > { %v4233_v14 = vadd.f32 %v4232_v61, %v4144_v12  ;;  %4096 = vmatmul.bf16.gmra.mxu2 %v15187_v44  ;;  %4274 = vmatmul.bf16.gmra.mxu0 %v13297_v53  ;;  %v10166_v29 = vld [vmem:[#allocation11 + $0x188] sm:$0xf] }
 0x3f3   : > { %4185 = vmatmul.bf16.gmra.mxu3 %v15188_v37  ;;  %4363 = vmatmul.bf16.gmra.mxu1 %v13289_v24  ;;  %v11431_v39 = vld [vmem:[#allocation11 + $0x1a4] sm:$0xf0] }
 0x3f4   : > { %v4322_v35 = vadd.f32 %v4321_v58, %v4233_v14  ;;  %4992 = vmatpush.bf16.msrb.mxu1 %v10967_v48 }
 0x3f5   : > { %v4057_v59 = vpop.f32.mrf.mxu2 }
 0x3f6   : > { %v6965_v30 = vmul.f32 0.2, %v4322_v35  ;;  %v4058_v46 = vadd.f32 %v4057_v59, %v13293_v33  ;;  %v4146_v16 = vpop.f32.mrf.mxu3 }
 0x3f7   : > { %v4237_v9 = vpop.f32.mrf.mxu0 }
 0x3f8   : > { %v4147_v12 = vadd.f32 %v4146_v16, %v4058_v46  ;;  %v4326_v61 = vpop.f32.mrf.mxu1  ;;  %v7221_v19 = vmax.f32 %v4322_v35, %v6965_v30  ;;  %v15190_v46 = vld [vmem:[#allocation35_spill] sm:$0xff] }
 0x3fa   : > { %v4236_v40 = vadd.f32 %v4235_v32, %v4147_v12  ;;  %v13354_v20 = vpack.c.bf16 %v7221_v19, %v7213_v55  ;;  %v10167_v12 = vor.u32 %v11431_v39, %v10166_v29  ;;  %v11495_v55 = vld [vmem:[#allocation11 + $0x3a4] sm:$0xf0] }
 0x3fc   : > { %15189 = vst [vmem:[#allocation30_spill] sm:$0xff] %v13354_v20  ;;  %v4325_v51 = vadd.f32 %v4324_v45, %v4236_v40  ;;  %4726 = vmatpush.bf16.msrb.mxu2 %v10167_v12 }
 0x3fd   : > { %v4059_v21 = vpop.f32.mrf.mxu2 }
 0x3fe   : > { %v4060_v58 = vadd.f32 %v4059_v21, %v13293_v33  ;;  %v4148_v23 = vpop.f32.mrf.mxu3  ;;  %v6973_v32 = vmul.f32 0.2, %v4325_v51 }
 0x3ff   : > { %v4240_v28 = vpop.f32.mrf.mxu0 }
 0x400   : > { %v4149_v14 = vadd.f32 %v4148_v23, %v4060_v58  ;;  %v4329_v59 = vpop.f32.mrf.mxu1  ;;  %v7229_v58 = vmax.f32 %v4325_v51, %v6973_v32  ;;  %v15193_v51 = vld [vmem:[#allocation33_spill] sm:$0xff] }
 0x402   : > { %v4238_v7 = vadd.f32 %v4237_v9, %v4149_v14  ;;  %4377 = vmatmul.bf16.vlgmr.msra.gmra.mxu2 %v12856_v42  ;;  %4555 = vmatmul.bf16.vlgmr.msra.gmra.mxu0 %v13116_v0  ;;  %v10422_v9 = vld [vmem:[#allocation11 + $0x388] sm:$0xf] }
 0x403   : > { %4466 = vmatmul.bf16.vlgmr.msra.gmra.mxu3 %v15190_v46  ;;  %4644 = vmatmul.bf16.vlgmr.msra.gmra.mxu1 %v15191_v10  ;;  %v10423_v21 = vor.u32 %v11495_v55, %v10422_v9  ;;  %v10678_v46 = vld [vmem:[#allocation11 + $0x588] sm:$0xf] }
 0x404   : > { %v4327_v36 = vadd.f32 %v4326_v61, %v4238_v7  ;;  %v11559_v0 = vld [vmem:[#allocation11 + $0x5a4] sm:$0xf0] }
 0x405   : > { %v4062_v35 = vpop.f32.mrf.mxu2  ;;  %4815 = vmatpush.bf16.msrb.mxu3 %v10423_v21  ;;  %v10679_v39 = vor.u32 %v11559_v0, %v10678_v46  ;;  %v10934_v0 = vld [vmem:[#allocation11 + $0x788] sm:$0xf] }
 0x406   : > { %v6981_v45 = vmul.f32 0.2, %v4327_v36  ;;  %v4063_v30 = vadd.f32 %v4062_v35, %v13293_v33  ;;  %v4151_v16 = vpop.f32.mrf.mxu3  ;;  %v11623_v46 = vld [vmem:[#allocation11 + $0x7a4] sm:$0xf0] }
 0x407   : > { %v4242_v48 = vpop.f32.mrf.mxu0  ;;  %4904 = vmatpush.bf16.msrb.mxu0 %v10679_v39  ;;  %v10935_v12 = vor.u32 %v11623_v46, %v10934_v0  ;;  %v15195_v0 = vld [vmem:[#allocation47_spill] sm:$0xff] }
 0x408   : > { %v4152_v19 = vadd.f32 %v4151_v16, %v4063_v30  ;;  %v4331_v40 = vpop.f32.mrf.mxu1  ;;  %v7237_v23 = vmax.f32 %v4327_v36, %v6981_v45  ;;  %v10134_v46 = vld [vmem:[#allocation11 + $0x148] sm:$0xf] }
 0x409   : > { %4993 = vmatpush.bf16.msrb.mxu1 %v10935_v12  ;;  %v11423_v12 = vld [vmem:[#allocation11 + $0x164] sm:$0xf0] }
 0x40a   : > { %v4241_v14 = vadd.f32 %v4240_v28, %v4152_v19  ;;  %v13362_v7 = vpack.c.bf16 %v7237_v23, %v7229_v58 }
 0x40c   : > { %15192 = vst [vmem:[#allocation29_spill] sm:$0xff] %v13362_v7  ;;  %v4330_v61 = vadd.f32 %v4329_v59, %v4241_v14 }
 0x40d   : > { %v4064_v20 = vpop.f32.mrf.mxu2 }
 0x40e   : > { %v4065_v35 = vadd.f32 %v4064_v20, %v13293_v33  ;;  %v4153_v10 = vpop.f32.mrf.mxu3  ;;  %v6989_v28 = vmul.f32 0.2, %v4330_v61 }
 0x40f   : > { %v4245_v29 = vpop.f32.mrf.mxu0 }
 0x410   : > { %v4154_v42 = vadd.f32 %v4153_v10, %v4065_v35  ;;  %v4334_v30 = vpop.f32.mrf.mxu1  ;;  %v7245_v9 = vmax.f32 %v4330_v61, %v6989_v28  ;;  %v15197_v61 = vld [vmem:[#allocation34_spill] sm:$0xff] }
 0x412   : > { %v4243_v16 = vadd.f32 %v4242_v48, %v4154_v42  ;;  %4382 = vmatmul.bf16.gmra.mxu2 %v12880_v63  ;;  %4560 = vmatmul.bf16.gmra.mxu0 %v13128_v11 }
 0x413   : > { %4471 = vmatmul.bf16.gmra.mxu3 %v12863_v41  ;;  %4649 = vmatmul.bf16.gmra.mxu1 %v15193_v51 }
 0x414   : > { %v4332_v59 = vadd.f32 %v4331_v40, %v4243_v16 }
 0x415   : > { %v4067_v20 = vpop.f32.mrf.mxu2 }
 0x416   : > { %v6997_v32 = vmul.f32 0.2, %v4332_v59  ;;  %v4068_v36 = vadd.f32 %v4067_v20, %v13293_v33  ;;  %v4156_v45 = vpop.f32.mrf.mxu3 }
 0x417   : > { %v4247_v10 = vpop.f32.mrf.mxu0 }
 0x418   : > { %v4157_v42 = vadd.f32 %v4156_v45, %v4068_v36  ;;  %v4336_v48 = vpop.f32.mrf.mxu1  ;;  %v7253_v55 = vmax.f32 %v4332_v59, %v6997_v32  ;;  %v15196_v36 = vld [vmem:[#allocation37_spill] sm:$0xff] }
 0x41a   : > { %v4246_v19 = vadd.f32 %v4245_v29, %v4157_v42  ;;  %v13370_v21 = vpack.c.bf16 %v7253_v55, %v7245_v9  ;;  %v10135_v9 = vor.u32 %v11423_v12, %v10134_v46  ;;  %v11487_v55 = vld [vmem:[#allocation11 + $0x364] sm:$0xf0] }
 0x41c   : > { %15194 = vst [vmem:[#allocation33_spill] sm:$0xff] %v13370_v21  ;;  %v4335_v58 = vadd.f32 %v4334_v30, %v4246_v19  ;;  %4727 = vmatpush.bf16.msrb.mxu2 %v10135_v9 }
 0x41d   : > { %v4069_v23 = vpop.f32.mrf.mxu2 }
 0x41e   : > { %v4070_v40 = vadd.f32 %v4069_v23, %v13293_v33  ;;  %v4158_v14 = vpop.f32.mrf.mxu3  ;;  %v7005_v29 = vmul.f32 0.2, %v4335_v58 }
 0x41f   : > { %v4250_v35 = vpop.f32.mrf.mxu0 }
 0x420   : > { %v4159_v39 = vadd.f32 %v4158_v14, %v4070_v40  ;;  %v4339_v16 = vpop.f32.mrf.mxu1  ;;  %v7261_v14 = vmax.f32 %v4335_v58, %v7005_v29  ;;  %v15199_v58 = vld [vmem:[#allocation48_spill] sm:$0xff] }
 0x422   : > { %v4248_v20 = vadd.f32 %v4247_v10, %v4159_v39  ;;  %4387 = vmatmul.bf16.gmra.mxu2 %v12904_v3  ;;  %4565 = vmatmul.bf16.gmra.mxu0 %v15195_v0  ;;  %v10390_v10 = vld [vmem:[#allocation11 + $0x348] sm:$0xf] }
 0x423   : > { %4476 = vmatmul.bf16.gmra.mxu3 %v15196_v36  ;;  %4654 = vmatmul.bf16.gmra.mxu1 %v15197_v61  ;;  %v10391_v40 = vor.u32 %v11487_v55, %v10390_v10  ;;  %v10646_v36 = vld [vmem:[#allocation11 + $0x548] sm:$0xf] }
 0x424   : > { %v4337_v28 = vadd.f32 %v4336_v48, %v4248_v20  ;;  %v11551_v0 = vld [vmem:[#allocation11 + $0x564] sm:$0xf0] }
 0x425   : > { %v4072_v59 = vpop.f32.mrf.mxu2  ;;  %4816 = vmatpush.bf16.msrb.mxu3 %v10391_v40  ;;  %v10647_v12 = vor.u32 %v11551_v0, %v10646_v36  ;;  %v10902_v0 = vld [vmem:[#allocation11 + $0x748] sm:$0xf] }
 0x426   : > { %v7013_v30 = vmul.f32 0.2, %v4337_v28  ;;  %v4073_v32 = vadd.f32 %v4072_v59, %v13293_v33  ;;  %v4161_v45 = vpop.f32.mrf.mxu3  ;;  %v11615_v36 = vld [vmem:[#allocation11 + $0x764] sm:$0xf0] }
 0x427   : > { %v4252_v42 = vpop.f32.mrf.mxu0  ;;  %4905 = vmatpush.bf16.msrb.mxu0 %v10647_v12 }
 0x428   : > { %v4162_v19 = vadd.f32 %v4161_v45, %v4073_v32  ;;  %v4341_v23 = vpop.f32.mrf.mxu1  ;;  %v7269_v39 = vmax.f32 %v4337_v28, %v7013_v30  ;;  %v10903_v30 = vor.u32 %v11615_v36, %v10902_v0  ;;  %v15201_v0 = vld [vmem:[#allocation50_spill] sm:$0xff]  ;;  %v10102_v36 = vld [vmem:[#allocation11 + $0x108] sm:$0xf] }
 0x42a   : > { %v4251_v21 = vadd.f32 %v4250_v35, %v4162_v19  ;;  %v13378_v48 = vpack.c.bf16 %v7269_v39, %v7261_v14  ;;  %4994 = vmatpush.bf16.msrb.mxu1 %v10903_v30  ;;  %v11415_v30 = vld [vmem:[#allocation11 + $0x124] sm:$0xf0] }
 0x42c   : > { %15198 = vst [vmem:[#allocation66_spill] sm:$0xff] %v13378_v48  ;;  %v4340_v20 = vadd.f32 %v4339_v16, %v4251_v21 }
 0x42d   : > { %v4074_v7 = vpop.f32.mrf.mxu2 }
 0x42e   : > { %v4075_v59 = vadd.f32 %v4074_v7, %v13293_v33  ;;  %v4163_v61 = vpop.f32.mrf.mxu3  ;;  %v7021_v21 = vmul.f32 0.2, %v4340_v20 }
 0x42f   : > { %v4255_v46 = vpop.f32.mrf.mxu0 }
 0x430   : > { %v4164_v3 = vadd.f32 %v4163_v61, %v4075_v59  ;;  %v4344_v32 = vpop.f32.mrf.mxu1  ;;  %v7277_v9 = vmax.f32 %v4340_v20, %v7021_v21  ;;  %v15203_v20 = vld [vmem:[#allocation49_spill] sm:$0xff] }
 0x432   : > { %v4253_v45 = vadd.f32 %v4252_v42, %v4164_v3  ;;  %4392 = vmatmul.bf16.gmra.mxu2 %v12928_v22  ;;  %4570 = vmatmul.bf16.gmra.mxu0 %v13152_v6 }
 0x433   : > { %4481 = vmatmul.bf16.gmra.mxu3 %v12911_v18  ;;  %4659 = vmatmul.bf16.gmra.mxu1 %v15199_v58 }
 0x434   : > { %v4342_v35 = vadd.f32 %v4341_v23, %v4253_v45 }
 0x435   : > { %v4077_v7 = vpop.f32.mrf.mxu2 }
 0x436   : > { %v7029_v16 = vmul.f32 0.2, %v4342_v35  ;;  %v4078_v29 = vadd.f32 %v4077_v7, %v13293_v33  ;;  %v4166_v28 = vpop.f32.mrf.mxu3 }
 0x437   : > { %v4257_v61 = vpop.f32.mrf.mxu0 }
 0x438   : > { %v4167_v3 = vadd.f32 %v4166_v28, %v4078_v29  ;;  %v4346_v42 = vpop.f32.mrf.mxu1  ;;  %v7285_v10 = vmax.f32 %v4342_v35, %v7029_v16  ;;  %v15202_v29 = vld [vmem:[#allocation39_spill] sm:$0xff] }
 0x43a   : > { %v4256_v55 = vadd.f32 %v4255_v46, %v4167_v3  ;;  %v13386_v19 = vpack.c.bf16 %v7285_v10, %v7277_v9  ;;  %v10103_v9 = vor.u32 %v11415_v30, %v10102_v36  ;;  %v11479_v10 = vld [vmem:[#allocation11 + $0x324] sm:$0xf0] }
 0x43c   : > { %15200 = vst [vmem:[#allocation48_spill] sm:$0xff] %v13386_v19  ;;  %v4345_v40 = vadd.f32 %v4344_v32, %v4256_v55  ;;  %4728 = vmatpush.bf16.msrb.mxu2 %v10103_v9 }
 0x43d   : > { %v4079_v14 = vpop.f32.mrf.mxu2 }
 0x43e   : > { %v4080_v23 = vadd.f32 %v4079_v14, %v13293_v33  ;;  %v4168_v39 = vpop.f32.mrf.mxu3  ;;  %v7037_v46 = vmul.f32 0.2, %v4345_v40 }
 0x43f   : > { %v4260_v59 = vpop.f32.mrf.mxu0 }
 0x440   : > { %v4169_v12 = vadd.f32 %v4168_v39, %v4080_v23  ;;  %v4349_v45 = vpop.f32.mrf.mxu1  ;;  %v7293_v39 = vmax.f32 %v4345_v40, %v7037_v46  ;;  %v15205_v40 = vld [vmem:[#allocation51_spill] sm:$0xff] }
 0x442   : > { %v4258_v7 = vadd.f32 %v4257_v61, %v4169_v12  ;;  %4397 = vmatmul.bf16.gmra.mxu2 %v12952_v60  ;;  %4575 = vmatmul.bf16.gmra.mxu0 %v15201_v0  ;;  %v10358_v61 = vld [vmem:[#allocation11 + $0x308] sm:$0xf] }
 0x443   : > { %4486 = vmatmul.bf16.gmra.mxu3 %v15202_v29  ;;  %4664 = vmatmul.bf16.gmra.mxu1 %v15203_v20  ;;  %v10359_v23 = vor.u32 %v11479_v10, %v10358_v61  ;;  %v10614_v29 = vld [vmem:[#allocation11 + $0x508] sm:$0xf] }
 0x444   : > { %v4347_v21 = vadd.f32 %v4346_v42, %v4258_v7  ;;  %v11543_v0 = vld [vmem:[#allocation11 + $0x524] sm:$0xf0] }
 0x445   : > { %v4082_v35 = vpop.f32.mrf.mxu2  ;;  %4817 = vmatpush.bf16.msrb.mxu3 %v10359_v23  ;;  %v10615_v30 = vor.u32 %v11543_v0, %v10614_v29  ;;  %v10870_v0 = vld [vmem:[#allocation11 + $0x708] sm:$0xf] }
 0x446   : > { %v7045_v32 = vmul.f32 0.2, %v4347_v21  ;;  %v4083_v16 = vadd.f32 %v4082_v35, %v13293_v33  ;;  %v4171_v28 = vpop.f32.mrf.mxu3  ;;  %v11607_v29 = vld [vmem:[#allocation11 + $0x724] sm:$0xf0] }
 0x447   : > { %v4262_v3 = vpop.f32.mrf.mxu0  ;;  %4906 = vmatpush.bf16.msrb.mxu0 %v10615_v30 }
 0x448   : > { %v4172_v55 = vadd.f32 %v4171_v28, %v4083_v16  ;;  %v4351_v14 = vpop.f32.mrf.mxu1  ;;  %v7301_v12 = vmax.f32 %v4347_v21, %v7045_v32  ;;  %v10871_v32 = vor.u32 %v11607_v29, %v10870_v0  ;;  %v15207_v0 = vld [vmem:[#allocation53_spill] sm:$0xff]  ;;  %v10070_v29 = vld [vmem:[#allocation11 + $0xc8] sm:$0xf] }
 0x44a   : > { %v4261_v19 = vadd.f32 %v4260_v59, %v4172_v55  ;;  %v13394_v42 = vpack.c.bf16 %v7301_v12, %v7293_v39  ;;  %4995 = vmatpush.bf16.msrb.mxu1 %v10871_v32  ;;  %v11407_v32 = vld [vmem:[#allocation11 + $0xe4] sm:$0xf0] }
 0x44c   : > { %15204 = vst [vmem:[#allocation67_spill] sm:$0xff] %v13394_v42  ;;  %v4350_v7 = vadd.f32 %v4349_v45, %v4261_v19 }
 0x44d   : > { %v4084_v48 = vpop.f32.mrf.mxu2 }
 0x44e   : > { %v4085_v35 = vadd.f32 %v4084_v48, %v13293_v33  ;;  %v4173_v20 = vpop.f32.mrf.mxu3  ;;  %v7053_v19 = vmul.f32 0.2, %v4350_v7 }
 0x44f   : > { %v4265_v36 = vpop.f32.mrf.mxu0 }
 0x450   : > { %v4174_v60 = vadd.f32 %v4173_v20, %v4085_v35  ;;  %v4354_v16 = vpop.f32.mrf.mxu1  ;;  %v7309_v9 = vmax.f32 %v4350_v7, %v7053_v19  ;;  %v15209_v7 = vld [vmem:[#allocation52_spill] sm:$0xff] }
 0x452   : > { %v4263_v28 = vadd.f32 %v4262_v3, %v4174_v60  ;;  %4402 = vmatmul.bf16.gmra.mxu2 %v12976_v34  ;;  %4580 = vmatmul.bf16.gmra.mxu0 %v13176_v8 }
 0x453   : > { %4491 = vmatmul.bf16.gmra.mxu3 %v12959_v1  ;;  %4669 = vmatmul.bf16.gmra.mxu1 %v15205_v40 }
 0x454   : > { %v4352_v59 = vadd.f32 %v4351_v14, %v4263_v28 }
 0x455   : > { %v4087_v48 = vpop.f32.mrf.mxu2 }
 0x456   : > { %v7061_v45 = vmul.f32 0.2, %v4352_v59  ;;  %v4088_v46 = vadd.f32 %v4087_v48, %v13293_v33  ;;  %v4176_v21 = vpop.f32.mrf.mxu3 }
 0x457   : > { %v4267_v20 = vpop.f32.mrf.mxu0 }
 0x458   : > { %v4177_v60 = vadd.f32 %v4176_v21, %v4088_v46  ;;  %v4356_v3 = vpop.f32.mrf.mxu1  ;;  %v7317_v61 = vmax.f32 %v4352_v59, %v7061_v45  ;;  %v15208_v46 = vld [vmem:[#allocation41_spill] sm:$0xff] }
 0x45a   : > { %v4266_v10 = vadd.f32 %v4265_v36, %v4177_v60  ;;  %v13402_v55 = vpack.c.bf16 %v7317_v61, %v7309_v9  ;;  %v10071_v9 = vor.u32 %v11407_v32, %v10070_v29  ;;  %v11471_v61 = vld [vmem:[#allocation11 + $0x2e4] sm:$0xf0] }
 0x45b   : > { %v10582_v32 = vld [vmem:[#allocation11 + $0x4c8] sm:$0xf] }
 0x45c   : > { %15206 = vst [vmem:[#allocation51_spill] sm:$0xff] %v13402_v55  ;;  %v4355_v23 = vadd.f32 %v4354_v16, %v4266_v10  ;;  %4729 = vmatpush.bf16.msrb.mxu2 %v10071_v9  ;;  %v10838_v9 = vld [vmem:[#allocation11 + $0x6c8] sm:$0xf] }
 0x45d   : > { %v4089_v39 = vpop.f32.mrf.mxu2 }
 0x45e   : > { %v4090_v14 = vadd.f32 %v4089_v39, %v13293_v33  ;;  %v4178_v12 = vpop.f32.mrf.mxu3  ;;  %v7069_v36 = vmul.f32 0.2, %v4355_v23 }
 0x45f   : > { %v4270_v35 = vpop.f32.mrf.mxu0 }
 0x460   : > { %v4179_v30 = vadd.f32 %v4178_v12, %v4090_v14  ;;  %v4359_v28 = vpop.f32.mrf.mxu1  ;;  %v7325_v12 = vmax.f32 %v4355_v23, %v7069_v36 }
 0x462   : > { %v4268_v48 = vadd.f32 %v4267_v20, %v4179_v30  ;;  %4407 = vmatmul.bf16.gmra.mxu2 %v12992_v25  ;;  %4585 = vmatmul.bf16.gmra.mxu0 %v15207_v0  ;;  %v10326_v20 = vld [vmem:[#allocation11 + $0x2c8] sm:$0xf] }
 0x463   : > { %4496 = vmatmul.bf16.gmra.mxu3 %v15208_v46  ;;  %4674 = vmatmul.bf16.gmra.mxu1 %v15209_v7  ;;  %v10327_v14 = vor.u32 %v11471_v61, %v10326_v20  ;;  %v11535_v25 = vld [vmem:[#allocation11 + $0x4e4] sm:$0xf0] }
 0x464   : > { %v4357_v19 = vadd.f32 %v4356_v3, %v4268_v48  ;;  %v11599_v20 = vld [vmem:[#allocation11 + $0x6e4] sm:$0xf0] }
 0x465   : > { %v4092_v59 = vpop.f32.mrf.mxu2  ;;  %4818 = vmatpush.bf16.msrb.mxu3 %v10327_v14 }
 0x466   : > { %v7077_v16 = vmul.f32 0.2, %v4357_v19  ;;  %v4093_v45 = vadd.f32 %v4092_v59, %v13293_v33  ;;  %v4181_v21 = vpop.f32.mrf.mxu3 }
 0x467   : > { %v4272_v60 = vpop.f32.mrf.mxu0 }
 0x468   : > { %v4182_v10 = vadd.f32 %v4181_v21, %v4093_v45  ;;  %v4361_v39 = vpop.f32.mrf.mxu1  ;;  %v7333_v30 = vmax.f32 %v4357_v19, %v7077_v16  ;;  %v10583_v45 = vor.u32 %v11535_v25, %v10582_v32 }
 0x46a   : > { %v4271_v55 = vadd.f32 %v4270_v35, %v4182_v10  ;;  %v13410_v3 = vpack.c.bf16 %v7333_v30, %v7325_v12  ;;  %4907 = vmatpush.bf16.msrb.mxu0 %v10583_v45  ;;  %v10839_v10 = vor.u32 %v11599_v20, %v10838_v9  ;;  %v10294_v20 = vld [vmem:[#allocation11 + $0x288] sm:$0xf] }
 0x46c   : > { %15210 = vst [vmem:[#allocation68_spill] sm:$0xff] %v13410_v3  ;;  %v4360_v48 = vadd.f32 %v4359_v28, %v4271_v55  ;;  %4996 = vmatpush.bf16.msrb.mxu1 %v10839_v10  ;;  %v11463_v10 = vld [vmem:[#allocation11 + $0x2a4] sm:$0xf0] }
 0x46d   : > { %v4094_v42 = vpop.f32.mrf.mxu2 }
 0x46e   : > { %v4095_v59 = vadd.f32 %v4094_v42, %v13293_v33  ;;  %v4183_v7 = vpop.f32.mrf.mxu3  ;;  %v7085_v55 = vmul.f32 0.2, %v4360_v48 }
 0x46f   : > { %v4275_v46 = vpop.f32.mrf.mxu0 }
 0x470   : > { %v4184_v0 = vadd.f32 %v4183_v7, %v4095_v59  ;;  %v4364_v29 = vpop.f32.mrf.mxu1 }
 0x472   : > { %v4273_v21 = vadd.f32 %v4272_v60, %v4184_v0  ;;  %4412 = vmatmul.bf16.gmra.mxu2 %v13004_v47  ;;  %4590 = vmatmul.bf16.gmra.mxu0 %v13200_v26  ;;  %v7341_v0 = vmax.f32 %v4360_v48, %v7085_v55  ;;  %v15213_v48 = vld [vmem:[#allocation55_spill] sm:$0xff] }
 0x473   : > { %4501 = vmatmul.bf16.gmra.mxu3 %v12997_v13  ;;  %4679 = vmatmul.bf16.gmra.mxu1 %v13193_v4 }
 0x474   : > { %v4362_v23 = vadd.f32 %v4361_v39, %v4273_v21 }
 0x475   : > { %v4097_v42 = vpop.f32.mrf.mxu2 }
 0x476   : > { %v7093_v35 = vmul.f32 0.2, %v4362_v23  ;;  %v4098_v28 = vadd.f32 %v4097_v42, %v13293_v33  ;;  %v4186_v7 = vpop.f32.mrf.mxu3  ;;  %v15212_v42 = vld [vmem:[#allocation44_spill] sm:$0xff] }
 0x477   : > { %v4277_v36 = vpop.f32.mrf.mxu0 }
 0x478   : > { %v4187_v19 = vadd.f32 %v4186_v7, %v4098_v28  ;;  %v4366_v25 = vpop.f32.mrf.mxu1  ;;  %v7349_v16 = vmax.f32 %v4362_v23, %v7093_v35  ;;  %v15214_v23 = vld [vmem:[#allocation43_spill] sm:$0xff]  ;;  %v15215_v35 = vld [vmem:[#allocation54_spill] sm:$0xff] }
 0x47a   : > { %v4276_v60 = vadd.f32 %v4275_v46, %v4187_v19  ;;  %v13418_v61 = vpack.c.bf16 %v7349_v16, %v7341_v0  ;;  %v12067_v46 = vld [vmem:[#allocation13] sm:$0xff]  ;;  %v10038_v16 = vld [vmem:[#allocation11 + $0x88] sm:$0xf] }
 0x47b   : > { %v13423_v55 = vperm.slane %v12067_v46, 1 }
 0x47c   : > { %15211 = vst [vmem:[#allocation69_spill] sm:$0xff] %v13418_v61  ;;  %v4365_v14 = vadd.f32 %v4364_v29, %v4276_v60 }
 0x47d   : > { %v4099_v12 = vpop.f32.mrf.mxu2 }
 0x47e   : > { %v4100_v39 = vadd.f32 %v4099_v12, %v13293_v33  ;;  %v4188_v30 = vpop.f32.mrf.mxu3  ;;  %v7101_v29 = vmul.f32 0.2, %v4365_v14 }
 0x47f   : > { %v4556_v59 = vpop.f32.mrf.mxu0 }
 0x480   : > { %v4189_v32 = vadd.f32 %v4188_v30, %v4100_v39  ;;  %v4645_v45 = vpop.f32.mrf.mxu1  ;;  %v10295_v30 = vor.u32 %v11463_v10, %v10294_v20 }
 0x482   : > { %v4278_v21 = vadd.f32 %v4277_v36, %v4189_v32  ;;  %4417 = vmatmul.bf16.gmra.mxu2 %v15212_v42  ;;  %4595 = vmatmul.bf16.gmra.mxu0 %v15213_v48  ;;  %v11399_v36 = vld [vmem:[#allocation11 + $0xa4] sm:$0xf0]  ;;  %v7357_v32 = vmax.f32 %v4365_v14, %v7101_v29  ;;  %v15217_v14 = vld [vmem:[#allocation45_spill] sm:$0xff] }
 0x483   : > { %4506 = vmatmul.bf16.gmra.mxu3 %v15214_v23  ;;  %4684 = vmatmul.bf16.gmra.mxu1 %v15215_v35  ;;  %v10039_v9 = vor.u32 %v11399_v36, %v10038_v16  ;;  %v10550_v23 = vld [vmem:[#allocation11 + $0x488] sm:$0xf] }
 0x484   : > { %v4367_v28 = vadd.f32 %v4366_v25, %v4278_v21  ;;  %4819 = vmatpush.bf16.msrb.mxu3 %v10295_v30  ;;  %v11527_v48 = vld [vmem:[#allocation11 + $0x4a4] sm:$0xf0] }
 0x485   : > { %v4378_v7 = vpop.f32.mrf.mxu2  ;;  %4730 = vmatpush.bf16.msrb.mxu2 %v10039_v9  ;;  %v10551_v36 = vor.u32 %v11527_v48, %v10550_v23  ;;  %v10806_v48 = vld [vmem:[#allocation11 + $0x688] sm:$0xf] }
 0x486   : > { %v7109_v33 = vmul.f32 0.2, %v4367_v28  ;;  %v4379_v19 = vadd.f32 %v4378_v7, %v13423_v55  ;;  %v4467_v0 = vpop.f32.mrf.mxu3  ;;  %v11591_v23 = vld [vmem:[#allocation11 + $0x6a4] sm:$0xf0] }
 0x487   : > { %v4558_v60 = vpop.f32.mrf.mxu0  ;;  %4908 = vmatpush.bf16.msrb.mxu0 %v10551_v36  ;;  %v10807_v9 = vor.u32 %v11591_v23, %v10806_v48  ;;  %v10006_v48 = vld [vmem:[#allocation11 + $0x48] sm:$0xf] }
 0x488   : > { %v4468_v12 = vadd.f32 %v4467_v0, %v4379_v19  ;;  %v4647_v39 = vpop.f32.mrf.mxu1  ;;  %v7365_v46 = vmax.f32 %v4367_v28, %v7109_v33  ;;  %v11391_v23 = vld [vmem:[#allocation11 + $0x64] sm:$0xf0] }
 0x489   : > { %4997 = vmatpush.bf16.msrb.mxu1 %v10807_v9 }
 0x48a   : > { %v4557_v61 = vadd.f32 %v4556_v59, %v4468_v12  ;;  %v13428_v25 = vpack.c.bf16 %v7365_v46, %v7357_v32  ;;  %v15218_v59 = vld [vmem:[#allocation56_spill] sm:$0xff] }
 0x48c   : > { %15216 = vst [vmem:[#allocation70_spill] sm:$0xff] %v13428_v25  ;;  %v4646_v21 = vadd.f32 %v4645_v45, %v4557_v61 }
 0x48d   : > { %v4380_v3 = vpop.f32.mrf.mxu2 }
 0x48e   : > { %v4381_v7 = vadd.f32 %v4380_v3, %v13423_v55  ;;  %v4469_v35 = vpop.f32.mrf.mxu3  ;;  %v6862_v61 = vmul.f32 0.2, %v4646_v21 }
 0x48f   : > { %v4561_v16 = vpop.f32.mrf.mxu0 }
 0x490   : > { %v4470_v42 = vadd.f32 %v4469_v35, %v4381_v7  ;;  %v4650_v19 = vpop.f32.mrf.mxu1 }
 0x492   : > { %v4559_v0 = vadd.f32 %v4558_v60, %v4470_v42  ;;  %4422 = vmatmul.bf16.gmra.mxu2 %v13028_v38  ;;  %4600 = vmatmul.bf16.gmra.mxu0 %v13224_v43  ;;  %v7118_v42 = vmax.f32 %v4646_v21, %v6862_v61  ;;  %v15220_v21 = vld [vmem:[#allocation46_spill] sm:$0xff]  ;;  %v15221_v61 = vld [vmem:[#allocation57_spill] sm:$0xff] }
 0x493   : > { %4511 = vmatmul.bf16.gmra.mxu3 %v15217_v14  ;;  %4689 = vmatmul.bf16.gmra.mxu1 %v15218_v59 }
 0x494   : > { %v4648_v45 = vadd.f32 %v4647_v39, %v4559_v0 }
 0x495   : > { %v4383_v3 = vpop.f32.mrf.mxu2 }
 0x496   : > { %v6870_v29 = vmul.f32 0.2, %v4648_v45  ;;  %v4384_v28 = vadd.f32 %v4383_v3, %v13423_v55  ;;  %v4472_v33 = vpop.f32.mrf.mxu3 }
 0x497   : > { %v4563_v35 = vpop.f32.mrf.mxu0 }
 0x498   : > { %v7126_v60 = vmax.f32 %v4648_v45, %v6870_v29  ;;  %v4473_v20 = vadd.f32 %v4472_v33, %v4384_v28  ;;  %v4652_v10 = vpop.f32.mrf.mxu1 }
 0x49a   : > { %v13436_v12 = vpack.c.bf16 %v7126_v60, %v7118_v42  ;;  %v4562_v30 = vadd.f32 %v4561_v16, %v4473_v20  ;;  %v10007_v42 = vor.u32 %v11391_v23, %v10006_v48  ;;  %v11455_v60 = vld [vmem:[#allocation11 + $0x264] sm:$0xf0] }
 0x49c   : > { %15219 = vst [vmem:[#allocation45_spill] sm:$0xff] %v13436_v12  ;;  %v4651_v32 = vadd.f32 %v4650_v19, %v4562_v30  ;;  %4731 = vmatpush.bf16.msrb.mxu2 %v10007_v42 }
 0x49d   : > { %v4385_v46 = vpop.f32.mrf.mxu2 }
 0x49e   : > { %v4386_v39 = vadd.f32 %v4385_v46, %v13423_v55  ;;  %v4474_v7 = vpop.f32.mrf.mxu3  ;;  %v6878_v45 = vmul.f32 0.2, %v4651_v32 }
 0x49f   : > { %v4566_v36 = vpop.f32.mrf.mxu0 }
 0x4a0   : > { %v4475_v0 = vadd.f32 %v4474_v7, %v4386_v39  ;;  %v4655_v3 = vpop.f32.mrf.mxu1  ;;  %v7134_v39 = vmax.f32 %v4651_v32, %v6878_v45 }
 0x4a2   : > { %v4564_v25 = vadd.f32 %v4563_v35, %v4475_v0  ;;  %4427 = vmatmul.bf16.gmra.mxu2 %v13040_v62  ;;  %4605 = vmatmul.bf16.gmra.mxu0 %v13236_v50  ;;  %v10262_v35 = vld [vmem:[#allocation11 + $0x248] sm:$0xf] }
 0x4a3   : > { %4516 = vmatmul.bf16.gmra.mxu3 %v15220_v21  ;;  %4694 = vmatmul.bf16.gmra.mxu1 %v15221_v61  ;;  %v10263_v46 = vor.u32 %v11455_v60, %v10262_v35  ;;  %v10518_v21 = vld [vmem:[#allocation11 + $0x448] sm:$0xf] }
 0x4a4   : > { %v4653_v29 = vadd.f32 %v4652_v10, %v4564_v25  ;;  %v11519_v50 = vld [vmem:[#allocation11 + $0x464] sm:$0xf0] }
 0x4a5   : > { %v4388_v16 = vpop.f32.mrf.mxu2  ;;  %4820 = vmatpush.bf16.msrb.mxu3 %v10263_v46  ;;  %v10519_v23 = vor.u32 %v11519_v50, %v10518_v21  ;;  %v10774_v50 = vld [vmem:[#allocation11 + $0x648] sm:$0xf] }
 0x4a6   : > { %v6886_v19 = vmul.f32 0.2, %v4653_v29  ;;  %v4389_v28 = vadd.f32 %v4388_v16, %v13423_v55  ;;  %v4477_v33 = vpop.f32.mrf.mxu3  ;;  %v11583_v21 = vld [vmem:[#allocation11 + $0x664] sm:$0xf0] }
 0x4a7   : > { %v4568_v9 = vpop.f32.mrf.mxu0  ;;  %4909 = vmatpush.bf16.msrb.mxu0 %v10519_v23 }
 0x4a8   : > { %v4478_v20 = vadd.f32 %v4477_v33, %v4389_v28  ;;  %v4657_v30 = vpop.f32.mrf.mxu1  ;;  %v7142_v7 = vmax.f32 %v4653_v29, %v6886_v19  ;;  %v10775_v19 = vor.u32 %v11583_v21, %v10774_v50 }
 0x4aa   : > { %v4567_v0 = vadd.f32 %v4566_v36, %v4478_v20  ;;  %v13444_v25 = vpack.c.bf16 %v7142_v7, %v7134_v39  ;;  %4998 = vmatpush.bf16.msrb.mxu1 %v10775_v19  ;;  %v11447_v19 = vld [vmem:[#allocation11 + $0x224] sm:$0xf0] }
 0x4ac   : > { %15222 = vst [vmem:[#allocation56_spill] sm:$0xff] %v13444_v25  ;;  %v4656_v10 = vadd.f32 %v4655_v3, %v4567_v0  ;;  %v11511_v25 = vld [vmem:[#allocation11 + $0x424] sm:$0xf0] }
 0x4ad   : > { %v4390_v12 = vpop.f32.mrf.mxu2 }
 0x4ae   : > { %v4391_v16 = vadd.f32 %v4390_v12, %v13423_v55  ;;  %v4479_v61 = vpop.f32.mrf.mxu3  ;;  %v6894_v32 = vmul.f32 0.2, %v4656_v10 }
 0x4af   : > { %v4571_v48 = vpop.f32.mrf.mxu0 }
 0x4b0   : > { %v4480_v62 = vadd.f32 %v4479_v61, %v4391_v16  ;;  %v4660_v28 = vpop.f32.mrf.mxu1  ;;  %v7150_v42 = vmax.f32 %v4656_v10, %v6894_v32  ;;  %v15224_v10 = vld [vmem:[#allocation59_spill] sm:$0xff] }
 0x4b2   : > { %v4569_v33 = vadd.f32 %v4568_v9, %v4480_v62  ;;  %4432 = vmatmul.bf16.gmra.mxu2 %v13052_v31  ;;  %4610 = vmatmul.bf16.gmra.mxu0 %v13248_v57 }
 0x4b3   : > { %4521 = vmatmul.bf16.gmra.mxu3 %v13045_v49  ;;  %4699 = vmatmul.bf16.gmra.mxu1 %v13241_v27 }
 0x4b4   : > { %v4658_v36 = vadd.f32 %v4657_v30, %v4569_v33 }
 0x4b5   : > { %v4393_v12 = vpop.f32.mrf.mxu2 }
 0x4b6   : > { %v6902_v3 = vmul.f32 0.2, %v4658_v36  ;;  %v4394_v45 = vadd.f32 %v4393_v12, %v13423_v55  ;;  %v4482_v29 = vpop.f32.mrf.mxu3 }
 0x4b7   : > { %v4573_v61 = vpop.f32.mrf.mxu0 }
 0x4b8   : > { %v4483_v62 = vadd.f32 %v4482_v29, %v4394_v45  ;;  %v4662_v9 = vpop.f32.mrf.mxu1  ;;  %v7158_v35 = vmax.f32 %v4658_v36, %v6902_v3  ;;  %v9974_v45 = vld [vmem:[#allocation11 + $0x8] sm:$0xf] }
 0x4b9   : > { %v11383_v29 = vld [vmem:[#allocation11 + $0x24] sm:$0xf0] }
 0x4ba   : > { %v4572_v60 = vadd.f32 %v4571_v48, %v4483_v62  ;;  %v13452_v20 = vpack.c.bf16 %v7158_v35, %v7150_v42  ;;  %v9975_v21 = vor.u32 %v11383_v29, %v9974_v45 }
 0x4bc   : > { %15223 = vst [vmem:[#allocation71_spill] sm:$0xff] %v13452_v20  ;;  %v4661_v46 = vadd.f32 %v4660_v28, %v4572_v60  ;;  %4732 = vmatpush.bf16.msrb.mxu2 %v9975_v21  ;;  %v10486_v20 = vld [vmem:[#allocation11 + $0x408] sm:$0xf] }
 0x4bd   : > { %v4395_v39 = vpop.f32.mrf.mxu2  ;;  %v10487_v29 = vor.u32 %v11511_v25, %v10486_v20  ;;  %v10742_v25 = vld [vmem:[#allocation11 + $0x608] sm:$0xf] }
 0x4be   : > { %v4396_v30 = vadd.f32 %v4395_v39, %v13423_v55  ;;  %v4484_v7 = vpop.f32.mrf.mxu3  ;;  %v6910_v48 = vmul.f32 0.2, %v4661_v46  ;;  %v11575_v20 = vld [vmem:[#allocation11 + $0x624] sm:$0xf0] }
 0x4bf   : > { %v4576_v0 = vpop.f32.mrf.mxu0  ;;  %4910 = vmatpush.bf16.msrb.mxu0 %v10487_v29 }
 0x4c0   : > { %v4485_v16 = vadd.f32 %v4484_v7, %v4396_v30  ;;  %v4665_v23 = vpop.f32.mrf.mxu1  ;;  %v7166_v60 = vmax.f32 %v4661_v46, %v6910_v48  ;;  %v15226_v46 = vld [vmem:[#allocation60_spill] sm:$0xff] }
 0x4c2   : > { %v4574_v33 = vadd.f32 %v4573_v61, %v4485_v16  ;;  %4437 = vmatmul.bf16.gmra.mxu2 %v13064_v56  ;;  %4615 = vmatmul.bf16.gmra.mxu0 %v13260_v15  ;;  %v10230_v61 = vld [vmem:[#allocation11 + $0x208] sm:$0xf] }
 0x4c3   : > { %4526 = vmatmul.bf16.gmra.mxu3 %v15179_v17  ;;  %4704 = vmatmul.bf16.gmra.mxu1 %v15224_v10  ;;  %v10231_v35 = vor.u32 %v11447_v19, %v10230_v61  ;;  %v10743_v19 = vor.u32 %v11575_v20, %v10742_v25  ;;  %v15228_v25 = vld [vmem:[#allocation62_spill] sm:$0xff]  ;;  %v11435_v20 = vld [vmem:[#allocation11 + $0x1cc] sm:$0xf] }
 0x4c4   : > { %v4663_v32 = vadd.f32 %v4662_v9, %v4574_v33 }
 0x4c5   : > { %v4398_v36 = vpop.f32.mrf.mxu2  ;;  %4821 = vmatpush.bf16.msrb.mxu3 %v10231_v35  ;;  %4999 = vmatpush.bf16.msrb.mxu1 %v10743_v19  ;;  %v10200_v19 = vld [vmem:[#allocation11 + $0x1e8] sm:$0xf0] }
 0x4c6   : > { %v6918_v28 = vmul.f32 0.2, %v4663_v32  ;;  %v4399_v12 = vadd.f32 %v4398_v36, %v13423_v55  ;;  %v4487_v3 = vpop.f32.mrf.mxu3 }
 0x4c7   : > { %v4578_v50 = vpop.f32.mrf.mxu0 }
 0x4c8   : > { %v4488_v62 = vadd.f32 %v4487_v3, %v4399_v12  ;;  %v4667_v42 = vpop.f32.mrf.mxu1  ;;  %v7174_v39 = vmax.f32 %v4663_v32, %v6918_v28 }
 0x4ca   : > { %v4577_v30 = vadd.f32 %v4576_v0, %v4488_v62  ;;  %v13460_v9 = vpack.c.bf16 %v7174_v39, %v7166_v60 }
 0x4cc   : > { %15225 = vst [vmem:[#allocation72_spill] sm:$0xff] %v13460_v9  ;;  %v4666_v7 = vadd.f32 %v4665_v23, %v4577_v30 }
 0x4cd   : > { %v4400_v16 = vpop.f32.mrf.mxu2 }
 0x4ce   : > { %v4401_v33 = vadd.f32 %v4400_v16, %v13423_v55  ;;  %v4489_v36 = vpop.f32.mrf.mxu3  ;;  %v6926_v0 = vmul.f32 0.2, %v4666_v7 }
 0x4cf   : > { %v4581_v45 = vpop.f32.mrf.mxu0 }
 0x4d0   : > { %v4490_v10 = vadd.f32 %v4489_v36, %v4401_v33  ;;  %v4670_v12 = vpop.f32.mrf.mxu1  ;;  %v7182_v62 = vmax.f32 %v4666_v7, %v6926_v0  ;;  %v15230_v7 = vld [vmem:[#allocation61_spill] sm:$0xff] }
 0x4d2   : > { %v4579_v3 = vadd.f32 %v4578_v50, %v4490_v10  ;;  %4442 = vmatmul.bf16.gmra.mxu2 %v15181_v54  ;;  %4620 = vmatmul.bf16.gmra.mxu0 %v13272_v5 }
 0x4d3   : > { %4531 = vmatmul.bf16.gmra.mxu3 %v15182_v2  ;;  %4709 = vmatmul.bf16.gmra.mxu1 %v15226_v46 }
 0x4d4   : > { %v4668_v23 = vadd.f32 %v4667_v42, %v4579_v3 }
 0x4d5   : > { %v4403_v48 = vpop.f32.mrf.mxu2 }
 0x4d6   : > { %v6934_v32 = vmul.f32 0.2, %v4668_v23  ;;  %v4404_v28 = vadd.f32 %v4403_v48, %v13423_v55  ;;  %v4492_v21 = vpop.f32.mrf.mxu3 }
 0x4d7   : > { %v4583_v61 = vpop.f32.mrf.mxu0 }
 0x4d8   : > { %v4493_v10 = vadd.f32 %v4492_v21, %v4404_v28  ;;  %v4672_v50 = vpop.f32.mrf.mxu1  ;;  %v7190_v35 = vmax.f32 %v4668_v23, %v6934_v32  ;;  %v15229_v28 = vld [vmem:[#allocation27_spill] sm:$0xff] }
 0x4da   : > { %v4582_v60 = vadd.f32 %v4581_v45, %v4493_v10  ;;  %v13468_v39 = vpack.c.bf16 %v7190_v35, %v7182_v62  ;;  %v10203_v62 = vor.u32 %v11435_v20, %v10200_v19  ;;  %v10456_v35 = vld [vmem:[#allocation11 + $0x3e8] sm:$0xf0] }
 0x4dc   : > { %15227 = vst [vmem:[#allocation60_spill] sm:$0xff] %v13468_v39  ;;  %v4671_v30 = vadd.f32 %v4670_v12, %v4582_v60  ;;  %5081 = vmatpush.bf16.msra.mxu2 %v10203_v62 }
 0x4dd   : > { %v4405_v16 = vpop.f32.mrf.mxu2 }
 0x4de   : > { %v4406_v42 = vadd.f32 %v4405_v16, %v13423_v55  ;;  %v4494_v33 = vpop.f32.mrf.mxu3  ;;  %v6942_v45 = vmul.f32 0.2, %v4671_v30 }
 0x4df   : > { %v4586_v36 = vpop.f32.mrf.mxu0 }
 0x4e0   : > { %v4495_v29 = vadd.f32 %v4494_v33, %v4406_v42  ;;  %v4675_v3 = vpop.f32.mrf.mxu1  ;;  %v7198_v33 = vmax.f32 %v4671_v30, %v6942_v45 }
 0x4e2   : > { %v4584_v48 = vadd.f32 %v4583_v61, %v4495_v29  ;;  %4447 = vmatmul.bf16.gmra.mxu2 %v15184_v52  ;;  %4625 = vmatmul.bf16.gmra.mxu0 %v15228_v25  ;;  %v11499_v61 = vld [vmem:[#allocation11 + $0x3cc] sm:$0xf] }
 0x4e3   : > { %4536 = vmatmul.bf16.gmra.mxu3 %v15229_v28  ;;  %4714 = vmatmul.bf16.gmra.mxu1 %v15230_v7  ;;  %v10459_v42 = vor.u32 %v11499_v61, %v10456_v35  ;;  %v11563_v28 = vld [vmem:[#allocation11 + $0x5cc] sm:$0xf] }
 0x4e4   : > { %v4673_v0 = vadd.f32 %v4672_v50, %v4584_v48  ;;  %v10712_v25 = vld [vmem:[#allocation11 + $0x5e8] sm:$0xf0] }
 0x4e5   : > { %v4408_v23 = vpop.f32.mrf.mxu2  ;;  %5170 = vmatpush.bf16.msra.mxu3 %v10459_v42  ;;  %v10715_v19 = vor.u32 %v11563_v28, %v10712_v25  ;;  %v11627_v25 = vld [vmem:[#allocation11 + $0x7cc] sm:$0xf] }
 0x4e6   : > { %v6950_v12 = vmul.f32 0.2, %v4673_v0  ;;  %v4409_v32 = vadd.f32 %v4408_v23, %v13423_v55  ;;  %v4497_v21 = vpop.f32.mrf.mxu3  ;;  %v10968_v28 = vld [vmem:[#allocation11 + $0x7e8] sm:$0xf0] }
 0x4e7   : > { %v4588_v10 = vpop.f32.mrf.mxu0  ;;  %5259 = vmatpush.bf16.msra.mxu0 %v10715_v19 }
 0x4e8   : > { %v4498_v60 = vadd.f32 %v4497_v21, %v4409_v32  ;;  %v4677_v16 = vpop.f32.mrf.mxu1  ;;  %v7206_v29 = vmax.f32 %v4673_v0, %v6950_v12  ;;  %v10971_v0 = vor.u32 %v11627_v25, %v10968_v28  ;;  %v15234_v25 = vld [vmem:[#allocation32_spill] sm:$0xff]  ;;  %v11427_v28 = vld [vmem:[#allocation11 + $0x18c] sm:$0xf] }
 0x4ea   : > { %v4587_v39 = vadd.f32 %v4586_v36, %v4498_v60  ;;  %v13476_v50 = vpack.c.bf16 %v7206_v29, %v7198_v33  ;;  %5348 = vmatpush.bf16.msra.mxu1 %v10971_v0  ;;  %v10168_v0 = vld [vmem:[#allocation11 + $0x1a8] sm:$0xf0] }
 0x4ec   : > { %15231 = vst [vmem:[#allocation73_spill] sm:$0xff] %v13476_v50  ;;  %v4676_v48 = vadd.f32 %v4675_v3, %v4587_v39 }
 0x4ed   : > { %v4410_v9 = vpop.f32.mrf.mxu2 }
 0x4ee   : > { %v4411_v23 = vadd.f32 %v4410_v9, %v13423_v55  ;;  %v4499_v7 = vpop.f32.mrf.mxu3  ;;  %v6958_v39 = vmul.f32 0.2, %v4676_v48 }
 0x4ef   : > { %v4591_v20 = vpop.f32.mrf.mxu0 }
 0x4f0   : > { %v4500_v52 = vadd.f32 %v4499_v7, %v4411_v23  ;;  %v4680_v32 = vpop.f32.mrf.mxu1 }
 0x4f2   : > { %v4589_v21 = vadd.f32 %v4588_v10, %v4500_v52  ;;  %4452 = vmatmul.bf16.gmra.mxu2 %v15187_v44  ;;  %4630 = vmatmul.bf16.gmra.mxu0 %v13297_v53  ;;  %v7214_v10 = vmax.f32 %v4676_v48, %v6958_v39  ;;  %v15236_v48 = vld [vmem:[#allocation31_spill] sm:$0xff] }
 0x4f3   : > { %4541 = vmatmul.bf16.gmra.mxu3 %v15188_v37  ;;  %4719 = vmatmul.bf16.gmra.mxu1 %v13289_v24 }
 0x4f4   : > { %v4678_v30 = vadd.f32 %v4677_v16, %v4589_v21 }
 0x4f5   : > { %v4413_v9 = vpop.f32.mrf.mxu2 }
 0x4f6   : > { %v6966_v36 = vmul.f32 0.2, %v4678_v30  ;;  %v4414_v3 = vadd.f32 %v4413_v9, %v13423_v55  ;;  %v4502_v45 = vpop.f32.mrf.mxu3  ;;  %v15233_v9 = vld [vmem:[#allocation36_spill] sm:$0xff] }
 0x4f7   : > { %v4593_v7 = vpop.f32.mrf.mxu0 }
 0x4f8   : > { %v4503_v52 = vadd.f32 %v4502_v45, %v4414_v3  ;;  %v4682_v12 = vpop.f32.mrf.mxu1  ;;  %v7222_v62 = vmax.f32 %v4678_v30, %v6966_v36  ;;  %v15235_v3 = vld [vmem:[#allocation35_spill] sm:$0xff] }
 0x4fa   : > { %v4592_v61 = vadd.f32 %v4591_v20, %v4503_v52  ;;  %v13484_v35 = vpack.c.bf16 %v7222_v62, %v7214_v10  ;;  %v10171_v10 = vor.u32 %v11427_v28, %v10168_v0  ;;  %v10424_v62 = vld [vmem:[#allocation11 + $0x3a8] sm:$0xf0] }
 0x4fc   : > { %15232 = vst [vmem:[#allocation74_spill] sm:$0xff] %v13484_v35  ;;  %v4681_v60 = vadd.f32 %v4680_v32, %v4592_v61  ;;  %5082 = vmatpush.bf16.msra.mxu2 %v10171_v10 }
 0x4fd   : > { %v4415_v42 = vpop.f32.mrf.mxu2 }
 0x4fe   : > { %v4416_v16 = vadd.f32 %v4415_v42, %v13423_v55  ;;  %v4504_v33 = vpop.f32.mrf.mxu3  ;;  %v6974_v20 = vmul.f32 0.2, %v4681_v60 }
 0x4ff   : > { %v4596_v29 = vpop.f32.mrf.mxu0 }
 0x500   : > { %v4505_v23 = vadd.f32 %v4504_v33, %v4416_v16  ;;  %v4685_v19 = vpop.f32.mrf.mxu1  ;;  %v7230_v33 = vmax.f32 %v4681_v60, %v6974_v20 }
 0x502   : > { %v4594_v21 = vadd.f32 %v4593_v7, %v4505_v23  ;;  %4733 = vmatmul.bf16.vlgmr.msrb.gmra.mxu2 %v15233_v9  ;;  %4911 = vmatmul.bf16.vlgmr.msrb.gmra.mxu0 %v15234_v25  ;;  %v11491_v7 = vld [vmem:[#allocation11 + $0x38c] sm:$0xf] }
 0x503   : > { %4822 = vmatmul.bf16.vlgmr.msrb.gmra.mxu3 %v15235_v3  ;;  %5000 = vmatmul.bf16.vlgmr.msrb.gmra.mxu1 %v15236_v48  ;;  %v10427_v16 = vor.u32 %v11491_v7, %v10424_v62  ;;  %v11555_v3 = vld [vmem:[#allocation11 + $0x58c] sm:$0xf] }
 0x504   : > { %v4683_v39 = vadd.f32 %v4682_v12, %v4594_v21  ;;  %v10680_v25 = vld [vmem:[#allocation11 + $0x5a8] sm:$0xf0] }
 0x505   : > { %v4418_v30 = vpop.f32.mrf.mxu2  ;;  %5171 = vmatpush.bf16.msra.mxu3 %v10427_v16  ;;  %v10683_v0 = vor.u32 %v11555_v3, %v10680_v25  ;;  %v11619_v25 = vld [vmem:[#allocation11 + $0x78c] sm:$0xf] }
 0x506   : > { %v6982_v32 = vmul.f32 0.2, %v4683_v39  ;;  %v4419_v36 = vadd.f32 %v4418_v30, %v13423_v55  ;;  %v4507_v45 = vpop.f32.mrf.mxu3  ;;  %v10936_v3 = vld [vmem:[#allocation11 + $0x7a8] sm:$0xf0] }
 0x507   : > { %v4598_v52 = vpop.f32.mrf.mxu0  ;;  %5260 = vmatpush.bf16.msra.mxu0 %v10683_v0 }
 0x508   : > { %v4508_v61 = vadd.f32 %v4507_v45, %v4419_v36  ;;  %v4687_v42 = vpop.f32.mrf.mxu1  ;;  %v7238_v23 = vmax.f32 %v4683_v39, %v6982_v32  ;;  %v10939_v39 = vor.u32 %v11619_v25, %v10936_v3  ;;  %v15240_v25 = vld [vmem:[#allocation47_spill] sm:$0xff] }
 0x509   : > { %v11419_v3 = vld [vmem:[#allocation11 + $0x14c] sm:$0xf] }
 0x50a   : > { %v4597_v35 = vadd.f32 %v4596_v29, %v4508_v61  ;;  %v13492_v12 = vpack.c.bf16 %v7238_v23, %v7230_v33  ;;  %5349 = vmatpush.bf16.msra.mxu1 %v10939_v39  ;;  %v10136_v39 = vld [vmem:[#allocation11 + $0x168] sm:$0xf0] }
 0x50c   : > { %15237 = vst [vmem:[#allocation75_spill] sm:$0xff] %v13492_v12  ;;  %v4686_v21 = vadd.f32 %v4685_v19, %v4597_v35 }
 0x50d   : > { %v4420_v50 = vpop.f32.mrf.mxu2 }
 0x50e   : > { %v4421_v30 = vadd.f32 %v4420_v50, %v13423_v55  ;;  %v4509_v48 = vpop.f32.mrf.mxu3  ;;  %v6990_v35 = vmul.f32 0.2, %v4686_v21 }
 0x50f   : > { %v4601_v28 = vpop.f32.mrf.mxu0 }
 0x510   : > { %v4510_v9 = vadd.f32 %v4509_v48, %v4421_v30  ;;  %v4690_v36 = vpop.f32.mrf.mxu1 }
 0x512   : > { %v4599_v45 = vadd.f32 %v4598_v52, %v4510_v9  ;;  %4738 = vmatmul.bf16.gmra.mxu2 %v12880_v63  ;;  %4916 = vmatmul.bf16.gmra.mxu0 %v13128_v11  ;;  %v7246_v52 = vmax.f32 %v4686_v21, %v6990_v35  ;;  %v15242_v21 = vld [vmem:[#allocation34_spill] sm:$0xff] }
 0x513   : > { %4827 = vmatmul.bf16.gmra.mxu3 %v12863_v41  ;;  %5005 = vmatmul.bf16.gmra.mxu1 %v15193_v51 }
 0x514   : > { %v4688_v60 = vadd.f32 %v4687_v42, %v4599_v45 }
 0x515   : > { %v4423_v50 = vpop.f32.mrf.mxu2 }
 0x516   : > { %v6998_v29 = vmul.f32 0.2, %v4688_v60  ;;  %v4424_v19 = vadd.f32 %v4423_v50, %v13423_v55  ;;  %v4512_v20 = vpop.f32.mrf.mxu3  ;;  %v15239_v50 = vld [vmem:[#allocation38_spill] sm:$0xff] }
 0x517   : > { %v4603_v48 = vpop.f32.mrf.mxu0 }
 0x518   : > { %v4513_v9 = vadd.f32 %v4512_v20, %v4424_v19  ;;  %v4692_v32 = vpop.f32.mrf.mxu1  ;;  %v7254_v10 = vmax.f32 %v4688_v60, %v6998_v29  ;;  %v15241_v19 = vld [vmem:[#allocation37_spill] sm:$0xff] }
 0x51a   : > { %v4602_v7 = vadd.f32 %v4601_v28, %v4513_v9  ;;  %v13500_v62 = vpack.c.bf16 %v7254_v10, %v7246_v52  ;;  %v10139_v52 = vor.u32 %v11419_v3, %v10136_v39  ;;  %v10392_v10 = vld [vmem:[#allocation11 + $0x368] sm:$0xf0] }
 0x51c   : > { %15238 = vst [vmem:[#allocation76_spill] sm:$0xff] %v13500_v62  ;;  %v4691_v61 = vadd.f32 %v4690_v36, %v4602_v7  ;;  %5083 = vmatpush.bf16.msra.mxu2 %v10139_v52 }
 0x51d   : > { %v4425_v16 = vpop.f32.mrf.mxu2 }
 0x51e   : > { %v4426_v42 = vadd.f32 %v4425_v16, %v13423_v55  ;;  %v4514_v33 = vpop.f32.mrf.mxu3  ;;  %v7006_v28 = vmul.f32 0.2, %v4691_v61 }
 0x51f   : > { %v4606_v23 = vpop.f32.mrf.mxu0 }
 0x520   : > { %v4515_v30 = vadd.f32 %v4514_v33, %v4426_v42  ;;  %v4695_v0 = vpop.f32.mrf.mxu1  ;;  %v7262_v33 = vmax.f32 %v4691_v61, %v7006_v28 }
 0x522   : > { %v4604_v45 = vadd.f32 %v4603_v48, %v4515_v30  ;;  %4743 = vmatmul.bf16.gmra.mxu2 %v15239_v50  ;;  %4921 = vmatmul.bf16.gmra.mxu0 %v15240_v25  ;;  %v11483_v48 = vld [vmem:[#allocation11 + $0x34c] sm:$0xf] }
 0x523   : > { %4832 = vmatmul.bf16.gmra.mxu3 %v15241_v19  ;;  %5010 = vmatmul.bf16.gmra.mxu1 %v15242_v21  ;;  %v10395_v42 = vor.u32 %v11483_v48, %v10392_v10  ;;  %v11547_v19 = vld [vmem:[#allocation11 + $0x54c] sm:$0xf] }
 0x524   : > { %v4693_v35 = vadd.f32 %v4692_v32, %v4604_v45  ;;  %v10648_v25 = vld [vmem:[#allocation11 + $0x568] sm:$0xf0] }
 0x525   : > { %v4428_v60 = vpop.f32.mrf.mxu2  ;;  %5172 = vmatpush.bf16.msra.mxu3 %v10395_v42  ;;  %v10651_v39 = vor.u32 %v11547_v19, %v10648_v25  ;;  %v11611_v25 = vld [vmem:[#allocation11 + $0x74c] sm:$0xf] }
 0x526   : > { %v7014_v36 = vmul.f32 0.2, %v4693_v35  ;;  %v4429_v29 = vadd.f32 %v4428_v60, %v13423_v55  ;;  %v4517_v20 = vpop.f32.mrf.mxu3  ;;  %v10904_v19 = vld [vmem:[#allocation11 + $0x768] sm:$0xf0] }
 0x527   : > { %v4608_v9 = vpop.f32.mrf.mxu0  ;;  %5261 = vmatpush.bf16.msra.mxu0 %v10651_v39 }
 0x528   : > { %v4518_v7 = vadd.f32 %v4517_v20, %v4429_v29  ;;  %v4697_v16 = vpop.f32.mrf.mxu1  ;;  %v7270_v30 = vmax.f32 %v4693_v35, %v7014_v36  ;;  %v10907_v35 = vor.u32 %v11611_v25, %v10904_v19  ;;  %v15246_v25 = vld [vmem:[#allocation50_spill] sm:$0xff]  ;;  %v11411_v19 = vld [vmem:[#allocation11 + $0x10c] sm:$0xf] }
 0x52a   : > { %v4607_v62 = vadd.f32 %v4606_v23, %v4518_v7  ;;  %v13508_v32 = vpack.c.bf16 %v7270_v30, %v7262_v33  ;;  %5350 = vmatpush.bf16.msra.mxu1 %v10907_v35  ;;  %v10104_v35 = vld [vmem:[#allocation11 + $0x128] sm:$0xf0] }
 0x52c   : > { %15243 = vst [vmem:[#allocation77_spill] sm:$0xff] %v13508_v32  ;;  %v4696_v45 = vadd.f32 %v4695_v0, %v4607_v62 }
 0x52d   : > { %v4430_v12 = vpop.f32.mrf.mxu2 }
 0x52e   : > { %v4431_v60 = vadd.f32 %v4430_v12, %v13423_v55  ;;  %v4519_v21 = vpop.f32.mrf.mxu3  ;;  %v7022_v62 = vmul.f32 0.2, %v4696_v45 }
 0x52f   : > { %v4611_v3 = vpop.f32.mrf.mxu0 }
 0x530   : > { %v4520_v50 = vadd.f32 %v4519_v21, %v4431_v60  ;;  %v4700_v29 = vpop.f32.mrf.mxu1 }
 0x532   : > { %v4609_v20 = vadd.f32 %v4608_v9, %v4520_v50  ;;  %4748 = vmatmul.bf16.gmra.mxu2 %v12928_v22  ;;  %4926 = vmatmul.bf16.gmra.mxu0 %v13152_v6  ;;  %v7278_v9 = vmax.f32 %v4696_v45, %v7022_v62  ;;  %v15248_v45 = vld [vmem:[#allocation49_spill] sm:$0xff] }
 0x533   : > { %4837 = vmatmul.bf16.gmra.mxu3 %v12911_v18  ;;  %5015 = vmatmul.bf16.gmra.mxu1 %v15199_v58 }
 0x534   : > { %v4698_v61 = vadd.f32 %v4697_v16, %v4609_v20 }
 0x535   : > { %v4433_v12 = vpop.f32.mrf.mxu2 }
 0x536   : > { %v7030_v23 = vmul.f32 0.2, %v4698_v61  ;;  %v4434_v0 = vadd.f32 %v4433_v12, %v13423_v55  ;;  %v4522_v28 = vpop.f32.mrf.mxu3  ;;  %v15245_v12 = vld [vmem:[#allocation40_spill] sm:$0xff] }
 0x537   : > { %v4613_v21 = vpop.f32.mrf.mxu0 }
 0x538   : > { %v4523_v50 = vadd.f32 %v4522_v28, %v4434_v0  ;;  %v4702_v36 = vpop.f32.mrf.mxu1  ;;  %v7286_v52 = vmax.f32 %v4698_v61, %v7030_v23  ;;  %v15247_v0 = vld [vmem:[#allocation39_spill] sm:$0xff] }
 0x53a   : > { %v4612_v48 = vadd.f32 %v4611_v3, %v4523_v50  ;;  %v13516_v10 = vpack.c.bf16 %v7286_v52, %v7278_v9  ;;  %v10107_v9 = vor.u32 %v11411_v19, %v10104_v35  ;;  %v10360_v52 = vld [vmem:[#allocation11 + $0x328] sm:$0xf0] }
 0x53c   : > { %15244 = vst [vmem:[#allocation78_spill] sm:$0xff] %v13516_v10  ;;  %v4701_v7 = vadd.f32 %v4700_v29, %v4612_v48  ;;  %5084 = vmatpush.bf16.msra.mxu2 %v10107_v9 }
 0x53d   : > { %v4435_v42 = vpop.f32.mrf.mxu2 }
 0x53e   : > { %v4436_v16 = vadd.f32 %v4435_v42, %v13423_v55  ;;  %v4524_v33 = vpop.f32.mrf.mxu3  ;;  %v7038_v3 = vmul.f32 0.2, %v4701_v7 }
 0x53f   : > { %v4616_v30 = vpop.f32.mrf.mxu0 }
 0x540   : > { %v4525_v60 = vadd.f32 %v4524_v33, %v4436_v16  ;;  %v4705_v39 = vpop.f32.mrf.mxu1  ;;  %v7294_v33 = vmax.f32 %v4701_v7, %v7038_v3 }
 0x542   : > { %v4614_v20 = vadd.f32 %v4613_v21, %v4525_v60  ;;  %4753 = vmatmul.bf16.gmra.mxu2 %v15245_v12  ;;  %4931 = vmatmul.bf16.gmra.mxu0 %v15246_v25  ;;  %v11475_v21 = vld [vmem:[#allocation11 + $0x30c] sm:$0xf] }
 0x543   : > { %4842 = vmatmul.bf16.gmra.mxu3 %v15247_v0  ;;  %5020 = vmatmul.bf16.gmra.mxu1 %v15248_v45  ;;  %v10363_v16 = vor.u32 %v11475_v21, %v10360_v52  ;;  %v11539_v0 = vld [vmem:[#allocation11 + $0x50c] sm:$0xf] }
 0x544   : > { %v4703_v62 = vadd.f32 %v4702_v36, %v4614_v20  ;;  %v10616_v25 = vld [vmem:[#allocation11 + $0x528] sm:$0xf0] }
 0x545   : > { %v4438_v61 = vpop.f32.mrf.mxu2  ;;  %5173 = vmatpush.bf16.msra.mxu3 %v10363_v16  ;;  %v10619_v35 = vor.u32 %v11539_v0, %v10616_v25  ;;  %v11603_v25 = vld [vmem:[#allocation11 + $0x70c] sm:$0xf] }
 0x546   : > { %v7046_v29 = vmul.f32 0.2, %v4703_v62  ;;  %v4439_v23 = vadd.f32 %v4438_v61, %v13423_v55  ;;  %v4527_v28 = vpop.f32.mrf.mxu3  ;;  %v10872_v0 = vld [vmem:[#allocation11 + $0x728] sm:$0xf0] }
 0x547   : > { %v4618_v50 = vpop.f32.mrf.mxu0  ;;  %5262 = vmatpush.bf16.msra.mxu0 %v10619_v35 }
 0x548   : > { %v4528_v48 = vadd.f32 %v4527_v28, %v4439_v23  ;;  %v4707_v42 = vpop.f32.mrf.mxu1  ;;  %v7302_v60 = vmax.f32 %v4703_v62, %v7046_v29  ;;  %v10875_v62 = vor.u32 %v11603_v25, %v10872_v0  ;;  %v15252_v25 = vld [vmem:[#allocation53_spill] sm:$0xff]  ;;  %v11403_v0 = vld [vmem:[#allocation11 + $0xcc] sm:$0xf] }
 0x54a   : > { %v4617_v10 = vadd.f32 %v4616_v30, %v4528_v48  ;;  %v13524_v36 = vpack.c.bf16 %v7302_v60, %v7294_v33  ;;  %5351 = vmatpush.bf16.msra.mxu1 %v10875_v62  ;;  %v10072_v62 = vld [vmem:[#allocation11 + $0xe8] sm:$0xf0] }
 0x54c   : > { %15249 = vst [vmem:[#allocation79_spill] sm:$0xff] %v13524_v36  ;;  %v4706_v20 = vadd.f32 %v4705_v39, %v4617_v10 }
 0x54d   : > { %v4440_v32 = vpop.f32.mrf.mxu2 }
 0x54e   : > { %v4441_v61 = vadd.f32 %v4440_v32, %v13423_v55  ;;  %v4529_v45 = vpop.f32.mrf.mxu3  ;;  %v7054_v10 = vmul.f32 0.2, %v4706_v20 }
 0x54f   : > { %v4621_v19 = vpop.f32.mrf.mxu0 }
 0x550   : > { %v4530_v12 = vadd.f32 %v4529_v45, %v4441_v61  ;;  %v4710_v23 = vpop.f32.mrf.mxu1 }
 0x552   : > { %v4619_v28 = vadd.f32 %v4618_v50, %v4530_v12  ;;  %4758 = vmatmul.bf16.gmra.mxu2 %v12976_v34  ;;  %4936 = vmatmul.bf16.gmra.mxu0 %v13176_v8  ;;  %v7310_v50 = vmax.f32 %v4706_v20, %v7054_v10  ;;  %v15254_v20 = vld [vmem:[#allocation52_spill] sm:$0xff] }
 0x553   : > { %4847 = vmatmul.bf16.gmra.mxu3 %v12959_v1  ;;  %5025 = vmatmul.bf16.gmra.mxu1 %v15205_v40 }
 0x554   : > { %v4708_v7 = vadd.f32 %v4707_v42, %v4619_v28 }
 0x555   : > { %v4443_v32 = vpop.f32.mrf.mxu2 }
 0x556   : > { %v7062_v30 = vmul.f32 0.2, %v4708_v7  ;;  %v4444_v39 = vadd.f32 %v4443_v32, %v13423_v55  ;;  %v4532_v3 = vpop.f32.mrf.mxu3  ;;  %v15251_v32 = vld [vmem:[#allocation42_spill] sm:$0xff] }
 0x557   : > { %v4623_v45 = vpop.f32.mrf.mxu0 }
 0x558   : > { %v4533_v12 = vadd.f32 %v4532_v3, %v4444_v39  ;;  %v4712_v29 = vpop.f32.mrf.mxu1  ;;  %v7318_v9 = vmax.f32 %v4708_v7, %v7062_v30  ;;  %v15253_v39 = vld [vmem:[#allocation41_spill] sm:$0xff] }
 0x55a   : > { %v4622_v21 = vadd.f32 %v4621_v19, %v4533_v12  ;;  %v13532_v52 = vpack.c.bf16 %v7318_v9, %v7310_v50  ;;  %v10075_v50 = vor.u32 %v11403_v0, %v10072_v62  ;;  %v10328_v9 = vld [vmem:[#allocation11 + $0x2e8] sm:$0xf0] }
 0x55b   : > { %v11531_v62 = vld [vmem:[#allocation11 + $0x4cc] sm:$0xf] }
 0x55c   : > { %15250 = vst [vmem:[#allocation80_spill] sm:$0xff] %v13532_v52  ;;  %v4711_v48 = vadd.f32 %v4710_v23, %v4622_v21  ;;  %5085 = vmatpush.bf16.msra.mxu2 %v10075_v50  ;;  %v11595_v50 = vld [vmem:[#allocation11 + $0x6cc] sm:$0xf] }
 0x55d   : > { %v4445_v16 = vpop.f32.mrf.mxu2 }
 0x55e   : > { %v4446_v42 = vadd.f32 %v4445_v16, %v13423_v55  ;;  %v4534_v33 = vpop.f32.mrf.mxu3  ;;  %v7070_v19 = vmul.f32 0.2, %v4711_v48 }
 0x55f   : > { %v4626_v60 = vpop.f32.mrf.mxu0 }
 0x560   : > { %v4535_v61 = vadd.f32 %v4534_v33, %v4446_v42  ;;  %v4715_v35 = vpop.f32.mrf.mxu1  ;;  %v7326_v33 = vmax.f32 %v4711_v48, %v7070_v19 }
 0x562   : > { %v4624_v28 = vadd.f32 %v4623_v45, %v4535_v61  ;;  %4763 = vmatmul.bf16.gmra.mxu2 %v15251_v32  ;;  %4941 = vmatmul.bf16.gmra.mxu0 %v15252_v25  ;;  %v11467_v45 = vld [vmem:[#allocation11 + $0x2cc] sm:$0xf] }
 0x563   : > { %4852 = vmatmul.bf16.gmra.mxu3 %v15253_v39  ;;  %5030 = vmatmul.bf16.gmra.mxu1 %v15254_v20  ;;  %v10331_v42 = vor.u32 %v11467_v45, %v10328_v9  ;;  %v10584_v32 = vld [vmem:[#allocation11 + $0x4e8] sm:$0xf0] }
 0x564   : > { %v4713_v10 = vadd.f32 %v4712_v29, %v4624_v28  ;;  %v10840_v45 = vld [vmem:[#allocation11 + $0x6e8] sm:$0xf0] }
 0x565   : > { %v4448_v7 = vpop.f32.mrf.mxu2  ;;  %5174 = vmatpush.bf16.msra.mxu3 %v10331_v42 }
 0x566   : > { %v7078_v23 = vmul.f32 0.2, %v4713_v10  ;;  %v4449_v30 = vadd.f32 %v4448_v7, %v13423_v55  ;;  %v4537_v3 = vpop.f32.mrf.mxu3 }
 0x567   : > { %v4628_v12 = vpop.f32.mrf.mxu0 }
 0x568   : > { %v4538_v21 = vadd.f32 %v4537_v3, %v4449_v30  ;;  %v4717_v16 = vpop.f32.mrf.mxu1  ;;  %v7334_v61 = vmax.f32 %v4713_v10, %v7078_v23  ;;  %v10587_v30 = vor.u32 %v11531_v62, %v10584_v32 }
 0x56a   : > { %v4627_v52 = vadd.f32 %v4626_v60, %v4538_v21  ;;  %v13540_v29 = vpack.c.bf16 %v7334_v61, %v7326_v33  ;;  %5263 = vmatpush.bf16.msra.mxu0 %v10587_v30  ;;  %v10843_v21 = vor.u32 %v11595_v50, %v10840_v45  ;;  %v11459_v45 = vld [vmem:[#allocation11 + $0x28c] sm:$0xf] }
 0x56c   : > { %15255 = vst [vmem:[#allocation81_spill] sm:$0xff] %v13540_v29  ;;  %v4716_v28 = vadd.f32 %v4715_v35, %v4627_v52  ;;  %5352 = vmatpush.bf16.msra.mxu1 %v10843_v21  ;;  %v10296_v21 = vld [vmem:[#allocation11 + $0x2a8] sm:$0xf0] }
 0x56d   : > { %v4450_v36 = vpop.f32.mrf.mxu2 }
 0x56e   : > { %v4451_v7 = vadd.f32 %v4450_v36, %v13423_v55  ;;  %v4539_v20 = vpop.f32.mrf.mxu3  ;;  %v7086_v52 = vmul.f32 0.2, %v4716_v28 }
 0x56f   : > { %v4631_v39 = vpop.f32.mrf.mxu0 }
 0x570   : > { %v4540_v25 = vadd.f32 %v4539_v20, %v4451_v7  ;;  %v4720_v0 = vpop.f32.mrf.mxu1 }
 0x572   : > { %v4629_v3 = vadd.f32 %v4628_v12, %v4540_v25  ;;  %4768 = vmatmul.bf16.gmra.mxu2 %v13004_v47  ;;  %4946 = vmatmul.bf16.gmra.mxu0 %v13200_v26  ;;  %v7342_v25 = vmax.f32 %v4716_v28, %v7086_v52  ;;  %v15258_v28 = vld [vmem:[#allocation55_spill] sm:$0xff] }
 0x573   : > { %4857 = vmatmul.bf16.gmra.mxu3 %v12997_v13  ;;  %5035 = vmatmul.bf16.gmra.mxu1 %v13193_v4 }
 0x574   : > { %v4718_v48 = vadd.f32 %v4717_v16, %v4629_v3 }
 0x575   : > { %v4453_v36 = vpop.f32.mrf.mxu2 }
 0x576   : > { %v7094_v60 = vmul.f32 0.2, %v4718_v48  ;;  %v4454_v35 = vadd.f32 %v4453_v36, %v13423_v55  ;;  %v4542_v20 = vpop.f32.mrf.mxu3  ;;  %v15257_v36 = vld [vmem:[#allocation44_spill] sm:$0xff] }
 0x577   : > { %v4633_v19 = vpop.f32.mrf.mxu0 }
 0x578   : > { %v4543_v10 = vadd.f32 %v4542_v20, %v4454_v35  ;;  %v4722_v32 = vpop.f32.mrf.mxu1  ;;  %v7350_v23 = vmax.f32 %v4718_v48, %v7094_v60  ;;  %v15259_v48 = vld [vmem:[#allocation43_spill] sm:$0xff]  ;;  %v15260_v60 = vld [vmem:[#allocation54_spill] sm:$0xff] }
 0x57a   : > { %v4632_v12 = vadd.f32 %v4631_v39, %v4543_v10  ;;  %v13548_v9 = vpack.c.bf16 %v7350_v23, %v7342_v25  ;;  %v12068_v39 = vld [vmem:[#allocation13] sm:$0xff]  ;;  %v11395_v23 = vld [vmem:[#allocation11 + $0x8c] sm:$0xf] }
 0x57b   : > { %v13553_v52 = vperm.slane %v12068_v39, 2 }
 0x57c   : > { %15256 = vst [vmem:[#allocation82_spill] sm:$0xff] %v13548_v9  ;;  %v4721_v42 = vadd.f32 %v4720_v0, %v4632_v12 }
 0x57d   : > { %v4455_v33 = vpop.f32.mrf.mxu2 }
 0x57e   : > { %v4456_v16 = vadd.f32 %v4455_v33, %v13423_v55  ;;  %v4544_v61 = vpop.f32.mrf.mxu3  ;;  %v7102_v0 = vmul.f32 0.2, %v4721_v42 }
 0x57f   : > { %v4912_v7 = vpop.f32.mrf.mxu0 }
 0x580   : > { %v4545_v62 = vadd.f32 %v4544_v61, %v4456_v16  ;;  %v5001_v30 = vpop.f32.mrf.mxu1  ;;  %v10299_v61 = vor.u32 %v11459_v45, %v10296_v21 }
 0x582   : > { %v4634_v3 = vadd.f32 %v4633_v19, %v4545_v62  ;;  %4773 = vmatmul.bf16.gmra.mxu2 %v15257_v36  ;;  %4951 = vmatmul.bf16.gmra.mxu0 %v15258_v28  ;;  %v10040_v19 = vld [vmem:[#allocation11 + $0xa8] sm:$0xf0]  ;;  %v7358_v62 = vmax.f32 %v4721_v42, %v7102_v0 }
 0x583   : > { %4862 = vmatmul.bf16.gmra.mxu3 %v15259_v48  ;;  %5040 = vmatmul.bf16.gmra.mxu1 %v15260_v60  ;;  %v10043_v50 = vor.u32 %v11395_v23, %v10040_v19  ;;  %v11523_v48 = vld [vmem:[#allocation11 + $0x48c] sm:$0xf] }
 0x584   : > { %v4723_v35 = vadd.f32 %v4722_v32, %v4634_v3  ;;  %5175 = vmatpush.bf16.msra.mxu3 %v10299_v61  ;;  %v10552_v28 = vld [vmem:[#allocation11 + $0x4a8] sm:$0xf0] }
 0x585   : > { %v4734_v20 = vpop.f32.mrf.mxu2  ;;  %5086 = vmatpush.bf16.msra.mxu2 %v10043_v50  ;;  %v10555_v19 = vor.u32 %v11523_v48, %v10552_v28  ;;  %v11587_v28 = vld [vmem:[#allocation11 + $0x68c] sm:$0xf] }
 0x586   : > { %v7110_v55 = vmul.f32 0.2, %v4723_v35  ;;  %v4735_v10 = vadd.f32 %v4734_v20, %v13553_v52  ;;  %v4823_v25 = vpop.f32.mrf.mxu3  ;;  %v10808_v48 = vld [vmem:[#allocation11 + $0x6a8] sm:$0xf0] }
 0x587   : > { %v4914_v12 = vpop.f32.mrf.mxu0  ;;  %5264 = vmatpush.bf16.msra.mxu0 %v10555_v19 }
 0x588   : > { %v4824_v33 = vadd.f32 %v4823_v25, %v4735_v10  ;;  %v5003_v16 = vpop.f32.mrf.mxu1  ;;  %v7366_v39 = vmax.f32 %v4723_v35, %v7110_v55  ;;  %v10811_v35 = vor.u32 %v11587_v28, %v10808_v48  ;;  %v15264_v28 = vld [vmem:[#allocation58_spill] sm:$0xff]  ;;  %v11387_v48 = vld [vmem:[#allocation11 + $0x4c] sm:$0xf] }
 0x58a   : > { %v4913_v9 = vadd.f32 %v4912_v7, %v4824_v33  ;;  %v13558_v32 = vpack.c.bf16 %v7366_v39, %v7358_v62  ;;  %5353 = vmatpush.bf16.msra.mxu1 %v10811_v35  ;;  %v10008_v35 = vld [vmem:[#allocation11 + $0x68] sm:$0xf0] }
 0x58c   : > { %15261 = vst [vmem:[#allocation83_spill] sm:$0xff] %v13558_v32  ;;  %v5002_v3 = vadd.f32 %v5001_v30, %v4913_v9 }
 0x58d   : > { %v4736_v29 = vpop.f32.mrf.mxu2 }
 0x58e   : > { %v4737_v20 = vadd.f32 %v4736_v29, %v13553_v52  ;;  %v4825_v60 = vpop.f32.mrf.mxu3  ;;  %v6863_v9 = vmul.f32 0.2, %v5002_v3 }
 0x58f   : > { %v4917_v23 = vpop.f32.mrf.mxu0 }
 0x590   : > { %v4826_v36 = vadd.f32 %v4825_v60, %v4737_v20  ;;  %v5006_v10 = vpop.f32.mrf.mxu1 }
 0x592   : > { %v4915_v25 = vadd.f32 %v4914_v12, %v4826_v36  ;;  %4778 = vmatmul.bf16.gmra.mxu2 %v13028_v38  ;;  %4956 = vmatmul.bf16.gmra.mxu0 %v13224_v43  ;;  %v7119_v36 = vmax.f32 %v5002_v3, %v6863_v9  ;;  %v15265_v3 = vld [vmem:[#allocation46_spill] sm:$0xff]  ;;  %v15266_v9 = vld [vmem:[#allocation57_spill] sm:$0xff] }
 0x593   : > { %4867 = vmatmul.bf16.gmra.mxu3 %v15217_v14  ;;  %5045 = vmatmul.bf16.gmra.mxu1 %v15218_v59 }
 0x594   : > { %v5004_v42 = vadd.f32 %v5003_v16, %v4915_v25 }
 0x595   : > { %v4739_v29 = vpop.f32.mrf.mxu2 }
 0x596   : > { %v6871_v7 = vmul.f32 0.2, %v5004_v42  ;;  %v4740_v30 = vadd.f32 %v4739_v29, %v13553_v52  ;;  %v4828_v0 = vpop.f32.mrf.mxu3  ;;  %v15263_v29 = vld [vmem:[#allocation23_spill] sm:$0xff] }
 0x597   : > { %v4919_v60 = vpop.f32.mrf.mxu0 }
 0x598   : > { %v7127_v55 = vmax.f32 %v5004_v42, %v6871_v7  ;;  %v4829_v12 = vadd.f32 %v4828_v0, %v4740_v30  ;;  %v5008_v50 = vpop.f32.mrf.mxu1 }
 0x59a   : > { %v13566_v45 = vpack.c.bf16 %v7127_v55, %v7119_v36  ;;  %v4918_v21 = vadd.f32 %v4917_v23, %v4829_v12  ;;  %v10011_v55 = vor.u32 %v11387_v48, %v10008_v35  ;;  %v10264_v12 = vld [vmem:[#allocation11 + $0x268] sm:$0xf0] }
 0x59c   : > { %15262 = vst [vmem:[#allocation84_spill] sm:$0xff] %v13566_v45  ;;  %v5007_v33 = vadd.f32 %v5006_v10, %v4918_v21  ;;  %5087 = vmatpush.bf16.msra.mxu2 %v10011_v55 }
 0x59d   : > { %v4741_v61 = vpop.f32.mrf.mxu2 }
 0x59e   : > { %v4742_v16 = vadd.f32 %v4741_v61, %v13553_v52  ;;  %v4830_v62 = vpop.f32.mrf.mxu3  ;;  %v6879_v42 = vmul.f32 0.2, %v5007_v33 }
 0x59f   : > { %v4922_v39 = vpop.f32.mrf.mxu0 }
 0x5a0   : > { %v4831_v20 = vadd.f32 %v4830_v62, %v4742_v16  ;;  %v5011_v19 = vpop.f32.mrf.mxu1  ;;  %v7135_v62 = vmax.f32 %v5007_v33, %v6879_v42 }
 0x5a2   : > { %v4920_v25 = vadd.f32 %v4919_v60, %v4831_v20  ;;  %4783 = vmatmul.bf16.gmra.mxu2 %v15263_v29  ;;  %4961 = vmatmul.bf16.gmra.mxu0 %v15264_v28  ;;  %v11451_v60 = vld [vmem:[#allocation11 + $0x24c] sm:$0xf] }
 0x5a3   : > { %4872 = vmatmul.bf16.gmra.mxu3 %v15265_v3  ;;  %5050 = vmatmul.bf16.gmra.mxu1 %v15266_v9  ;;  %v10267_v16 = vor.u32 %v11451_v60, %v10264_v12  ;;  %v11515_v3 = vld [vmem:[#allocation11 + $0x44c] sm:$0xf] }
 0x5a4   : > { %v5009_v7 = vadd.f32 %v5008_v50, %v4920_v25  ;;  %v10520_v28 = vld [vmem:[#allocation11 + $0x468] sm:$0xf0] }
 0x5a5   : > { %v4744_v23 = vpop.f32.mrf.mxu2  ;;  %5176 = vmatpush.bf16.msra.mxu3 %v10267_v16  ;;  %v10523_v35 = vor.u32 %v11515_v3, %v10520_v28  ;;  %v11579_v28 = vld [vmem:[#allocation11 + $0x64c] sm:$0xf] }
 0x5a6   : > { %v6887_v10 = vmul.f32 0.2, %v5009_v7  ;;  %v4745_v30 = vadd.f32 %v4744_v23, %v13553_v52  ;;  %v4833_v0 = vpop.f32.mrf.mxu3  ;;  %v10776_v3 = vld [vmem:[#allocation11 + $0x668] sm:$0xf0] }
 0x5a7   : > { %v4924_v36 = vpop.f32.mrf.mxu0  ;;  %5265 = vmatpush.bf16.msra.mxu0 %v10523_v35 }
 0x5a8   : > { %v4834_v21 = vadd.f32 %v4833_v0, %v4745_v30  ;;  %v5013_v61 = vpop.f32.mrf.mxu1  ;;  %v7143_v20 = vmax.f32 %v5009_v7, %v6887_v10  ;;  %v10779_v7 = vor.u32 %v11579_v28, %v10776_v3 }
 0x5aa   : > { %v4923_v32 = vadd.f32 %v4922_v39, %v4834_v21  ;;  %v13574_v50 = vpack.c.bf16 %v7143_v20, %v7135_v62  ;;  %5354 = vmatpush.bf16.msra.mxu1 %v10779_v7  ;;  %v10232_v7 = vld [vmem:[#allocation11 + $0x228] sm:$0xf0] }
 0x5ac   : > { %15267 = vst [vmem:[#allocation85_spill] sm:$0xff] %v13574_v50  ;;  %v5012_v25 = vadd.f32 %v5011_v19, %v4923_v32  ;;  %v10488_v50 = vld [vmem:[#allocation11 + $0x428] sm:$0xf0] }
 0x5ad   : > { %v4746_v45 = vpop.f32.mrf.mxu2 }
 0x5ae   : > { %v4747_v23 = vadd.f32 %v4746_v45, %v13553_v52  ;;  %v4835_v9 = vpop.f32.mrf.mxu3  ;;  %v6895_v32 = vmul.f32 0.2, %v5012_v25 }
 0x5af   : > { %v4927_v48 = vpop.f32.mrf.mxu0 }
 0x5b0   : > { %v4836_v29 = vadd.f32 %v4835_v9, %v4747_v23  ;;  %v5016_v30 = vpop.f32.mrf.mxu1 }
 0x5b2   : > { %v4925_v0 = vadd.f32 %v4924_v36, %v4836_v29  ;;  %4788 = vmatmul.bf16.gmra.mxu2 %v13052_v31  ;;  %4966 = vmatmul.bf16.gmra.mxu0 %v13248_v57  ;;  %v7151_v36 = vmax.f32 %v5012_v25, %v6895_v32  ;;  %v15269_v25 = vld [vmem:[#allocation59_spill] sm:$0xff] }
 0x5b3   : > { %4877 = vmatmul.bf16.gmra.mxu3 %v13045_v49  ;;  %5055 = vmatmul.bf16.gmra.mxu1 %v13241_v27 }
 0x5b4   : > { %v5014_v33 = vadd.f32 %v5013_v61, %v4925_v0 }
 0x5b5   : > { %v4749_v45 = vpop.f32.mrf.mxu2 }
 0x5b6   : > { %v6903_v39 = vmul.f32 0.2, %v5014_v33  ;;  %v4750_v19 = vadd.f32 %v4749_v45, %v13553_v52  ;;  %v4838_v42 = vpop.f32.mrf.mxu3 }
 0x5b7   : > { %v4929_v9 = vpop.f32.mrf.mxu0 }
 0x5b8   : > { %v4839_v29 = vadd.f32 %v4838_v42, %v4750_v19  ;;  %v5018_v10 = vpop.f32.mrf.mxu1  ;;  %v7159_v55 = vmax.f32 %v5014_v33, %v6903_v39  ;;  %v11379_v19 = vld [vmem:[#allocation11 + $0xc] sm:$0xf] }
 0x5b9   : > { %v9976_v42 = vld [vmem:[#allocation11 + $0x28] sm:$0xf0] }
 0x5ba   : > { %v4928_v60 = vadd.f32 %v4927_v48, %v4839_v29  ;;  %v13582_v12 = vpack.c.bf16 %v7159_v55, %v7151_v36  ;;  %v9979_v3 = vor.u32 %v11379_v19, %v9976_v42 }
 0x5bc   : > { %15268 = vst [vmem:[#allocation86_spill] sm:$0xff] %v13582_v12  ;;  %v5017_v21 = vadd.f32 %v5016_v30, %v4928_v60  ;;  %5088 = vmatpush.bf16.msra.mxu2 %v9979_v3  ;;  %v11507_v12 = vld [vmem:[#allocation11 + $0x40c] sm:$0xf] }
 0x5bd   : > { %v4751_v16 = vpop.f32.mrf.mxu2  ;;  %v10491_v42 = vor.u32 %v11507_v12, %v10488_v50  ;;  %v11571_v50 = vld [vmem:[#allocation11 + $0x60c] sm:$0xf] }
 0x5be   : > { %v4752_v61 = vadd.f32 %v4751_v16, %v13553_v52  ;;  %v4840_v62 = vpop.f32.mrf.mxu3  ;;  %v6911_v48 = vmul.f32 0.2, %v5017_v21  ;;  %v10744_v12 = vld [vmem:[#allocation11 + $0x628] sm:$0xf0] }
 0x5bf   : > { %v4932_v20 = vpop.f32.mrf.mxu0  ;;  %5266 = vmatpush.bf16.msra.mxu0 %v10491_v42 }
 0x5c0   : > { %v4841_v23 = vadd.f32 %v4840_v62, %v4752_v61  ;;  %v5021_v35 = vpop.f32.mrf.mxu1  ;;  %v7167_v60 = vmax.f32 %v5017_v21, %v6911_v48 }
 0x5c2   : > { %v4930_v0 = vadd.f32 %v4929_v9, %v4841_v23  ;;  %4793 = vmatmul.bf16.gmra.mxu2 %v13064_v56  ;;  %4971 = vmatmul.bf16.gmra.mxu0 %v13260_v15  ;;  %v11443_v9 = vld [vmem:[#allocation11 + $0x20c] sm:$0xf] }
 0x5c3   : > { %4882 = vmatmul.bf16.gmra.mxu3 %v15179_v17  ;;  %5060 = vmatmul.bf16.gmra.mxu1 %v15269_v25  ;;  %v10235_v55 = vor.u32 %v11443_v9, %v10232_v7  ;;  %v10747_v9 = vor.u32 %v11571_v50, %v10744_v12  ;;  %v15273_v50 = vld [vmem:[#allocation62_spill] sm:$0xff]  ;;  %v10206_v12 = vld [vmem:[#allocation11 + $0x1d0] sm:$0xf] }
 0x5c4   : > { %v5019_v32 = vadd.f32 %v5018_v10, %v4930_v0 }
 0x5c5   : > { %v4754_v33 = vpop.f32.mrf.mxu2  ;;  %5177 = vmatpush.bf16.msra.mxu3 %v10235_v55  ;;  %5355 = vmatpush.bf16.msra.mxu1 %v10747_v9  ;;  %v11440_v9 = vld [vmem:[#allocation11 + $0x1ec] sm:$0xf0] }
 0x5c6   : > { %v6919_v30 = vmul.f32 0.2, %v5019_v32  ;;  %v4755_v45 = vadd.f32 %v4754_v33, %v13553_v52  ;;  %v4843_v39 = vpop.f32.mrf.mxu3 }
 0x5c7   : > { %v4934_v28 = vpop.f32.mrf.mxu0 }
 0x5c8   : > { %v4844_v29 = vadd.f32 %v4843_v39, %v4755_v45  ;;  %v5023_v36 = vpop.f32.mrf.mxu1  ;;  %v7175_v16 = vmax.f32 %v5019_v32, %v6919_v30 }
 0x5ca   : > { %v4933_v61 = vadd.f32 %v4932_v20, %v4844_v29  ;;  %v13590_v10 = vpack.c.bf16 %v7175_v16, %v7167_v60 }
 0x5cc   : > { %15270 = vst [vmem:[#allocation87_spill] sm:$0xff] %v13590_v10  ;;  %v5022_v62 = vadd.f32 %v5021_v35, %v4933_v61 }
 0x5cd   : > { %v4756_v23 = vpop.f32.mrf.mxu2 }
 0x5ce   : > { %v4757_v0 = vadd.f32 %v4756_v23, %v13553_v52  ;;  %v4845_v33 = vpop.f32.mrf.mxu3  ;;  %v6927_v21 = vmul.f32 0.2, %v5022_v62 }
 0x5cf   : > { %v4937_v19 = vpop.f32.mrf.mxu0 }
 0x5d0   : > { %v4846_v25 = vadd.f32 %v4845_v33, %v4757_v0  ;;  %v5026_v45 = vpop.f32.mrf.mxu1  ;;  %v7183_v7 = vmax.f32 %v5022_v62, %v6927_v21  ;;  %v15275_v62 = vld [vmem:[#allocation61_spill] sm:$0xff] }
 0x5d2   : > { %v4935_v39 = vadd.f32 %v4934_v28, %v4846_v25  ;;  %4798 = vmatmul.bf16.gmra.mxu2 %v15181_v54  ;;  %4976 = vmatmul.bf16.gmra.mxu0 %v13272_v5 }
 0x5d3   : > { %4887 = vmatmul.bf16.gmra.mxu3 %v15182_v2  ;;  %5065 = vmatmul.bf16.gmra.mxu1 %v15226_v46 }
 0x5d4   : > { %v5024_v20 = vadd.f32 %v5023_v36, %v4935_v39 }
 0x5d5   : > { %v4759_v35 = vpop.f32.mrf.mxu2 }
 0x5d6   : > { %v6935_v48 = vmul.f32 0.2, %v5024_v20  ;;  %v4760_v32 = vadd.f32 %v4759_v35, %v13553_v52  ;;  %v4848_v30 = vpop.f32.mrf.mxu3  ;;  %v15272_v35 = vld [vmem:[#allocation28_spill] sm:$0xff] }
 0x5d7   : > { %v4939_v3 = vpop.f32.mrf.mxu0 }
 0x5d8   : > { %v4849_v25 = vadd.f32 %v4848_v30, %v4760_v32  ;;  %v5028_v28 = vpop.f32.mrf.mxu1  ;;  %v7191_v29 = vmax.f32 %v5024_v20, %v6935_v48  ;;  %v15274_v32 = vld [vmem:[#allocation27_spill] sm:$0xff] }
 0x5da   : > { %v4938_v55 = vadd.f32 %v4937_v19, %v4849_v25  ;;  %v13598_v60 = vpack.c.bf16 %v7191_v29, %v7183_v7  ;;  %v10207_v7 = vor.u32 %v11440_v9, %v10206_v12  ;;  %v11504_v29 = vld [vmem:[#allocation11 + $0x3ec] sm:$0xf0] }
 0x5dc   : > { %15271 = vst [vmem:[#allocation88_spill] sm:$0xff] %v13598_v60  ;;  %v5027_v16 = vadd.f32 %v5026_v45, %v4938_v55  ;;  %5437 = vmatpush.bf16.msrb.mxu2 %v10207_v7 }
 0x5dd   : > { %v4761_v61 = vpop.f32.mrf.mxu2 }
 0x5de   : > { %v4762_v36 = vadd.f32 %v4761_v61, %v13553_v52  ;;  %v4850_v23 = vpop.f32.mrf.mxu3  ;;  %v6943_v19 = vmul.f32 0.2, %v5027_v16 }
 0x5df   : > { %v4942_v0 = vpop.f32.mrf.mxu0 }
 0x5e0   : > { %v4851_v33 = vadd.f32 %v4850_v23, %v4762_v36  ;;  %v5031_v42 = vpop.f32.mrf.mxu1  ;;  %v7199_v23 = vmax.f32 %v5027_v16, %v6943_v19 }
 0x5e2   : > { %v4940_v39 = vadd.f32 %v4939_v3, %v4851_v33  ;;  %4803 = vmatmul.bf16.gmra.mxu2 %v15272_v35  ;;  %4981 = vmatmul.bf16.gmra.mxu0 %v15273_v50  ;;  %v10462_v3 = vld [vmem:[#allocation11 + $0x3d0] sm:$0xf] }
 0x5e3   : > { %4892 = vmatmul.bf16.gmra.mxu3 %v15274_v32  ;;  %5070 = vmatmul.bf16.gmra.mxu1 %v15275_v62  ;;  %v10463_v36 = vor.u32 %v11504_v29, %v10462_v3  ;;  %v10718_v32 = vld [vmem:[#allocation11 + $0x5d0] sm:$0xf] }
 0x5e4   : > { %v5029_v21 = vadd.f32 %v5028_v28, %v4940_v39  ;;  %v11568_v50 = vld [vmem:[#allocation11 + $0x5ec] sm:$0xf0] }
 0x5e5   : > { %v4764_v20 = vpop.f32.mrf.mxu2  ;;  %5526 = vmatpush.bf16.msrb.mxu3 %v10463_v36  ;;  %v10719_v9 = vor.u32 %v11568_v50, %v10718_v32  ;;  %v10974_v50 = vld [vmem:[#allocation11 + $0x7d0] sm:$0xf] }
 0x5e6   : > { %v6951_v45 = vmul.f32 0.2, %v5029_v21  ;;  %v4765_v48 = vadd.f32 %v4764_v20, %v13553_v52  ;;  %v4853_v30 = vpop.f32.mrf.mxu3  ;;  %v11632_v32 = vld [vmem:[#allocation11 + $0x7ec] sm:$0xf0] }
 0x5e7   : > { %v4944_v25 = vpop.f32.mrf.mxu0  ;;  %5615 = vmatpush.bf16.msrb.mxu0 %v10719_v9 }
 0x5e8   : > { %v4854_v55 = vadd.f32 %v4853_v30, %v4765_v48  ;;  %v5033_v61 = vpop.f32.mrf.mxu1  ;;  %v7207_v33 = vmax.f32 %v5029_v21, %v6951_v45  ;;  %v10975_v21 = vor.u32 %v11632_v32, %v10974_v50  ;;  %v15279_v50 = vld [vmem:[#allocation32_spill] sm:$0xff] }
 0x5e9   : > { %v10174_v32 = vld [vmem:[#allocation11 + $0x190] sm:$0xf] }
 0x5ea   : > { %v4943_v60 = vadd.f32 %v4942_v0, %v4854_v55  ;;  %v13606_v28 = vpack.c.bf16 %v7207_v33, %v7199_v23  ;;  %5704 = vmatpush.bf16.msrb.mxu1 %v10975_v21  ;;  %v11432_v21 = vld [vmem:[#allocation11 + $0x1ac] sm:$0xf0] }
 0x5ec   : > { %15276 = vst [vmem:[#allocation89_spill] sm:$0xff] %v13606_v28  ;;  %v5032_v39 = vadd.f32 %v5031_v42, %v4943_v60 }
 0x5ed   : > { %v4766_v10 = vpop.f32.mrf.mxu2 }
 0x5ee   : > { %v4767_v20 = vadd.f32 %v4766_v10, %v13553_v52  ;;  %v4855_v62 = vpop.f32.mrf.mxu3  ;;  %v6959_v60 = vmul.f32 0.2, %v5032_v39 }
 0x5ef   : > { %v4947_v12 = vpop.f32.mrf.mxu0 }
 0x5f0   : > { %v4856_v35 = vadd.f32 %v4855_v62, %v4767_v20  ;;  %v5036_v48 = vpop.f32.mrf.mxu1 }
 0x5f2   : > { %v4945_v30 = vadd.f32 %v4944_v25, %v4856_v35  ;;  %4808 = vmatmul.bf16.gmra.mxu2 %v15187_v44  ;;  %4986 = vmatmul.bf16.gmra.mxu0 %v13297_v53  ;;  %v7215_v25 = vmax.f32 %v5032_v39, %v6959_v60  ;;  %v15281_v39 = vld [vmem:[#allocation31_spill] sm:$0xff] }
 0x5f3   : > { %4897 = vmatmul.bf16.gmra.mxu3 %v15188_v37  ;;  %5075 = vmatmul.bf16.gmra.mxu1 %v13289_v24 }
 0x5f4   : > { %v5034_v16 = vadd.f32 %v5033_v61, %v4945_v30 }
 0x5f5   : > { %v4769_v10 = vpop.f32.mrf.mxu2 }
 0x5f6   : > { %v6967_v0 = vmul.f32 0.2, %v5034_v16  ;;  %v4770_v42 = vadd.f32 %v4769_v10, %v13553_v52  ;;  %v4858_v19 = vpop.f32.mrf.mxu3  ;;  %v15278_v10 = vld [vmem:[#allocation36_spill] sm:$0xff] }
 0x5f7   : > { %v4949_v62 = vpop.f32.mrf.mxu0 }
 0x5f8   : > { %v4859_v35 = vadd.f32 %v4858_v19, %v4770_v42  ;;  %v5038_v45 = vpop.f32.mrf.mxu1  ;;  %v7223_v7 = vmax.f32 %v5034_v16, %v6967_v0  ;;  %v15280_v42 = vld [vmem:[#allocation35_spill] sm:$0xff] }
 0x5fa   : > { %v4948_v3 = vadd.f32 %v4947_v12, %v4859_v35  ;;  %v13614_v29 = vpack.c.bf16 %v7223_v7, %v7215_v25  ;;  %v10175_v25 = vor.u32 %v11432_v21, %v10174_v32  ;;  %v11496_v7 = vld [vmem:[#allocation11 + $0x3ac] sm:$0xf0] }
 0x5fc   : > { %15277 = vst [vmem:[#allocation90_spill] sm:$0xff] %v13614_v29  ;;  %v5037_v55 = vadd.f32 %v5036_v48, %v4948_v3  ;;  %5438 = vmatpush.bf16.msrb.mxu2 %v10175_v25 }
 0x5fd   : > { %v4771_v36 = vpop.f32.mrf.mxu2 }
 0x5fe   : > { %v4772_v61 = vadd.f32 %v4771_v36, %v13553_v52  ;;  %v4860_v23 = vpop.f32.mrf.mxu3  ;;  %v6975_v12 = vmul.f32 0.2, %v5037_v55 }
 0x5ff   : > { %v4952_v33 = vpop.f32.mrf.mxu0 }
 0x600   : > { %v4861_v20 = vadd.f32 %v4860_v23, %v4772_v61  ;;  %v5041_v9 = vpop.f32.mrf.mxu1  ;;  %v7231_v23 = vmax.f32 %v5037_v55, %v6975_v12 }
 0x602   : > { %v4950_v30 = vadd.f32 %v4949_v62, %v4861_v20  ;;  %5089 = vmatmul.bf16.vlgmr.msra.gmra.mxu2 %v15278_v10  ;;  %5267 = vmatmul.bf16.vlgmr.msra.gmra.mxu0 %v15279_v50  ;;  %v10430_v62 = vld [vmem:[#allocation11 + $0x390] sm:$0xf] }
 0x603   : > { %5178 = vmatmul.bf16.vlgmr.msra.gmra.mxu3 %v15280_v42  ;;  %5356 = vmatmul.bf16.vlgmr.msra.gmra.mxu1 %v15281_v39  ;;  %v10431_v61 = vor.u32 %v11496_v7, %v10430_v62  ;;  %v10686_v42 = vld [vmem:[#allocation11 + $0x590] sm:$0xf] }
 0x604   : > { %v5039_v60 = vadd.f32 %v5038_v45, %v4950_v30  ;;  %v11560_v50 = vld [vmem:[#allocation11 + $0x5ac] sm:$0xf0] }
 0x605   : > { %v4774_v16 = vpop.f32.mrf.mxu2  ;;  %5527 = vmatpush.bf16.msrb.mxu3 %v10431_v61  ;;  %v10687_v21 = vor.u32 %v11560_v50, %v10686_v42  ;;  %v10942_v50 = vld [vmem:[#allocation11 + $0x790] sm:$0xf] }
 0x606   : > { %v6983_v48 = vmul.f32 0.2, %v5039_v60  ;;  %v4775_v0 = vadd.f32 %v4774_v16, %v13553_v52  ;;  %v4863_v19 = vpop.f32.mrf.mxu3  ;;  %v11624_v42 = vld [vmem:[#allocation11 + $0x7ac] sm:$0xf0] }
 0x607   : > { %v4954_v35 = vpop.f32.mrf.mxu0  ;;  %5616 = vmatpush.bf16.msrb.mxu0 %v10687_v21 }
 0x608   : > { %v4864_v3 = vadd.f32 %v4863_v19, %v4775_v0  ;;  %v5043_v36 = vpop.f32.mrf.mxu1  ;;  %v7239_v20 = vmax.f32 %v5039_v60, %v6983_v48  ;;  %v10943_v60 = vor.u32 %v11624_v42, %v10942_v50  ;;  %v15285_v50 = vld [vmem:[#allocation47_spill] sm:$0xff]  ;;  %v10142_v42 = vld [vmem:[#allocation11 + $0x150] sm:$0xf] }
 0x60a   : > { %v4953_v29 = vadd.f32 %v4952_v33, %v4864_v3  ;;  %v13622_v45 = vpack.c.bf16 %v7239_v20, %v7231_v23  ;;  %5705 = vmatpush.bf16.msrb.mxu1 %v10943_v60  ;;  %v11424_v60 = vld [vmem:[#allocation11 + $0x16c] sm:$0xf0] }
 0x60c   : > { %15282 = vst [vmem:[#allocation91_spill] sm:$0xff] %v13622_v45  ;;  %v5042_v30 = vadd.f32 %v5041_v9, %v4953_v29 }
 0x60d   : > { %v4776_v28 = vpop.f32.mrf.mxu2 }
 0x60e   : > { %v4777_v16 = vadd.f32 %v4776_v28, %v13553_v52  ;;  %v4865_v39 = vpop.f32.mrf.mxu3  ;;  %v6991_v29 = vmul.f32 0.2, %v5042_v30 }
 0x60f   : > { %v4957_v32 = vpop.f32.mrf.mxu0 }
 0x610   : > { %v4866_v10 = vadd.f32 %v4865_v39, %v4777_v16  ;;  %v5046_v0 = vpop.f32.mrf.mxu1 }
 0x612   : > { %v4955_v19 = vadd.f32 %v4954_v35, %v4866_v10  ;;  %5094 = vmatmul.bf16.gmra.mxu2 %v12880_v63  ;;  %5272 = vmatmul.bf16.gmra.mxu0 %v13128_v11  ;;  %v7247_v35 = vmax.f32 %v5042_v30, %v6991_v29  ;;  %v15287_v30 = vld [vmem:[#allocation34_spill] sm:$0xff] }
 0x613   : > { %5183 = vmatmul.bf16.gmra.mxu3 %v12863_v41  ;;  %5361 = vmatmul.bf16.gmra.mxu1 %v15193_v51 }
 0x614   : > { %v5044_v55 = vadd.f32 %v5043_v36, %v4955_v19 }
 0x615   : > { %v4779_v28 = vpop.f32.mrf.mxu2 }
 0x616   : > { %v6999_v33 = vmul.f32 0.2, %v5044_v55  ;;  %v4780_v9 = vadd.f32 %v4779_v28, %v13553_v52  ;;  %v4868_v12 = vpop.f32.mrf.mxu3  ;;  %v15284_v28 = vld [vmem:[#allocation38_spill] sm:$0xff] }
 0x617   : > { %v4959_v39 = vpop.f32.mrf.mxu0 }
 0x618   : > { %v4869_v10 = vadd.f32 %v4868_v12, %v4780_v9  ;;  %v5048_v48 = vpop.f32.mrf.mxu1  ;;  %v7255_v25 = vmax.f32 %v5044_v55, %v6999_v33  ;;  %v15286_v9 = vld [vmem:[#allocation37_spill] sm:$0xff] }
 0x61a   : > { %v4958_v62 = vadd.f32 %v4957_v32, %v4869_v10  ;;  %v13630_v7 = vpack.c.bf16 %v7255_v25, %v7247_v35  ;;  %v10143_v35 = vor.u32 %v11424_v60, %v10142_v42  ;;  %v11488_v25 = vld [vmem:[#allocation11 + $0x36c] sm:$0xf0] }
 0x61c   : > { %15283 = vst [vmem:[#allocation92_spill] sm:$0xff] %v13630_v7  ;;  %v5047_v3 = vadd.f32 %v5046_v0, %v4958_v62  ;;  %5439 = vmatpush.bf16.msrb.mxu2 %v10143_v35 }
 0x61d   : > { %v4781_v61 = vpop.f32.mrf.mxu2 }
 0x61e   : > { %v4782_v36 = vadd.f32 %v4781_v61, %v13553_v52  ;;  %v4870_v23 = vpop.f32.mrf.mxu3  ;;  %v7007_v32 = vmul.f32 0.2, %v5047_v3 }
 0x61f   : > { %v4962_v20 = vpop.f32.mrf.mxu0 }
 0x620   : > { %v4871_v16 = vadd.f32 %v4870_v23, %v4782_v36  ;;  %v5051_v21 = vpop.f32.mrf.mxu1  ;;  %v7263_v23 = vmax.f32 %v5047_v3, %v7007_v32 }
 0x622   : > { %v4960_v19 = vadd.f32 %v4959_v39, %v4871_v16  ;;  %5099 = vmatmul.bf16.gmra.mxu2 %v15284_v28  ;;  %5277 = vmatmul.bf16.gmra.mxu0 %v15285_v50  ;;  %v10398_v39 = vld [vmem:[#allocation11 + $0x350] sm:$0xf] }
 0x623   : > { %5188 = vmatmul.bf16.gmra.mxu3 %v15286_v9  ;;  %5366 = vmatmul.bf16.gmra.mxu1 %v15287_v30  ;;  %v10399_v36 = vor.u32 %v11488_v25, %v10398_v39  ;;  %v10654_v9 = vld [vmem:[#allocation11 + $0x550] sm:$0xf] }
 0x624   : > { %v5049_v29 = vadd.f32 %v5048_v48, %v4960_v19  ;;  %v11552_v50 = vld [vmem:[#allocation11 + $0x56c] sm:$0xf0] }
 0x625   : > { %v4784_v55 = vpop.f32.mrf.mxu2  ;;  %5528 = vmatpush.bf16.msrb.mxu3 %v10399_v36  ;;  %v10655_v60 = vor.u32 %v11552_v50, %v10654_v9  ;;  %v10910_v50 = vld [vmem:[#allocation11 + $0x750] sm:$0xf] }
 0x626   : > { %v7015_v0 = vmul.f32 0.2, %v5049_v29  ;;  %v4785_v33 = vadd.f32 %v4784_v55, %v13553_v52  ;;  %v4873_v12 = vpop.f32.mrf.mxu3  ;;  %v11616_v9 = vld [vmem:[#allocation11 + $0x76c] sm:$0xf0] }
 0x627   : > { %v4964_v10 = vpop.f32.mrf.mxu0  ;;  %5617 = vmatpush.bf16.msrb.mxu0 %v10655_v60 }
 0x628   : > { %v4874_v62 = vadd.f32 %v4873_v12, %v4785_v33  ;;  %v5053_v61 = vpop.f32.mrf.mxu1  ;;  %v7271_v16 = vmax.f32 %v5049_v29, %v7015_v0  ;;  %v10911_v29 = vor.u32 %v11616_v9, %v10910_v50  ;;  %v15291_v50 = vld [vmem:[#allocation50_spill] sm:$0xff]  ;;  %v10110_v9 = vld [vmem:[#allocation11 + $0x110] sm:$0xf] }
 0x62a   : > { %v4963_v7 = vadd.f32 %v4962_v20, %v4874_v62  ;;  %v13638_v48 = vpack.c.bf16 %v7271_v16, %v7263_v23  ;;  %5706 = vmatpush.bf16.msrb.mxu1 %v10911_v29  ;;  %v11416_v29 = vld [vmem:[#allocation11 + $0x12c] sm:$0xf0] }
 0x62c   : > { %15288 = vst [vmem:[#allocation93_spill] sm:$0xff] %v13638_v48  ;;  %v5052_v19 = vadd.f32 %v5051_v21, %v4963_v7 }
 0x62d   : > { %v4786_v45 = vpop.f32.mrf.mxu2 }
 0x62e   : > { %v4787_v55 = vadd.f32 %v4786_v45, %v13553_v52  ;;  %v4875_v30 = vpop.f32.mrf.mxu3  ;;  %v7023_v7 = vmul.f32 0.2, %v5052_v19 }
 0x62f   : > { %v4967_v42 = vpop.f32.mrf.mxu0 }
 0x630   : > { %v4876_v28 = vadd.f32 %v4875_v30, %v4787_v55  ;;  %v5056_v33 = vpop.f32.mrf.mxu1 }
 0x632   : > { %v4965_v12 = vadd.f32 %v4964_v10, %v4876_v28  ;;  %5104 = vmatmul.bf16.gmra.mxu2 %v12928_v22  ;;  %5282 = vmatmul.bf16.gmra.mxu0 %v13152_v6  ;;  %v7279_v10 = vmax.f32 %v5052_v19, %v7023_v7  ;;  %v15293_v19 = vld [vmem:[#allocation49_spill] sm:$0xff] }
 0x633   : > { %5193 = vmatmul.bf16.gmra.mxu3 %v12911_v18  ;;  %5371 = vmatmul.bf16.gmra.mxu1 %v15199_v58 }
 0x634   : > { %v5054_v3 = vadd.f32 %v5053_v61, %v4965_v12 }
 0x635   : > { %v4789_v45 = vpop.f32.mrf.mxu2 }
 0x636   : > { %v7031_v20 = vmul.f32 0.2, %v5054_v3  ;;  %v4790_v21 = vadd.f32 %v4789_v45, %v13553_v52  ;;  %v4878_v32 = vpop.f32.mrf.mxu3  ;;  %v15290_v45 = vld [vmem:[#allocation40_spill] sm:$0xff] }
 0x637   : > { %v4969_v30 = vpop.f32.mrf.mxu0 }
 0x638   : > { %v4879_v28 = vadd.f32 %v4878_v32, %v4790_v21  ;;  %v5058_v0 = vpop.f32.mrf.mxu1  ;;  %v7287_v35 = vmax.f32 %v5054_v3, %v7031_v20  ;;  %v15292_v21 = vld [vmem:[#allocation39_spill] sm:$0xff] }
 0x63a   : > { %v4968_v39 = vadd.f32 %v4967_v42, %v4879_v28  ;;  %v13646_v25 = vpack.c.bf16 %v7287_v35, %v7279_v10  ;;  %v10111_v10 = vor.u32 %v11416_v29, %v10110_v9  ;;  %v11480_v35 = vld [vmem:[#allocation11 + $0x32c] sm:$0xf0] }
 0x63c   : > { %15289 = vst [vmem:[#allocation94_spill] sm:$0xff] %v13646_v25  ;;  %v5057_v62 = vadd.f32 %v5056_v33, %v4968_v39  ;;  %5440 = vmatpush.bf16.msrb.mxu2 %v10111_v10 }
 0x63d   : > { %v4791_v36 = vpop.f32.mrf.mxu2 }
 0x63e   : > { %v4792_v61 = vadd.f32 %v4791_v36, %v13553_v52  ;;  %v4880_v23 = vpop.f32.mrf.mxu3  ;;  %v7039_v42 = vmul.f32 0.2, %v5057_v62 }
 0x63f   : > { %v4972_v16 = vpop.f32.mrf.mxu0 }
 0x640   : > { %v4881_v55 = vadd.f32 %v4880_v23, %v4792_v61  ;;  %v5061_v60 = vpop.f32.mrf.mxu1  ;;  %v7295_v23 = vmax.f32 %v5057_v62, %v7039_v42 }
 0x642   : > { %v4970_v12 = vadd.f32 %v4969_v30, %v4881_v55  ;;  %5109 = vmatmul.bf16.gmra.mxu2 %v15290_v45  ;;  %5287 = vmatmul.bf16.gmra.mxu0 %v15291_v50  ;;  %v10366_v30 = vld [vmem:[#allocation11 + $0x310] sm:$0xf] }
 0x643   : > { %5198 = vmatmul.bf16.gmra.mxu3 %v15292_v21  ;;  %5376 = vmatmul.bf16.gmra.mxu1 %v15293_v19  ;;  %v10367_v61 = vor.u32 %v11480_v35, %v10366_v30  ;;  %v10622_v21 = vld [vmem:[#allocation11 + $0x510] sm:$0xf] }
 0x644   : > { %v5059_v7 = vadd.f32 %v5058_v0, %v4970_v12  ;;  %v11544_v50 = vld [vmem:[#allocation11 + $0x52c] sm:$0xf0] }
 0x645   : > { %v4794_v3 = vpop.f32.mrf.mxu2  ;;  %5529 = vmatpush.bf16.msrb.mxu3 %v10367_v61  ;;  %v10623_v29 = vor.u32 %v11544_v50, %v10622_v21  ;;  %v10878_v50 = vld [vmem:[#allocation11 + $0x710] sm:$0xf] }
 0x646   : > { %v7047_v33 = vmul.f32 0.2, %v5059_v7  ;;  %v4795_v20 = vadd.f32 %v4794_v3, %v13553_v52  ;;  %v4883_v32 = vpop.f32.mrf.mxu3  ;;  %v11608_v21 = vld [vmem:[#allocation11 + $0x72c] sm:$0xf0] }
 0x647   : > { %v4974_v28 = vpop.f32.mrf.mxu0  ;;  %5618 = vmatpush.bf16.msrb.mxu0 %v10623_v29 }
 0x648   : > { %v4884_v39 = vadd.f32 %v4883_v32, %v4795_v20  ;;  %v5063_v36 = vpop.f32.mrf.mxu1  ;;  %v7303_v55 = vmax.f32 %v5059_v7, %v7047_v33  ;;  %v10879_v7 = vor.u32 %v11608_v21, %v10878_v50  ;;  %v15297_v50 = vld [vmem:[#allocation53_spill] sm:$0xff]  ;;  %v10078_v21 = vld [vmem:[#allocation11 + $0xd0] sm:$0xf] }
 0x64a   : > { %v4973_v25 = vadd.f32 %v4972_v16, %v4884_v39  ;;  %v13654_v0 = vpack.c.bf16 %v7303_v55, %v7295_v23  ;;  %5707 = vmatpush.bf16.msrb.mxu1 %v10879_v7  ;;  %v11408_v7 = vld [vmem:[#allocation11 + $0xec] sm:$0xf0] }
 0x64c   : > { %15294 = vst [vmem:[#allocation95_spill] sm:$0xff] %v13654_v0  ;;  %v5062_v12 = vadd.f32 %v5061_v60, %v4973_v25 }
 0x64d   : > { %v4796_v48 = vpop.f32.mrf.mxu2 }
 0x64e   : > { %v4797_v3 = vadd.f32 %v4796_v48, %v13553_v52  ;;  %v4885_v19 = vpop.f32.mrf.mxu3  ;;  %v7055_v25 = vmul.f32 0.2, %v5062_v12 }
 0x64f   : > { %v4977_v9 = vpop.f32.mrf.mxu0 }
 0x650   : > { %v4886_v45 = vadd.f32 %v4885_v19, %v4797_v3  ;;  %v5066_v20 = vpop.f32.mrf.mxu1 }
 0x652   : > { %v4975_v32 = vadd.f32 %v4974_v28, %v4886_v45  ;;  %5114 = vmatmul.bf16.gmra.mxu2 %v12976_v34  ;;  %5292 = vmatmul.bf16.gmra.mxu0 %v13176_v8  ;;  %v7311_v28 = vmax.f32 %v5062_v12, %v7055_v25  ;;  %v15299_v12 = vld [vmem:[#allocation52_spill] sm:$0xff] }
 0x653   : > { %5203 = vmatmul.bf16.gmra.mxu3 %v12959_v1  ;;  %5381 = vmatmul.bf16.gmra.mxu1 %v15205_v40 }
 0x654   : > { %v5064_v62 = vadd.f32 %v5063_v36, %v4975_v32 }
 0x655   : > { %v4799_v48 = vpop.f32.mrf.mxu2 }
 0x656   : > { %v7063_v16 = vmul.f32 0.2, %v5064_v62  ;;  %v4800_v60 = vadd.f32 %v4799_v48, %v13553_v52  ;;  %v4888_v42 = vpop.f32.mrf.mxu3  ;;  %v15296_v48 = vld [vmem:[#allocation42_spill] sm:$0xff] }
 0x657   : > { %v4979_v19 = vpop.f32.mrf.mxu0 }
 0x658   : > { %v4889_v45 = vadd.f32 %v4888_v42, %v4800_v60  ;;  %v5068_v33 = vpop.f32.mrf.mxu1  ;;  %v7319_v10 = vmax.f32 %v5064_v62, %v7063_v16  ;;  %v15298_v60 = vld [vmem:[#allocation41_spill] sm:$0xff] }
 0x65a   : > { %v4978_v30 = vadd.f32 %v4977_v9, %v4889_v45  ;;  %v13662_v35 = vpack.c.bf16 %v7319_v10, %v7311_v28  ;;  %v10079_v28 = vor.u32 %v11408_v7, %v10078_v21  ;;  %v11472_v10 = vld [vmem:[#allocation11 + $0x2ec] sm:$0xf0] }
 0x65b   : > { %v10590_v7 = vld [vmem:[#allocation11 + $0x4d0] sm:$0xf] }
 0x65c   : > { %15295 = vst [vmem:[#allocation96_spill] sm:$0xff] %v13662_v35  ;;  %v5067_v39 = vadd.f32 %v5066_v20, %v4978_v30  ;;  %5441 = vmatpush.bf16.msrb.mxu2 %v10079_v28  ;;  %v10846_v28 = vld [vmem:[#allocation11 + $0x6d0] sm:$0xf] }
 0x65d   : > { %v4801_v61 = vpop.f32.mrf.mxu2 }
 0x65e   : > { %v4802_v36 = vadd.f32 %v4801_v61, %v13553_v52  ;;  %v4890_v23 = vpop.f32.mrf.mxu3  ;;  %v7071_v9 = vmul.f32 0.2, %v5067_v39 }
 0x65f   : > { %v4982_v55 = vpop.f32.mrf.mxu0 }
 0x660   : > { %v4891_v3 = vadd.f32 %v4890_v23, %v4802_v36  ;;  %v5071_v29 = vpop.f32.mrf.mxu1  ;;  %v7327_v23 = vmax.f32 %v5067_v39, %v7071_v9 }
 0x662   : > { %v4980_v32 = vadd.f32 %v4979_v19, %v4891_v3  ;;  %5119 = vmatmul.bf16.gmra.mxu2 %v15296_v48  ;;  %5297 = vmatmul.bf16.gmra.mxu0 %v15297_v50  ;;  %v10334_v19 = vld [vmem:[#allocation11 + $0x2d0] sm:$0xf] }
 0x663   : > { %5208 = vmatmul.bf16.gmra.mxu3 %v15298_v60  ;;  %5386 = vmatmul.bf16.gmra.mxu1 %v15299_v12  ;;  %v10335_v36 = vor.u32 %v11472_v10, %v10334_v19  ;;  %v11536_v48 = vld [vmem:[#allocation11 + $0x4ec] sm:$0xf0] }
 0x664   : > { %v5069_v25 = vadd.f32 %v5068_v33, %v4980_v32  ;;  %v11600_v19 = vld [vmem:[#allocation11 + $0x6ec] sm:$0xf0] }
 0x665   : > { %v4804_v62 = vpop.f32.mrf.mxu2  ;;  %5530 = vmatpush.bf16.msrb.mxu3 %v10335_v36 }
 0x666   : > { %v7079_v20 = vmul.f32 0.2, %v5069_v25  ;;  %v4805_v16 = vadd.f32 %v4804_v62, %v13553_v52  ;;  %v4893_v42 = vpop.f32.mrf.mxu3 }
 0x667   : > { %v4984_v45 = vpop.f32.mrf.mxu0 }
 0x668   : > { %v4894_v30 = vadd.f32 %v4893_v42, %v4805_v16  ;;  %v5073_v61 = vpop.f32.mrf.mxu1  ;;  %v7335_v3 = vmax.f32 %v5069_v25, %v7079_v20  ;;  %v10591_v16 = vor.u32 %v11536_v48, %v10590_v7 }
 0x66a   : > { %v4983_v35 = vadd.f32 %v4982_v55, %v4894_v30  ;;  %v13670_v33 = vpack.c.bf16 %v7335_v3, %v7327_v23  ;;  %5619 = vmatpush.bf16.msrb.mxu0 %v10591_v16  ;;  %v10847_v30 = vor.u32 %v11600_v19, %v10846_v28  ;;  %v10302_v19 = vld [vmem:[#allocation11 + $0x290] sm:$0xf] }
 0x66c   : > { %15300 = vst [vmem:[#allocation97_spill] sm:$0xff] %v13670_v33  ;;  %v5072_v32 = vadd.f32 %v5071_v29, %v4983_v35  ;;  %5708 = vmatpush.bf16.msrb.mxu1 %v10847_v30  ;;  %v11464_v30 = vld [vmem:[#allocation11 + $0x2ac] sm:$0xf0] }
 0x66d   : > { %v4806_v0 = vpop.f32.mrf.mxu2 }
 0x66e   : > { %v4807_v62 = vadd.f32 %v4806_v0, %v13553_v52  ;;  %v4895_v12 = vpop.f32.mrf.mxu3  ;;  %v7087_v35 = vmul.f32 0.2, %v5072_v32 }
 0x66f   : > { %v4987_v60 = vpop.f32.mrf.mxu0 }
 0x670   : > { %v4896_v50 = vadd.f32 %v4895_v12, %v4807_v62  ;;  %v5076_v21 = vpop.f32.mrf.mxu1 }
 0x672   : > { %v4985_v42 = vadd.f32 %v4984_v45, %v4896_v50  ;;  %5124 = vmatmul.bf16.gmra.mxu2 %v13004_v47  ;;  %5302 = vmatmul.bf16.gmra.mxu0 %v13200_v26  ;;  %v7343_v50 = vmax.f32 %v5072_v32, %v7087_v35  ;;  %v15303_v32 = vld [vmem:[#allocation55_spill] sm:$0xff] }
 0x673   : > { %5213 = vmatmul.bf16.gmra.mxu3 %v12997_v13  ;;  %5391 = vmatmul.bf16.gmra.mxu1 %v13193_v4 }
 0x674   : > { %v5074_v39 = vadd.f32 %v5073_v61, %v4985_v42 }
 0x675   : > { %v4809_v0 = vpop.f32.mrf.mxu2 }
 0x676   : > { %v7095_v55 = vmul.f32 0.2, %v5074_v39  ;;  %v4810_v29 = vadd.f32 %v4809_v0, %v13553_v52  ;;  %v4898_v12 = vpop.f32.mrf.mxu3  ;;  %v15302_v0 = vld [vmem:[#allocation44_spill] sm:$0xff] }
 0x677   : > { %v4989_v9 = vpop.f32.mrf.mxu0 }
 0x678   : > { %v4899_v25 = vadd.f32 %v4898_v12, %v4810_v29  ;;  %v5078_v48 = vpop.f32.mrf.mxu1  ;;  %v7351_v20 = vmax.f32 %v5074_v39, %v7095_v55  ;;  %v15304_v39 = vld [vmem:[#allocation43_spill] sm:$0xff]  ;;  %v15305_v55 = vld [vmem:[#allocation54_spill] sm:$0xff] }
 0x67a   : > { %v4988_v45 = vadd.f32 %v4987_v60, %v4899_v25  ;;  %v13678_v10 = vpack.c.bf16 %v7351_v20, %v7343_v50  ;;  %v12069_v60 = vld [vmem:[#allocation13] sm:$0xff]  ;;  %v10046_v20 = vld [vmem:[#allocation11 + $0x90] sm:$0xf] }
 0x67b   : > { %v13683_v35 = vperm.slane %v12069_v60, 3 }
 0x67c   : > { %15301 = vst [vmem:[#allocation98_spill] sm:$0xff] %v13678_v10  ;;  %v5077_v36 = vadd.f32 %v5076_v21, %v4988_v45 }
 0x67d   : > { %v4811_v23 = vpop.f32.mrf.mxu2 }
 0x67e   : > { %v4812_v61 = vadd.f32 %v4811_v23, %v13553_v52  ;;  %v4900_v3 = vpop.f32.mrf.mxu3  ;;  %v7103_v21 = vmul.f32 0.2, %v5077_v36 }
 0x67f   : > { %v5268_v62 = vpop.f32.mrf.mxu0 }
 0x680   : > { %v4901_v7 = vadd.f32 %v4900_v3, %v4812_v61  ;;  %v5357_v16 = vpop.f32.mrf.mxu1  ;;  %v10303_v3 = vor.u32 %v11464_v30, %v10302_v19 }
 0x682   : > { %v4990_v42 = vadd.f32 %v4989_v9, %v4901_v7  ;;  %5129 = vmatmul.bf16.gmra.mxu2 %v15302_v0  ;;  %5307 = vmatmul.bf16.gmra.mxu0 %v15303_v32  ;;  %v11400_v9 = vld [vmem:[#allocation11 + $0xac] sm:$0xf0]  ;;  %v7359_v7 = vmax.f32 %v5077_v36, %v7103_v21 }
 0x683   : > { %5218 = vmatmul.bf16.gmra.mxu3 %v15304_v39  ;;  %5396 = vmatmul.bf16.gmra.mxu1 %v15305_v55  ;;  %v10047_v28 = vor.u32 %v11400_v9, %v10046_v20  ;;  %v10558_v39 = vld [vmem:[#allocation11 + $0x490] sm:$0xf] }
 0x684   : > { %v5079_v29 = vadd.f32 %v5078_v48, %v4990_v42  ;;  %5531 = vmatpush.bf16.msrb.mxu3 %v10303_v3  ;;  %v11528_v32 = vld [vmem:[#allocation11 + $0x4ac] sm:$0xf0] }
 0x685   : > { %v5090_v12 = vpop.f32.mrf.mxu2  ;;  %5442 = vmatpush.bf16.msrb.mxu2 %v10047_v28  ;;  %v10559_v9 = vor.u32 %v11528_v32, %v10558_v39  ;;  %v10814_v32 = vld [vmem:[#allocation11 + $0x690] sm:$0xf] }
 0x686   : > { %v7111_v52 = vmul.f32 0.2, %v5079_v29  ;;  %v5091_v25 = vadd.f32 %v5090_v12, %v13683_v35  ;;  %v5179_v50 = vpop.f32.mrf.mxu3  ;;  %v11592_v39 = vld [vmem:[#allocation11 + $0x6ac] sm:$0xf0] }
 0x687   : > { %v5270_v45 = vpop.f32.mrf.mxu0  ;;  %5620 = vmatpush.bf16.msrb.mxu0 %v10559_v9 }
 0x688   : > { %v5180_v23 = vadd.f32 %v5179_v50, %v5091_v25  ;;  %v5359_v61 = vpop.f32.mrf.mxu1  ;;  %v7367_v60 = vmax.f32 %v5079_v29, %v7111_v52  ;;  %v10815_v29 = vor.u32 %v11592_v39, %v10814_v32  ;;  %v15309_v32 = vld [vmem:[#allocation58_spill] sm:$0xff]  ;;  %v10014_v39 = vld [vmem:[#allocation11 + $0x50] sm:$0xf] }
 0x68a   : > { %v5269_v10 = vadd.f32 %v5268_v62, %v5180_v23  ;;  %v13688_v48 = vpack.c.bf16 %v7367_v60, %v7359_v7  ;;  %5709 = vmatpush.bf16.msrb.mxu1 %v10815_v29  ;;  %v11392_v29 = vld [vmem:[#allocation11 + $0x6c] sm:$0xf0] }
 0x68c   : > { %15306 = vst [vmem:[#allocation99_spill] sm:$0xff] %v13688_v48  ;;  %v5358_v42 = vadd.f32 %v5357_v16, %v5269_v10 }
 0x68d   : > { %v5092_v33 = vpop.f32.mrf.mxu2 }
 0x68e   : > { %v5093_v12 = vadd.f32 %v5092_v33, %v13683_v35  ;;  %v5181_v55 = vpop.f32.mrf.mxu3  ;;  %v6864_v10 = vmul.f32 0.2, %v5358_v42 }
 0x68f   : > { %v5273_v20 = vpop.f32.mrf.mxu0 }
 0x690   : > { %v5182_v0 = vadd.f32 %v5181_v55, %v5093_v12  ;;  %v5362_v25 = vpop.f32.mrf.mxu1 }
 0x692   : > { %v5271_v50 = vadd.f32 %v5270_v45, %v5182_v0  ;;  %5134 = vmatmul.bf16.gmra.mxu2 %v13028_v38  ;;  %5312 = vmatmul.bf16.gmra.mxu0 %v13224_v43  ;;  %v7120_v0 = vmax.f32 %v5358_v42, %v6864_v10  ;;  %v15310_v42 = vld [vmem:[#allocation46_spill] sm:$0xff]  ;;  %v15311_v10 = vld [vmem:[#allocation57_spill] sm:$0xff] }
 0x693   : > { %5223 = vmatmul.bf16.gmra.mxu3 %v15217_v14  ;;  %5401 = vmatmul.bf16.gmra.mxu1 %v15218_v59 }
 0x694   : > { %v5360_v36 = vadd.f32 %v5359_v61, %v5271_v50 }
 0x695   : > { %v5095_v33 = vpop.f32.mrf.mxu2 }
 0x696   : > { %v6872_v62 = vmul.f32 0.2, %v5360_v36  ;;  %v5096_v16 = vadd.f32 %v5095_v33, %v13683_v35  ;;  %v5184_v21 = vpop.f32.mrf.mxu3  ;;  %v15308_v33 = vld [vmem:[#allocation23_spill] sm:$0xff] }
 0x697   : > { %v5275_v55 = vpop.f32.mrf.mxu0 }
 0x698   : > { %v7128_v52 = vmax.f32 %v5360_v36, %v6872_v62  ;;  %v5185_v45 = vadd.f32 %v5184_v21, %v5096_v16  ;;  %v5364_v28 = vpop.f32.mrf.mxu1 }
 0x69a   : > { %v13696_v19 = vpack.c.bf16 %v7128_v52, %v7120_v0  ;;  %v5274_v30 = vadd.f32 %v5273_v20, %v5185_v45  ;;  %v10015_v52 = vor.u32 %v11392_v29, %v10014_v39  ;;  %v11456_v45 = vld [vmem:[#allocation11 + $0x26c] sm:$0xf0] }
 0x69c   : > { %15307 = vst [vmem:[#allocation100_spill] sm:$0xff] %v13696_v19  ;;  %v5363_v23 = vadd.f32 %v5362_v25, %v5274_v30  ;;  %5443 = vmatpush.bf16.msrb.mxu2 %v10015_v52 }
 0x69d   : > { %v5097_v3 = vpop.f32.mrf.mxu2 }
 0x69e   : > { %v5098_v61 = vadd.f32 %v5097_v3, %v13683_v35  ;;  %v5186_v7 = vpop.f32.mrf.mxu3  ;;  %v6880_v36 = vmul.f32 0.2, %v5363_v23 }
 0x69f   : > { %v5278_v60 = vpop.f32.mrf.mxu0 }
 0x6a0   : > { %v5187_v12 = vadd.f32 %v5186_v7, %v5098_v61  ;;  %v5367_v9 = vpop.f32.mrf.mxu1  ;;  %v7136_v7 = vmax.f32 %v5363_v23, %v6880_v36 }
 0x6a2   : > { %v5276_v50 = vadd.f32 %v5275_v55, %v5187_v12  ;;  %5139 = vmatmul.bf16.gmra.mxu2 %v15308_v33  ;;  %5317 = vmatmul.bf16.gmra.mxu0 %v15309_v32  ;;  %v10270_v55 = vld [vmem:[#allocation11 + $0x250] sm:$0xf] }
 0x6a3   : > { %5228 = vmatmul.bf16.gmra.mxu3 %v15310_v42  ;;  %5406 = vmatmul.bf16.gmra.mxu1 %v15311_v10  ;;  %v10271_v61 = vor.u32 %v11456_v45, %v10270_v55  ;;  %v10526_v42 = vld [vmem:[#allocation11 + $0x450] sm:$0xf] }
 0x6a4   : > { %v5365_v62 = vadd.f32 %v5364_v28, %v5276_v50  ;;  %v11520_v32 = vld [vmem:[#allocation11 + $0x46c] sm:$0xf0] }
 0x6a5   : > { %v5100_v20 = vpop.f32.mrf.mxu2  ;;  %5532 = vmatpush.bf16.msrb.mxu3 %v10271_v61  ;;  %v10527_v29 = vor.u32 %v11520_v32, %v10526_v42  ;;  %v10782_v32 = vld [vmem:[#allocation11 + $0x650] sm:$0xf] }
 0x6a6   : > { %v6888_v25 = vmul.f32 0.2, %v5365_v62  ;;  %v5101_v16 = vadd.f32 %v5100_v20, %v13683_v35  ;;  %v5189_v21 = vpop.f32.mrf.mxu3  ;;  %v11584_v42 = vld [vmem:[#allocation11 + $0x66c] sm:$0xf0] }
 0x6a7   : > { %v5280_v0 = vpop.f32.mrf.mxu0  ;;  %5621 = vmatpush.bf16.msrb.mxu0 %v10527_v29 }
 0x6a8   : > { %v5190_v30 = vadd.f32 %v5189_v21, %v5101_v16  ;;  %v5369_v3 = vpop.f32.mrf.mxu1  ;;  %v7144_v12 = vmax.f32 %v5365_v62, %v6888_v25  ;;  %v10783_v62 = vor.u32 %v11584_v42, %v10782_v32 }
 0x6aa   : > { %v5279_v48 = vadd.f32 %v5278_v60, %v5190_v30  ;;  %v13704_v28 = vpack.c.bf16 %v7144_v12, %v7136_v7  ;;  %5710 = vmatpush.bf16.msrb.mxu1 %v10783_v62  ;;  %v11448_v62 = vld [vmem:[#allocation11 + $0x22c] sm:$0xf0] }
 0x6ac   : > { %15312 = vst [vmem:[#allocation101_spill] sm:$0xff] %v13704_v28  ;;  %v5368_v50 = vadd.f32 %v5367_v9, %v5279_v48  ;;  %v11512_v28 = vld [vmem:[#allocation11 + $0x42c] sm:$0xf0] }
 0x6ad   : > { %v5102_v19 = vpop.f32.mrf.mxu2 }
 0x6ae   : > { %v5103_v20 = vadd.f32 %v5102_v19, %v13683_v35  ;;  %v5191_v10 = vpop.f32.mrf.mxu3  ;;  %v6896_v48 = vmul.f32 0.2, %v5368_v50 }
 0x6af   : > { %v5283_v39 = vpop.f32.mrf.mxu0 }
 0x6b0   : > { %v5192_v33 = vadd.f32 %v5191_v10, %v5103_v20  ;;  %v5372_v16 = vpop.f32.mrf.mxu1 }
 0x6b2   : > { %v5281_v21 = vadd.f32 %v5280_v0, %v5192_v33  ;;  %5144 = vmatmul.bf16.gmra.mxu2 %v13052_v31  ;;  %5322 = vmatmul.bf16.gmra.mxu0 %v13248_v57  ;;  %v7152_v0 = vmax.f32 %v5368_v50, %v6896_v48  ;;  %v15314_v50 = vld [vmem:[#allocation59_spill] sm:$0xff] }
 0x6b3   : > { %5233 = vmatmul.bf16.gmra.mxu3 %v13045_v49  ;;  %5411 = vmatmul.bf16.gmra.mxu1 %v13241_v27 }
 0x6b4   : > { %v5370_v23 = vadd.f32 %v5369_v3, %v5281_v21 }
 0x6b5   : > { %v5105_v19 = vpop.f32.mrf.mxu2 }
 0x6b6   : > { %v6904_v60 = vmul.f32 0.2, %v5370_v23  ;;  %v5106_v9 = vadd.f32 %v5105_v19, %v13683_v35  ;;  %v5194_v36 = vpop.f32.mrf.mxu3 }
 0x6b7   : > { %v5285_v10 = vpop.f32.mrf.mxu0 }
 0x6b8   : > { %v5195_v33 = vadd.f32 %v5194_v36, %v5106_v9  ;;  %v5374_v25 = vpop.f32.mrf.mxu1  ;;  %v7160_v52 = vmax.f32 %v5370_v23, %v6904_v60  ;;  %v9982_v9 = vld [vmem:[#allocation11 + $0x10] sm:$0xf] }
 0x6b9   : > { %v11384_v36 = vld [vmem:[#allocation11 + $0x2c] sm:$0xf0] }
 0x6ba   : > { %v5284_v55 = vadd.f32 %v5283_v39, %v5195_v33  ;;  %v13712_v45 = vpack.c.bf16 %v7160_v52, %v7152_v0  ;;  %v9983_v42 = vor.u32 %v11384_v36, %v9982_v9 }
 0x6bc   : > { %15313 = vst [vmem:[#allocation102_spill] sm:$0xff] %v13712_v45  ;;  %v5373_v30 = vadd.f32 %v5372_v16, %v5284_v55  ;;  %5444 = vmatpush.bf16.msrb.mxu2 %v9983_v42  ;;  %v10494_v45 = vld [vmem:[#allocation11 + $0x410] sm:$0xf] }
 0x6bd   : > { %v5107_v61 = vpop.f32.mrf.mxu2  ;;  %v10495_v36 = vor.u32 %v11512_v28, %v10494_v45  ;;  %v10750_v28 = vld [vmem:[#allocation11 + $0x610] sm:$0xf] }
 0x6be   : > { %v5108_v3 = vadd.f32 %v5107_v61, %v13683_v35  ;;  %v5196_v7 = vpop.f32.mrf.mxu3  ;;  %v6912_v39 = vmul.f32 0.2, %v5373_v30  ;;  %v11576_v45 = vld [vmem:[#allocation11 + $0x62c] sm:$0xf0] }
 0x6bf   : > { %v5288_v12 = vpop.f32.mrf.mxu0  ;;  %5622 = vmatpush.bf16.msrb.mxu0 %v10495_v36 }
 0x6c0   : > { %v5197_v20 = vadd.f32 %v5196_v7, %v5108_v3  ;;  %v5377_v29 = vpop.f32.mrf.mxu1  ;;  %v7168_v55 = vmax.f32 %v5373_v30, %v6912_v39 }
 0x6c2   : > { %v5286_v21 = vadd.f32 %v5285_v10, %v5197_v20  ;;  %5149 = vmatmul.bf16.gmra.mxu2 %v13064_v56  ;;  %5327 = vmatmul.bf16.gmra.mxu0 %v13260_v15  ;;  %v10238_v10 = vld [vmem:[#allocation11 + $0x210] sm:$0xf] }
 0x6c3   : > { %5238 = vmatmul.bf16.gmra.mxu3 %v15179_v17  ;;  %5416 = vmatmul.bf16.gmra.mxu1 %v15314_v50  ;;  %v10239_v52 = vor.u32 %v11448_v62, %v10238_v10  ;;  %v10751_v10 = vor.u32 %v11576_v45, %v10750_v28  ;;  %v15318_v28 = vld [vmem:[#allocation62_spill] sm:$0xff]  ;;  %v11436_v45 = vld [vmem:[#allocation11 + $0x1d4] sm:$0xf] }
 0x6c4   : > { %v5375_v48 = vadd.f32 %v5374_v25, %v5286_v21 }
 0x6c5   : > { %v5110_v23 = vpop.f32.mrf.mxu2  ;;  %5533 = vmatpush.bf16.msrb.mxu3 %v10239_v52  ;;  %5711 = vmatpush.bf16.msrb.mxu1 %v10751_v10  ;;  %v10208_v10 = vld [vmem:[#allocation11 + $0x1f0] sm:$0xf0] }
 0x6c6   : > { %v6920_v16 = vmul.f32 0.2, %v5375_v48  ;;  %v5111_v19 = vadd.f32 %v5110_v23, %v13683_v35  ;;  %v5199_v60 = vpop.f32.mrf.mxu3 }
 0x6c7   : > { %v5290_v32 = vpop.f32.mrf.mxu0 }
 0x6c8   : > { %v5200_v33 = vadd.f32 %v5199_v60, %v5111_v19  ;;  %v5379_v0 = vpop.f32.mrf.mxu1  ;;  %v7176_v61 = vmax.f32 %v5375_v48, %v6920_v16 }
 0x6ca   : > { %v5289_v3 = vadd.f32 %v5288_v12, %v5200_v33  ;;  %v13720_v25 = vpack.c.bf16 %v7176_v61, %v7168_v55 }
 0x6cc   : > { %15315 = vst [vmem:[#allocation103_spill] sm:$0xff] %v13720_v25  ;;  %v5378_v7 = vadd.f32 %v5377_v29, %v5289_v3 }
 0x6cd   : > { %v5112_v20 = vpop.f32.mrf.mxu2 }
 0x6ce   : > { %v5113_v21 = vadd.f32 %v5112_v20, %v13683_v35  ;;  %v5201_v23 = vpop.f32.mrf.mxu3  ;;  %v6928_v30 = vmul.f32 0.2, %v5378_v7 }
 0x6cf   : > { %v5293_v9 = vpop.f32.mrf.mxu0 }
 0x6d0   : > { %v5202_v50 = vadd.f32 %v5201_v23, %v5113_v21  ;;  %v5382_v19 = vpop.f32.mrf.mxu1  ;;  %v7184_v62 = vmax.f32 %v5378_v7, %v6928_v30  ;;  %v15320_v7 = vld [vmem:[#allocation61_spill] sm:$0xff] }
 0x6d2   : > { %v5291_v60 = vadd.f32 %v5290_v32, %v5202_v50  ;;  %5154 = vmatmul.bf16.gmra.mxu2 %v15181_v54  ;;  %5332 = vmatmul.bf16.gmra.mxu0 %v13272_v5 }
 0x6d3   : > { %5243 = vmatmul.bf16.gmra.mxu3 %v15182_v2  ;;  %5421 = vmatmul.bf16.gmra.mxu1 %v15226_v46 }
 0x6d4   : > { %v5380_v12 = vadd.f32 %v5379_v0, %v5291_v60 }
 0x6d5   : > { %v5115_v29 = vpop.f32.mrf.mxu2 }
 0x6d6   : > { %v6936_v39 = vmul.f32 0.2, %v5380_v12  ;;  %v5116_v48 = vadd.f32 %v5115_v29, %v13683_v35  ;;  %v5204_v16 = vpop.f32.mrf.mxu3  ;;  %v15317_v29 = vld [vmem:[#allocation28_spill] sm:$0xff] }
 0x6d7   : > { %v5295_v42 = vpop.f32.mrf.mxu0 }
 0x6d8   : > { %v5205_v50 = vadd.f32 %v5204_v16, %v5116_v48  ;;  %v5384_v32 = vpop.f32.mrf.mxu1  ;;  %v7192_v33 = vmax.f32 %v5380_v12, %v6936_v39  ;;  %v15319_v48 = vld [vmem:[#allocation27_spill] sm:$0xff] }
 0x6da   : > { %v5294_v52 = vadd.f32 %v5293_v9, %v5205_v50  ;;  %v13728_v55 = vpack.c.bf16 %v7192_v33, %v7184_v62  ;;  %v10211_v62 = vor.u32 %v11436_v45, %v10208_v10  ;;  %v10464_v33 = vld [vmem:[#allocation11 + $0x3f0] sm:$0xf0] }
 0x6dc   : > { %15316 = vst [vmem:[#allocation104_spill] sm:$0xff] %v13728_v55  ;;  %v5383_v61 = vadd.f32 %v5382_v19, %v5294_v52  ;;  %5793 = vmatpush.bf16.msra.mxu2 %v10211_v62 }
 0x6dd   : > { %v5117_v3 = vpop.f32.mrf.mxu2 }
 0x6de   : > { %v5118_v0 = vadd.f32 %v5117_v3, %v13683_v35  ;;  %v5206_v20 = vpop.f32.mrf.mxu3  ;;  %v6944_v9 = vmul.f32 0.2, %v5383_v61 }
 0x6df   : > { %v5298_v21 = vpop.f32.mrf.mxu0 }
 0x6e0   : > { %v5207_v23 = vadd.f32 %v5206_v20, %v5118_v0  ;;  %v5387_v36 = vpop.f32.mrf.mxu1  ;;  %v7200_v20 = vmax.f32 %v5383_v61, %v6944_v9 }
 0x6e2   : > { %v5296_v60 = vadd.f32 %v5295_v42, %v5207_v23  ;;  %5159 = vmatmul.bf16.gmra.mxu2 %v15317_v29  ;;  %5337 = vmatmul.bf16.gmra.mxu0 %v15318_v28  ;;  %v11500_v42 = vld [vmem:[#allocation11 + $0x3d4] sm:$0xf] }
 0x6e3   : > { %5248 = vmatmul.bf16.gmra.mxu3 %v15319_v48  ;;  %5426 = vmatmul.bf16.gmra.mxu1 %v15320_v7  ;;  %v10467_v0 = vor.u32 %v11500_v42, %v10464_v33  ;;  %v11564_v48 = vld [vmem:[#allocation11 + $0x5d4] sm:$0xf] }
 0x6e4   : > { %v5385_v30 = vadd.f32 %v5384_v32, %v5296_v60  ;;  %v10720_v28 = vld [vmem:[#allocation11 + $0x5f0] sm:$0xf0] }
 0x6e5   : > { %v5120_v12 = vpop.f32.mrf.mxu2  ;;  %5882 = vmatpush.bf16.msra.mxu3 %v10467_v0  ;;  %v10723_v10 = vor.u32 %v11564_v48, %v10720_v28  ;;  %v11628_v28 = vld [vmem:[#allocation11 + $0x7d4] sm:$0xf] }
 0x6e6   : > { %v6952_v19 = vmul.f32 0.2, %v5385_v30  ;;  %v5121_v39 = vadd.f32 %v5120_v12, %v13683_v35  ;;  %v5209_v16 = vpop.f32.mrf.mxu3  ;;  %v10976_v48 = vld [vmem:[#allocation11 + $0x7f0] sm:$0xf0] }
 0x6e7   : > { %v5300_v50 = vpop.f32.mrf.mxu0  ;;  %5971 = vmatpush.bf16.msra.mxu0 %v10723_v10 }
 0x6e8   : > { %v5210_v52 = vadd.f32 %v5209_v16, %v5121_v39  ;;  %v5389_v3 = vpop.f32.mrf.mxu1  ;;  %v7208_v23 = vmax.f32 %v5385_v30, %v6952_v19  ;;  %v10979_v30 = vor.u32 %v11628_v28, %v10976_v48  ;;  %v15324_v28 = vld [vmem:[#allocation32_spill] sm:$0xff] }
 0x6e9   : > { %v11428_v48 = vld [vmem:[#allocation11 + $0x194] sm:$0xf] }
 0x6ea   : > { %v5299_v55 = vadd.f32 %v5298_v21, %v5210_v52  ;;  %v13736_v32 = vpack.c.bf16 %v7208_v23, %v7200_v20  ;;  %6060 = vmatpush.bf16.msra.mxu1 %v10979_v30  ;;  %v10176_v30 = vld [vmem:[#allocation11 + $0x1b0] sm:$0xf0] }
 0x6ec   : > { %15321 = vst [vmem:[#allocation105_spill] sm:$0xff] %v13736_v32  ;;  %v5388_v60 = vadd.f32 %v5387_v36, %v5299_v55 }
 0x6ed   : > { %v5122_v25 = vpop.f32.mrf.mxu2 }
 0x6ee   : > { %v5123_v12 = vadd.f32 %v5122_v25, %v13683_v35  ;;  %v5211_v7 = vpop.f32.mrf.mxu3  ;;  %v6960_v55 = vmul.f32 0.2, %v5388_v60 }
 0x6ef   : > { %v5303_v45 = vpop.f32.mrf.mxu0 }
 0x6f0   : > { %v5212_v29 = vadd.f32 %v5211_v7, %v5123_v12  ;;  %v5392_v39 = vpop.f32.mrf.mxu1 }
 0x6f2   : > { %v5301_v16 = vadd.f32 %v5300_v50, %v5212_v29  ;;  %5164 = vmatmul.bf16.gmra.mxu2 %v15187_v44  ;;  %5342 = vmatmul.bf16.gmra.mxu0 %v13297_v53  ;;  %v7216_v50 = vmax.f32 %v5388_v60, %v6960_v55  ;;  %v15326_v60 = vld [vmem:[#allocation31_spill] sm:$0xff] }
 0x6f3   : > { %5253 = vmatmul.bf16.gmra.mxu3 %v15188_v37  ;;  %5431 = vmatmul.bf16.gmra.mxu1 %v13289_v24 }
 0x6f4   : > { %v5390_v61 = vadd.f32 %v5389_v3, %v5301_v16 }
 0x6f5   : > { %v5125_v25 = vpop.f32.mrf.mxu2 }
 0x6f6   : > { %v6968_v21 = vmul.f32 0.2, %v5390_v61  ;;  %v5126_v36 = vadd.f32 %v5125_v25, %v13683_v35  ;;  %v5214_v9 = vpop.f32.mrf.mxu3  ;;  %v15323_v25 = vld [vmem:[#allocation36_spill] sm:$0xff] }
 0x6f7   : > { %v5305_v7 = vpop.f32.mrf.mxu0 }
 0x6f8   : > { %v5215_v29 = vadd.f32 %v5214_v9, %v5126_v36  ;;  %v5394_v19 = vpop.f32.mrf.mxu1  ;;  %v7224_v62 = vmax.f32 %v5390_v61, %v6968_v21  ;;  %v15325_v36 = vld [vmem:[#allocation35_spill] sm:$0xff] }
 0x6fa   : > { %v5304_v42 = vadd.f32 %v5303_v45, %v5215_v29  ;;  %v13744_v33 = vpack.c.bf16 %v7224_v62, %v7216_v50  ;;  %v10179_v50 = vor.u32 %v11428_v48, %v10176_v30  ;;  %v10432_v62 = vld [vmem:[#allocation11 + $0x3b0] sm:$0xf0] }
 0x6fc   : > { %15322 = vst [vmem:[#allocation106_spill] sm:$0xff] %v13744_v33  ;;  %v5393_v52 = vadd.f32 %v5392_v39, %v5304_v42  ;;  %5794 = vmatpush.bf16.msra.mxu2 %v10179_v50 }
 0x6fd   : > { %v5127_v0 = vpop.f32.mrf.mxu2 }
 0x6fe   : > { %v5128_v3 = vadd.f32 %v5127_v0, %v13683_v35  ;;  %v5216_v20 = vpop.f32.mrf.mxu3  ;;  %v6976_v45 = vmul.f32 0.2, %v5393_v52 }
 0x6ff   : > { %v5308_v23 = vpop.f32.mrf.mxu0 }
 0x700   : > { %v5217_v12 = vadd.f32 %v5216_v20, %v5128_v3  ;;  %v5397_v10 = vpop.f32.mrf.mxu1  ;;  %v7232_v20 = vmax.f32 %v5393_v52, %v6976_v45 }
 0x702   : > { %v5306_v16 = vadd.f32 %v5305_v7, %v5217_v12  ;;  %5445 = vmatmul.bf16.vlgmr.msrb.gmra.mxu2 %v15323_v25  ;;  %5623 = vmatmul.bf16.vlgmr.msrb.gmra.mxu0 %v15324_v28  ;;  %v11492_v7 = vld [vmem:[#allocation11 + $0x394] sm:$0xf] }
 0x703   : > { %5534 = vmatmul.bf16.vlgmr.msrb.gmra.mxu3 %v15325_v36  ;;  %5712 = vmatmul.bf16.vlgmr.msrb.gmra.mxu1 %v15326_v60  ;;  %v10435_v3 = vor.u32 %v11492_v7, %v10432_v62  ;;  %v11556_v36 = vld [vmem:[#allocation11 + $0x594] sm:$0xf] }
 0x704   : > { %v5395_v55 = vadd.f32 %v5394_v19, %v5306_v16  ;;  %v10688_v28 = vld [vmem:[#allocation11 + $0x5b0] sm:$0xf0] }
 0x705   : > { %v5130_v61 = vpop.f32.mrf.mxu2  ;;  %5883 = vmatpush.bf16.msra.mxu3 %v10435_v3  ;;  %v10691_v30 = vor.u32 %v11556_v36, %v10688_v28  ;;  %v11620_v28 = vld [vmem:[#allocation11 + $0x794] sm:$0xf] }
 0x706   : > { %v6984_v39 = vmul.f32 0.2, %v5395_v55  ;;  %v5131_v21 = vadd.f32 %v5130_v61, %v13683_v35  ;;  %v5219_v9 = vpop.f32.mrf.mxu3  ;;  %v10944_v36 = vld [vmem:[#allocation11 + $0x7b0] sm:$0xf0] }
 0x707   : > { %v5310_v29 = vpop.f32.mrf.mxu0  ;;  %5972 = vmatpush.bf16.msra.mxu0 %v10691_v30 }
 0x708   : > { %v5220_v42 = vadd.f32 %v5219_v9, %v5131_v21  ;;  %v5399_v0 = vpop.f32.mrf.mxu1  ;;  %v7240_v12 = vmax.f32 %v5395_v55, %v6984_v39  ;;  %v10947_v55 = vor.u32 %v11620_v28, %v10944_v36  ;;  %v15330_v28 = vld [vmem:[#allocation47_spill] sm:$0xff]  ;;  %v11420_v36 = vld [vmem:[#allocation11 + $0x154] sm:$0xf] }
 0x70a   : > { %v5309_v33 = vadd.f32 %v5308_v23, %v5220_v42  ;;  %v13752_v19 = vpack.c.bf16 %v7240_v12, %v7232_v20  ;;  %6061 = vmatpush.bf16.msra.mxu1 %v10947_v55  ;;  %v10144_v55 = vld [vmem:[#allocation11 + $0x170] sm:$0xf0] }
 0x70c   : > { %15327 = vst [vmem:[#allocation107_spill] sm:$0xff] %v13752_v19  ;;  %v5398_v16 = vadd.f32 %v5397_v10, %v5309_v33 }
 0x70d   : > { %v5132_v32 = vpop.f32.mrf.mxu2 }
 0x70e   : > { %v5133_v61 = vadd.f32 %v5132_v32, %v13683_v35  ;;  %v5221_v60 = vpop.f32.mrf.mxu3  ;;  %v6992_v33 = vmul.f32 0.2, %v5398_v16 }
 0x70f   : > { %v5313_v48 = vpop.f32.mrf.mxu0 }
 0x710   : > { %v5222_v25 = vadd.f32 %v5221_v60, %v5133_v61  ;;  %v5402_v21 = vpop.f32.mrf.mxu1 }
 0x712   : > { %v5311_v9 = vadd.f32 %v5310_v29, %v5222_v25  ;;  %5450 = vmatmul.bf16.gmra.mxu2 %v12880_v63  ;;  %5628 = vmatmul.bf16.gmra.mxu0 %v13128_v11  ;;  %v7248_v29 = vmax.f32 %v5398_v16, %v6992_v33  ;;  %v15332_v16 = vld [vmem:[#allocation34_spill] sm:$0xff] }
 0x713   : > { %5539 = vmatmul.bf16.gmra.mxu3 %v12863_v41  ;;  %5717 = vmatmul.bf16.gmra.mxu1 %v15193_v51 }
 0x714   : > { %v5400_v52 = vadd.f32 %v5399_v0, %v5311_v9 }
 0x715   : > { %v5135_v32 = vpop.f32.mrf.mxu2 }
 0x716   : > { %v7000_v23 = vmul.f32 0.2, %v5400_v52  ;;  %v5136_v10 = vadd.f32 %v5135_v32, %v13683_v35  ;;  %v5224_v45 = vpop.f32.mrf.mxu3  ;;  %v15329_v32 = vld [vmem:[#allocation38_spill] sm:$0xff] }
 0x717   : > { %v5315_v60 = vpop.f32.mrf.mxu0 }
 0x718   : > { %v5225_v25 = vadd.f32 %v5224_v45, %v5136_v10  ;;  %v5404_v39 = vpop.f32.mrf.mxu1  ;;  %v7256_v50 = vmax.f32 %v5400_v52, %v7000_v23  ;;  %v15331_v10 = vld [vmem:[#allocation37_spill] sm:$0xff] }
 0x71a   : > { %v5314_v7 = vadd.f32 %v5313_v48, %v5225_v25  ;;  %v13760_v62 = vpack.c.bf16 %v7256_v50, %v7248_v29  ;;  %v10147_v29 = vor.u32 %v11420_v36, %v10144_v55  ;;  %v10400_v50 = vld [vmem:[#allocation11 + $0x370] sm:$0xf0] }
 0x71c   : > { %15328 = vst [vmem:[#allocation108_spill] sm:$0xff] %v13760_v62  ;;  %v5403_v42 = vadd.f32 %v5402_v21, %v5314_v7  ;;  %5795 = vmatpush.bf16.msra.mxu2 %v10147_v29 }
 0x71d   : > { %v5137_v3 = vpop.f32.mrf.mxu2 }
 0x71e   : > { %v5138_v0 = vadd.f32 %v5137_v3, %v13683_v35  ;;  %v5226_v20 = vpop.f32.mrf.mxu3  ;;  %v7008_v48 = vmul.f32 0.2, %v5403_v42 }
 0x71f   : > { %v5318_v12 = vpop.f32.mrf.mxu0 }
 0x720   : > { %v5227_v61 = vadd.f32 %v5226_v20, %v5138_v0  ;;  %v5407_v30 = vpop.f32.mrf.mxu1  ;;  %v7264_v20 = vmax.f32 %v5403_v42, %v7008_v48 }
 0x722   : > { %v5316_v9 = vadd.f32 %v5315_v60, %v5227_v61  ;;  %5455 = vmatmul.bf16.gmra.mxu2 %v15329_v32  ;;  %5633 = vmatmul.bf16.gmra.mxu0 %v15330_v28  ;;  %v11484_v60 = vld [vmem:[#allocation11 + $0x354] sm:$0xf] }
 0x723   : > { %5544 = vmatmul.bf16.gmra.mxu3 %v15331_v10  ;;  %5722 = vmatmul.bf16.gmra.mxu1 %v15332_v16  ;;  %v10403_v0 = vor.u32 %v11484_v60, %v10400_v50  ;;  %v11548_v10 = vld [vmem:[#allocation11 + $0x554] sm:$0xf] }
 0x724   : > { %v5405_v33 = vadd.f32 %v5404_v39, %v5316_v9  ;;  %v10656_v28 = vld [vmem:[#allocation11 + $0x570] sm:$0xf0] }
 0x725   : > { %v5140_v52 = vpop.f32.mrf.mxu2  ;;  %5884 = vmatpush.bf16.msra.mxu3 %v10403_v0  ;;  %v10659_v55 = vor.u32 %v11548_v10, %v10656_v28  ;;  %v11612_v28 = vld [vmem:[#allocation11 + $0x754] sm:$0xf] }
 0x726   : > { %v7016_v21 = vmul.f32 0.2, %v5405_v33  ;;  %v5141_v23 = vadd.f32 %v5140_v52, %v13683_v35  ;;  %v5229_v45 = vpop.f32.mrf.mxu3  ;;  %v10912_v10 = vld [vmem:[#allocation11 + $0x770] sm:$0xf0] }
 0x727   : > { %v5320_v25 = vpop.f32.mrf.mxu0  ;;  %5973 = vmatpush.bf16.msra.mxu0 %v10659_v55 }
 0x728   : > { %v5230_v7 = vadd.f32 %v5229_v45, %v5141_v23  ;;  %v5409_v3 = vpop.f32.mrf.mxu1  ;;  %v7272_v61 = vmax.f32 %v5405_v33, %v7016_v21  ;;  %v10915_v33 = vor.u32 %v11612_v28, %v10912_v10  ;;  %v15336_v28 = vld [vmem:[#allocation50_spill] sm:$0xff]  ;;  %v11412_v10 = vld [vmem:[#allocation11 + $0x114] sm:$0xf] }
 0x72a   : > { %v5319_v62 = vadd.f32 %v5318_v12, %v5230_v7  ;;  %v13768_v39 = vpack.c.bf16 %v7272_v61, %v7264_v20  ;;  %6062 = vmatpush.bf16.msra.mxu1 %v10915_v33  ;;  %v10112_v33 = vld [vmem:[#allocation11 + $0x130] sm:$0xf0] }
 0x72c   : > { %15333 = vst [vmem:[#allocation109_spill] sm:$0xff] %v13768_v39  ;;  %v5408_v9 = vadd.f32 %v5407_v30, %v5319_v62 }
 0x72d   : > { %v5142_v19 = vpop.f32.mrf.mxu2 }
 0x72e   : > { %v5143_v52 = vadd.f32 %v5142_v19, %v13683_v35  ;;  %v5231_v16 = vpop.f32.mrf.mxu3  ;;  %v7024_v62 = vmul.f32 0.2, %v5408_v9 }
 0x72f   : > { %v5323_v36 = vpop.f32.mrf.mxu0 }
 0x730   : > { %v5232_v32 = vadd.f32 %v5231_v16, %v5143_v52  ;;  %v5412_v23 = vpop.f32.mrf.mxu1 }
 0x732   : > { %v5321_v45 = vadd.f32 %v5320_v25, %v5232_v32  ;;  %5460 = vmatmul.bf16.gmra.mxu2 %v12928_v22  ;;  %5638 = vmatmul.bf16.gmra.mxu0 %v13152_v6  ;;  %v7280_v25 = vmax.f32 %v5408_v9, %v7024_v62  ;;  %v15338_v9 = vld [vmem:[#allocation49_spill] sm:$0xff] }
 0x733   : > { %5549 = vmatmul.bf16.gmra.mxu3 %v12911_v18  ;;  %5727 = vmatmul.bf16.gmra.mxu1 %v15199_v58 }
 0x734   : > { %v5410_v42 = vadd.f32 %v5409_v3, %v5321_v45 }
 0x735   : > { %v5145_v19 = vpop.f32.mrf.mxu2 }
 0x736   : > { %v7032_v12 = vmul.f32 0.2, %v5410_v42  ;;  %v5146_v30 = vadd.f32 %v5145_v19, %v13683_v35  ;;  %v5234_v48 = vpop.f32.mrf.mxu3  ;;  %v15335_v19 = vld [vmem:[#allocation40_spill] sm:$0xff] }
 0x737   : > { %v5325_v16 = vpop.f32.mrf.mxu0 }
 0x738   : > { %v5235_v32 = vadd.f32 %v5234_v48, %v5146_v30  ;;  %v5414_v21 = vpop.f32.mrf.mxu1  ;;  %v7288_v29 = vmax.f32 %v5410_v42, %v7032_v12  ;;  %v15337_v30 = vld [vmem:[#allocation39_spill] sm:$0xff] }
 0x73a   : > { %v5324_v60 = vadd.f32 %v5323_v36, %v5235_v32  ;;  %v13776_v50 = vpack.c.bf16 %v7288_v29, %v7280_v25  ;;  %v10115_v25 = vor.u32 %v11412_v10, %v10112_v33  ;;  %v10368_v29 = vld [vmem:[#allocation11 + $0x330] sm:$0xf0] }
 0x73c   : > { %15334 = vst [vmem:[#allocation110_spill] sm:$0xff] %v13776_v50  ;;  %v5413_v7 = vadd.f32 %v5412_v23, %v5324_v60  ;;  %5796 = vmatpush.bf16.msra.mxu2 %v10115_v25 }
 0x73d   : > { %v5147_v0 = vpop.f32.mrf.mxu2 }
 0x73e   : > { %v5148_v3 = vadd.f32 %v5147_v0, %v13683_v35  ;;  %v5236_v20 = vpop.f32.mrf.mxu3  ;;  %v7040_v36 = vmul.f32 0.2, %v5413_v7 }
 0x73f   : > { %v5328_v61 = vpop.f32.mrf.mxu0 }
 0x740   : > { %v5237_v52 = vadd.f32 %v5236_v20, %v5148_v3  ;;  %v5417_v55 = vpop.f32.mrf.mxu1  ;;  %v7296_v20 = vmax.f32 %v5413_v7, %v7040_v36 }
 0x742   : > { %v5326_v45 = vadd.f32 %v5325_v16, %v5237_v52  ;;  %5465 = vmatmul.bf16.gmra.mxu2 %v15335_v19  ;;  %5643 = vmatmul.bf16.gmra.mxu0 %v15336_v28  ;;  %v11476_v16 = vld [vmem:[#allocation11 + $0x314] sm:$0xf] }
 0x743   : > { %5554 = vmatmul.bf16.gmra.mxu3 %v15337_v30  ;;  %5732 = vmatmul.bf16.gmra.mxu1 %v15338_v9  ;;  %v10371_v3 = vor.u32 %v11476_v16, %v10368_v29  ;;  %v11540_v30 = vld [vmem:[#allocation11 + $0x514] sm:$0xf] }
 0x744   : > { %v5415_v62 = vadd.f32 %v5414_v21, %v5326_v45  ;;  %v10624_v28 = vld [vmem:[#allocation11 + $0x530] sm:$0xf0] }
 0x745   : > { %v5150_v42 = vpop.f32.mrf.mxu2  ;;  %5885 = vmatpush.bf16.msra.mxu3 %v10371_v3  ;;  %v10627_v33 = vor.u32 %v11540_v30, %v10624_v28  ;;  %v11604_v28 = vld [vmem:[#allocation11 + $0x714] sm:$0xf] }
 0x746   : > { %v7048_v23 = vmul.f32 0.2, %v5415_v62  ;;  %v5151_v12 = vadd.f32 %v5150_v42, %v13683_v35  ;;  %v5239_v48 = vpop.f32.mrf.mxu3  ;;  %v10880_v30 = vld [vmem:[#allocation11 + $0x730] sm:$0xf0] }
 0x747   : > { %v5330_v32 = vpop.f32.mrf.mxu0  ;;  %5974 = vmatpush.bf16.msra.mxu0 %v10627_v33 }
 0x748   : > { %v5240_v60 = vadd.f32 %v5239_v48, %v5151_v12  ;;  %v5419_v0 = vpop.f32.mrf.mxu1  ;;  %v7304_v52 = vmax.f32 %v5415_v62, %v7048_v23  ;;  %v10883_v62 = vor.u32 %v11604_v28, %v10880_v30  ;;  %v15342_v28 = vld [vmem:[#allocation53_spill] sm:$0xff]  ;;  %v11404_v30 = vld [vmem:[#allocation11 + $0xd4] sm:$0xf] }
 0x74a   : > { %v5329_v50 = vadd.f32 %v5328_v61, %v5240_v60  ;;  %v13784_v21 = vpack.c.bf16 %v7304_v52, %v7296_v20  ;;  %6063 = vmatpush.bf16.msra.mxu1 %v10883_v62  ;;  %v10080_v62 = vld [vmem:[#allocation11 + $0xf0] sm:$0xf0] }
 0x74c   : > { %15339 = vst [vmem:[#allocation111_spill] sm:$0xff] %v13784_v21  ;;  %v5418_v45 = vadd.f32 %v5417_v55, %v5329_v50 }
 0x74d   : > { %v5152_v39 = vpop.f32.mrf.mxu2 }
 0x74e   : > { %v5153_v42 = vadd.f32 %v5152_v39, %v13683_v35  ;;  %v5241_v9 = vpop.f32.mrf.mxu3  ;;  %v7056_v50 = vmul.f32 0.2, %v5418_v45 }
 0x74f   : > { %v5333_v10 = vpop.f32.mrf.mxu0 }
 0x750   : > { %v5242_v19 = vadd.f32 %v5241_v9, %v5153_v42  ;;  %v5422_v12 = vpop.f32.mrf.mxu1 }
 0x752   : > { %v5331_v48 = vadd.f32 %v5330_v32, %v5242_v19  ;;  %5470 = vmatmul.bf16.gmra.mxu2 %v12976_v34  ;;  %5648 = vmatmul.bf16.gmra.mxu0 %v13176_v8  ;;  %v7312_v32 = vmax.f32 %v5418_v45, %v7056_v50  ;;  %v15344_v45 = vld [vmem:[#allocation52_spill] sm:$0xff] }
 0x753   : > { %5559 = vmatmul.bf16.gmra.mxu3 %v12959_v1  ;;  %5737 = vmatmul.bf16.gmra.mxu1 %v15205_v40 }
 0x754   : > { %v5420_v7 = vadd.f32 %v5419_v0, %v5331_v48 }
 0x755   : > { %v5155_v39 = vpop.f32.mrf.mxu2 }
 0x756   : > { %v7064_v61 = vmul.f32 0.2, %v5420_v7  ;;  %v5156_v55 = vadd.f32 %v5155_v39, %v13683_v35  ;;  %v5244_v36 = vpop.f32.mrf.mxu3  ;;  %v15341_v39 = vld [vmem:[#allocation42_spill] sm:$0xff] }
 0x757   : > { %v5335_v9 = vpop.f32.mrf.mxu0 }
 0x758   : > { %v5245_v19 = vadd.f32 %v5244_v36, %v5156_v55  ;;  %v5424_v23 = vpop.f32.mrf.mxu1  ;;  %v7320_v25 = vmax.f32 %v5420_v7, %v7064_v61  ;;  %v15343_v55 = vld [vmem:[#allocation41_spill] sm:$0xff] }
 0x75a   : > { %v5334_v16 = vadd.f32 %v5333_v10, %v5245_v19  ;;  %v13792_v29 = vpack.c.bf16 %v7320_v25, %v7312_v32  ;;  %v10083_v32 = vor.u32 %v11404_v30, %v10080_v62  ;;  %v10336_v25 = vld [vmem:[#allocation11 + $0x2f0] sm:$0xf0] }
 0x75b   : > { %v11532_v62 = vld [vmem:[#allocation11 + $0x4d4] sm:$0xf] }
 0x75c   : > { %15340 = vst [vmem:[#allocation112_spill] sm:$0xff] %v13792_v29  ;;  %v5423_v60 = vadd.f32 %v5422_v12, %v5334_v16  ;;  %5797 = vmatpush.bf16.msra.mxu2 %v10083_v32  ;;  %v11596_v32 = vld [vmem:[#allocation11 + $0x6d4] sm:$0xf] }
 0x75d   : > { %v5157_v3 = vpop.f32.mrf.mxu2 }
 0x75e   : > { %v5158_v0 = vadd.f32 %v5157_v3, %v13683_v35  ;;  %v5246_v20 = vpop.f32.mrf.mxu3  ;;  %v7072_v10 = vmul.f32 0.2, %v5423_v60 }
 0x75f   : > { %v5338_v52 = vpop.f32.mrf.mxu0 }
 0x760   : > { %v5247_v42 = vadd.f32 %v5246_v20, %v5158_v0  ;;  %v5427_v33 = vpop.f32.mrf.mxu1  ;;  %v7328_v20 = vmax.f32 %v5423_v60, %v7072_v10 }
 0x762   : > { %v5336_v48 = vadd.f32 %v5335_v9, %v5247_v42  ;;  %5475 = vmatmul.bf16.gmra.mxu2 %v15341_v39  ;;  %5653 = vmatmul.bf16.gmra.mxu0 %v15342_v28  ;;  %v11468_v9 = vld [vmem:[#allocation11 + $0x2d4] sm:$0xf] }
 0x763   : > { %5564 = vmatmul.bf16.gmra.mxu3 %v15343_v55  ;;  %5742 = vmatmul.bf16.gmra.mxu1 %v15344_v45  ;;  %v10339_v0 = vor.u32 %v11468_v9, %v10336_v25  ;;  %v10592_v39 = vld [vmem:[#allocation11 + $0x4f0] sm:$0xf0] }
 0x764   : > { %v5425_v50 = vadd.f32 %v5424_v23, %v5336_v48  ;;  %v10848_v9 = vld [vmem:[#allocation11 + $0x6f0] sm:$0xf0] }
 0x765   : > { %v5160_v7 = vpop.f32.mrf.mxu2  ;;  %5886 = vmatpush.bf16.msra.mxu3 %v10339_v0 }
 0x766   : > { %v7080_v12 = vmul.f32 0.2, %v5425_v50  ;;  %v5161_v61 = vadd.f32 %v5160_v7, %v13683_v35  ;;  %v5249_v36 = vpop.f32.mrf.mxu3 }
 0x767   : > { %v5340_v19 = vpop.f32.mrf.mxu0 }
 0x768   : > { %v5250_v16 = vadd.f32 %v5249_v36, %v5161_v61  ;;  %v5429_v3 = vpop.f32.mrf.mxu1  ;;  %v7336_v42 = vmax.f32 %v5425_v50, %v7080_v12  ;;  %v10595_v61 = vor.u32 %v11532_v62, %v10592_v39 }
 0x76a   : > { %v5339_v29 = vadd.f32 %v5338_v52, %v5250_v16  ;;  %v13800_v23 = vpack.c.bf16 %v7336_v42, %v7328_v20  ;;  %5975 = vmatpush.bf16.msra.mxu0 %v10595_v61  ;;  %v10851_v16 = vor.u32 %v11596_v32, %v10848_v9  ;;  %v11460_v9 = vld [vmem:[#allocation11 + $0x294] sm:$0xf] }
 0x76c   : > { %15345 = vst [vmem:[#allocation113_spill] sm:$0xff] %v13800_v23  ;;  %v5428_v48 = vadd.f32 %v5427_v33, %v5339_v29  ;;  %6064 = vmatpush.bf16.msra.mxu1 %v10851_v16  ;;  %v10304_v16 = vld [vmem:[#allocation11 + $0x2b0] sm:$0xf0] }
 0x76d   : > { %v5162_v21 = vpop.f32.mrf.mxu2 }
 0x76e   : > { %v5163_v7 = vadd.f32 %v5162_v21, %v13683_v35  ;;  %v5251_v45 = vpop.f32.mrf.mxu3  ;;  %v7088_v29 = vmul.f32 0.2, %v5428_v48 }
 0x76f   : > { %v5343_v55 = vpop.f32.mrf.mxu0 }
 0x770   : > { %v5252_v28 = vadd.f32 %v5251_v45, %v5163_v7  ;;  %v5432_v30 = vpop.f32.mrf.mxu1 }
 0x772   : > { %v5341_v36 = vadd.f32 %v5340_v19, %v5252_v28  ;;  %5480 = vmatmul.bf16.gmra.mxu2 %v13004_v47  ;;  %5658 = vmatmul.bf16.gmra.mxu0 %v13200_v26  ;;  %v7344_v28 = vmax.f32 %v5428_v48, %v7088_v29  ;;  %v15348_v48 = vld [vmem:[#allocation55_spill] sm:$0xff] }
 0x773   : > { %5569 = vmatmul.bf16.gmra.mxu3 %v12997_v13  ;;  %5747 = vmatmul.bf16.gmra.mxu1 %v13193_v4 }
 0x774   : > { %v5430_v60 = vadd.f32 %v5429_v3, %v5341_v36 }
 0x775   : > { %v5165_v21 = vpop.f32.mrf.mxu2 }
 0x776   : > { %v7096_v52 = vmul.f32 0.2, %v5430_v60  ;;  %v5166_v33 = vadd.f32 %v5165_v21, %v13683_v35  ;;  %v5254_v45 = vpop.f32.mrf.mxu3  ;;  %v15347_v21 = vld [vmem:[#allocation44_spill] sm:$0xff] }
 0x777   : > { %v5345_v10 = vpop.f32.mrf.mxu0 }
 0x778   : > { %v5255_v50 = vadd.f32 %v5254_v45, %v5166_v33  ;;  %v5434_v39 = vpop.f32.mrf.mxu1  ;;  %v7352_v12 = vmax.f32 %v5430_v60, %v7096_v52  ;;  %v15349_v60 = vld [vmem:[#allocation43_spill] sm:$0xff]  ;;  %v15350_v52 = vld [vmem:[#allocation54_spill] sm:$0xff] }
 0x77a   : > { %v5344_v19 = vadd.f32 %v5343_v55, %v5255_v50  ;;  %v13808_v25 = vpack.c.bf16 %v7352_v12, %v7344_v28  ;;  %v12070_v55 = vld [vmem:[#allocation13] sm:$0xff]  ;;  %v11396_v12 = vld [vmem:[#allocation11 + $0x94] sm:$0xf] }
 0x77b   : > { %v13813_v29 = vperm.slane %v12070_v55, 4 }
 0x77c   : > { %15346 = vst [vmem:[#allocation114_spill] sm:$0xff] %v13808_v25  ;;  %v5433_v0 = vadd.f32 %v5432_v30, %v5344_v19 }
 0x77d   : > { %v5167_v20 = vpop.f32.mrf.mxu2 }
 0x77e   : > { %v5168_v3 = vadd.f32 %v5167_v20, %v13683_v35  ;;  %v5256_v42 = vpop.f32.mrf.mxu3  ;;  %v7104_v30 = vmul.f32 0.2, %v5433_v0 }
 0x77f   : > { %v5624_v7 = vpop.f32.mrf.mxu0 }
 0x780   : > { %v5257_v62 = vadd.f32 %v5256_v42, %v5168_v3  ;;  %v5713_v61 = vpop.f32.mrf.mxu1  ;;  %v10307_v42 = vor.u32 %v11460_v9, %v10304_v16 }
 0x782   : > { %v5346_v36 = vadd.f32 %v5345_v10, %v5257_v62  ;;  %5485 = vmatmul.bf16.gmra.mxu2 %v15347_v21  ;;  %5663 = vmatmul.bf16.gmra.mxu0 %v15348_v48  ;;  %v10048_v10 = vld [vmem:[#allocation11 + $0xb0] sm:$0xf0]  ;;  %v7360_v62 = vmax.f32 %v5433_v0, %v7104_v30 }
 0x783   : > { %5574 = vmatmul.bf16.gmra.mxu3 %v15349_v60  ;;  %5752 = vmatmul.bf16.gmra.mxu1 %v15350_v52  ;;  %v10051_v32 = vor.u32 %v11396_v12, %v10048_v10  ;;  %v11524_v60 = vld [vmem:[#allocation11 + $0x494] sm:$0xf] }
 0x784   : > { %v5435_v33 = vadd.f32 %v5434_v39, %v5346_v36  ;;  %5887 = vmatpush.bf16.msra.mxu3 %v10307_v42  ;;  %v10560_v48 = vld [vmem:[#allocation11 + $0x4b0] sm:$0xf0] }
 0x785   : > { %v5446_v45 = vpop.f32.mrf.mxu2  ;;  %5798 = vmatpush.bf16.msra.mxu2 %v10051_v32  ;;  %v10563_v10 = vor.u32 %v11524_v60, %v10560_v48  ;;  %v11588_v48 = vld [vmem:[#allocation11 + $0x694] sm:$0xf] }
 0x786   : > { %v7112_v35 = vmul.f32 0.2, %v5435_v33  ;;  %v5447_v50 = vadd.f32 %v5446_v45, %v13813_v29  ;;  %v5535_v28 = vpop.f32.mrf.mxu3  ;;  %v10816_v60 = vld [vmem:[#allocation11 + $0x6b0] sm:$0xf0] }
 0x787   : > { %v5626_v19 = vpop.f32.mrf.mxu0  ;;  %5976 = vmatpush.bf16.msra.mxu0 %v10563_v10 }
 0x788   : > { %v5536_v20 = vadd.f32 %v5535_v28, %v5447_v50  ;;  %v5715_v3 = vpop.f32.mrf.mxu1  ;;  %v7368_v55 = vmax.f32 %v5435_v33, %v7112_v35  ;;  %v10819_v33 = vor.u32 %v11588_v48, %v10816_v60  ;;  %v15354_v48 = vld [vmem:[#allocation58_spill] sm:$0xff]  ;;  %v11388_v60 = vld [vmem:[#allocation11 + $0x54] sm:$0xf] }
 0x78a   : > { %v5625_v25 = vadd.f32 %v5624_v7, %v5536_v20  ;;  %v13818_v39 = vpack.c.bf16 %v7368_v55, %v7360_v62  ;;  %6065 = vmatpush.bf16.msra.mxu1 %v10819_v33  ;;  %v10016_v33 = vld [vmem:[#allocation11 + $0x70] sm:$0xf0] }
 0x78c   : > { %15351 = vst [vmem:[#allocation115_spill] sm:$0xff] %v13818_v39  ;;  %v5714_v36 = vadd.f32 %v5713_v61, %v5625_v25 }
 0x78d   : > { %v5448_v23 = vpop.f32.mrf.mxu2 }
 0x78e   : > { %v5449_v45 = vadd.f32 %v5448_v23, %v13813_v29  ;;  %v5537_v52 = vpop.f32.mrf.mxu3  ;;  %v6865_v25 = vmul.f32 0.2, %v5714_v36 }
 0x78f   : > { %v5629_v12 = vpop.f32.mrf.mxu0 }
 0x790   : > { %v5538_v21 = vadd.f32 %v5537_v52, %v5449_v45  ;;  %v5718_v50 = vpop.f32.mrf.mxu1 }
 0x792   : > { %v5627_v28 = vadd.f32 %v5626_v19, %v5538_v21  ;;  %5490 = vmatmul.bf16.gmra.mxu2 %v13028_v38  ;;  %5668 = vmatmul.bf16.gmra.mxu0 %v13224_v43  ;;  %v7121_v21 = vmax.f32 %v5714_v36, %v6865_v25  ;;  %v15355_v36 = vld [vmem:[#allocation46_spill] sm:$0xff]  ;;  %v15356_v25 = vld [vmem:[#allocation57_spill] sm:$0xff] }
 0x793   : > { %5579 = vmatmul.bf16.gmra.mxu3 %v15217_v14  ;;  %5757 = vmatmul.bf16.gmra.mxu1 %v15218_v59 }
 0x794   : > { %v5716_v0 = vadd.f32 %v5715_v3, %v5627_v28 }
 0x795   : > { %v5451_v23 = vpop.f32.mrf.mxu2 }
 0x796   : > { %v6873_v7 = vmul.f32 0.2, %v5716_v0  ;;  %v5452_v61 = vadd.f32 %v5451_v23, %v13813_v29  ;;  %v5540_v30 = vpop.f32.mrf.mxu3  ;;  %v15353_v23 = vld [vmem:[#allocation23_spill] sm:$0xff] }
 0x797   : > { %v5631_v52 = vpop.f32.mrf.mxu0 }
 0x798   : > { %v7129_v35 = vmax.f32 %v5716_v0, %v6873_v7  ;;  %v5541_v19 = vadd.f32 %v5540_v30, %v5452_v61  ;;  %v5720_v32 = vpop.f32.mrf.mxu1 }
 0x79a   : > { %v13826_v9 = vpack.c.bf16 %v7129_v35, %v7121_v21  ;;  %v5630_v16 = vadd.f32 %v5629_v12, %v5541_v19  ;;  %v10019_v35 = vor.u32 %v11388_v60, %v10016_v33  ;;  %v10272_v19 = vld [vmem:[#allocation11 + $0x270] sm:$0xf0] }
 0x79c   : > { %15352 = vst [vmem:[#allocation116_spill] sm:$0xff] %v13826_v9  ;;  %v5719_v20 = vadd.f32 %v5718_v50, %v5630_v16  ;;  %5799 = vmatpush.bf16.msra.mxu2 %v10019_v35 }
 0x79d   : > { %v5453_v42 = vpop.f32.mrf.mxu2 }
 0x79e   : > { %v5454_v3 = vadd.f32 %v5453_v42, %v13813_v29  ;;  %v5542_v62 = vpop.f32.mrf.mxu3  ;;  %v6881_v0 = vmul.f32 0.2, %v5719_v20 }
 0x79f   : > { %v5634_v55 = vpop.f32.mrf.mxu0 }
 0x7a0   : > { %v5543_v45 = vadd.f32 %v5542_v62, %v5454_v3  ;;  %v5723_v10 = vpop.f32.mrf.mxu1  ;;  %v7137_v62 = vmax.f32 %v5719_v20, %v6881_v0 }
 0x7a2   : > { %v5632_v28 = vadd.f32 %v5631_v52, %v5543_v45  ;;  %5495 = vmatmul.bf16.gmra.mxu2 %v15353_v23  ;;  %5673 = vmatmul.bf16.gmra.mxu0 %v15354_v48  ;;  %v11452_v52 = vld [vmem:[#allocation11 + $0x254] sm:$0xf] }
 0x7a3   : > { %5584 = vmatmul.bf16.gmra.mxu3 %v15355_v36  ;;  %5762 = vmatmul.bf16.gmra.mxu1 %v15356_v25  ;;  %v10275_v3 = vor.u32 %v11452_v52, %v10272_v19  ;;  %v11516_v36 = vld [vmem:[#allocation11 + $0x454] sm:$0xf] }
 0x7a4   : > { %v5721_v7 = vadd.f32 %v5720_v32, %v5632_v28  ;;  %v10528_v48 = vld [vmem:[#allocation11 + $0x470] sm:$0xf0] }
 0x7a5   : > { %v5456_v12 = vpop.f32.mrf.mxu2  ;;  %5888 = vmatpush.bf16.msra.mxu3 %v10275_v3  ;;  %v10531_v33 = vor.u32 %v11516_v36, %v10528_v48  ;;  %v11580_v48 = vld [vmem:[#allocation11 + $0x654] sm:$0xf] }
 0x7a6   : > { %v6889_v50 = vmul.f32 0.2, %v5721_v7  ;;  %v5457_v61 = vadd.f32 %v5456_v12, %v13813_v29  ;;  %v5545_v30 = vpop.f32.mrf.mxu3  ;;  %v10784_v36 = vld [vmem:[#allocation11 + $0x670] sm:$0xf0] }
 0x7a7   : > { %v5636_v21 = vpop.f32.mrf.mxu0  ;;  %5977 = vmatpush.bf16.msra.mxu0 %v10531_v33 }
 0x7a8   : > { %v5546_v16 = vadd.f32 %v5545_v30, %v5457_v61  ;;  %v5725_v42 = vpop.f32.mrf.mxu1  ;;  %v7145_v45 = vmax.f32 %v5721_v7, %v6889_v50  ;;  %v10787_v7 = vor.u32 %v11580_v48, %v10784_v36 }
 0x7aa   : > { %v5635_v9 = vadd.f32 %v5634_v55, %v5546_v16  ;;  %v13834_v32 = vpack.c.bf16 %v7145_v45, %v7137_v62  ;;  %6066 = vmatpush.bf16.msra.mxu1 %v10787_v7  ;;  %v10240_v7 = vld [vmem:[#allocation11 + $0x230] sm:$0xf0] }
 0x7ac   : > { %15357 = vst [vmem:[#allocation117_spill] sm:$0xff] %v13834_v32  ;;  %v5724_v28 = vadd.f32 %v5723_v10, %v5635_v9  ;;  %v10496_v32 = vld [vmem:[#allocation11 + $0x430] sm:$0xf0] }
 0x7ad   : > { %v5458_v39 = vpop.f32.mrf.mxu2 }
 0x7ae   : > { %v5459_v12 = vadd.f32 %v5458_v39, %v13813_v29  ;;  %v5547_v25 = vpop.f32.mrf.mxu3  ;;  %v6897_v9 = vmul.f32 0.2, %v5724_v28 }
 0x7af   : > { %v5639_v60 = vpop.f32.mrf.mxu0 }
 0x7b0   : > { %v5548_v23 = vadd.f32 %v5547_v25, %v5459_v12  ;;  %v5728_v61 = vpop.f32.mrf.mxu1 }
 0x7b2   : > { %v5637_v30 = vadd.f32 %v5636_v21, %v5548_v23  ;;  %5500 = vmatmul.bf16.gmra.mxu2 %v13052_v31  ;;  %5678 = vmatmul.bf16.gmra.mxu0 %v13248_v57  ;;  %v7153_v21 = vmax.f32 %v5724_v28, %v6897_v9  ;;  %v15359_v28 = vld [vmem:[#allocation59_spill] sm:$0xff] }
 0x7b3   : > { %5589 = vmatmul.bf16.gmra.mxu3 %v13045_v49  ;;  %5767 = vmatmul.bf16.gmra.mxu1 %v13241_v27 }
 0x7b4   : > { %v5726_v20 = vadd.f32 %v5725_v42, %v5637_v30 }
 0x7b5   : > { %v5461_v39 = vpop.f32.mrf.mxu2 }
 0x7b6   : > { %v6905_v55 = vmul.f32 0.2, %v5726_v20  ;;  %v5462_v10 = vadd.f32 %v5461_v39, %v13813_v29  ;;  %v5550_v0 = vpop.f32.mrf.mxu3 }
 0x7b7   : > { %v5641_v25 = vpop.f32.mrf.mxu0 }
 0x7b8   : > { %v5551_v23 = vadd.f32 %v5550_v0, %v5462_v10  ;;  %v5730_v50 = vpop.f32.mrf.mxu1  ;;  %v7161_v35 = vmax.f32 %v5726_v20, %v6905_v55  ;;  %v11380_v10 = vld [vmem:[#allocation11 + $0x14] sm:$0xf] }
 0x7b9   : > { %v9984_v0 = vld [vmem:[#allocation11 + $0x30] sm:$0xf0] }
 0x7ba   : > { %v5640_v52 = vadd.f32 %v5639_v60, %v5551_v23  ;;  %v13842_v19 = vpack.c.bf16 %v7161_v35, %v7153_v21  ;;  %v9987_v36 = vor.u32 %v11380_v10, %v9984_v0 }
 0x7bc   : > { %15358 = vst [vmem:[#allocation118_spill] sm:$0xff] %v13842_v19  ;;  %v5729_v16 = vadd.f32 %v5728_v61, %v5640_v52  ;;  %5800 = vmatpush.bf16.msra.mxu2 %v9987_v36  ;;  %v11508_v19 = vld [vmem:[#allocation11 + $0x414] sm:$0xf] }
 0x7bd   : > { %v5463_v3 = vpop.f32.mrf.mxu2  ;;  %v10499_v0 = vor.u32 %v11508_v19, %v10496_v32  ;;  %v11572_v32 = vld [vmem:[#allocation11 + $0x614] sm:$0xf] }
 0x7be   : > { %v5464_v42 = vadd.f32 %v5463_v3, %v13813_v29  ;;  %v5552_v62 = vpop.f32.mrf.mxu3  ;;  %v6913_v60 = vmul.f32 0.2, %v5729_v16  ;;  %v10752_v19 = vld [vmem:[#allocation11 + $0x630] sm:$0xf0] }
 0x7bf   : > { %v5644_v45 = vpop.f32.mrf.mxu0  ;;  %5978 = vmatpush.bf16.msra.mxu0 %v10499_v0 }
 0x7c0   : > { %v5553_v12 = vadd.f32 %v5552_v62, %v5464_v42  ;;  %v5733_v33 = vpop.f32.mrf.mxu1  ;;  %v7169_v52 = vmax.f32 %v5729_v16, %v6913_v60 }
 0x7c2   : > { %v5642_v30 = vadd.f32 %v5641_v25, %v5553_v12  ;;  %5505 = vmatmul.bf16.gmra.mxu2 %v13064_v56  ;;  %5683 = vmatmul.bf16.gmra.mxu0 %v13260_v15  ;;  %v11444_v25 = vld [vmem:[#allocation11 + $0x214] sm:$0xf] }
 0x7c3   : > { %5594 = vmatmul.bf16.gmra.mxu3 %v15179_v17  ;;  %5772 = vmatmul.bf16.gmra.mxu1 %v15359_v28  ;;  %v10243_v35 = vor.u32 %v11444_v25, %v10240_v7  ;;  %v10755_v25 = vor.u32 %v11572_v32, %v10752_v19  ;;  %v15363_v32 = vld [vmem:[#allocation62_spill] sm:$0xff]  ;;  %v10214_v19 = vld [vmem:[#allocation11 + $0x1d8] sm:$0xf] }
 0x7c4   : > { %v5731_v9 = vadd.f32 %v5730_v50, %v5642_v30 }
 0x7c5   : > { %v5466_v20 = vpop.f32.mrf.mxu2  ;;  %5889 = vmatpush.bf16.msra.mxu3 %v10243_v35  ;;  %6067 = vmatpush.bf16.msra.mxu1 %v10755_v25  ;;  %v11441_v25 = vld [vmem:[#allocation11 + $0x1f4] sm:$0xf0] }
 0x7c6   : > { %v6921_v61 = vmul.f32 0.2, %v5731_v9  ;;  %v5467_v39 = vadd.f32 %v5466_v20, %v13813_v29  ;;  %v5555_v55 = vpop.f32.mrf.mxu3 }
 0x7c7   : > { %v5646_v48 = vpop.f32.mrf.mxu0 }
 0x7c8   : > { %v5556_v23 = vadd.f32 %v5555_v55, %v5467_v39  ;;  %v5735_v21 = vpop.f32.mrf.mxu1  ;;  %v7177_v3 = vmax.f32 %v5731_v9, %v6921_v61 }
 0x7ca   : > { %v5645_v42 = vadd.f32 %v5644_v45, %v5556_v23  ;;  %v13850_v50 = vpack.c.bf16 %v7177_v3, %v7169_v52 }
 0x7cc   : > { %15360 = vst [vmem:[#allocation119_spill] sm:$0xff] %v13850_v50  ;;  %v5734_v62 = vadd.f32 %v5733_v33, %v5645_v42 }
 0x7cd   : > { %v5468_v12 = vpop.f32.mrf.mxu2 }
 0x7ce   : > { %v5469_v30 = vadd.f32 %v5468_v12, %v13813_v29  ;;  %v5557_v20 = vpop.f32.mrf.mxu3  ;;  %v6929_v16 = vmul.f32 0.2, %v5734_v62 }
 0x7cf   : > { %v5649_v10 = vpop.f32.mrf.mxu0 }
 0x7d0   : > { %v5558_v28 = vadd.f32 %v5557_v20, %v5469_v30  ;;  %v5738_v39 = vpop.f32.mrf.mxu1  ;;  %v7185_v7 = vmax.f32 %v5734_v62, %v6929_v16  ;;  %v15365_v62 = vld [vmem:[#allocation61_spill] sm:$0xff] }
 0x7d2   : > { %v5647_v55 = vadd.f32 %v5646_v48, %v5558_v28  ;;  %5510 = vmatmul.bf16.gmra.mxu2 %v15181_v54  ;;  %5688 = vmatmul.bf16.gmra.mxu0 %v13272_v5 }
 0x7d3   : > { %5599 = vmatmul.bf16.gmra.mxu3 %v15182_v2  ;;  %5777 = vmatmul.bf16.gmra.mxu1 %v15226_v46 }
 0x7d4   : > { %v5736_v45 = vadd.f32 %v5735_v21, %v5647_v55 }
 0x7d5   : > { %v5471_v33 = vpop.f32.mrf.mxu2 }
 0x7d6   : > { %v6937_v60 = vmul.f32 0.2, %v5736_v45  ;;  %v5472_v9 = vadd.f32 %v5471_v33, %v13813_v29  ;;  %v5560_v61 = vpop.f32.mrf.mxu3  ;;  %v15362_v33 = vld [vmem:[#allocation28_spill] sm:$0xff] }
 0x7d7   : > { %v5651_v36 = vpop.f32.mrf.mxu0 }
 0x7d8   : > { %v5561_v28 = vadd.f32 %v5560_v61, %v5472_v9  ;;  %v5740_v48 = vpop.f32.mrf.mxu1  ;;  %v7193_v23 = vmax.f32 %v5736_v45, %v6937_v60  ;;  %v15364_v9 = vld [vmem:[#allocation27_spill] sm:$0xff] }
 0x7da   : > { %v5650_v35 = vadd.f32 %v5649_v10, %v5561_v28  ;;  %v13858_v52 = vpack.c.bf16 %v7193_v23, %v7185_v7  ;;  %v10215_v7 = vor.u32 %v11441_v25, %v10214_v19  ;;  %v11505_v23 = vld [vmem:[#allocation11 + $0x3f4] sm:$0xf0] }
 0x7dc   : > { %15361 = vst [vmem:[#allocation120_spill] sm:$0xff] %v13858_v52  ;;  %v5739_v3 = vadd.f32 %v5738_v39, %v5650_v35  ;;  %6149 = vmatpush.bf16.msrb.mxu2 %v10215_v7 }
 0x7dd   : > { %v5473_v42 = vpop.f32.mrf.mxu2 }
 0x7de   : > { %v5474_v21 = vadd.f32 %v5473_v42, %v13813_v29  ;;  %v5562_v12 = vpop.f32.mrf.mxu3  ;;  %v6945_v10 = vmul.f32 0.2, %v5739_v3 }
 0x7df   : > { %v5654_v30 = vpop.f32.mrf.mxu0 }
 0x7e0   : > { %v5563_v20 = vadd.f32 %v5562_v12, %v5474_v21  ;;  %v5743_v0 = vpop.f32.mrf.mxu1  ;;  %v7201_v12 = vmax.f32 %v5739_v3, %v6945_v10 }
 0x7e2   : > { %v5652_v55 = vadd.f32 %v5651_v36, %v5563_v20  ;;  %5515 = vmatmul.bf16.gmra.mxu2 %v15362_v33  ;;  %5693 = vmatmul.bf16.gmra.mxu0 %v15363_v32  ;;  %v10470_v36 = vld [vmem:[#allocation11 + $0x3d8] sm:$0xf] }
 0x7e3   : > { %5604 = vmatmul.bf16.gmra.mxu3 %v15364_v9  ;;  %5782 = vmatmul.bf16.gmra.mxu1 %v15365_v62  ;;  %v10471_v21 = vor.u32 %v11505_v23, %v10470_v36  ;;  %v10726_v9 = vld [vmem:[#allocation11 + $0x5d8] sm:$0xf] }
 0x7e4   : > { %v5741_v16 = vadd.f32 %v5740_v48, %v5652_v55  ;;  %v11569_v32 = vld [vmem:[#allocation11 + $0x5f4] sm:$0xf0] }
 0x7e5   : > { %v5476_v45 = vpop.f32.mrf.mxu2  ;;  %6238 = vmatpush.bf16.msrb.mxu3 %v10471_v21  ;;  %v10727_v25 = vor.u32 %v11569_v32, %v10726_v9  ;;  %v10982_v32 = vld [vmem:[#allocation11 + $0x7d8] sm:$0xf] }
 0x7e6   : > { %v6953_v39 = vmul.f32 0.2, %v5741_v16  ;;  %v5477_v60 = vadd.f32 %v5476_v45, %v13813_v29  ;;  %v5565_v61 = vpop.f32.mrf.mxu3  ;;  %v11633_v9 = vld [vmem:[#allocation11 + $0x7f4] sm:$0xf0] }
 0x7e7   : > { %v5656_v28 = vpop.f32.mrf.mxu0  ;;  %6327 = vmatpush.bf16.msrb.mxu0 %v10727_v25 }
 0x7e8   : > { %v5566_v35 = vadd.f32 %v5565_v61, %v5477_v60  ;;  %v5745_v42 = vpop.f32.mrf.mxu1  ;;  %v7209_v20 = vmax.f32 %v5741_v16, %v6953_v39  ;;  %v10983_v16 = vor.u32 %v11633_v9, %v10982_v32  ;;  %v15369_v32 = vld [vmem:[#allocation32_spill] sm:$0xff]  ;;  %v10182_v9 = vld [vmem:[#allocation11 + $0x198] sm:$0xf] }
 0x7ea   : > { %v5655_v52 = vadd.f32 %v5654_v30, %v5566_v35  ;;  %v13866_v48 = vpack.c.bf16 %v7209_v20, %v7201_v12  ;;  %6416 = vmatpush.bf16.msrb.mxu1 %v10983_v16  ;;  %v11433_v16 = vld [vmem:[#allocation11 + $0x1b4] sm:$0xf0] }
 0x7ec   : > { %15366 = vst [vmem:[#allocation121_spill] sm:$0xff] %v13866_v48  ;;  %v5744_v55 = vadd.f32 %v5743_v0, %v5655_v52 }
 0x7ed   : > { %v5478_v50 = vpop.f32.mrf.mxu2 }
 0x7ee   : > { %v5479_v45 = vadd.f32 %v5478_v50, %v13813_v29  ;;  %v5567_v62 = vpop.f32.mrf.mxu3  ;;  %v6961_v52 = vmul.f32 0.2, %v5744_v55 }
 0x7ef   : > { %v5659_v19 = vpop.f32.mrf.mxu0 }
 0x7f0   : > { %v5568_v33 = vadd.f32 %v5567_v62, %v5479_v45  ;;  %v5748_v60 = vpop.f32.mrf.mxu1 }
 0x7f2   : > { %v5657_v61 = vadd.f32 %v5656_v28, %v5568_v33  ;;  %5520 = vmatmul.bf16.gmra.mxu2 %v15187_v44  ;;  %5698 = vmatmul.bf16.gmra.mxu0 %v13297_v53  ;;  %v7217_v28 = vmax.f32 %v5744_v55, %v6961_v52  ;;  %v15371_v55 = vld [vmem:[#allocation31_spill] sm:$0xff] }
 0x7f3   : > { %5609 = vmatmul.bf16.gmra.mxu3 %v15188_v37  ;;  %5787 = vmatmul.bf16.gmra.mxu1 %v13289_v24 }
 0x7f4   : > { %v5746_v3 = vadd.f32 %v5745_v42, %v5657_v61 }
 0x7f5   : > { %v5481_v50 = vpop.f32.mrf.mxu2 }
 0x7f6   : > { %v6969_v30 = vmul.f32 0.2, %v5746_v3  ;;  %v5482_v0 = vadd.f32 %v5481_v50, %v13813_v29  ;;  %v5570_v10 = vpop.f32.mrf.mxu3  ;;  %v15368_v50 = vld [vmem:[#allocation36_spill] sm:$0xff] }
 0x7f7   : > { %v5661_v62 = vpop.f32.mrf.mxu0 }
 0x7f8   : > { %v5571_v33 = vadd.f32 %v5570_v10, %v5482_v0  ;;  %v5750_v39 = vpop.f32.mrf.mxu1  ;;  %v7225_v7 = vmax.f32 %v5746_v3, %v6969_v30  ;;  %v15370_v0 = vld [vmem:[#allocation35_spill] sm:$0xff] }
 0x7fa   : > { %v5660_v36 = vadd.f32 %v5659_v19, %v5571_v33  ;;  %v13874_v23 = vpack.c.bf16 %v7225_v7, %v7217_v28  ;;  %v10183_v28 = vor.u32 %v11433_v16, %v10182_v9  ;;  %v11497_v7 = vld [vmem:[#allocation11 + $0x3b4] sm:$0xf0] }
 0x7fc   : > { %15367 = vst [vmem:[#allocation122_spill] sm:$0xff] %v13874_v23  ;;  %v5749_v35 = vadd.f32 %v5748_v60, %v5660_v36  ;;  %6150 = vmatpush.bf16.msrb.mxu2 %v10183_v28 }
 0x7fd   : > { %v5483_v21 = vpop.f32.mrf.mxu2 }
 0x7fe   : > { %v5484_v42 = vadd.f32 %v5483_v21, %v13813_v29  ;;  %v5572_v12 = vpop.f32.mrf.mxu3  ;;  %v6977_v19 = vmul.f32 0.2, %v5749_v35 }
 0x7ff   : > { %v5664_v20 = vpop.f32.mrf.mxu0 }
 0x800   : > { %v5573_v45 = vadd.f32 %v5572_v12, %v5484_v42  ;;  %v5753_v25 = vpop.f32.mrf.mxu1  ;;  %v7233_v12 = vmax.f32 %v5749_v35, %v6977_v19 }
 0x802   : > { %v5662_v61 = vadd.f32 %v5661_v62, %v5573_v45  ;;  %5801 = vmatmul.bf16.vlgmr.msra.gmra.mxu2 %v15368_v50  ;;  %5979 = vmatmul.bf16.vlgmr.msra.gmra.mxu0 %v15369_v32  ;;  %v10438_v62 = vld [vmem:[#allocation11 + $0x398] sm:$0xf] }
 0x803   : > { %5890 = vmatmul.bf16.vlgmr.msra.gmra.mxu3 %v15370_v0  ;;  %6068 = vmatmul.bf16.vlgmr.msra.gmra.mxu1 %v15371_v55  ;;  %v10439_v42 = vor.u32 %v11497_v7, %v10438_v62  ;;  %v10694_v0 = vld [vmem:[#allocation11 + $0x598] sm:$0xf] }
 0x804   : > { %v5751_v52 = vadd.f32 %v5750_v39, %v5662_v61  ;;  %v11561_v32 = vld [vmem:[#allocation11 + $0x5b4] sm:$0xf0] }
 0x805   : > { %v5486_v3 = vpop.f32.mrf.mxu2  ;;  %6239 = vmatpush.bf16.msrb.mxu3 %v10439_v42  ;;  %v10695_v16 = vor.u32 %v11561_v32, %v10694_v0  ;;  %v10950_v32 = vld [vmem:[#allocation11 + $0x798] sm:$0xf] }
 0x806   : > { %v6985_v60 = vmul.f32 0.2, %v5751_v52  ;;  %v5487_v30 = vadd.f32 %v5486_v3, %v13813_v29  ;;  %v5575_v10 = vpop.f32.mrf.mxu3  ;;  %v11625_v0 = vld [vmem:[#allocation11 + $0x7b4] sm:$0xf0] }
 0x807   : > { %v5666_v33 = vpop.f32.mrf.mxu0  ;;  %6328 = vmatpush.bf16.msrb.mxu0 %v10695_v16 }
 0x808   : > { %v5576_v36 = vadd.f32 %v5575_v10, %v5487_v30  ;;  %v5755_v21 = vpop.f32.mrf.mxu1  ;;  %v7241_v45 = vmax.f32 %v5751_v52, %v6985_v60  ;;  %v10951_v52 = vor.u32 %v11625_v0, %v10950_v32  ;;  %v15375_v32 = vld [vmem:[#allocation47_spill] sm:$0xff]  ;;  %v10150_v0 = vld [vmem:[#allocation11 + $0x158] sm:$0xf] }
 0x80a   : > { %v5665_v23 = vadd.f32 %v5664_v20, %v5576_v36  ;;  %v13882_v39 = vpack.c.bf16 %v7241_v45, %v7233_v12  ;;  %6417 = vmatpush.bf16.msrb.mxu1 %v10951_v52  ;;  %v11425_v52 = vld [vmem:[#allocation11 + $0x174] sm:$0xf0] }
 0x80c   : > { %15372 = vst [vmem:[#allocation123_spill] sm:$0xff] %v13882_v39  ;;  %v5754_v61 = vadd.f32 %v5753_v25, %v5665_v23 }
 0x80d   : > { %v5488_v48 = vpop.f32.mrf.mxu2 }
 0x80e   : > { %v5489_v3 = vadd.f32 %v5488_v48, %v13813_v29  ;;  %v5577_v55 = vpop.f32.mrf.mxu3  ;;  %v6993_v23 = vmul.f32 0.2, %v5754_v61 }
 0x80f   : > { %v5669_v9 = vpop.f32.mrf.mxu0 }
 0x810   : > { %v5578_v50 = vadd.f32 %v5577_v55, %v5489_v3  ;;  %v5758_v30 = vpop.f32.mrf.mxu1 }
 0x812   : > { %v5667_v10 = vadd.f32 %v5666_v33, %v5578_v50  ;;  %5806 = vmatmul.bf16.gmra.mxu2 %v12880_v63  ;;  %5984 = vmatmul.bf16.gmra.mxu0 %v13128_v11  ;;  %v7249_v33 = vmax.f32 %v5754_v61, %v6993_v23  ;;  %v15377_v61 = vld [vmem:[#allocation34_spill] sm:$0xff] }
 0x813   : > { %5895 = vmatmul.bf16.gmra.mxu3 %v12863_v41  ;;  %6073 = vmatmul.bf16.gmra.mxu1 %v15193_v51 }
 0x814   : > { %v5756_v35 = vadd.f32 %v5755_v21, %v5667_v10 }
 0x815   : > { %v5491_v48 = vpop.f32.mrf.mxu2 }
 0x816   : > { %v7001_v20 = vmul.f32 0.2, %v5756_v35  ;;  %v5492_v25 = vadd.f32 %v5491_v48, %v13813_v29  ;;  %v5580_v19 = vpop.f32.mrf.mxu3  ;;  %v15374_v48 = vld [vmem:[#allocation38_spill] sm:$0xff] }
 0x817   : > { %v5671_v55 = vpop.f32.mrf.mxu0 }
 0x818   : > { %v5581_v50 = vadd.f32 %v5580_v19, %v5492_v25  ;;  %v5760_v60 = vpop.f32.mrf.mxu1  ;;  %v7257_v28 = vmax.f32 %v5756_v35, %v7001_v20  ;;  %v15376_v25 = vld [vmem:[#allocation37_spill] sm:$0xff] }
 0x81a   : > { %v5670_v62 = vadd.f32 %v5669_v9, %v5581_v50  ;;  %v13890_v7 = vpack.c.bf16 %v7257_v28, %v7249_v33  ;;  %v10151_v33 = vor.u32 %v11425_v52, %v10150_v0  ;;  %v11489_v28 = vld [vmem:[#allocation11 + $0x374] sm:$0xf0] }
 0x81c   : > { %15373 = vst [vmem:[#allocation124_spill] sm:$0xff] %v13890_v7  ;;  %v5759_v36 = vadd.f32 %v5758_v30, %v5670_v62  ;;  %6151 = vmatpush.bf16.msrb.mxu2 %v10151_v33 }
 0x81d   : > { %v5493_v42 = vpop.f32.mrf.mxu2 }
 0x81e   : > { %v5494_v21 = vadd.f32 %v5493_v42, %v13813_v29  ;;  %v5582_v12 = vpop.f32.mrf.mxu3  ;;  %v7009_v9 = vmul.f32 0.2, %v5759_v36 }
 0x81f   : > { %v5674_v45 = vpop.f32.mrf.mxu0 }
 0x820   : > { %v5583_v3 = vadd.f32 %v5582_v12, %v5494_v21  ;;  %v5763_v16 = vpop.f32.mrf.mxu1  ;;  %v7265_v12 = vmax.f32 %v5759_v36, %v7009_v9 }
 0x822   : > { %v5672_v10 = vadd.f32 %v5671_v55, %v5583_v3  ;;  %5811 = vmatmul.bf16.gmra.mxu2 %v15374_v48  ;;  %5989 = vmatmul.bf16.gmra.mxu0 %v15375_v32  ;;  %v10406_v55 = vld [vmem:[#allocation11 + $0x358] sm:$0xf] }
 0x823   : > { %5900 = vmatmul.bf16.gmra.mxu3 %v15376_v25  ;;  %6078 = vmatmul.bf16.gmra.mxu1 %v15377_v61  ;;  %v10407_v21 = vor.u32 %v11489_v28, %v10406_v55  ;;  %v10662_v25 = vld [vmem:[#allocation11 + $0x558] sm:$0xf] }
 0x824   : > { %v5761_v23 = vadd.f32 %v5760_v60, %v5672_v10  ;;  %v11553_v32 = vld [vmem:[#allocation11 + $0x574] sm:$0xf0] }
 0x825   : > { %v5496_v35 = vpop.f32.mrf.mxu2  ;;  %6240 = vmatpush.bf16.msrb.mxu3 %v10407_v21  ;;  %v10663_v52 = vor.u32 %v11553_v32, %v10662_v25  ;;  %v10918_v32 = vld [vmem:[#allocation11 + $0x758] sm:$0xf] }
 0x826   : > { %v7017_v30 = vmul.f32 0.2, %v5761_v23  ;;  %v5497_v20 = vadd.f32 %v5496_v35, %v13813_v29  ;;  %v5585_v19 = vpop.f32.mrf.mxu3  ;;  %v11617_v25 = vld [vmem:[#allocation11 + $0x774] sm:$0xf0] }
 0x827   : > { %v5676_v50 = vpop.f32.mrf.mxu0  ;;  %6329 = vmatpush.bf16.msrb.mxu0 %v10663_v52 }
 0x828   : > { %v5586_v62 = vadd.f32 %v5585_v19, %v5497_v20  ;;  %v5765_v42 = vpop.f32.mrf.mxu1  ;;  %v7273_v3 = vmax.f32 %v5761_v23, %v7017_v30  ;;  %v10919_v23 = vor.u32 %v11617_v25, %v10918_v32  ;;  %v15381_v32 = vld [vmem:[#allocation50_spill] sm:$0xff]  ;;  %v10118_v25 = vld [vmem:[#allocation11 + $0x118] sm:$0xf] }
 0x82a   : > { %v5675_v7 = vadd.f32 %v5674_v45, %v5586_v62  ;;  %v13898_v60 = vpack.c.bf16 %v7273_v3, %v7265_v12  ;;  %6418 = vmatpush.bf16.msrb.mxu1 %v10919_v23  ;;  %v11417_v23 = vld [vmem:[#allocation11 + $0x134] sm:$0xf0] }
 0x82c   : > { %15378 = vst [vmem:[#allocation125_spill] sm:$0xff] %v13898_v60  ;;  %v5764_v10 = vadd.f32 %v5763_v16, %v5675_v7 }
 0x82d   : > { %v5498_v39 = vpop.f32.mrf.mxu2 }
 0x82e   : > { %v5499_v35 = vadd.f32 %v5498_v39, %v13813_v29  ;;  %v5587_v61 = vpop.f32.mrf.mxu3  ;;  %v7025_v7 = vmul.f32 0.2, %v5764_v10 }
 0x82f   : > { %v5679_v0 = vpop.f32.mrf.mxu0 }
 0x830   : > { %v5588_v48 = vadd.f32 %v5587_v61, %v5499_v35  ;;  %v5768_v20 = vpop.f32.mrf.mxu1 }
 0x832   : > { %v5677_v19 = vadd.f32 %v5676_v50, %v5588_v48  ;;  %5816 = vmatmul.bf16.gmra.mxu2 %v12928_v22  ;;  %5994 = vmatmul.bf16.gmra.mxu0 %v13152_v6  ;;  %v7281_v50 = vmax.f32 %v5764_v10, %v7025_v7  ;;  %v15383_v10 = vld [vmem:[#allocation49_spill] sm:$0xff] }
 0x833   : > { %5905 = vmatmul.bf16.gmra.mxu3 %v12911_v18  ;;  %6083 = vmatmul.bf16.gmra.mxu1 %v15199_v58 }
 0x834   : > { %v5766_v36 = vadd.f32 %v5765_v42, %v5677_v19 }
 0x835   : > { %v5501_v39 = vpop.f32.mrf.mxu2 }
 0x836   : > { %v7033_v45 = vmul.f32 0.2, %v5766_v36  ;;  %v5502_v16 = vadd.f32 %v5501_v39, %v13813_v29  ;;  %v5590_v9 = vpop.f32.mrf.mxu3  ;;  %v15380_v39 = vld [vmem:[#allocation40_spill] sm:$0xff] }
 0x837   : > { %v5681_v61 = vpop.f32.mrf.mxu0 }
 0x838   : > { %v5591_v48 = vadd.f32 %v5590_v9, %v5502_v16  ;;  %v5770_v30 = vpop.f32.mrf.mxu1  ;;  %v7289_v33 = vmax.f32 %v5766_v36, %v7033_v45  ;;  %v15382_v16 = vld [vmem:[#allocation39_spill] sm:$0xff] }
 0x83a   : > { %v5680_v55 = vadd.f32 %v5679_v0, %v5591_v48  ;;  %v13906_v28 = vpack.c.bf16 %v7289_v33, %v7281_v50  ;;  %v10119_v50 = vor.u32 %v11417_v23, %v10118_v25  ;;  %v11481_v33 = vld [vmem:[#allocation11 + $0x334] sm:$0xf0] }
 0x83c   : > { %15379 = vst [vmem:[#allocation126_spill] sm:$0xff] %v13906_v28  ;;  %v5769_v62 = vadd.f32 %v5768_v20, %v5680_v55  ;;  %6152 = vmatpush.bf16.msrb.mxu2 %v10119_v50 }
 0x83d   : > { %v5503_v21 = vpop.f32.mrf.mxu2 }
 0x83e   : > { %v5504_v42 = vadd.f32 %v5503_v21, %v13813_v29  ;;  %v5592_v12 = vpop.f32.mrf.mxu3  ;;  %v7041_v0 = vmul.f32 0.2, %v5769_v62 }
 0x83f   : > { %v5684_v3 = vpop.f32.mrf.mxu0 }
 0x840   : > { %v5593_v35 = vadd.f32 %v5592_v12, %v5504_v42  ;;  %v5773_v52 = vpop.f32.mrf.mxu1  ;;  %v7297_v12 = vmax.f32 %v5769_v62, %v7041_v0 }
 0x842   : > { %v5682_v19 = vadd.f32 %v5681_v61, %v5593_v35  ;;  %5821 = vmatmul.bf16.gmra.mxu2 %v15380_v39  ;;  %5999 = vmatmul.bf16.gmra.mxu0 %v15381_v32  ;;  %v10374_v61 = vld [vmem:[#allocation11 + $0x318] sm:$0xf] }
 0x843   : > { %5910 = vmatmul.bf16.gmra.mxu3 %v15382_v16  ;;  %6088 = vmatmul.bf16.gmra.mxu1 %v15383_v10  ;;  %v10375_v42 = vor.u32 %v11481_v33, %v10374_v61  ;;  %v10630_v16 = vld [vmem:[#allocation11 + $0x518] sm:$0xf] }
 0x844   : > { %v5771_v7 = vadd.f32 %v5770_v30, %v5682_v19  ;;  %v11545_v32 = vld [vmem:[#allocation11 + $0x534] sm:$0xf0] }
 0x845   : > { %v5506_v36 = vpop.f32.mrf.mxu2  ;;  %6241 = vmatpush.bf16.msrb.mxu3 %v10375_v42  ;;  %v10631_v23 = vor.u32 %v11545_v32, %v10630_v16  ;;  %v10886_v32 = vld [vmem:[#allocation11 + $0x718] sm:$0xf] }
 0x846   : > { %v7049_v20 = vmul.f32 0.2, %v5771_v7  ;;  %v5507_v45 = vadd.f32 %v5506_v36, %v13813_v29  ;;  %v5595_v9 = vpop.f32.mrf.mxu3  ;;  %v11609_v16 = vld [vmem:[#allocation11 + $0x734] sm:$0xf0] }
 0x847   : > { %v5686_v48 = vpop.f32.mrf.mxu0  ;;  %6330 = vmatpush.bf16.msrb.mxu0 %v10631_v23 }
 0x848   : > { %v5596_v55 = vadd.f32 %v5595_v9, %v5507_v45  ;;  %v5775_v21 = vpop.f32.mrf.mxu1  ;;  %v7305_v35 = vmax.f32 %v5771_v7, %v7049_v20  ;;  %v10887_v7 = vor.u32 %v11609_v16, %v10886_v32  ;;  %v15387_v32 = vld [vmem:[#allocation53_spill] sm:$0xff] }
 0x849   : > { %v10086_v16 = vld [vmem:[#allocation11 + $0xd8] sm:$0xf] }
 0x84a   : > { %v5685_v28 = vadd.f32 %v5684_v3, %v5596_v55  ;;  %v13914_v30 = vpack.c.bf16 %v7305_v35, %v7297_v12  ;;  %6419 = vmatpush.bf16.msrb.mxu1 %v10887_v7  ;;  %v11409_v7 = vld [vmem:[#allocation11 + $0xf4] sm:$0xf0] }
 0x84c   : > { %15384 = vst [vmem:[#allocation127_spill] sm:$0xff] %v13914_v30  ;;  %v5774_v19 = vadd.f32 %v5773_v52, %v5685_v28 }
 0x84d   : > { %v5508_v60 = vpop.f32.mrf.mxu2 }
 0x84e   : > { %v5509_v36 = vadd.f32 %v5508_v60, %v13813_v29  ;;  %v5597_v10 = vpop.f32.mrf.mxu3  ;;  %v7057_v28 = vmul.f32 0.2, %v5774_v19 }
 0x84f   : > { %v5689_v25 = vpop.f32.mrf.mxu0 }
 0x850   : > { %v5598_v39 = vadd.f32 %v5597_v10, %v5509_v36  ;;  %v5778_v45 = vpop.f32.mrf.mxu1 }
 0x852   : > { %v5687_v9 = vadd.f32 %v5686_v48, %v5598_v39  ;;  %5826 = vmatmul.bf16.gmra.mxu2 %v12976_v34  ;;  %6004 = vmatmul.bf16.gmra.mxu0 %v13176_v8  ;;  %v7313_v48 = vmax.f32 %v5774_v19, %v7057_v28  ;;  %v15389_v19 = vld [vmem:[#allocation52_spill] sm:$0xff] }
 0x853   : > { %5915 = vmatmul.bf16.gmra.mxu3 %v12959_v1  ;;  %6093 = vmatmul.bf16.gmra.mxu1 %v15205_v40 }
 0x854   : > { %v5776_v62 = vadd.f32 %v5775_v21, %v5687_v9 }
 0x855   : > { %v5511_v60 = vpop.f32.mrf.mxu2 }
 0x856   : > { %v7065_v3 = vmul.f32 0.2, %v5776_v62  ;;  %v5512_v52 = vadd.f32 %v5511_v60, %v13813_v29  ;;  %v5600_v0 = vpop.f32.mrf.mxu3  ;;  %v15386_v60 = vld [vmem:[#allocation42_spill] sm:$0xff] }
 0x857   : > { %v5691_v10 = vpop.f32.mrf.mxu0 }
 0x858   : > { %v5601_v39 = vadd.f32 %v5600_v0, %v5512_v52  ;;  %v5780_v20 = vpop.f32.mrf.mxu1  ;;  %v7321_v50 = vmax.f32 %v5776_v62, %v7065_v3  ;;  %v15388_v52 = vld [vmem:[#allocation41_spill] sm:$0xff] }
 0x85a   : > { %v5690_v61 = vadd.f32 %v5689_v25, %v5601_v39  ;;  %v13922_v33 = vpack.c.bf16 %v7321_v50, %v7313_v48  ;;  %v10087_v48 = vor.u32 %v11409_v7, %v10086_v16  ;;  %v11473_v50 = vld [vmem:[#allocation11 + $0x2f4] sm:$0xf0] }
 0x85b   : > { %v10598_v7 = vld [vmem:[#allocation11 + $0x4d8] sm:$0xf] }
 0x85c   : > { %15385 = vst [vmem:[#allocation128_spill] sm:$0xff] %v13922_v33  ;;  %v5779_v55 = vadd.f32 %v5778_v45, %v5690_v61  ;;  %6153 = vmatpush.bf16.msrb.mxu2 %v10087_v48  ;;  %v10854_v48 = vld [vmem:[#allocation11 + $0x6d8] sm:$0xf] }
 0x85d   : > { %v5513_v42 = vpop.f32.mrf.mxu2 }
 0x85e   : > { %v5514_v21 = vadd.f32 %v5513_v42, %v13813_v29  ;;  %v5602_v12 = vpop.f32.mrf.mxu3  ;;  %v7073_v25 = vmul.f32 0.2, %v5779_v55 }
 0x85f   : > { %v5694_v35 = vpop.f32.mrf.mxu0 }
 0x860   : > { %v5603_v36 = vadd.f32 %v5602_v12, %v5514_v21  ;;  %v5783_v23 = vpop.f32.mrf.mxu1  ;;  %v7329_v12 = vmax.f32 %v5779_v55, %v7073_v25 }
 0x862   : > { %v5692_v9 = vadd.f32 %v5691_v10, %v5603_v36  ;;  %5831 = vmatmul.bf16.gmra.mxu2 %v15386_v60  ;;  %6009 = vmatmul.bf16.gmra.mxu0 %v15387_v32  ;;  %v10342_v10 = vld [vmem:[#allocation11 + $0x2d8] sm:$0xf] }
 0x863   : > { %5920 = vmatmul.bf16.gmra.mxu3 %v15388_v52  ;;  %6098 = vmatmul.bf16.gmra.mxu1 %v15389_v19  ;;  %v10343_v21 = vor.u32 %v11473_v50, %v10342_v10  ;;  %v11537_v60 = vld [vmem:[#allocation11 + $0x4f4] sm:$0xf0] }
 0x864   : > { %v5781_v28 = vadd.f32 %v5780_v20, %v5692_v9  ;;  %v11601_v10 = vld [vmem:[#allocation11 + $0x6f4] sm:$0xf0] }
 0x865   : > { %v5516_v62 = vpop.f32.mrf.mxu2  ;;  %6242 = vmatpush.bf16.msrb.mxu3 %v10343_v21 }
 0x866   : > { %v7081_v45 = vmul.f32 0.2, %v5781_v28  ;;  %v5517_v3 = vadd.f32 %v5516_v62, %v13813_v29  ;;  %v5605_v0 = vpop.f32.mrf.mxu3 }
 0x867   : > { %v5696_v39 = vpop.f32.mrf.mxu0 }
 0x868   : > { %v5606_v61 = vadd.f32 %v5605_v0, %v5517_v3  ;;  %v5785_v42 = vpop.f32.mrf.mxu1  ;;  %v7337_v36 = vmax.f32 %v5781_v28, %v7081_v45  ;;  %v10599_v3 = vor.u32 %v11537_v60, %v10598_v7 }
 0x86a   : > { %v5695_v33 = vadd.f32 %v5694_v35, %v5606_v61  ;;  %v13930_v20 = vpack.c.bf16 %v7337_v36, %v7329_v12  ;;  %6331 = vmatpush.bf16.msrb.mxu0 %v10599_v3  ;;  %v10855_v61 = vor.u32 %v11601_v10, %v10854_v48  ;;  %v10310_v10 = vld [vmem:[#allocation11 + $0x298] sm:$0xf] }
 0x86c   : > { %15390 = vst [vmem:[#allocation129_spill] sm:$0xff] %v13930_v20  ;;  %v5784_v9 = vadd.f32 %v5783_v23, %v5695_v33  ;;  %6420 = vmatpush.bf16.msrb.mxu1 %v10855_v61  ;;  %v11465_v61 = vld [vmem:[#allocation11 + $0x2b4] sm:$0xf0] }
 0x86d   : > { %v5518_v30 = vpop.f32.mrf.mxu2 }
 0x86e   : > { %v5519_v62 = vadd.f32 %v5518_v30, %v13813_v29  ;;  %v5607_v19 = vpop.f32.mrf.mxu3  ;;  %v7089_v33 = vmul.f32 0.2, %v5784_v9 }
 0x86f   : > { %v5699_v52 = vpop.f32.mrf.mxu0 }
 0x870   : > { %v5608_v32 = vadd.f32 %v5607_v19, %v5519_v62  ;;  %v5788_v16 = vpop.f32.mrf.mxu1 }
 0x872   : > { %v5697_v0 = vadd.f32 %v5696_v39, %v5608_v32  ;;  %5836 = vmatmul.bf16.gmra.mxu2 %v13004_v47  ;;  %6014 = vmatmul.bf16.gmra.mxu0 %v13200_v26  ;;  %v7345_v32 = vmax.f32 %v5784_v9, %v7089_v33  ;;  %v15393_v9 = vld [vmem:[#allocation55_spill] sm:$0xff] }
 0x873   : > { %5925 = vmatmul.bf16.gmra.mxu3 %v12997_v13  ;;  %6103 = vmatmul.bf16.gmra.mxu1 %v13193_v4 }
 0x874   : > { %v5786_v55 = vadd.f32 %v5785_v42, %v5697_v0 }
 0x875   : > { %v5521_v30 = vpop.f32.mrf.mxu2 }
 0x876   : > { %v7097_v35 = vmul.f32 0.2, %v5786_v55  ;;  %v5522_v23 = vadd.f32 %v5521_v30, %v13813_v29  ;;  %v5610_v19 = vpop.f32.mrf.mxu3  ;;  %v15392_v30 = vld [vmem:[#allocation44_spill] sm:$0xff] }
 0x877   : > { %v5701_v25 = vpop.f32.mrf.mxu0 }
 0x878   : > { %v5611_v28 = vadd.f32 %v5610_v19, %v5522_v23  ;;  %v5790_v60 = vpop.f32.mrf.mxu1  ;;  %v7353_v45 = vmax.f32 %v5786_v55, %v7097_v35  ;;  %v15394_v55 = vld [vmem:[#allocation43_spill] sm:$0xff]  ;;  %v15395_v35 = vld [vmem:[#allocation54_spill] sm:$0xff] }
 0x87a   : > { %v5700_v39 = vadd.f32 %v5699_v52, %v5611_v28  ;;  %v13938_v50 = vpack.c.bf16 %v7353_v45, %v7345_v32  ;;  %v12071_v52 = vld [vmem:[#allocation13] sm:$0xff]  ;;  %v10054_v45 = vld [vmem:[#allocation11 + $0x98] sm:$0xf] }
 0x87b   : > { %v13943_v33 = vperm.slane %v12071_v52, 5 }
 0x87c   : > { %15391 = vst [vmem:[#allocation130_spill] sm:$0xff] %v13938_v50  ;;  %v5789_v21 = vadd.f32 %v5788_v16, %v5700_v39 }
 0x87d   : > { %v5523_v12 = vpop.f32.mrf.mxu2 }
 0x87e   : > { %v5524_v42 = vadd.f32 %v5523_v12, %v13813_v29  ;;  %v5612_v36 = vpop.f32.mrf.mxu3  ;;  %v7105_v16 = vmul.f32 0.2, %v5789_v21 }
 0x87f   : > { %v5980_v62 = vpop.f32.mrf.mxu0 }
 0x880   : > { %v5613_v7 = vadd.f32 %v5612_v36, %v5524_v42  ;;  %v6069_v3 = vpop.f32.mrf.mxu1  ;;  %v10311_v36 = vor.u32 %v11465_v61, %v10310_v10 }
 0x882   : > { %v5702_v0 = vadd.f32 %v5701_v25, %v5613_v7  ;;  %5841 = vmatmul.bf16.gmra.mxu2 %v15392_v30  ;;  %6019 = vmatmul.bf16.gmra.mxu0 %v15393_v9  ;;  %v11401_v25 = vld [vmem:[#allocation11 + $0xb4] sm:$0xf0]  ;;  %v7361_v7 = vmax.f32 %v5789_v21, %v7105_v16 }
 0x883   : > { %5930 = vmatmul.bf16.gmra.mxu3 %v15394_v55  ;;  %6108 = vmatmul.bf16.gmra.mxu1 %v15395_v35  ;;  %v10055_v48 = vor.u32 %v11401_v25, %v10054_v45  ;;  %v10566_v55 = vld [vmem:[#allocation11 + $0x498] sm:$0xf] }
 0x884   : > { %v5791_v23 = vadd.f32 %v5790_v60, %v5702_v0  ;;  %6243 = vmatpush.bf16.msrb.mxu3 %v10311_v36  ;;  %v11529_v9 = vld [vmem:[#allocation11 + $0x4b4] sm:$0xf0] }
 0x885   : > { %v5802_v19 = vpop.f32.mrf.mxu2  ;;  %6154 = vmatpush.bf16.msrb.mxu2 %v10055_v48  ;;  %v10567_v25 = vor.u32 %v11529_v9, %v10566_v55  ;;  %v10822_v9 = vld [vmem:[#allocation11 + $0x698] sm:$0xf] }
 0x886   : > { %v7113_v29 = vmul.f32 0.2, %v5791_v23  ;;  %v5803_v28 = vadd.f32 %v5802_v19, %v13943_v33  ;;  %v5891_v32 = vpop.f32.mrf.mxu3  ;;  %v11593_v55 = vld [vmem:[#allocation11 + $0x6b4] sm:$0xf0] }
 0x887   : > { %v5982_v39 = vpop.f32.mrf.mxu0  ;;  %6332 = vmatpush.bf16.msrb.mxu0 %v10567_v25 }
 0x888   : > { %v5892_v12 = vadd.f32 %v5891_v32, %v5803_v28  ;;  %v6071_v42 = vpop.f32.mrf.mxu1  ;;  %v7369_v52 = vmax.f32 %v5791_v23, %v7113_v29  ;;  %v10823_v23 = vor.u32 %v11593_v55, %v10822_v9  ;;  %v15399_v9 = vld [vmem:[#allocation58_spill] sm:$0xff]  ;;  %v10022_v55 = vld [vmem:[#allocation11 + $0x58] sm:$0xf] }
 0x88a   : > { %v5981_v50 = vadd.f32 %v5980_v62, %v5892_v12  ;;  %v13948_v60 = vpack.c.bf16 %v7369_v52, %v7361_v7  ;;  %6421 = vmatpush.bf16.msrb.mxu1 %v10823_v23  ;;  %v11393_v23 = vld [vmem:[#allocation11 + $0x74] sm:$0xf0] }
 0x88c   : > { %15396 = vst [vmem:[#allocation131_spill] sm:$0xff] %v13948_v60  ;;  %v6070_v0 = vadd.f32 %v6069_v3, %v5981_v50 }
 0x88d   : > { %v5804_v20 = vpop.f32.mrf.mxu2 }
 0x88e   : > { %v5805_v19 = vadd.f32 %v5804_v20, %v13943_v33  ;;  %v5893_v35 = vpop.f32.mrf.mxu3  ;;  %v6866_v50 = vmul.f32 0.2, %v6070_v0 }
 0x88f   : > { %v5985_v45 = vpop.f32.mrf.mxu0 }
 0x890   : > { %v5894_v30 = vadd.f32 %v5893_v35, %v5805_v19  ;;  %v6074_v28 = vpop.f32.mrf.mxu1 }
 0x892   : > { %v5983_v32 = vadd.f32 %v5982_v39, %v5894_v30  ;;  %5846 = vmatmul.bf16.gmra.mxu2 %v13028_v38  ;;  %6024 = vmatmul.bf16.gmra.mxu0 %v13224_v43  ;;  %v7122_v30 = vmax.f32 %v6070_v0, %v6866_v50  ;;  %v15400_v0 = vld [vmem:[#allocation46_spill] sm:$0xff]  ;;  %v15401_v50 = vld [vmem:[#allocation57_spill] sm:$0xff] }
 0x893   : > { %5935 = vmatmul.bf16.gmra.mxu3 %v15217_v14  ;;  %6113 = vmatmul.bf16.gmra.mxu1 %v15218_v59 }
 0x894   : > { %v6072_v21 = vadd.f32 %v6071_v42, %v5983_v32 }
 0x895   : > { %v5807_v20 = vpop.f32.mrf.mxu2 }
 0x896   : > { %v6874_v62 = vmul.f32 0.2, %v6072_v21  ;;  %v5808_v3 = vadd.f32 %v5807_v20, %v13943_v33  ;;  %v5896_v16 = vpop.f32.mrf.mxu3  ;;  %v15398_v20 = vld [vmem:[#allocation23_spill] sm:$0xff] }
 0x897   : > { %v5987_v35 = vpop.f32.mrf.mxu0 }
 0x898   : > { %v7130_v29 = vmax.f32 %v6072_v21, %v6874_v62  ;;  %v5897_v39 = vadd.f32 %v5896_v16, %v5808_v3  ;;  %v6076_v48 = vpop.f32.mrf.mxu1 }
 0x89a   : > { %v13956_v10 = vpack.c.bf16 %v7130_v29, %v7122_v30  ;;  %v5986_v61 = vadd.f32 %v5985_v45, %v5897_v39  ;;  %v10023_v29 = vor.u32 %v11393_v23, %v10022_v55  ;;  %v11457_v39 = vld [vmem:[#allocation11 + $0x274] sm:$0xf0] }
 0x89c   : > { %15397 = vst [vmem:[#allocation132_spill] sm:$0xff] %v13956_v10  ;;  %v6075_v12 = vadd.f32 %v6074_v28, %v5986_v61  ;;  %6155 = vmatpush.bf16.msrb.mxu2 %v10023_v29 }
 0x89d   : > { %v5809_v36 = vpop.f32.mrf.mxu2 }
 0x89e   : > { %v5810_v42 = vadd.f32 %v5809_v36, %v13943_v33  ;;  %v5898_v7 = vpop.f32.mrf.mxu3  ;;  %v6882_v21 = vmul.f32 0.2, %v6075_v12 }
 0x89f   : > { %v5990_v52 = vpop.f32.mrf.mxu0 }
 0x8a0   : > { %v5899_v19 = vadd.f32 %v5898_v7, %v5810_v42  ;;  %v6079_v25 = vpop.f32.mrf.mxu1  ;;  %v7138_v7 = vmax.f32 %v6075_v12, %v6882_v21 }
 0x8a2   : > { %v5988_v32 = vadd.f32 %v5987_v35, %v5899_v19  ;;  %5851 = vmatmul.bf16.gmra.mxu2 %v15398_v20  ;;  %6029 = vmatmul.bf16.gmra.mxu0 %v15399_v9  ;;  %v10278_v35 = vld [vmem:[#allocation11 + $0x258] sm:$0xf] }
 0x8a3   : > { %5940 = vmatmul.bf16.gmra.mxu3 %v15400_v0  ;;  %6118 = vmatmul.bf16.gmra.mxu1 %v15401_v50  ;;  %v10279_v42 = vor.u32 %v11457_v39, %v10278_v35  ;;  %v10534_v0 = vld [vmem:[#allocation11 + $0x458] sm:$0xf] }
 0x8a4   : > { %v6077_v62 = vadd.f32 %v6076_v48, %v5988_v32  ;;  %v11521_v9 = vld [vmem:[#allocation11 + $0x474] sm:$0xf0] }
 0x8a5   : > { %v5812_v45 = vpop.f32.mrf.mxu2  ;;  %6244 = vmatpush.bf16.msrb.mxu3 %v10279_v42  ;;  %v10535_v23 = vor.u32 %v11521_v9, %v10534_v0  ;;  %v10790_v9 = vld [vmem:[#allocation11 + $0x658] sm:$0xf] }
 0x8a6   : > { %v6890_v28 = vmul.f32 0.2, %v6077_v62  ;;  %v5813_v3 = vadd.f32 %v5812_v45, %v13943_v33  ;;  %v5901_v16 = vpop.f32.mrf.mxu3  ;;  %v11585_v0 = vld [vmem:[#allocation11 + $0x674] sm:$0xf0] }
 0x8a7   : > { %v5992_v30 = vpop.f32.mrf.mxu0  ;;  %6333 = vmatpush.bf16.msrb.mxu0 %v10535_v23 }
 0x8a8   : > { %v5902_v61 = vadd.f32 %v5901_v16, %v5813_v3  ;;  %v6081_v36 = vpop.f32.mrf.mxu1  ;;  %v7146_v19 = vmax.f32 %v6077_v62, %v6890_v28  ;;  %v10791_v62 = vor.u32 %v11585_v0, %v10790_v9 }
 0x8aa   : > { %v5991_v60 = vadd.f32 %v5990_v52, %v5902_v61  ;;  %v13964_v48 = vpack.c.bf16 %v7146_v19, %v7138_v7  ;;  %6422 = vmatpush.bf16.msrb.mxu1 %v10791_v62  ;;  %v11449_v62 = vld [vmem:[#allocation11 + $0x234] sm:$0xf0] }
 0x8ac   : > { %15402 = vst [vmem:[#allocation133_spill] sm:$0xff] %v13964_v48  ;;  %v6080_v32 = vadd.f32 %v6079_v25, %v5991_v60  ;;  %v11513_v48 = vld [vmem:[#allocation11 + $0x434] sm:$0xf0] }
 0x8ad   : > { %v5814_v10 = vpop.f32.mrf.mxu2 }
 0x8ae   : > { %v5815_v45 = vadd.f32 %v5814_v10, %v13943_v33  ;;  %v5903_v50 = vpop.f32.mrf.mxu3  ;;  %v6898_v60 = vmul.f32 0.2, %v6080_v32 }
 0x8af   : > { %v5995_v55 = vpop.f32.mrf.mxu0 }
 0x8b0   : > { %v5904_v20 = vadd.f32 %v5903_v50, %v5815_v45  ;;  %v6084_v3 = vpop.f32.mrf.mxu1 }
 0x8b2   : > { %v5993_v16 = vadd.f32 %v5992_v30, %v5904_v20  ;;  %5856 = vmatmul.bf16.gmra.mxu2 %v13052_v31  ;;  %6034 = vmatmul.bf16.gmra.mxu0 %v13248_v57  ;;  %v7154_v30 = vmax.f32 %v6080_v32, %v6898_v60  ;;  %v15404_v32 = vld [vmem:[#allocation59_spill] sm:$0xff] }
 0x8b3   : > { %5945 = vmatmul.bf16.gmra.mxu3 %v13045_v49  ;;  %6123 = vmatmul.bf16.gmra.mxu1 %v13241_v27 }
 0x8b4   : > { %v6082_v12 = vadd.f32 %v6081_v36, %v5993_v16 }
 0x8b5   : > { %v5817_v10 = vpop.f32.mrf.mxu2 }
 0x8b6   : > { %v6906_v52 = vmul.f32 0.2, %v6082_v12  ;;  %v5818_v25 = vadd.f32 %v5817_v10, %v13943_v33  ;;  %v5906_v21 = vpop.f32.mrf.mxu3 }
 0x8b7   : > { %v5997_v50 = vpop.f32.mrf.mxu0 }
 0x8b8   : > { %v5907_v20 = vadd.f32 %v5906_v21, %v5818_v25  ;;  %v6086_v28 = vpop.f32.mrf.mxu1  ;;  %v7162_v29 = vmax.f32 %v6082_v12, %v6906_v52  ;;  %v9990_v25 = vld [vmem:[#allocation11 + $0x18] sm:$0xf] }
 0x8b9   : > { %v11385_v21 = vld [vmem:[#allocation11 + $0x34] sm:$0xf0] }
 0x8ba   : > { %v5996_v35 = vadd.f32 %v5995_v55, %v5907_v20  ;;  %v13972_v39 = vpack.c.bf16 %v7162_v29, %v7154_v30  ;;  %v9991_v0 = vor.u32 %v11385_v21, %v9990_v25 }
 0x8bc   : > { %15403 = vst [vmem:[#allocation134_spill] sm:$0xff] %v13972_v39  ;;  %v6085_v61 = vadd.f32 %v6084_v3, %v5996_v35  ;;  %6156 = vmatpush.bf16.msrb.mxu2 %v9991_v0  ;;  %v10502_v39 = vld [vmem:[#allocation11 + $0x418] sm:$0xf] }
 0x8bd   : > { %v5819_v42 = vpop.f32.mrf.mxu2  ;;  %v10503_v21 = vor.u32 %v11513_v48, %v10502_v39  ;;  %v10758_v48 = vld [vmem:[#allocation11 + $0x618] sm:$0xf] }
 0x8be   : > { %v5820_v36 = vadd.f32 %v5819_v42, %v13943_v33  ;;  %v5908_v7 = vpop.f32.mrf.mxu3  ;;  %v6914_v55 = vmul.f32 0.2, %v6085_v61  ;;  %v11577_v39 = vld [vmem:[#allocation11 + $0x634] sm:$0xf0] }
 0x8bf   : > { %v6000_v19 = vpop.f32.mrf.mxu0  ;;  %6334 = vmatpush.bf16.msrb.mxu0 %v10503_v21 }
 0x8c0   : > { %v5909_v45 = vadd.f32 %v5908_v7, %v5820_v36  ;;  %v6089_v23 = vpop.f32.mrf.mxu1  ;;  %v7170_v35 = vmax.f32 %v6085_v61, %v6914_v55 }
 0x8c2   : > { %v5998_v16 = vadd.f32 %v5997_v50, %v5909_v45  ;;  %5861 = vmatmul.bf16.gmra.mxu2 %v13064_v56  ;;  %6039 = vmatmul.bf16.gmra.mxu0 %v13260_v15  ;;  %v10246_v50 = vld [vmem:[#allocation11 + $0x218] sm:$0xf] }
 0x8c3   : > { %5950 = vmatmul.bf16.gmra.mxu3 %v15179_v17  ;;  %6128 = vmatmul.bf16.gmra.mxu1 %v15404_v32  ;;  %v10247_v29 = vor.u32 %v11449_v62, %v10246_v50  ;;  %v10759_v50 = vor.u32 %v11577_v39, %v10758_v48  ;;  %v15408_v48 = vld [vmem:[#allocation62_spill] sm:$0xff]  ;;  %v11437_v39 = vld [vmem:[#allocation11 + $0x1dc] sm:$0xf] }
 0x8c4   : > { %v6087_v60 = vadd.f32 %v6086_v28, %v5998_v16 }
 0x8c5   : > { %v5822_v12 = vpop.f32.mrf.mxu2  ;;  %6245 = vmatpush.bf16.msrb.mxu3 %v10247_v29  ;;  %6423 = vmatpush.bf16.msrb.mxu1 %v10759_v50  ;;  %v10216_v50 = vld [vmem:[#allocation11 + $0x1f8] sm:$0xf0] }
 0x8c6   : > { %v6922_v3 = vmul.f32 0.2, %v6087_v60  ;;  %v5823_v10 = vadd.f32 %v5822_v12, %v13943_v33  ;;  %v5911_v52 = vpop.f32.mrf.mxu3 }
 0x8c7   : > { %v6002_v9 = vpop.f32.mrf.mxu0 }
 0x8c8   : > { %v5912_v20 = vadd.f32 %v5911_v52, %v5823_v10  ;;  %v6091_v30 = vpop.f32.mrf.mxu1  ;;  %v7178_v42 = vmax.f32 %v6087_v60, %v6922_v3 }
 0x8ca   : > { %v6001_v36 = vadd.f32 %v6000_v19, %v5912_v20  ;;  %v13980_v28 = vpack.c.bf16 %v7178_v42, %v7170_v35 }
 0x8cc   : > { %15405 = vst [vmem:[#allocation135_spill] sm:$0xff] %v13980_v28  ;;  %v6090_v7 = vadd.f32 %v6089_v23, %v6001_v36 }
 0x8cd   : > { %v5824_v45 = vpop.f32.mrf.mxu2 }
 0x8ce   : > { %v5825_v16 = vadd.f32 %v5824_v45, %v13943_v33  ;;  %v5913_v12 = vpop.f32.mrf.mxu3  ;;  %v6930_v61 = vmul.f32 0.2, %v6090_v7 }
 0x8cf   : > { %v6005_v25 = vpop.f32.mrf.mxu0 }
 0x8d0   : > { %v5914_v32 = vadd.f32 %v5913_v12, %v5825_v16  ;;  %v6094_v10 = vpop.f32.mrf.mxu1  ;;  %v7186_v62 = vmax.f32 %v6090_v7, %v6930_v61  ;;  %v15410_v7 = vld [vmem:[#allocation61_spill] sm:$0xff] }
 0x8d2   : > { %v6003_v52 = vadd.f32 %v6002_v9, %v5914_v32  ;;  %5866 = vmatmul.bf16.gmra.mxu2 %v15181_v54  ;;  %6044 = vmatmul.bf16.gmra.mxu0 %v13272_v5 }
 0x8d3   : > { %5955 = vmatmul.bf16.gmra.mxu3 %v15182_v2  ;;  %6133 = vmatmul.bf16.gmra.mxu1 %v15226_v46 }
 0x8d4   : > { %v6092_v19 = vadd.f32 %v6091_v30, %v6003_v52 }
 0x8d5   : > { %v5827_v23 = vpop.f32.mrf.mxu2 }
 0x8d6   : > { %v6938_v55 = vmul.f32 0.2, %v6092_v19  ;;  %v5828_v60 = vadd.f32 %v5827_v23, %v13943_v33  ;;  %v5916_v3 = vpop.f32.mrf.mxu3  ;;  %v15407_v23 = vld [vmem:[#allocation28_spill] sm:$0xff] }
 0x8d7   : > { %v6007_v0 = vpop.f32.mrf.mxu0 }
 0x8d8   : > { %v5917_v32 = vadd.f32 %v5916_v3, %v5828_v60  ;;  %v6096_v9 = vpop.f32.mrf.mxu1  ;;  %v7194_v20 = vmax.f32 %v6092_v19, %v6938_v55  ;;  %v15409_v60 = vld [vmem:[#allocation27_spill] sm:$0xff] }
 0x8da   : > { %v6006_v29 = vadd.f32 %v6005_v25, %v5917_v32  ;;  %v13988_v35 = vpack.c.bf16 %v7194_v20, %v7186_v62  ;;  %v10219_v62 = vor.u32 %v11437_v39, %v10216_v50  ;;  %v10472_v20 = vld [vmem:[#allocation11 + $0x3f8] sm:$0xf0] }
 0x8dc   : > { %15406 = vst [vmem:[#allocation136_spill] sm:$0xff] %v13988_v35  ;;  %v6095_v42 = vadd.f32 %v6094_v10, %v6006_v29  ;;  %6505 = vmatpush.bf16.msra.mxu2 %v10219_v62 }
 0x8dd   : > { %v5829_v36 = vpop.f32.mrf.mxu2 }
 0x8de   : > { %v5830_v30 = vadd.f32 %v5829_v36, %v13943_v33  ;;  %v5918_v45 = vpop.f32.mrf.mxu3  ;;  %v6946_v25 = vmul.f32 0.2, %v6095_v42 }
 0x8df   : > { %v6010_v16 = vpop.f32.mrf.mxu0 }
 0x8e0   : > { %v5919_v12 = vadd.f32 %v5918_v45, %v5830_v30  ;;  %v6099_v21 = vpop.f32.mrf.mxu1  ;;  %v7202_v45 = vmax.f32 %v6095_v42, %v6946_v25 }
 0x8e2   : > { %v6008_v52 = vadd.f32 %v6007_v0, %v5919_v12  ;;  %5871 = vmatmul.bf16.gmra.mxu2 %v15407_v23  ;;  %6049 = vmatmul.bf16.gmra.mxu0 %v15408_v48  ;;  %v11501_v0 = vld [vmem:[#allocation11 + $0x3dc] sm:$0xf] }
 0x8e3   : > { %5960 = vmatmul.bf16.gmra.mxu3 %v15409_v60  ;;  %6138 = vmatmul.bf16.gmra.mxu1 %v15410_v7  ;;  %v10475_v30 = vor.u32 %v11501_v0, %v10472_v20  ;;  %v11565_v60 = vld [vmem:[#allocation11 + $0x5dc] sm:$0xf] }
 0x8e4   : > { %v6097_v61 = vadd.f32 %v6096_v9, %v6008_v52  ;;  %v10728_v48 = vld [vmem:[#allocation11 + $0x5f8] sm:$0xf0] }
 0x8e5   : > { %v5832_v19 = vpop.f32.mrf.mxu2  ;;  %6594 = vmatpush.bf16.msra.mxu3 %v10475_v30  ;;  %v10731_v50 = vor.u32 %v11565_v60, %v10728_v48  ;;  %v11629_v48 = vld [vmem:[#allocation11 + $0x7dc] sm:$0xf] }
 0x8e6   : > { %v6954_v10 = vmul.f32 0.2, %v6097_v61  ;;  %v5833_v55 = vadd.f32 %v5832_v19, %v13943_v33  ;;  %v5921_v3 = vpop.f32.mrf.mxu3  ;;  %v10984_v60 = vld [vmem:[#allocation11 + $0x7f8] sm:$0xf0] }
 0x8e7   : > { %v6012_v32 = vpop.f32.mrf.mxu0  ;;  %6683 = vmatpush.bf16.msra.mxu0 %v10731_v50 }
 0x8e8   : > { %v5922_v29 = vadd.f32 %v5921_v3, %v5833_v55  ;;  %v6101_v36 = vpop.f32.mrf.mxu1  ;;  %v7210_v12 = vmax.f32 %v6097_v61, %v6954_v10  ;;  %v10987_v61 = vor.u32 %v11629_v48, %v10984_v60  ;;  %v15414_v48 = vld [vmem:[#allocation32_spill] sm:$0xff]  ;;  %v11429_v60 = vld [vmem:[#allocation11 + $0x19c] sm:$0xf] }
 0x8ea   : > { %v6011_v35 = vadd.f32 %v6010_v16, %v5922_v29  ;;  %v13996_v9 = vpack.c.bf16 %v7210_v12, %v7202_v45  ;;  %6772 = vmatpush.bf16.msra.mxu1 %v10987_v61  ;;  %v10184_v61 = vld [vmem:[#allocation11 + $0x1b8] sm:$0xf0] }
 0x8ec   : > { %15411 = vst [vmem:[#allocation137_spill] sm:$0xff] %v13996_v9  ;;  %v6100_v52 = vadd.f32 %v6099_v21, %v6011_v35 }
 0x8ed   : > { %v5834_v28 = vpop.f32.mrf.mxu2 }
 0x8ee   : > { %v5835_v19 = vadd.f32 %v5834_v28, %v13943_v33  ;;  %v5923_v7 = vpop.f32.mrf.mxu3  ;;  %v6962_v35 = vmul.f32 0.2, %v6100_v52 }
 0x8ef   : > { %v6015_v39 = vpop.f32.mrf.mxu0 }
 0x8f0   : > { %v5924_v23 = vadd.f32 %v5923_v7, %v5835_v19  ;;  %v6104_v55 = vpop.f32.mrf.mxu1 }
 0x8f2   : > { %v6013_v3 = vadd.f32 %v6012_v32, %v5924_v23  ;;  %5876 = vmatmul.bf16.gmra.mxu2 %v15187_v44  ;;  %6054 = vmatmul.bf16.gmra.mxu0 %v13297_v53  ;;  %v7218_v32 = vmax.f32 %v6100_v52, %v6962_v35  ;;  %v15416_v52 = vld [vmem:[#allocation31_spill] sm:$0xff] }
 0x8f3   : > { %5965 = vmatmul.bf16.gmra.mxu3 %v15188_v37  ;;  %6143 = vmatmul.bf16.gmra.mxu1 %v13289_v24 }
 0x8f4   : > { %v6102_v42 = vadd.f32 %v6101_v36, %v6013_v3 }
 0x8f5   : > { %v5837_v28 = vpop.f32.mrf.mxu2 }
 0x8f6   : > { %v6970_v16 = vmul.f32 0.2, %v6102_v42  ;;  %v5838_v21 = vadd.f32 %v5837_v28, %v13943_v33  ;;  %v5926_v25 = vpop.f32.mrf.mxu3  ;;  %v15413_v28 = vld [vmem:[#allocation36_spill] sm:$0xff] }
 0x8f7   : > { %v6017_v7 = vpop.f32.mrf.mxu0 }
 0x8f8   : > { %v5927_v23 = vadd.f32 %v5926_v25, %v5838_v21  ;;  %v6106_v10 = vpop.f32.mrf.mxu1  ;;  %v7226_v62 = vmax.f32 %v6102_v42, %v6970_v16  ;;  %v15415_v21 = vld [vmem:[#allocation35_spill] sm:$0xff] }
 0x8fa   : > { %v6016_v0 = vadd.f32 %v6015_v39, %v5927_v23  ;;  %v14004_v20 = vpack.c.bf16 %v7226_v62, %v7218_v32  ;;  %v10187_v32 = vor.u32 %v11429_v60, %v10184_v61  ;;  %v10440_v62 = vld [vmem:[#allocation11 + $0x3b8] sm:$0xf0] }
 0x8fc   : > { %15412 = vst [vmem:[#allocation138_spill] sm:$0xff] %v14004_v20  ;;  %v6105_v29 = vadd.f32 %v6104_v55, %v6016_v0  ;;  %6506 = vmatpush.bf16.msra.mxu2 %v10187_v32 }
 0x8fd   : > { %v5839_v30 = vpop.f32.mrf.mxu2 }
 0x8fe   : > { %v5840_v36 = vadd.f32 %v5839_v30, %v13943_v33  ;;  %v5928_v45 = vpop.f32.mrf.mxu3  ;;  %v6978_v39 = vmul.f32 0.2, %v6105_v29 }
 0x8ff   : > { %v6020_v12 = vpop.f32.mrf.mxu0 }
 0x900   : > { %v5929_v19 = vadd.f32 %v5928_v45, %v5840_v36  ;;  %v6109_v50 = vpop.f32.mrf.mxu1  ;;  %v7234_v45 = vmax.f32 %v6105_v29, %v6978_v39 }
 0x902   : > { %v6018_v3 = vadd.f32 %v6017_v7, %v5929_v19  ;;  %6157 = vmatmul.bf16.vlgmr.msrb.gmra.mxu2 %v15413_v28  ;;  %6335 = vmatmul.bf16.vlgmr.msrb.gmra.mxu0 %v15414_v48  ;;  %v11493_v7 = vld [vmem:[#allocation11 + $0x39c] sm:$0xf] }
 0x903   : > { %6246 = vmatmul.bf16.vlgmr.msrb.gmra.mxu3 %v15415_v21  ;;  %6424 = vmatmul.bf16.vlgmr.msrb.gmra.mxu1 %v15416_v52  ;;  %v10443_v36 = vor.u32 %v11493_v7, %v10440_v62  ;;  %v11557_v21 = vld [vmem:[#allocation11 + $0x59c] sm:$0xf] }
 0x904   : > { %v6107_v35 = vadd.f32 %v6106_v10, %v6018_v3  ;;  %v10696_v48 = vld [vmem:[#allocation11 + $0x5b8] sm:$0xf0] }
 0x905   : > { %v5842_v42 = vpop.f32.mrf.mxu2  ;;  %6595 = vmatpush.bf16.msra.mxu3 %v10443_v36  ;;  %v10699_v61 = vor.u32 %v11557_v21, %v10696_v48  ;;  %v11621_v48 = vld [vmem:[#allocation11 + $0x79c] sm:$0xf] }
 0x906   : > { %v6986_v55 = vmul.f32 0.2, %v6107_v35  ;;  %v5843_v16 = vadd.f32 %v5842_v42, %v13943_v33  ;;  %v5931_v25 = vpop.f32.mrf.mxu3  ;;  %v10952_v21 = vld [vmem:[#allocation11 + $0x7b8] sm:$0xf0] }
 0x907   : > { %v6022_v23 = vpop.f32.mrf.mxu0  ;;  %6684 = vmatpush.bf16.msra.mxu0 %v10699_v61 }
 0x908   : > { %v5932_v0 = vadd.f32 %v5931_v25, %v5843_v16  ;;  %v6111_v30 = vpop.f32.mrf.mxu1  ;;  %v7242_v19 = vmax.f32 %v6107_v35, %v6986_v55  ;;  %v10955_v35 = vor.u32 %v11621_v48, %v10952_v21  ;;  %v15420_v48 = vld [vmem:[#allocation47_spill] sm:$0xff]  ;;  %v11421_v21 = vld [vmem:[#allocation11 + $0x15c] sm:$0xf] }
 0x90a   : > { %v6021_v20 = vadd.f32 %v6020_v12, %v5932_v0  ;;  %v14012_v10 = vpack.c.bf16 %v7242_v19, %v7234_v45  ;;  %6773 = vmatpush.bf16.msra.mxu1 %v10955_v35  ;;  %v10152_v35 = vld [vmem:[#allocation11 + $0x178] sm:$0xf0] }
 0x90c   : > { %15417 = vst [vmem:[#allocation139_spill] sm:$0xff] %v14012_v10  ;;  %v6110_v3 = vadd.f32 %v6109_v50, %v6021_v20 }
 0x90d   : > { %v5844_v9 = vpop.f32.mrf.mxu2 }
 0x90e   : > { %v5845_v42 = vadd.f32 %v5844_v9, %v13943_v33  ;;  %v5933_v52 = vpop.f32.mrf.mxu3  ;;  %v6994_v20 = vmul.f32 0.2, %v6110_v3 }
 0x90f   : > { %v6025_v60 = vpop.f32.mrf.mxu0 }
 0x910   : > { %v5934_v28 = vadd.f32 %v5933_v52, %v5845_v42  ;;  %v6114_v16 = vpop.f32.mrf.mxu1 }
 0x912   : > { %v6023_v25 = vadd.f32 %v6022_v23, %v5934_v28  ;;  %6162 = vmatmul.bf16.gmra.mxu2 %v12880_v63  ;;  %6340 = vmatmul.bf16.gmra.mxu0 %v13128_v11  ;;  %v7250_v23 = vmax.f32 %v6110_v3, %v6994_v20  ;;  %v15422_v3 = vld [vmem:[#allocation34_spill] sm:$0xff] }
 0x913   : > { %6251 = vmatmul.bf16.gmra.mxu3 %v12863_v41  ;;  %6429 = vmatmul.bf16.gmra.mxu1 %v15193_v51 }
 0x914   : > { %v6112_v29 = vadd.f32 %v6111_v30, %v6023_v25 }
 0x915   : > { %v5847_v9 = vpop.f32.mrf.mxu2 }
 0x916   : > { %v7002_v12 = vmul.f32 0.2, %v6112_v29  ;;  %v5848_v50 = vadd.f32 %v5847_v9, %v13943_v33  ;;  %v5936_v39 = vpop.f32.mrf.mxu3  ;;  %v15419_v9 = vld [vmem:[#allocation38_spill] sm:$0xff] }
 0x917   : > { %v6027_v52 = vpop.f32.mrf.mxu0 }
 0x918   : > { %v5937_v28 = vadd.f32 %v5936_v39, %v5848_v50  ;;  %v6116_v55 = vpop.f32.mrf.mxu1  ;;  %v7258_v32 = vmax.f32 %v6112_v29, %v7002_v12  ;;  %v15421_v50 = vld [vmem:[#allocation37_spill] sm:$0xff] }
 0x91a   : > { %v6026_v7 = vadd.f32 %v6025_v60, %v5937_v28  ;;  %v14020_v62 = vpack.c.bf16 %v7258_v32, %v7250_v23  ;;  %v10155_v23 = vor.u32 %v11421_v21, %v10152_v35  ;;  %v10408_v32 = vld [vmem:[#allocation11 + $0x378] sm:$0xf0] }
 0x91c   : > { %15418 = vst [vmem:[#allocation140_spill] sm:$0xff] %v14020_v62  ;;  %v6115_v0 = vadd.f32 %v6114_v16, %v6026_v7  ;;  %6507 = vmatpush.bf16.msra.mxu2 %v10155_v23 }
 0x91d   : > { %v5849_v36 = vpop.f32.mrf.mxu2 }
 0x91e   : > { %v5850_v30 = vadd.f32 %v5849_v36, %v13943_v33  ;;  %v5938_v45 = vpop.f32.mrf.mxu3  ;;  %v7010_v60 = vmul.f32 0.2, %v6115_v0 }
 0x91f   : > { %v6030_v19 = vpop.f32.mrf.mxu0 }
 0x920   : > { %v5939_v42 = vadd.f32 %v5938_v45, %v5850_v30  ;;  %v6119_v61 = vpop.f32.mrf.mxu1  ;;  %v7266_v45 = vmax.f32 %v6115_v0, %v7010_v60 }
 0x922   : > { %v6028_v25 = vadd.f32 %v6027_v52, %v5939_v42  ;;  %6167 = vmatmul.bf16.gmra.mxu2 %v15419_v9  ;;  %6345 = vmatmul.bf16.gmra.mxu0 %v15420_v48  ;;  %v11485_v52 = vld [vmem:[#allocation11 + $0x35c] sm:$0xf] }
 0x923   : > { %6256 = vmatmul.bf16.gmra.mxu3 %v15421_v50  ;;  %6434 = vmatmul.bf16.gmra.mxu1 %v15422_v3  ;;  %v10411_v30 = vor.u32 %v11485_v52, %v10408_v32  ;;  %v11549_v50 = vld [vmem:[#allocation11 + $0x55c] sm:$0xf] }
 0x924   : > { %v6117_v20 = vadd.f32 %v6116_v55, %v6028_v25  ;;  %v10664_v48 = vld [vmem:[#allocation11 + $0x578] sm:$0xf0] }
 0x925   : > { %v5852_v29 = vpop.f32.mrf.mxu2  ;;  %6596 = vmatpush.bf16.msra.mxu3 %v10411_v30  ;;  %v10667_v35 = vor.u32 %v11549_v50, %v10664_v48  ;;  %v11613_v48 = vld [vmem:[#allocation11 + $0x75c] sm:$0xf] }
 0x926   : > { %v7018_v16 = vmul.f32 0.2, %v6117_v20  ;;  %v5853_v12 = vadd.f32 %v5852_v29, %v13943_v33  ;;  %v5941_v39 = vpop.f32.mrf.mxu3  ;;  %v10920_v50 = vld [vmem:[#allocation11 + $0x778] sm:$0xf0] }
 0x927   : > { %v6032_v28 = vpop.f32.mrf.mxu0  ;;  %6685 = vmatpush.bf16.msra.mxu0 %v10667_v35 }
 0x928   : > { %v5942_v7 = vadd.f32 %v5941_v39, %v5853_v12  ;;  %v6121_v36 = vpop.f32.mrf.mxu1  ;;  %v7274_v42 = vmax.f32 %v6117_v20, %v7018_v16  ;;  %v10923_v20 = vor.u32 %v11613_v48, %v10920_v50  ;;  %v15426_v48 = vld [vmem:[#allocation50_spill] sm:$0xff]  ;;  %v11413_v50 = vld [vmem:[#allocation11 + $0x11c] sm:$0xf] }
 0x92a   : > { %v6031_v62 = vadd.f32 %v6030_v19, %v5942_v7  ;;  %v14028_v55 = vpack.c.bf16 %v7274_v42, %v7266_v45  ;;  %6774 = vmatpush.bf16.msra.mxu1 %v10923_v20  ;;  %v10120_v20 = vld [vmem:[#allocation11 + $0x138] sm:$0xf0] }
 0x92c   : > { %15423 = vst [vmem:[#allocation141_spill] sm:$0xff] %v14028_v55  ;;  %v6120_v25 = vadd.f32 %v6119_v61, %v6031_v62 }
 0x92d   : > { %v5854_v10 = vpop.f32.mrf.mxu2 }
 0x92e   : > { %v5855_v29 = vadd.f32 %v5854_v10, %v13943_v33  ;;  %v5943_v3 = vpop.f32.mrf.mxu3  ;;  %v7026_v62 = vmul.f32 0.2, %v6120_v25 }
 0x92f   : > { %v6035_v21 = vpop.f32.mrf.mxu0 }
 0x930   : > { %v5944_v9 = vadd.f32 %v5943_v3, %v5855_v29  ;;  %v6124_v12 = vpop.f32.mrf.mxu1 }
 0x932   : > { %v6033_v39 = vadd.f32 %v6032_v28, %v5944_v9  ;;  %6172 = vmatmul.bf16.gmra.mxu2 %v12928_v22  ;;  %6350 = vmatmul.bf16.gmra.mxu0 %v13152_v6  ;;  %v7282_v28 = vmax.f32 %v6120_v25, %v7026_v62  ;;  %v15428_v25 = vld [vmem:[#allocation49_spill] sm:$0xff] }
 0x933   : > { %6261 = vmatmul.bf16.gmra.mxu3 %v12911_v18  ;;  %6439 = vmatmul.bf16.gmra.mxu1 %v15199_v58 }
 0x934   : > { %v6122_v0 = vadd.f32 %v6121_v36, %v6033_v39 }
 0x935   : > { %v5857_v10 = vpop.f32.mrf.mxu2 }
 0x936   : > { %v7034_v19 = vmul.f32 0.2, %v6122_v0  ;;  %v5858_v61 = vadd.f32 %v5857_v10, %v13943_v33  ;;  %v5946_v60 = vpop.f32.mrf.mxu3  ;;  %v15425_v10 = vld [vmem:[#allocation40_spill] sm:$0xff] }
 0x937   : > { %v6037_v3 = vpop.f32.mrf.mxu0 }
 0x938   : > { %v5947_v9 = vadd.f32 %v5946_v60, %v5858_v61  ;;  %v6126_v16 = vpop.f32.mrf.mxu1  ;;  %v7290_v23 = vmax.f32 %v6122_v0, %v7034_v19  ;;  %v15427_v61 = vld [vmem:[#allocation39_spill] sm:$0xff] }
 0x93a   : > { %v6036_v52 = vadd.f32 %v6035_v21, %v5947_v9  ;;  %v14036_v32 = vpack.c.bf16 %v7290_v23, %v7282_v28  ;;  %v10123_v28 = vor.u32 %v11413_v50, %v10120_v20  ;;  %v10376_v23 = vld [vmem:[#allocation11 + $0x338] sm:$0xf0] }
 0x93c   : > { %15424 = vst [vmem:[#allocation142_spill] sm:$0xff] %v14036_v32  ;;  %v6125_v7 = vadd.f32 %v6124_v12, %v6036_v52  ;;  %6508 = vmatpush.bf16.msra.mxu2 %v10123_v28 }
 0x93d   : > { %v5859_v30 = vpop.f32.mrf.mxu2 }
 0x93e   : > { %v5860_v36 = vadd.f32 %v5859_v30, %v13943_v33  ;;  %v5948_v45 = vpop.f32.mrf.mxu3  ;;  %v7042_v21 = vmul.f32 0.2, %v6125_v7 }
 0x93f   : > { %v6040_v42 = vpop.f32.mrf.mxu0 }
 0x940   : > { %v5949_v29 = vadd.f32 %v5948_v45, %v5860_v36  ;;  %v6129_v35 = vpop.f32.mrf.mxu1  ;;  %v7298_v45 = vmax.f32 %v6125_v7, %v7042_v21 }
 0x942   : > { %v6038_v39 = vadd.f32 %v6037_v3, %v5949_v29  ;;  %6177 = vmatmul.bf16.gmra.mxu2 %v15425_v10  ;;  %6355 = vmatmul.bf16.gmra.mxu0 %v15426_v48  ;;  %v11477_v3 = vld [vmem:[#allocation11 + $0x31c] sm:$0xf] }
 0x943   : > { %6266 = vmatmul.bf16.gmra.mxu3 %v15427_v61  ;;  %6444 = vmatmul.bf16.gmra.mxu1 %v15428_v25  ;;  %v10379_v36 = vor.u32 %v11477_v3, %v10376_v23  ;;  %v11541_v61 = vld [vmem:[#allocation11 + $0x51c] sm:$0xf] }
 0x944   : > { %v6127_v62 = vadd.f32 %v6126_v16, %v6038_v39  ;;  %v10632_v48 = vld [vmem:[#allocation11 + $0x538] sm:$0xf0] }
 0x945   : > { %v5862_v0 = vpop.f32.mrf.mxu2  ;;  %6597 = vmatpush.bf16.msra.mxu3 %v10379_v36  ;;  %v10635_v20 = vor.u32 %v11541_v61, %v10632_v48  ;;  %v11605_v48 = vld [vmem:[#allocation11 + $0x71c] sm:$0xf] }
 0x946   : > { %v7050_v12 = vmul.f32 0.2, %v6127_v62  ;;  %v5863_v19 = vadd.f32 %v5862_v0, %v13943_v33  ;;  %v5951_v60 = vpop.f32.mrf.mxu3  ;;  %v10888_v61 = vld [vmem:[#allocation11 + $0x738] sm:$0xf0] }
 0x947   : > { %v6042_v9 = vpop.f32.mrf.mxu0  ;;  %6686 = vmatpush.bf16.msra.mxu0 %v10635_v20 }
 0x948   : > { %v5952_v52 = vadd.f32 %v5951_v60, %v5863_v19  ;;  %v6131_v30 = vpop.f32.mrf.mxu1  ;;  %v7306_v29 = vmax.f32 %v6127_v62, %v7050_v12  ;;  %v10891_v62 = vor.u32 %v11605_v48, %v10888_v61  ;;  %v15432_v48 = vld [vmem:[#allocation53_spill] sm:$0xff] }
 0x949   : > { %v11405_v61 = vld [vmem:[#allocation11 + $0xdc] sm:$0xf] }
 0x94a   : > { %v6041_v32 = vadd.f32 %v6040_v42, %v5952_v52  ;;  %v14044_v16 = vpack.c.bf16 %v7306_v29, %v7298_v45  ;;  %6775 = vmatpush.bf16.msra.mxu1 %v10891_v62  ;;  %v10088_v62 = vld [vmem:[#allocation11 + $0xf8] sm:$0xf0] }
 0x94c   : > { %15429 = vst [vmem:[#allocation143_spill] sm:$0xff] %v14044_v16  ;;  %v6130_v39 = vadd.f32 %v6129_v35, %v6041_v32 }
 0x94d   : > { %v5864_v55 = vpop.f32.mrf.mxu2 }
 0x94e   : > { %v5865_v0 = vadd.f32 %v5864_v55, %v13943_v33  ;;  %v5953_v25 = vpop.f32.mrf.mxu3  ;;  %v7058_v32 = vmul.f32 0.2, %v6130_v39 }
 0x94f   : > { %v6045_v50 = vpop.f32.mrf.mxu0 }
 0x950   : > { %v5954_v10 = vadd.f32 %v5953_v25, %v5865_v0  ;;  %v6134_v19 = vpop.f32.mrf.mxu1 }
 0x952   : > { %v6043_v60 = vadd.f32 %v6042_v9, %v5954_v10  ;;  %6182 = vmatmul.bf16.gmra.mxu2 %v12976_v34  ;;  %6360 = vmatmul.bf16.gmra.mxu0 %v13176_v8  ;;  %v7314_v9 = vmax.f32 %v6130_v39, %v7058_v32  ;;  %v15434_v39 = vld [vmem:[#allocation52_spill] sm:$0xff] }
 0x953   : > { %6271 = vmatmul.bf16.gmra.mxu3 %v12959_v1  ;;  %6449 = vmatmul.bf16.gmra.mxu1 %v15205_v40 }
 0x954   : > { %v6132_v7 = vadd.f32 %v6131_v30, %v6043_v60 }
 0x955   : > { %v5867_v55 = vpop.f32.mrf.mxu2 }
 0x956   : > { %v7066_v42 = vmul.f32 0.2, %v6132_v7  ;;  %v5868_v35 = vadd.f32 %v5867_v55, %v13943_v33  ;;  %v5956_v21 = vpop.f32.mrf.mxu3  ;;  %v15431_v55 = vld [vmem:[#allocation42_spill] sm:$0xff] }
 0x957   : > { %v6047_v25 = vpop.f32.mrf.mxu0 }
 0x958   : > { %v5957_v10 = vadd.f32 %v5956_v21, %v5868_v35  ;;  %v6136_v12 = vpop.f32.mrf.mxu1  ;;  %v7322_v28 = vmax.f32 %v6132_v7, %v7066_v42  ;;  %v15433_v35 = vld [vmem:[#allocation41_spill] sm:$0xff] }
 0x95a   : > { %v6046_v3 = vadd.f32 %v6045_v50, %v5957_v10  ;;  %v14052_v23 = vpack.c.bf16 %v7322_v28, %v7314_v9  ;;  %v10091_v9 = vor.u32 %v11405_v61, %v10088_v62  ;;  %v10344_v28 = vld [vmem:[#allocation11 + $0x2f8] sm:$0xf0] }
 0x95b   : > { %v11533_v62 = vld [vmem:[#allocation11 + $0x4dc] sm:$0xf] }
 0x95c   : > { %15430 = vst [vmem:[#allocation144_spill] sm:$0xff] %v14052_v23  ;;  %v6135_v52 = vadd.f32 %v6134_v19, %v6046_v3  ;;  %6509 = vmatpush.bf16.msra.mxu2 %v10091_v9  ;;  %v11597_v9 = vld [vmem:[#allocation11 + $0x6dc] sm:$0xf] }
 0x95d   : > { %v5869_v36 = vpop.f32.mrf.mxu2 }
 0x95e   : > { %v5870_v30 = vadd.f32 %v5869_v36, %v13943_v33  ;;  %v5958_v45 = vpop.f32.mrf.mxu3  ;;  %v7074_v50 = vmul.f32 0.2, %v6135_v52 }
 0x95f   : > { %v6050_v29 = vpop.f32.mrf.mxu0 }
 0x960   : > { %v5959_v0 = vadd.f32 %v5958_v45, %v5870_v30  ;;  %v6139_v20 = vpop.f32.mrf.mxu1  ;;  %v7330_v45 = vmax.f32 %v6135_v52, %v7074_v50 }
 0x962   : > { %v6048_v60 = vadd.f32 %v6047_v25, %v5959_v0  ;;  %6187 = vmatmul.bf16.gmra.mxu2 %v15431_v55  ;;  %6365 = vmatmul.bf16.gmra.mxu0 %v15432_v48  ;;  %v11469_v25 = vld [vmem:[#allocation11 + $0x2dc] sm:$0xf] }
 0x963   : > { %6276 = vmatmul.bf16.gmra.mxu3 %v15433_v35  ;;  %6454 = vmatmul.bf16.gmra.mxu1 %v15434_v39  ;;  %v10347_v30 = vor.u32 %v11469_v25, %v10344_v28  ;;  %v10600_v55 = vld [vmem:[#allocation11 + $0x4f8] sm:$0xf0] }
 0x964   : > { %v6137_v32 = vadd.f32 %v6136_v12, %v6048_v60  ;;  %v10856_v25 = vld [vmem:[#allocation11 + $0x6f8] sm:$0xf0] }
 0x965   : > { %v5872_v7 = vpop.f32.mrf.mxu2  ;;  %6598 = vmatpush.bf16.msra.mxu3 %v10347_v30 }
 0x966   : > { %v7082_v19 = vmul.f32 0.2, %v6137_v32  ;;  %v5873_v42 = vadd.f32 %v5872_v7, %v13943_v33  ;;  %v5961_v21 = vpop.f32.mrf.mxu3 }
 0x967   : > { %v6052_v10 = vpop.f32.mrf.mxu0 }
 0x968   : > { %v5962_v3 = vadd.f32 %v5961_v21, %v5873_v42  ;;  %v6141_v36 = vpop.f32.mrf.mxu1  ;;  %v7338_v0 = vmax.f32 %v6137_v32, %v7082_v19  ;;  %v10603_v42 = vor.u32 %v11533_v62, %v10600_v55 }
 0x96a   : > { %v6051_v23 = vadd.f32 %v6050_v29, %v5962_v3  ;;  %v14060_v12 = vpack.c.bf16 %v7338_v0, %v7330_v45  ;;  %6687 = vmatpush.bf16.msra.mxu0 %v10603_v42  ;;  %v10859_v3 = vor.u32 %v11597_v9, %v10856_v25  ;;  %v11461_v25 = vld [vmem:[#allocation11 + $0x29c] sm:$0xf] }
 0x96c   : > { %15435 = vst [vmem:[#allocation145_spill] sm:$0xff] %v14060_v12  ;;  %v6140_v60 = vadd.f32 %v6139_v20, %v6051_v23  ;;  %6776 = vmatpush.bf16.msra.mxu1 %v10859_v3  ;;  %v10312_v3 = vld [vmem:[#allocation11 + $0x2b8] sm:$0xf0] }
 0x96d   : > { %v5874_v16 = vpop.f32.mrf.mxu2 }
 0x96e   : > { %v5875_v7 = vadd.f32 %v5874_v16, %v13943_v33  ;;  %v5963_v39 = vpop.f32.mrf.mxu3  ;;  %v7090_v23 = vmul.f32 0.2, %v6140_v60 }
 0x96f   : > { %v6055_v35 = vpop.f32.mrf.mxu0 }
 0x970   : > { %v5964_v48 = vadd.f32 %v5963_v39, %v5875_v7  ;;  %v6144_v61 = vpop.f32.mrf.mxu1 }
 0x972   : > { %v6053_v21 = vadd.f32 %v6052_v10, %v5964_v48  ;;  %6192 = vmatmul.bf16.gmra.mxu2 %v13004_v47  ;;  %6370 = vmatmul.bf16.gmra.mxu0 %v13200_v26  ;;  %v7346_v48 = vmax.f32 %v6140_v60, %v7090_v23  ;;  %v15438_v60 = vld [vmem:[#allocation55_spill] sm:$0xff] }
 0x973   : > { %6281 = vmatmul.bf16.gmra.mxu3 %v12997_v13  ;;  %6459 = vmatmul.bf16.gmra.mxu1 %v13193_v4 }
 0x974   : > { %v6142_v52 = vadd.f32 %v6141_v36, %v6053_v21 }
 0x975   : > { %v5877_v16 = vpop.f32.mrf.mxu2 }
 0x976   : > { %v7098_v29 = vmul.f32 0.2, %v6142_v52  ;;  %v5878_v20 = vadd.f32 %v5877_v16, %v13943_v33  ;;  %v5966_v39 = vpop.f32.mrf.mxu3  ;;  %v15437_v16 = vld [vmem:[#allocation44_spill] sm:$0xff] }
 0x977   : > { %v6057_v50 = vpop.f32.mrf.mxu0 }
 0x978   : > { %v5967_v32 = vadd.f32 %v5966_v39, %v5878_v20  ;;  %v6146_v55 = vpop.f32.mrf.mxu1  ;;  %v7354_v19 = vmax.f32 %v6142_v52, %v7098_v29  ;;  %v15440_v52 = vld [vmem:[#allocation43_spill] sm:$0xff] }
 0x97a   : > { %v6056_v10 = vadd.f32 %v6055_v35, %v5967_v32  ;;  %v14068_v28 = vpack.c.bf16 %v7354_v19, %v7346_v48  ;;  %v14073_v35 = vld [vmem:[#allocation13] sm:$0xff]  ;;  %v11397_v48 = vld [vmem:[#allocation11 + $0x9c] sm:$0xf] }
 0x97b   : > { %15439 = vst [vmem:[#allocation147_spill] sm:$0xff] %v14073_v35  ;;  %v14076_v23 = vperm.slane %v14073_v35, 6  ;;  %v10056_v19 = vld [vmem:[#allocation11 + $0xb8] sm:$0xf0] }
 0x97c   : > { %15436 = vst [vmem:[#allocation146_spill] sm:$0xff] %v14068_v28  ;;  %v6145_v30 = vadd.f32 %v6144_v61, %v6056_v10  ;;  %v15441_v61 = vld [vmem:[#allocation54_spill] sm:$0xff]  ;;  %v10059_v9 = vor.u32 %v11397_v48, %v10056_v19  ;;  %v11525_v35 = vld [vmem:[#allocation11 + $0x49c] sm:$0xf] }
 0x97d   : > { %v5879_v45 = vpop.f32.mrf.mxu2 }
 0x97e   : > { %v5880_v36 = vadd.f32 %v5879_v45, %v13943_v33  ;;  %v5968_v0 = vpop.f32.mrf.mxu3  ;;  %v7106_v29 = vmul.f32 0.2, %v6145_v30  ;;  %6510 = vmatpush.bf16.msra.mxu2 %v10059_v9 }
 0x97f   : > { %v6336_v7 = vpop.f32.mrf.mxu0 }
 0x980   : > { %v5969_v62 = vadd.f32 %v5968_v0, %v5880_v36  ;;  %v6425_v42 = vpop.f32.mrf.mxu1  ;;  %v10315_v0 = vor.u32 %v11461_v25, %v10312_v3 }
 0x982   : > { %v6058_v21 = vadd.f32 %v6057_v50, %v5969_v62  ;;  %6197 = vmatmul.bf16.gmra.mxu2 %v15437_v16  ;;  %6375 = vmatmul.bf16.gmra.mxu0 %v15438_v60  ;;  %v7362_v62 = vmax.f32 %v6145_v30, %v7106_v29  ;;  %v10568_v60 = vld [vmem:[#allocation11 + $0x4b8] sm:$0xf0] }
 0x983   : > { %6286 = vmatmul.bf16.gmra.mxu3 %v15440_v52  ;;  %6464 = vmatmul.bf16.gmra.mxu1 %v15441_v61  ;;  %v10571_v19 = vor.u32 %v11525_v35, %v10568_v60  ;;  %v11589_v60 = vld [vmem:[#allocation11 + $0x69c] sm:$0xf] }
 0x984   : > { %v6147_v33 = vadd.f32 %v6146_v55, %v6058_v21  ;;  %6599 = vmatpush.bf16.msra.mxu3 %v10315_v0  ;;  %v10824_v35 = vld [vmem:[#allocation11 + $0x6b8] sm:$0xf0] }
 0x985   : > { %v6158_v20 = vpop.f32.mrf.mxu2  ;;  %6688 = vmatpush.bf16.msra.mxu0 %v10571_v19  ;;  %v10827_v29 = vor.u32 %v11589_v60, %v10824_v35  ;;  %v15445_v60 = vld [vmem:[#allocation58_spill] sm:$0xff]  ;;  %v11389_v35 = vld [vmem:[#allocation11 + $0x5c] sm:$0xf] }
 0x986   : > { %v7114_v39 = vmul.f32 0.2, %v6147_v33  ;;  %v6159_v32 = vadd.f32 %v6158_v20, %v14076_v23  ;;  %v6247_v50 = vpop.f32.mrf.mxu3 }
 0x987   : > { %v6338_v10 = vpop.f32.mrf.mxu0  ;;  %6777 = vmatpush.bf16.msra.mxu1 %v10827_v29  ;;  %v10024_v29 = vld [vmem:[#allocation11 + $0x78] sm:$0xf0] }
 0x988   : > { %v6248_v45 = vadd.f32 %v6247_v50, %v6159_v32  ;;  %v6427_v36 = vpop.f32.mrf.mxu1  ;;  %v7370_v28 = vmax.f32 %v6147_v33, %v7114_v39 }
 0x98a   : > { %v6337_v12 = vadd.f32 %v6336_v7, %v6248_v45  ;;  %v14081_v55 = vpack.c.bf16 %v7370_v28, %v7362_v62 }
 0x98c   : > { %15442 = vst [vmem:[#allocation148_spill] sm:$0xff] %v14081_v55  ;;  %v6426_v21 = vadd.f32 %v6425_v42, %v6337_v12 }
 0x98d   : > { %v6160_v61 = vpop.f32.mrf.mxu2 }
 0x98e   : > { %v6161_v20 = vadd.f32 %v6160_v61, %v14076_v23  ;;  %v6249_v52 = vpop.f32.mrf.mxu3  ;;  %v6867_v12 = vmul.f32 0.2, %v6426_v21 }
 0x98f   : > { %v6341_v48 = vpop.f32.mrf.mxu0 }
 0x990   : > { %v6250_v16 = vadd.f32 %v6249_v52, %v6161_v20  ;;  %v6430_v32 = vpop.f32.mrf.mxu1 }
 0x992   : > { %v6339_v50 = vadd.f32 %v6338_v10, %v6250_v16  ;;  %6202 = vmatmul.bf16.gmra.mxu2 %v13028_v38  ;;  %6380 = vmatmul.bf16.gmra.mxu0 %v13224_v43  ;;  %v7123_v16 = vmax.f32 %v6426_v21, %v6867_v12  ;;  %v15446_v21 = vld [vmem:[#allocation46_spill] sm:$0xff]  ;;  %v15447_v12 = vld [vmem:[#allocation57_spill] sm:$0xff] }
 0x993   : > { %6291 = vmatmul.bf16.gmra.mxu3 %v15217_v14  ;;  %6469 = vmatmul.bf16.gmra.mxu1 %v15218_v59 }
 0x994   : > { %v6428_v28 = vadd.f32 %v6427_v36, %v6339_v50 }
 0x995   : > { %v6163_v30 = vpop.f32.mrf.mxu2 }
 0x996   : > { %v6875_v7 = vmul.f32 0.2, %v6428_v28  ;;  %v6164_v42 = vadd.f32 %v6163_v30, %v14076_v23  ;;  %v6252_v61 = vpop.f32.mrf.mxu3  ;;  %v15444_v30 = vld [vmem:[#allocation23_spill] sm:$0xff] }
 0x997   : > { %v6343_v52 = vpop.f32.mrf.mxu0 }
 0x998   : > { %v7131_v33 = vmax.f32 %v6428_v28, %v6875_v7  ;;  %v6253_v39 = vadd.f32 %v6252_v61, %v6164_v42  ;;  %v6432_v10 = vpop.f32.mrf.mxu1 }
 0x99a   : > { %v14089_v9 = vpack.c.bf16 %v7131_v33, %v7123_v16  ;;  %v6342_v25 = vadd.f32 %v6341_v48, %v6253_v39  ;;  %v10027_v33 = vor.u32 %v11389_v35, %v10024_v29  ;;  %v10280_v39 = vld [vmem:[#allocation11 + $0x278] sm:$0xf0] }
 0x99c   : > { %15443 = vst [vmem:[#allocation149_spill] sm:$0xff] %v14089_v9  ;;  %v6431_v3 = vadd.f32 %v6430_v32, %v6342_v25  ;;  %6511 = vmatpush.bf16.msra.mxu2 %v10027_v33 }
 0x99d   : > { %v6165_v45 = vpop.f32.mrf.mxu2 }
 0x99e   : > { %v6166_v36 = vadd.f32 %v6165_v45, %v14076_v23  ;;  %v6254_v0 = vpop.f32.mrf.mxu3  ;;  %v6883_v28 = vmul.f32 0.2, %v6431_v3 }
 0x99f   : > { %v6346_v62 = vpop.f32.mrf.mxu0 }
 0x9a0   : > { %v6255_v20 = vadd.f32 %v6254_v0, %v6166_v36  ;;  %v6435_v19 = vpop.f32.mrf.mxu1  ;;  %v7139_v0 = vmax.f32 %v6431_v3, %v6883_v28 }
 0x9a2   : > { %v6344_v50 = vadd.f32 %v6343_v52, %v6255_v20  ;;  %6207 = vmatmul.bf16.gmra.mxu2 %v15444_v30  ;;  %6385 = vmatmul.bf16.gmra.mxu0 %v15445_v60  ;;  %v11453_v52 = vld [vmem:[#allocation11 + $0x25c] sm:$0xf] }
 0x9a3   : > { %6296 = vmatmul.bf16.gmra.mxu3 %v15446_v21  ;;  %6474 = vmatmul.bf16.gmra.mxu1 %v15447_v12  ;;  %v10283_v36 = vor.u32 %v11453_v52, %v10280_v39  ;;  %v11517_v21 = vld [vmem:[#allocation11 + $0x45c] sm:$0xf] }
 0x9a4   : > { %v6433_v7 = vadd.f32 %v6432_v10, %v6344_v50  ;;  %v10536_v60 = vld [vmem:[#allocation11 + $0x478] sm:$0xf0] }
 0x9a5   : > { %v6168_v48 = vpop.f32.mrf.mxu2  ;;  %6600 = vmatpush.bf16.msra.mxu3 %v10283_v36  ;;  %v10539_v29 = vor.u32 %v11517_v21, %v10536_v60  ;;  %v11581_v60 = vld [vmem:[#allocation11 + $0x65c] sm:$0xf] }
 0x9a6   : > { %v6891_v32 = vmul.f32 0.2, %v6433_v7  ;;  %v6169_v42 = vadd.f32 %v6168_v48, %v14076_v23  ;;  %v6257_v61 = vpop.f32.mrf.mxu3  ;;  %v10792_v21 = vld [vmem:[#allocation11 + $0x678] sm:$0xf0] }
 0x9a7   : > { %v6348_v16 = vpop.f32.mrf.mxu0  ;;  %6689 = vmatpush.bf16.msra.mxu0 %v10539_v29 }
 0x9a8   : > { %v6258_v25 = vadd.f32 %v6257_v61, %v6169_v42  ;;  %v6437_v45 = vpop.f32.mrf.mxu1  ;;  %v7147_v20 = vmax.f32 %v6433_v7, %v6891_v32  ;;  %v10795_v7 = vor.u32 %v11581_v60, %v10792_v21 }
 0x9aa   : > { %v6347_v55 = vadd.f32 %v6346_v62, %v6258_v25  ;;  %v14097_v10 = vpack.c.bf16 %v7147_v20, %v7139_v0  ;;  %6778 = vmatpush.bf16.msra.mxu1 %v10795_v7  ;;  %v10248_v7 = vld [vmem:[#allocation11 + $0x238] sm:$0xf0] }
 0x9ac   : > { %15448 = vst [vmem:[#allocation150_spill] sm:$0xff] %v14097_v10  ;;  %v6436_v50 = vadd.f32 %v6435_v19, %v6347_v55  ;;  %v10504_v10 = vld [vmem:[#allocation11 + $0x438] sm:$0xf0] }
 0x9ad   : > { %v6170_v9 = vpop.f32.mrf.mxu2 }
 0x9ae   : > { %v6171_v48 = vadd.f32 %v6170_v9, %v14076_v23  ;;  %v6259_v12 = vpop.f32.mrf.mxu3  ;;  %v6899_v55 = vmul.f32 0.2, %v6436_v50 }
 0x9af   : > { %v6351_v35 = vpop.f32.mrf.mxu0 }
 0x9b0   : > { %v6260_v30 = vadd.f32 %v6259_v12, %v6171_v48  ;;  %v6440_v42 = vpop.f32.mrf.mxu1 }
 0x9b2   : > { %v6349_v61 = vadd.f32 %v6348_v16, %v6260_v30  ;;  %6212 = vmatmul.bf16.gmra.mxu2 %v13052_v31  ;;  %6390 = vmatmul.bf16.gmra.mxu0 %v13248_v57  ;;  %v7155_v16 = vmax.f32 %v6436_v50, %v6899_v55  ;;  %v15450_v50 = vld [vmem:[#allocation59_spill] sm:$0xff] }
 0x9b3   : > { %6301 = vmatmul.bf16.gmra.mxu3 %v13045_v49  ;;  %6479 = vmatmul.bf16.gmra.mxu1 %v13241_v27 }
 0x9b4   : > { %v6438_v3 = vadd.f32 %v6437_v45, %v6349_v61 }
 0x9b5   : > { %v6173_v9 = vpop.f32.mrf.mxu2 }
 0x9b6   : > { %v6907_v62 = vmul.f32 0.2, %v6438_v3  ;;  %v6174_v19 = vadd.f32 %v6173_v9, %v14076_v23  ;;  %v6262_v28 = vpop.f32.mrf.mxu3 }
 0x9b7   : > { %v6353_v12 = vpop.f32.mrf.mxu0 }
 0x9b8   : > { %v6263_v30 = vadd.f32 %v6262_v28, %v6174_v19  ;;  %v6442_v32 = vpop.f32.mrf.mxu1  ;;  %v7163_v33 = vmax.f32 %v6438_v3, %v6907_v62  ;;  %v11381_v19 = vld [vmem:[#allocation11 + $0x1c] sm:$0xf] }
 0x9b9   : > { %v9992_v28 = vld [vmem:[#allocation11 + $0x38] sm:$0xf0] }
 0x9ba   : > { %v6352_v52 = vadd.f32 %v6351_v35, %v6263_v30  ;;  %v14105_v39 = vpack.c.bf16 %v7163_v33, %v7155_v16  ;;  %v9995_v21 = vor.u32 %v11381_v19, %v9992_v28 }
 0x9bc   : > { %15449 = vst [vmem:[#allocation151_spill] sm:$0xff] %v14105_v39  ;;  %v6441_v25 = vadd.f32 %v6440_v42, %v6352_v52  ;;  %6512 = vmatpush.bf16.msra.mxu2 %v9995_v21  ;;  %v11509_v39 = vld [vmem:[#allocation11 + $0x41c] sm:$0xf] }
 0x9bd   : > { %v6175_v36 = vpop.f32.mrf.mxu2  ;;  %v10507_v28 = vor.u32 %v11509_v39, %v10504_v10  ;;  %v11573_v10 = vld [vmem:[#allocation11 + $0x61c] sm:$0xf] }
 0x9be   : > { %v6176_v45 = vadd.f32 %v6175_v36, %v14076_v23  ;;  %v6264_v0 = vpop.f32.mrf.mxu3  ;;  %v6915_v35 = vmul.f32 0.2, %v6441_v25  ;;  %v10760_v39 = vld [vmem:[#allocation11 + $0x638] sm:$0xf0] }
 0x9bf   : > { %v6356_v20 = vpop.f32.mrf.mxu0  ;;  %6690 = vmatpush.bf16.msra.mxu0 %v10507_v28 }
 0x9c0   : > { %v6265_v48 = vadd.f32 %v6264_v0, %v6176_v45  ;;  %v6445_v29 = vpop.f32.mrf.mxu1  ;;  %v7171_v52 = vmax.f32 %v6441_v25, %v6915_v35 }
 0x9c2   : > { %v6354_v61 = vadd.f32 %v6353_v12, %v6265_v48  ;;  %6217 = vmatmul.bf16.gmra.mxu2 %v13064_v56  ;;  %6395 = vmatmul.bf16.gmra.mxu0 %v13260_v15  ;;  %v11445_v12 = vld [vmem:[#allocation11 + $0x21c] sm:$0xf] }
 0x9c3   : > { %6306 = vmatmul.bf16.gmra.mxu3 %v15179_v17  ;;  %6484 = vmatmul.bf16.gmra.mxu1 %v15450_v50  ;;  %v10251_v33 = vor.u32 %v11445_v12, %v10248_v7  ;;  %v10763_v12 = vor.u32 %v11573_v10, %v10760_v39  ;;  %v15454_v10 = vld [vmem:[#allocation62_spill] sm:$0xff] }
 0x9c4   : > { %v6443_v55 = vadd.f32 %v6442_v32, %v6354_v61  ;;  %v11641_v39 = vld [vmem:[#allocation14 + $0x38] sm:$0xff] }
 0x9c5   : > { %v6178_v3 = vpop.f32.mrf.mxu2  ;;  %6601 = vmatpush.bf16.msra.mxu3 %v10251_v33  ;;  %6779 = vmatpush.bf16.msra.mxu1 %v10763_v12  ;;  %v11649_v12 = vld [vmem:[#allocation14 + $0x78] sm:$0xff] }
 0x9c6   : > { %v6923_v42 = vmul.f32 0.2, %v6443_v55  ;;  %v6179_v9 = vadd.f32 %v6178_v3, %v14076_v23  ;;  %v6267_v62 = vpop.f32.mrf.mxu3  ;;  %8017 = vmatpush.bf16.msrb.mxu2 %v11641_v39 }
 0x9c7   : > { %v6358_v60 = vpop.f32.mrf.mxu0 }
 0x9c8   : > { %v6268_v30 = vadd.f32 %v6267_v62, %v6179_v9  ;;  %v6447_v16 = vpop.f32.mrf.mxu1  ;;  %v7179_v36 = vmax.f32 %v6443_v55, %v6923_v42 }
 0x9c9   : > { %8106 = vmatpush.bf16.msrb.mxu3 %v11649_v12 }
 0x9ca   : > { %v6357_v45 = vadd.f32 %v6356_v20, %v6268_v30  ;;  %v14113_v32 = vpack.c.bf16 %v7179_v36, %v7171_v52 }
 0x9cc   : > { %15451 = vst [vmem:[#allocation152_spill] sm:$0xff] %v14113_v32  ;;  %v6446_v0 = vadd.f32 %v6445_v29, %v6357_v45 }
 0x9cd   : > { %v6180_v48 = vpop.f32.mrf.mxu2 }
 0x9ce   : > { %v6181_v61 = vadd.f32 %v6180_v48, %v14076_v23  ;;  %v6269_v3 = vpop.f32.mrf.mxu3  ;;  %v6931_v25 = vmul.f32 0.2, %v6446_v0 }
 0x9cf   : > { %v6361_v19 = vpop.f32.mrf.mxu0 }
 0x9d0   : > { %v6270_v50 = vadd.f32 %v6269_v3, %v6181_v61  ;;  %v6450_v9 = vpop.f32.mrf.mxu1  ;;  %v7187_v7 = vmax.f32 %v6446_v0, %v6931_v25  ;;  %v15456_v0 = vld [vmem:[#allocation61_spill] sm:$0xff] }
 0x9d2   : > { %v6359_v62 = vadd.f32 %v6358_v60, %v6270_v50  ;;  %6222 = vmatmul.bf16.gmra.mxu2 %v15181_v54  ;;  %6400 = vmatmul.bf16.gmra.mxu0 %v13272_v5 }
 0x9d3   : > { %6311 = vmatmul.bf16.gmra.mxu3 %v15182_v2  ;;  %6489 = vmatmul.bf16.gmra.mxu1 %v15226_v46 }
 0x9d4   : > { %v6448_v20 = vadd.f32 %v6447_v16, %v6359_v62 }
 0x9d5   : > { %v6183_v29 = vpop.f32.mrf.mxu2 }
 0x9d6   : > { %v6939_v35 = vmul.f32 0.2, %v6448_v20  ;;  %v6184_v55 = vadd.f32 %v6183_v29, %v14076_v23  ;;  %v6272_v42 = vpop.f32.mrf.mxu3  ;;  %v15453_v29 = vld [vmem:[#allocation28_spill] sm:$0xff] }
 0x9d7   : > { %v6363_v21 = vpop.f32.mrf.mxu0 }
 0x9d8   : > { %v6273_v50 = vadd.f32 %v6272_v42, %v6184_v55  ;;  %v6452_v60 = vpop.f32.mrf.mxu1  ;;  %v7195_v30 = vmax.f32 %v6448_v20, %v6939_v35  ;;  %v15455_v55 = vld [vmem:[#allocation27_spill] sm:$0xff] }
 0x9da   : > { %v6362_v33 = vadd.f32 %v6361_v19, %v6273_v50  ;;  %v14121_v52 = vpack.c.bf16 %v7195_v30, %v7187_v7 }
 0x9dc   : > { %15452 = vst [vmem:[#allocation153_spill] sm:$0xff] %v14121_v52  ;;  %v6451_v36 = vadd.f32 %v6450_v9, %v6362_v33  ;;  %v11657_v52 = vld [vmem:[#allocation14 + $0xb8] sm:$0xff] }
 0x9dd   : > { %v6185_v45 = vpop.f32.mrf.mxu2  ;;  %8195 = vmatpush.bf16.msrb.mxu0 %v11657_v52 }
 0x9de   : > { %v6186_v16 = vadd.f32 %v6185_v45, %v14076_v23  ;;  %v6274_v48 = vpop.f32.mrf.mxu3  ;;  %v6947_v19 = vmul.f32 0.2, %v6451_v36 }
 0x9df   : > { %v6366_v61 = vpop.f32.mrf.mxu0 }
 0x9e0   : > { %v6275_v3 = vadd.f32 %v6274_v48, %v6186_v16  ;;  %v6455_v28 = vpop.f32.mrf.mxu1  ;;  %v7203_v30 = vmax.f32 %v6451_v36, %v6947_v19 }
 0x9e2   : > { %v6364_v62 = vadd.f32 %v6363_v21, %v6275_v3  ;;  %6227 = vmatmul.bf16.gmra.mxu2 %v15453_v29  ;;  %6405 = vmatmul.bf16.gmra.mxu0 %v15454_v10 }
 0x9e3   : > { %6316 = vmatmul.bf16.gmra.mxu3 %v15455_v55  ;;  %6494 = vmatmul.bf16.gmra.mxu1 %v15456_v0 }
 0x9e4   : > { %v6453_v25 = vadd.f32 %v6452_v60, %v6364_v62 }
 0x9e5   : > { %v6188_v20 = vpop.f32.mrf.mxu2 }
 0x9e6   : > { %v6955_v9 = vmul.f32 0.2, %v6453_v25  ;;  %v6189_v35 = vadd.f32 %v6188_v20, %v14076_v23  ;;  %v6277_v42 = vpop.f32.mrf.mxu3 }
 0x9e7   : > { %v6368_v50 = vpop.f32.mrf.mxu0 }
 0x9e8   : > { %v6278_v7 = vadd.f32 %v6277_v42, %v6189_v35  ;;  %v6457_v21 = vpop.f32.mrf.mxu1  ;;  %v7211_v33 = vmax.f32 %v6453_v25, %v6955_v9  ;;  %v11665_v35 = vld [vmem:[#allocation14 + $0xf8] sm:$0xff] }
 0x9e9   : > { %8284 = vmatpush.bf16.msrb.mxu1 %v11665_v35  ;;  %v11640_v35 = vld [vmem:[#allocation14 + $0x30] sm:$0xff] }
 0x9ea   : > { %v6367_v45 = vadd.f32 %v6366_v61, %v6278_v7  ;;  %v14129_v16 = vpack.c.bf16 %v7211_v33, %v7203_v30  ;;  %8018 = vmatpush.bf16.msrb.mxu2 %v11640_v35 }
 0x9ec   : > { %15457 = vst [vmem:[#allocation28_spill] sm:$0xff] %v14129_v16  ;;  %v6456_v48 = vadd.f32 %v6455_v28, %v6367_v45  ;;  %v15460_v16 = vld [vmem:[#allocation32_spill] sm:$0xff] }
 0x9ed   : > { %v6190_v3 = vpop.f32.mrf.mxu2 }
 0x9ee   : > { %v6191_v60 = vadd.f32 %v6190_v3, %v14076_v23  ;;  %v6279_v62 = vpop.f32.mrf.mxu3  ;;  %v6963_v36 = vmul.f32 0.2, %v6456_v48 }
 0x9ef   : > { %v6371_v20 = vpop.f32.mrf.mxu0 }
 0x9f0   : > { %v6280_v32 = vadd.f32 %v6279_v62, %v6191_v60  ;;  %v6460_v0 = vpop.f32.mrf.mxu1 }
 0x9f2   : > { %v6369_v55 = vadd.f32 %v6368_v50, %v6280_v32  ;;  %6232 = vmatmul.bf16.gmra.mxu2 %v15187_v44  ;;  %6410 = vmatmul.bf16.gmra.mxu0 %v13297_v53  ;;  %v7219_v32 = vmax.f32 %v6456_v48, %v6963_v36  ;;  %v15462_v48 = vld [vmem:[#allocation31_spill] sm:$0xff] }
 0x9f3   : > { %6321 = vmatmul.bf16.gmra.mxu3 %v15188_v37  ;;  %6499 = vmatmul.bf16.gmra.mxu1 %v13289_v24 }
 0x9f4   : > { %v6458_v61 = vadd.f32 %v6457_v21, %v6369_v55 }
 0x9f5   : > { %v6193_v28 = vpop.f32.mrf.mxu2 }
 0x9f6   : > { %v6971_v19 = vmul.f32 0.2, %v6458_v61  ;;  %v6194_v25 = vadd.f32 %v6193_v28, %v14076_v23  ;;  %v6282_v9 = vpop.f32.mrf.mxu3  ;;  %v15459_v28 = vld [vmem:[#allocation36_spill] sm:$0xff] }
 0x9f7   : > { %v6373_v42 = vpop.f32.mrf.mxu0 }
 0x9f8   : > { %v6283_v39 = vadd.f32 %v6282_v9, %v6194_v25  ;;  %v6462_v52 = vpop.f32.mrf.mxu1  ;;  %v7227_v12 = vmax.f32 %v6458_v61, %v6971_v19  ;;  %v15461_v25 = vld [vmem:[#allocation35_spill] sm:$0xff] }
 0x9fa   : > { %v6372_v50 = vadd.f32 %v6371_v20, %v6283_v39  ;;  %v14137_v7 = vpack.c.bf16 %v7227_v12, %v7219_v32  ;;  %v11648_v39 = vld [vmem:[#allocation14 + $0x70] sm:$0xff] }
 0x9fb   : > { %8107 = vmatpush.bf16.msrb.mxu3 %v11648_v39 }
 0x9fc   : > { %15458 = vst [vmem:[#allocation62_spill] sm:$0xff] %v14137_v7  ;;  %v6461_v30 = vadd.f32 %v6460_v0, %v6372_v50 }
 0x9fd   : > { %v6195_v33 = vpop.f32.mrf.mxu2 }
 0x9fe   : > { %v6196_v45 = vadd.f32 %v6195_v33, %v14076_v23  ;;  %v6284_v55 = vpop.f32.mrf.mxu3  ;;  %v6979_v20 = vmul.f32 0.2, %v6461_v30 }
 0x9ff   : > { %v6376_v21 = vpop.f32.mrf.mxu0 }
 0xa00   : > { %v6285_v3 = vadd.f32 %v6284_v55, %v6196_v45  ;;  %v6465_v60 = vpop.f32.mrf.mxu1  ;;  %v7235_v50 = vmax.f32 %v6461_v30, %v6979_v20 }
 0xa02   : > { %v6374_v62 = vadd.f32 %v6373_v42, %v6285_v3  ;;  %6513 = vmatmul.bf16.vlgmr.msra.gmra.mxu2 %v15459_v28  ;;  %6691 = vmatmul.bf16.vlgmr.msra.gmra.mxu0 %v15460_v16  ;;  %v11656_v28 = vld [vmem:[#allocation14 + $0xb0] sm:$0xff] }
 0xa03   : > { %6602 = vmatmul.bf16.vlgmr.msra.gmra.mxu3 %v15461_v25  ;;  %6780 = vmatmul.bf16.vlgmr.msra.gmra.mxu1 %v15462_v48 }
 0xa04   : > { %v6463_v36 = vadd.f32 %v6462_v52, %v6374_v62  ;;  %8196 = vmatpush.bf16.msrb.mxu0 %v11656_v28  ;;  %v15465_v28 = vld [vmem:[#allocation37_spill] sm:$0xff] }
 0xa05   : > { %v6198_v61 = vpop.f32.mrf.mxu2 }
 0xa06   : > { %v6987_v0 = vmul.f32 0.2, %v6463_v36  ;;  %v6199_v19 = vadd.f32 %v6198_v61, %v14076_v23  ;;  %v6287_v9 = vpop.f32.mrf.mxu3 }
 0xa07   : > { %v6378_v32 = vpop.f32.mrf.mxu0 }
 0xa08   : > { %v6288_v12 = vadd.f32 %v6287_v9, %v6199_v19  ;;  %v6467_v42 = vpop.f32.mrf.mxu1  ;;  %v7243_v16 = vmax.f32 %v6463_v36, %v6987_v0  ;;  %v11664_v19 = vld [vmem:[#allocation14 + $0xf0] sm:$0xff] }
 0xa09   : > { %8285 = vmatpush.bf16.msrb.mxu1 %v11664_v19 }
 0xa0a   : > { %v6377_v33 = vadd.f32 %v6376_v21, %v6288_v12  ;;  %v14145_v45 = vpack.c.bf16 %v7243_v16, %v7235_v50 }
 0xa0c   : > { %v6466_v55 = vadd.f32 %v6465_v60, %v6377_v33 }
 0xa0d   : > { %v6200_v3 = vpop.f32.mrf.mxu2 }
 0xa0e   : > { %v6201_v52 = vadd.f32 %v6200_v3, %v14076_v23  ;;  %v6289_v62 = vpop.f32.mrf.mxu3  ;;  %v6995_v30 = vmul.f32 0.2, %v6466_v55 }
 0xa0f   : > { %v6381_v25 = vpop.f32.mrf.mxu0 }
 0xa10   : > { %v6290_v48 = vadd.f32 %v6289_v62, %v6201_v52  ;;  %v6470_v61 = vpop.f32.mrf.mxu1  ;;  %v15463_v52 = vld [vmem:[#allocation38_spill] sm:$0xff]  ;;  %v15464_v62 = vld [vmem:[#allocation47_spill] sm:$0xff] }
 0xa12   : > { %v6379_v7 = vadd.f32 %v6378_v32, %v6290_v48  ;;  %6518 = vmatmul.bf16.gmra.mxu2 %v12880_v63  ;;  %6696 = vmatmul.bf16.gmra.mxu0 %v13128_v11  ;;  %v7251_v32 = vmax.f32 %v6466_v55, %v6995_v30  ;;  %v15466_v55 = vld [vmem:[#allocation34_spill] sm:$0xff] }
 0xa13   : > { %6607 = vmatmul.bf16.gmra.mxu3 %v12863_v41  ;;  %6785 = vmatmul.bf16.gmra.mxu1 %v15193_v51 }
 0xa14   : > { %v6468_v21 = vadd.f32 %v6467_v42, %v6379_v7 }
 0xa15   : > { %v6203_v60 = vpop.f32.mrf.mxu2 }
 0xa16   : > { %v7003_v20 = vmul.f32 0.2, %v6468_v21  ;;  %v6204_v36 = vadd.f32 %v6203_v60, %v14076_v23  ;;  %v6292_v0 = vpop.f32.mrf.mxu3 }
 0xa17   : > { %v6383_v9 = vpop.f32.mrf.mxu0 }
 0xa18   : > { %v6293_v35 = vadd.f32 %v6292_v0, %v6204_v36  ;;  %v6472_v39 = vpop.f32.mrf.mxu1  ;;  %v7259_v63 = vmax.f32 %v6468_v21, %v7003_v20  ;;  %v11639_v20 = vld [vmem:[#allocation14 + $0x28] sm:$0xff] }
 0xa19   : > { %v11647_v36 = vld [vmem:[#allocation14 + $0x68] sm:$0xff]  ;;  %8019 = vmatpush.bf16.msrb.mxu2 %v11639_v20 }
 0xa1a   : > { %v6382_v12 = vadd.f32 %v6381_v25, %v6293_v35  ;;  %v14153_v11 = vpack.c.bf16 %v7259_v63, %v7251_v32  ;;  %8108 = vmatpush.bf16.msrb.mxu3 %v11647_v36 }
 0xa1c   : > { %v6471_v41 = vadd.f32 %v6470_v61, %v6382_v12 }
 0xa1d   : > { %v6205_v50 = vpop.f32.mrf.mxu2 }
 0xa1e   : > { %v6206_v51 = vadd.f32 %v6205_v50, %v14076_v23  ;;  %v6294_v7 = vpop.f32.mrf.mxu3  ;;  %v7011_v25 = vmul.f32 0.2, %v6471_v41 }
 0xa1f   : > { %v6386_v42 = vpop.f32.mrf.mxu0 }
 0xa20   : > { %v6295_v16 = vadd.f32 %v6294_v7, %v6206_v51  ;;  %v6475_v33 = vpop.f32.mrf.mxu1  ;;  %v7267_v35 = vmax.f32 %v6471_v41, %v7011_v25 }
 0xa22   : > { %v6384_v3 = vadd.f32 %v6383_v9, %v6295_v16  ;;  %6523 = vmatmul.bf16.gmra.mxu2 %v15463_v52  ;;  %6701 = vmatmul.bf16.gmra.mxu0 %v15464_v62  ;;  %v11655_v16 = vld [vmem:[#allocation14 + $0xa8] sm:$0xff] }
 0xa23   : > { %6612 = vmatmul.bf16.gmra.mxu3 %v15465_v28  ;;  %6790 = vmatmul.bf16.gmra.mxu1 %v15466_v55 }
 0xa24   : > { %v6473_v48 = vadd.f32 %v6472_v39, %v6384_v3  ;;  %8197 = vmatpush.bf16.msrb.mxu0 %v11655_v16 }
 0xa25   : > { %v6208_v30 = vpop.f32.mrf.mxu2 }
 0xa26   : > { %v7019_v61 = vmul.f32 0.2, %v6473_v48  ;;  %v6209_v21 = vadd.f32 %v6208_v30, %v14076_v23  ;;  %v6297_v60 = vpop.f32.mrf.mxu3  ;;  %v11663_v30 = vld [vmem:[#allocation14 + $0xe8] sm:$0xff] }
 0xa27   : > { %v6388_v0 = vpop.f32.mrf.mxu0  ;;  %8286 = vmatpush.bf16.msrb.mxu1 %v11663_v30 }
 0xa28   : > { %v6298_v19 = vadd.f32 %v6297_v60, %v6209_v21  ;;  %v6477_v9 = vpop.f32.mrf.mxu1  ;;  %v7275_v32 = vmax.f32 %v6473_v48, %v7019_v61 }
 0xa2a   : > { %v6387_v63 = vadd.f32 %v6386_v42, %v6298_v19  ;;  %v14161_v12 = vpack.c.bf16 %v7275_v32, %v7267_v35 }
 0xa2c   : > { %v6476_v50 = vadd.f32 %v6475_v33, %v6387_v63 }
 0xa2d   : > { %v6210_v51 = vpop.f32.mrf.mxu2 }
 0xa2e   : > { %v6211_v39 = vadd.f32 %v6210_v51, %v14076_v23  ;;  %v6299_v7 = vpop.f32.mrf.mxu3  ;;  %v7027_v41 = vmul.f32 0.2, %v6476_v50  ;;  %v15467_v51 = vld [vmem:[#allocation40_spill] sm:$0xff] }
 0xa2f   : > { %v6391_v3 = vpop.f32.mrf.mxu0 }
 0xa30   : > { %v6300_v52 = vadd.f32 %v6299_v7, %v6211_v39  ;;  %v6480_v62 = vpop.f32.mrf.mxu1  ;;  %v7283_v20 = vmax.f32 %v6476_v50, %v7027_v41  ;;  %v15468_v39 = vld [vmem:[#allocation50_spill] sm:$0xff]  ;;  %v15469_v7 = vld [vmem:[#allocation39_spill] sm:$0xff]  ;;  %v15470_v50 = vld [vmem:[#allocation49_spill] sm:$0xff] }
 0xa32   : > { %v6389_v28 = vadd.f32 %v6388_v0, %v6300_v52  ;;  %6528 = vmatmul.bf16.gmra.mxu2 %v12928_v22  ;;  %6706 = vmatmul.bf16.gmra.mxu0 %v13152_v6 }
 0xa33   : > { %6617 = vmatmul.bf16.gmra.mxu3 %v12911_v18  ;;  %6795 = vmatmul.bf16.gmra.mxu1 %v15199_v58 }
 0xa34   : > { %v6478_v42 = vadd.f32 %v6477_v9, %v6389_v28 }
 0xa35   : > { %v6213_v33 = vpop.f32.mrf.mxu2 }
 0xa36   : > { %v7035_v55 = vmul.f32 0.2, %v6478_v42  ;;  %v6214_v25 = vadd.f32 %v6213_v33, %v14076_v23  ;;  %v6302_v48 = vpop.f32.mrf.mxu3  ;;  %v11646_v33 = vld [vmem:[#allocation14 + $0x60] sm:$0xff] }
 0xa37   : > { %v6393_v61 = vpop.f32.mrf.mxu0  ;;  %8109 = vmatpush.bf16.msrb.mxu3 %v11646_v33 }
 0xa38   : > { %v6303_v21 = vadd.f32 %v6302_v48, %v6214_v25  ;;  %v6482_v60 = vpop.f32.mrf.mxu1  ;;  %v7291_v22 = vmax.f32 %v6478_v42, %v7035_v55  ;;  %v11638_v42 = vld [vmem:[#allocation14 + $0x20] sm:$0xff] }
 0xa39   : > { %8020 = vmatpush.bf16.msrb.mxu2 %v11638_v42 }
 0xa3a   : > { %v6392_v36 = vadd.f32 %v6391_v3, %v6303_v21  ;;  %v14169_v6 = vpack.c.bf16 %v7291_v22, %v7283_v20 }
 0xa3c   : > { %v6481_v18 = vadd.f32 %v6480_v62, %v6392_v36 }
 0xa3d   : > { %v6215_v0 = vpop.f32.mrf.mxu2 }
 0xa3e   : > { %v6216_v58 = vadd.f32 %v6215_v0, %v14076_v23  ;;  %v6304_v19 = vpop.f32.mrf.mxu3  ;;  %v7043_v16 = vmul.f32 0.2, %v6481_v18 }
 0xa3f   : > { %v6396_v9 = vpop.f32.mrf.mxu0 }
 0xa40   : > { %v6305_v35 = vadd.f32 %v6304_v19, %v6216_v58  ;;  %v6485_v32 = vpop.f32.mrf.mxu1  ;;  %v7299_v30 = vmax.f32 %v6481_v18, %v7043_v16  ;;  %v11654_v58 = vld [vmem:[#allocation14 + $0xa0] sm:$0xff] }
 0xa41   : > { %8198 = vmatpush.bf16.msrb.mxu0 %v11654_v58  ;;  %v11662_v16 = vld [vmem:[#allocation14 + $0xe0] sm:$0xff] }
 0xa42   : > { %v6394_v63 = vadd.f32 %v6393_v61, %v6305_v35  ;;  %6533 = vmatmul.bf16.gmra.mxu2 %v15467_v51  ;;  %6711 = vmatmul.bf16.gmra.mxu0 %v15468_v39 }
 0xa43   : > { %6622 = vmatmul.bf16.gmra.mxu3 %v15469_v7  ;;  %6800 = vmatmul.bf16.gmra.mxu1 %v15470_v50 }
 0xa44   : > { %v6483_v3 = vadd.f32 %v6482_v60, %v6394_v63  ;;  %8287 = vmatpush.bf16.msrb.mxu1 %v11662_v16 }
 0xa45   : > { %v6218_v52 = vpop.f32.mrf.mxu2 }
 0xa46   : > { %v7051_v62 = vmul.f32 0.2, %v6483_v3  ;;  %v6219_v28 = vadd.f32 %v6218_v52, %v14076_v23  ;;  %v6307_v41 = vpop.f32.mrf.mxu3 }
 0xa47   : > { %v6398_v55 = vpop.f32.mrf.mxu0 }
 0xa48   : > { %v6308_v25 = vadd.f32 %v6307_v41, %v6219_v28  ;;  %v6487_v48 = vpop.f32.mrf.mxu1  ;;  %v7307_v61 = vmax.f32 %v6483_v3, %v7051_v62 }
 0xa4a   : > { %v6397_v21 = vadd.f32 %v6396_v9, %v6308_v25  ;;  %v14177_v20 = vpack.c.bf16 %v7307_v61, %v7299_v30  ;;  %v15471_v61 = vld [vmem:[#allocation42_spill] sm:$0xff] }
 0xa4c   : > { %v6486_v22 = vadd.f32 %v6485_v32, %v6397_v21  ;;  %v15472_v21 = vld [vmem:[#allocation53_spill] sm:$0xff] }
 0xa4d   : > { %v6220_v36 = vpop.f32.mrf.mxu2 }
 0xa4e   : > { %v6221_v60 = vadd.f32 %v6220_v36, %v14076_v23  ;;  %v6309_v0 = vpop.f32.mrf.mxu3  ;;  %v7059_v18 = vmul.f32 0.2, %v6486_v22  ;;  %v15473_v36 = vld [vmem:[#allocation41_spill] sm:$0xff] }
 0xa4f   : > { %v6401_v19 = vpop.f32.mrf.mxu0 }
 0xa50   : > { %v6310_v35 = vadd.f32 %v6309_v0, %v6221_v60  ;;  %v6490_v63 = vpop.f32.mrf.mxu1  ;;  %v7315_v28 = vmax.f32 %v6486_v22, %v7059_v18  ;;  %v15474_v22 = vld [vmem:[#allocation52_spill] sm:$0xff]  ;;  %v11645_v18 = vld [vmem:[#allocation14 + $0x58] sm:$0xff] }
 0xa51   : > { %8110 = vmatpush.bf16.msrb.mxu3 %v11645_v18 }
 0xa52   : > { %v6399_v51 = vadd.f32 %v6398_v55, %v6310_v35  ;;  %6538 = vmatmul.bf16.gmra.mxu2 %v12976_v34  ;;  %6716 = vmatmul.bf16.gmra.mxu0 %v13176_v8 }
 0xa53   : > { %6627 = vmatmul.bf16.gmra.mxu3 %v12959_v1  ;;  %6805 = vmatmul.bf16.gmra.mxu1 %v15205_v40 }
 0xa54   : > { %v6488_v9 = vadd.f32 %v6487_v48, %v6399_v51  ;;  %v11637_v51 = vld [vmem:[#allocation14 + $0x18] sm:$0xff] }
 0xa55   : > { %v6223_v32 = vpop.f32.mrf.mxu2  ;;  %8021 = vmatpush.bf16.msrb.mxu2 %v11637_v51 }
 0xa56   : > { %v7067_v39 = vmul.f32 0.2, %v6488_v9  ;;  %v6224_v7 = vadd.f32 %v6223_v32, %v14076_v23  ;;  %v6312_v50 = vpop.f32.mrf.mxu3 }
 0xa57   : > { %v6403_v3 = vpop.f32.mrf.mxu0 }
 0xa58   : > { %v6313_v52 = vadd.f32 %v6312_v50, %v6224_v7  ;;  %v6492_v62 = vpop.f32.mrf.mxu1  ;;  %v7323_v34 = vmax.f32 %v6488_v9, %v7067_v39 }
 0xa5a   : > { %v6402_v41 = vadd.f32 %v6401_v19, %v6313_v52  ;;  %v14185_v8 = vpack.c.bf16 %v7323_v34, %v7315_v28 }
 0xa5c   : > { %v6491_v1 = vadd.f32 %v6490_v63, %v6402_v41 }
 0xa5d   : > { %v6225_v42 = vpop.f32.mrf.mxu2 }
 0xa5e   : > { %v6226_v40 = vadd.f32 %v6225_v42, %v14076_v23  ;;  %v6314_v33 = vpop.f32.mrf.mxu3  ;;  %v7075_v60 = vmul.f32 0.2, %v6491_v1 }
 0xa5f   : > { %v6406_v55 = vpop.f32.mrf.mxu0 }
 0xa60   : > { %v6315_v25 = vadd.f32 %v6314_v33, %v6226_v40  ;;  %v6495_v48 = vpop.f32.mrf.mxu1  ;;  %v7331_v7 = vmax.f32 %v6491_v1, %v7075_v60  ;;  %v11653_v33 = vld [vmem:[#allocation14 + $0x98] sm:$0xff] }
 0xa61   : > { %8199 = vmatpush.bf16.msrb.mxu0 %v11653_v33  ;;  %v11636_v33 = vld [vmem:[#allocation14 + $0x10] sm:$0xff] }
 0xa62   : > { %v6404_v30 = vadd.f32 %v6403_v3, %v6315_v25  ;;  %6543 = vmatmul.bf16.gmra.mxu2 %v15471_v61  ;;  %6721 = vmatmul.bf16.gmra.mxu0 %v15472_v21 }
 0xa63   : > { %6632 = vmatmul.bf16.gmra.mxu3 %v15473_v36  ;;  %6810 = vmatmul.bf16.gmra.mxu1 %v15474_v22 }
 0xa64   : > { %v6493_v0 = vadd.f32 %v6492_v62, %v6404_v30  ;;  %8022 = vmatpush.bf16.msrb.mxu2 %v11636_v33 }
 0xa65   : > { %v6228_v58 = vpop.f32.mrf.mxu2 }
 0xa66   : > { %v7083_v19 = vmul.f32 0.2, %v6493_v0  ;;  %v6229_v35 = vadd.f32 %v6228_v58, %v14076_v23  ;;  %v6317_v63 = vpop.f32.mrf.mxu3 }
 0xa67   : > { %v6408_v9 = vpop.f32.mrf.mxu0 }
 0xa68   : > { %v6318_v32 = vadd.f32 %v6317_v63, %v6229_v35  ;;  %v6497_v39 = vpop.f32.mrf.mxu1  ;;  %v7339_v50 = vmax.f32 %v6493_v0, %v7083_v19  ;;  %v11661_v19 = vld [vmem:[#allocation14 + $0xd8] sm:$0xff] }
 0xa69   : > { %8288 = vmatpush.bf16.msrb.mxu1 %v11661_v19 }
 0xa6a   : > { %v6407_v16 = vadd.f32 %v6406_v55, %v6318_v32  ;;  %v14193_v3 = vpack.c.bf16 %v7339_v50, %v7331_v7  ;;  %v15476_v7 = vld [vmem:[#allocation55_spill] sm:$0xff] }
 0xa6b   : > { %v15477_v50 = vld [vmem:[#allocation147_spill] sm:$0xff] }
 0xa6c   : > { %v6496_v52 = vadd.f32 %v6495_v48, %v6407_v16  ;;  %v14207_v16 = vperm.slane %v15477_v50, 7 }
 0xa6d   : > { %v6230_v28 = vpop.f32.mrf.mxu2 }
 0xa6e   : > { %v6231_v62 = vadd.f32 %v6230_v28, %v14076_v23  ;;  %v6319_v34 = vpop.f32.mrf.mxu3  ;;  %v7091_v1 = vmul.f32 0.2, %v6496_v52  ;;  %v15479_v28 = vld [vmem:[#allocation54_spill] sm:$0xff] }
 0xa6f   : > { %v6411_v41 = vpop.f32.mrf.mxu0 }
 0xa70   : > { %v6320_v42 = vadd.f32 %v6319_v34, %v6231_v62  ;;  %v6500_v40 = vpop.f32.mrf.mxu1  ;;  %v7347_v0 = vmax.f32 %v6496_v52, %v7091_v1  ;;  %v15478_v52 = vld [vmem:[#allocation43_spill] sm:$0xff] }
 0xa72   : > { %v6409_v25 = vadd.f32 %v6408_v9, %v6320_v42  ;;  %6548 = vmatmul.bf16.gmra.mxu2 %v13004_v47  ;;  %6726 = vmatmul.bf16.gmra.mxu0 %v13200_v26 }
 0xa73   : > { %6637 = vmatmul.bf16.gmra.mxu3 %v12997_v13  ;;  %6815 = vmatmul.bf16.gmra.mxu1 %v13193_v4 }
 0xa74   : > { %v6498_v55 = vadd.f32 %v6497_v39, %v6409_v25  ;;  %v15475_v39 = vld [vmem:[#allocation44_spill] sm:$0xff]  ;;  %v11644_v25 = vld [vmem:[#allocation14 + $0x50] sm:$0xff] }
 0xa75   : > { %v6233_v48 = vpop.f32.mrf.mxu2  ;;  %8111 = vmatpush.bf16.msrb.mxu3 %v11644_v25 }
 0xa76   : > { %v7099_v30 = vmul.f32 0.2, %v6498_v55  ;;  %v6234_v61 = vadd.f32 %v6233_v48, %v14076_v23  ;;  %v6322_v21 = vpop.f32.mrf.mxu3 }
 0xa77   : > { %v6413_v36 = vpop.f32.mrf.mxu0 }
 0xa78   : > { %v6323_v22 = vadd.f32 %v6322_v21, %v6234_v61  ;;  %v6502_v60 = vpop.f32.mrf.mxu1  ;;  %v7355_v58 = vmax.f32 %v6498_v55, %v7099_v30 }
 0xa7a   : > { %v6412_v47 = vadd.f32 %v6411_v41, %v6323_v22  ;;  %v14201_v26 = vpack.c.bf16 %v7355_v58, %v7347_v0 }
 0xa7c   : > { %v6501_v13 = vadd.f32 %v6500_v40, %v6412_v47  ;;  %v11652_v47 = vld [vmem:[#allocation14 + $0x90] sm:$0xff] }
 0xa7d   : > { %v6235_v4 = vpop.f32.mrf.mxu2  ;;  %8200 = vmatpush.bf16.msrb.mxu0 %v11652_v47  ;;  %v11635_v47 = vld [vmem:[#allocation14 + $0x8] sm:$0xff] }
 0xa7e   : > { %v6236_v35 = vadd.f32 %v6235_v4, %v14076_v23  ;;  %v6324_v63 = vpop.f32.mrf.mxu3  ;;  %v7107_v62 = vmul.f32 0.2, %v6501_v13  ;;  %8023 = vmatpush.bf16.msrb.mxu2 %v11635_v47  ;;  %v15484_v47 = vld [vmem:[#allocation59_spill] sm:$0xff] }
 0xa7f   : > { %v6692_v51 = vpop.f32.mrf.mxu0 }
 0xa80   : > { %v6325_v18 = vadd.f32 %v6324_v63, %v6236_v35  ;;  %v6781_v9 = vpop.f32.mrf.mxu1  ;;  %v7363_v30 = vmax.f32 %v6501_v13, %v7107_v62 }
 0xa82   : > { %v6414_v32 = vadd.f32 %v6413_v36, %v6325_v18  ;;  %6553 = vmatmul.bf16.gmra.mxu2 %v15475_v39  ;;  %6731 = vmatmul.bf16.gmra.mxu0 %v15476_v7  ;;  %v11660_v7 = vld [vmem:[#allocation14 + $0xd0] sm:$0xff] }
 0xa83   : > { %6642 = vmatmul.bf16.gmra.mxu3 %v15478_v52  ;;  %6820 = vmatmul.bf16.gmra.mxu1 %v15479_v28 }
 0xa84   : > { %v6503_v34 = vadd.f32 %v6502_v60, %v6414_v32  ;;  %8289 = vmatpush.bf16.msrb.mxu1 %v11660_v7 }
 0xa85   : > { %v6514_v41 = vpop.f32.mrf.mxu2 }
 0xa86   : > { %v7115_v23 = vmul.f32 0.2, %v6503_v34  ;;  %v6515_v42 = vadd.f32 %v6514_v41, %v14207_v16  ;;  %v6603_v40 = vpop.f32.mrf.mxu3 }
 0xa87   : > { %v6694_v1 = vpop.f32.mrf.mxu0 }
 0xa88   : > { %v6604_v55 = vadd.f32 %v6603_v40, %v6515_v42  ;;  %v6783_v48 = vpop.f32.mrf.mxu1  ;;  %v7371_v61 = vmax.f32 %v6503_v34, %v7115_v23 }
 0xa8a   : > { %v6693_v21 = vadd.f32 %v6692_v51, %v6604_v55  ;;  %v14212_v36 = vpack.c.bf16 %v7371_v61, %v7363_v30  ;;  %v15481_v55 = vld [vmem:[#allocation58_spill] sm:$0xff]  ;;  %v15483_v30 = vld [vmem:[#allocation57_spill] sm:$0xff] }
 0xa8c   : > { %v6782_v22 = vadd.f32 %v6781_v9, %v6693_v21 }
 0xa8d   : > { %v6516_v0 = vpop.f32.mrf.mxu2 }
 0xa8e   : > { %v6517_v60 = vadd.f32 %v6516_v0, %v14207_v16  ;;  %v6605_v58 = vpop.f32.mrf.mxu3  ;;  %v6868_v13 = vmul.f32 0.2, %v6782_v22 }
 0xa8f   : > { %v6697_v19 = vpop.f32.mrf.mxu0 }
 0xa90   : > { %v6606_v4 = vadd.f32 %v6605_v58, %v6517_v60  ;;  %v6786_v35 = vpop.f32.mrf.mxu1  ;;  %v7124_v52 = vmax.f32 %v6782_v22, %v6868_v13 }
 0xa92   : > { %v6695_v63 = vadd.f32 %v6694_v1, %v6606_v4  ;;  %6558 = vmatmul.bf16.gmra.mxu2 %v13028_v38  ;;  %6736 = vmatmul.bf16.gmra.mxu0 %v13224_v43  ;;  %v15480_v1 = vld [vmem:[#allocation23_spill] sm:$0xff] }
 0xa93   : > { %6647 = vmatmul.bf16.gmra.mxu3 %v15217_v14  ;;  %6825 = vmatmul.bf16.gmra.mxu1 %v15218_v59 }
 0xa94   : > { %v6784_v51 = vadd.f32 %v6783_v48, %v6695_v63  ;;  %v15482_v48 = vld [vmem:[#allocation46_spill] sm:$0xff] }
 0xa95   : > { %v6519_v18 = vpop.f32.mrf.mxu2 }
 0xa96   : > { %v6876_v9 = vmul.f32 0.2, %v6784_v51  ;;  %v6520_v32 = vadd.f32 %v6519_v18, %v14207_v16  ;;  %v6608_v39 = vpop.f32.mrf.mxu3 }
 0xa97   : > { %v6699_v50 = vpop.f32.mrf.mxu0 }
 0xa98   : > { %v7132_v28 = vmax.f32 %v6784_v51, %v6876_v9  ;;  %v6609_v62 = vadd.f32 %v6608_v39, %v6520_v32  ;;  %v6788_v34 = vpop.f32.mrf.mxu1 }
 0xa9a   : > { %v14220_v38 = vpack.c.bf16 %v7132_v28, %v7124_v52  ;;  %v6698_v43 = vadd.f32 %v6697_v19, %v6609_v62  ;;  %v11643_v19 = vld [vmem:[#allocation14 + $0x48] sm:$0xff] }
 0xa9b   : > { %8112 = vmatpush.bf16.msrb.mxu3 %v11643_v19  ;;  %v11651_v52 = vld [vmem:[#allocation14 + $0x88] sm:$0xff] }
 0xa9c   : > { %v6787_v14 = vadd.f32 %v6786_v35, %v6698_v43  ;;  %8201 = vmatpush.bf16.msrb.mxu0 %v11651_v52 }
 0xa9d   : > { %v6521_v41 = vpop.f32.mrf.mxu2 }
 0xa9e   : > { %v6522_v59 = vadd.f32 %v6521_v41, %v14207_v16  ;;  %v6610_v23 = vpop.f32.mrf.mxu3  ;;  %v6884_v61 = vmul.f32 0.2, %v6787_v14 }
 0xa9f   : > { %v6702_v42 = vpop.f32.mrf.mxu0 }
 0xaa0   : > { %v6611_v40 = vadd.f32 %v6610_v23, %v6522_v59  ;;  %v6791_v33 = vpop.f32.mrf.mxu1  ;;  %v7140_v13 = vmax.f32 %v6787_v14, %v6884_v61 }
 0xaa2   : > { %v6700_v25 = vadd.f32 %v6699_v50, %v6611_v40  ;;  %6563 = vmatmul.bf16.gmra.mxu2 %v15480_v1  ;;  %6741 = vmatmul.bf16.gmra.mxu0 %v15481_v55 }
 0xaa3   : > { %6652 = vmatmul.bf16.gmra.mxu3 %v15482_v48  ;;  %6830 = vmatmul.bf16.gmra.mxu1 %v15483_v30 }
 0xaa4   : > { %v6789_v21 = vadd.f32 %v6788_v34, %v6700_v25 }
 0xaa5   : > { %v6524_v22 = vpop.f32.mrf.mxu2 }
 0xaa6   : > { %v6892_v0 = vmul.f32 0.2, %v6789_v21  ;;  %v6525_v60 = vadd.f32 %v6524_v22, %v14207_v16  ;;  %v6613_v58 = vpop.f32.mrf.mxu3 }
 0xaa7   : > { %v6704_v4 = vpop.f32.mrf.mxu0 }
 0xaa8   : > { %v6614_v35 = vadd.f32 %v6613_v58, %v6525_v60  ;;  %v6793_v63 = vpop.f32.mrf.mxu1  ;;  %v7148_v51 = vmax.f32 %v6789_v21, %v6892_v0 }
 0xaaa   : > { %v6703_v18 = vadd.f32 %v6702_v42, %v6614_v35  ;;  %v14228_v9 = vpack.c.bf16 %v7148_v51, %v7140_v13 }
 0xaac   : > { %v6792_v32 = vadd.f32 %v6791_v33, %v6703_v18  ;;  %v11659_v33 = vld [vmem:[#allocation14 + $0xc8] sm:$0xff]  ;;  %v11634_v18 = vld [vmem:[#allocation14] sm:$0xff] }
 0xaad   : > { %v6526_v39 = vpop.f32.mrf.mxu2  ;;  %8290 = vmatpush.bf16.msrb.mxu1 %v11659_v33  ;;  %8024 = vmatpush.bf16.msrb.mxu2 %v11634_v18 }
 0xaae   : > { %v6527_v7 = vadd.f32 %v6526_v39, %v14207_v16  ;;  %v6615_v50 = vpop.f32.mrf.mxu3  ;;  %v6900_v14 = vmul.f32 0.2, %v6792_v32 }
 0xaaf   : > { %v6707_v28 = vpop.f32.mrf.mxu0 }
 0xab0   : > { %v6616_v62 = vadd.f32 %v6615_v50, %v6527_v7  ;;  %v6796_v34 = vpop.f32.mrf.mxu1  ;;  %v7156_v48 = vmax.f32 %v6792_v32, %v6900_v14  ;;  %v11642_v32 = vld [vmem:[#allocation14 + $0x40] sm:$0xff] }
 0xab1   : > { %8113 = vmatpush.bf16.msrb.mxu3 %v11642_v32  ;;  %v11650_v14 = vld [vmem:[#allocation14 + $0x80] sm:$0xff] }
 0xab2   : > { %v6705_v43 = vadd.f32 %v6704_v4, %v6616_v62  ;;  %6568 = vmatmul.bf16.gmra.mxu2 %v13052_v31  ;;  %6746 = vmatmul.bf16.gmra.mxu0 %v13248_v57 }
 0xab3   : > { %6657 = vmatmul.bf16.gmra.mxu3 %v13045_v49  ;;  %6835 = vmatmul.bf16.gmra.mxu1 %v13241_v27 }
 0xab4   : > { %v6794_v41 = vadd.f32 %v6793_v63, %v6705_v43  ;;  %8202 = vmatpush.bf16.msrb.mxu0 %v11650_v14 }
 0xab5   : > { %v6529_v59 = vpop.f32.mrf.mxu2 }
 0xab6   : > { %v6908_v23 = vmul.f32 0.2, %v6794_v41  ;;  %v6530_v42 = vadd.f32 %v6529_v59, %v14207_v16  ;;  %v6618_v40 = vpop.f32.mrf.mxu3 }
 0xab7   : > { %v6709_v25 = vpop.f32.mrf.mxu0 }
 0xab8   : > { %v6619_v1 = vadd.f32 %v6618_v40, %v6530_v42  ;;  %v6798_v55 = vpop.f32.mrf.mxu1  ;;  %v7164_v31 = vmax.f32 %v6794_v41, %v6908_v23 }
 0xaba   : > { %v6708_v30 = vadd.f32 %v6707_v28, %v6619_v1  ;;  %v14236_v57 = vpack.c.bf16 %v7164_v31, %v7156_v48  ;;  %v11658_v31 = vld [vmem:[#allocation14 + $0xc0] sm:$0xff] }
 0xabb   : > { %8291 = vmatpush.bf16.msrb.mxu1 %v11658_v31 }
 0xabc   : > { %v6797_v49 = vadd.f32 %v6796_v34, %v6708_v30 }
 0xabd   : > { %v6531_v61 = vpop.f32.mrf.mxu2 }
 0xabe   : > { %v6532_v27 = vadd.f32 %v6531_v61, %v14207_v16  ;;  %v6620_v21 = vpop.f32.mrf.mxu3  ;;  %v6916_v19 = vmul.f32 0.2, %v6797_v49 }
 0xabf   : > { %v6712_v22 = vpop.f32.mrf.mxu0 }
 0xac0   : > { %v6621_v0 = vadd.f32 %v6620_v21, %v6532_v27  ;;  %v6801_v60 = vpop.f32.mrf.mxu1 }
 0xac2   : > { %v6710_v58 = vadd.f32 %v6709_v25, %v6621_v0  ;;  %6573 = vmatmul.bf16.gmra.mxu2 %v13064_v56  ;;  %6751 = vmatmul.bf16.gmra.mxu0 %v13260_v15  ;;  %v7172_v56 = vmax.f32 %v6797_v49, %v6916_v19 }
 0xac3   : > { %6662 = vmatmul.bf16.gmra.mxu3 %v15179_v17  ;;  %6840 = vmatmul.bf16.gmra.mxu1 %v15484_v47 }
 0xac4   : > { %v6799_v4 = vadd.f32 %v6798_v55, %v6710_v58 }
 0xac5   : > { %v6534_v35 = vpop.f32.mrf.mxu2 }
 0xac6   : > { %v6924_v63 = vmul.f32 0.2, %v6799_v4  ;;  %v6535_v13 = vadd.f32 %v6534_v35, %v14207_v16  ;;  %v6623_v51 = vpop.f32.mrf.mxu3  ;;  %v15486_v35 = vld [vmem:[#allocation61_spill] sm:$0xff] }
 0xac7   : > { %v6714_v39 = vpop.f32.mrf.mxu0 }
 0xac8   : > { %v6624_v7 = vadd.f32 %v6623_v51, %v6535_v13  ;;  %v6803_v50 = vpop.f32.mrf.mxu1  ;;  %v7180_v15 = vmax.f32 %v6799_v4, %v6924_v63  ;;  %v15485_v4 = vld [vmem:[#allocation27_spill] sm:$0xff] }
 0xaca   : > { %v6713_v52 = vadd.f32 %v6712_v22, %v6624_v7  ;;  %v14244_v17 = vpack.c.bf16 %v7180_v15, %v7172_v56  ;;  %v11673_v7 = vld [vmem:[#allocation14 + $0x138] sm:$0xff] }
 0xacb   : > { %8373 = vmatpush.bf16.msra.mxu2 %v11673_v7 }
 0xacc   : > { %v6802_v28 = vadd.f32 %v6801_v60, %v6713_v52 }
 0xacd   : > { %v6536_v62 = vpop.f32.mrf.mxu2 }
 0xace   : > { %v6537_v34 = vadd.f32 %v6536_v62, %v14207_v16  ;;  %v6625_v43 = vpop.f32.mrf.mxu3  ;;  %v6932_v40 = vmul.f32 0.2, %v6802_v28 }
 0xacf   : > { %v6717_v41 = vpop.f32.mrf.mxu0 }
 0xad0   : > { %v6626_v59 = vadd.f32 %v6625_v43, %v6537_v34  ;;  %v6806_v23 = vpop.f32.mrf.mxu1  ;;  %v7188_v27 = vmax.f32 %v6802_v28, %v6932_v40 }
 0xad2   : > { %v6715_v42 = vadd.f32 %v6714_v39, %v6626_v59  ;;  %6578 = vmatmul.bf16.gmra.mxu2 %v15181_v54  ;;  %6756 = vmatmul.bf16.gmra.mxu0 %v13272_v5  ;;  %v11689_v59 = vld [vmem:[#allocation14 + $0x1b8] sm:$0xff] }
 0xad3   : > { %6667 = vmatmul.bf16.gmra.mxu3 %v15182_v2  ;;  %6845 = vmatmul.bf16.gmra.mxu1 %v15226_v46 }
 0xad4   : > { %v6804_v33 = vadd.f32 %v6803_v50, %v6715_v42  ;;  %v11681_v50 = vld [vmem:[#allocation14 + $0x178] sm:$0xff]  ;;  %8551 = vmatpush.bf16.msra.mxu0 %v11689_v59 }
 0xad5   : > { %v6539_v25 = vpop.f32.mrf.mxu2  ;;  %8462 = vmatpush.bf16.msra.mxu3 %v11681_v50  ;;  %v11672_v50 = vld [vmem:[#allocation14 + $0x130] sm:$0xff] }
 0xad6   : > { %v6940_v1 = vmul.f32 0.2, %v6804_v33  ;;  %v6540_v55 = vadd.f32 %v6539_v25, %v14207_v16  ;;  %v6628_v48 = vpop.f32.mrf.mxu3  ;;  %8374 = vmatpush.bf16.msra.mxu2 %v11672_v50  ;;  %v15498_v50 = vld [vmem:[#allocation102_spill] sm:$0xff] }
 0xad7   : > { %v6719_v30 = vpop.f32.mrf.mxu0 }
 0xad8   : > { %v6629_v49 = vadd.f32 %v6628_v48, %v6540_v55  ;;  %v6808_v61 = vpop.f32.mrf.mxu1  ;;  %v7196_v54 = vmax.f32 %v6804_v33, %v6940_v1 }
 0xada   : > { %v6718_v21 = vadd.f32 %v6717_v41, %v6629_v49  ;;  %v14252_v5 = vpack.c.bf16 %v7196_v54, %v7188_v27  ;;  %v11697_v49 = vld [vmem:[#allocation14 + $0x1f8] sm:$0xff] }
 0xadb   : > { %8640 = vmatpush.bf16.msra.mxu1 %v11697_v49 }
 0xadc   : > { %v6807_v2 = vadd.f32 %v6806_v23, %v6718_v21 }
 0xadd   : > { %v6541_v22 = vpop.f32.mrf.mxu2 }
 0xade   : > { %v6542_v46 = vadd.f32 %v6541_v22, %v14207_v16  ;;  %v6630_v0 = vpop.f32.mrf.mxu3  ;;  %v6948_v63 = vmul.f32 0.2, %v6807_v2 }
 0xadf   : > { %v6722_v60 = vpop.f32.mrf.mxu0 }
 0xae0   : > { %v6631_v58 = vadd.f32 %v6630_v0, %v6542_v46  ;;  %v6811_v47 = vpop.f32.mrf.mxu1 }
 0xae2   : > { %v6720_v19 = vadd.f32 %v6719_v30, %v6631_v58  ;;  %6583 = vmatmul.bf16.gmra.mxu2 %v15453_v29  ;;  %6761 = vmatmul.bf16.gmra.mxu0 %v15454_v10  ;;  %v7204_v29 = vmax.f32 %v6807_v2, %v6948_v63  ;;  %v15490_v63 = vld [vmem:[#allocation100_spill] sm:$0xff] }
 0xae3   : > { %6672 = vmatmul.bf16.gmra.mxu3 %v15485_v4  ;;  %6850 = vmatmul.bf16.gmra.mxu1 %v15486_v35  ;;  %v15488_v4 = vld [vmem:[#allocation84_spill] sm:$0xff]  ;;  %v15489_v35 = vld [vmem:[#allocation45_spill] sm:$0xff] }
 0xae4   : > { %v6809_v13 = vadd.f32 %v6808_v61, %v6720_v19  ;;  %v15487_v19 = vld [vmem:[#allocation63_spill] sm:$0xff] }
 0xae5   : > { %v6544_v51 = vpop.f32.mrf.mxu2 }
 0xae6   : > { %v6956_v18 = vmul.f32 0.2, %v6809_v13  ;;  %v6545_v32 = vadd.f32 %v6544_v51, %v14207_v16  ;;  %v6633_v39 = vpop.f32.mrf.mxu3 }
 0xae7   : > { %v6724_v56 = vpop.f32.mrf.mxu0 }
 0xae8   : > { %v6634_v15 = vadd.f32 %v6633_v39, %v6545_v32  ;;  %v6813_v52 = vpop.f32.mrf.mxu1  ;;  %v7212_v10 = vmax.f32 %v6809_v13, %v6956_v18 }
 0xaea   : > { %v6723_v28 = vadd.f32 %v6722_v60, %v6634_v15  ;;  %v14260_v62 = vpack.c.bf16 %v7212_v10, %v7204_v29 }
 0xaec   : > { %v6812_v34 = vadd.f32 %v6811_v47, %v6723_v28 }
 0xaed   : > { %v6546_v43 = vpop.f32.mrf.mxu2 }
 0xaee   : > { %v6547_v14 = vadd.f32 %v6546_v43, %v14207_v16  ;;  %v6635_v41 = vpop.f32.mrf.mxu3  ;;  %v6964_v25 = vmul.f32 0.2, %v6812_v34 }
 0xaef   : > { %v6727_v23 = vpop.f32.mrf.mxu0 }
 0xaf0   : > { %v6636_v42 = vadd.f32 %v6635_v41, %v6547_v14  ;;  %v6816_v40 = vpop.f32.mrf.mxu1  ;;  %v7220_v21 = vmax.f32 %v6812_v34, %v6964_v25 }
 0xaf2   : > { %v6725_v33 = vadd.f32 %v6724_v56, %v6636_v42  ;;  %6588 = vmatmul.bf16.gmra.mxu2 %v15187_v44  ;;  %6766 = vmatmul.bf16.gmra.mxu0 %v13297_v53  ;;  %v11680_v56 = vld [vmem:[#allocation14 + $0x170] sm:$0xff] }
 0xaf3   : > { %6677 = vmatmul.bf16.gmra.mxu3 %v15188_v37  ;;  %6855 = vmatmul.bf16.gmra.mxu1 %v13289_v24  ;;  %v11688_v42 = vld [vmem:[#allocation14 + $0x1b0] sm:$0xff] }
 0xaf4   : > { %v6814_v1 = vadd.f32 %v6813_v52, %v6725_v33  ;;  %8463 = vmatpush.bf16.msra.mxu3 %v11680_v56  ;;  %8552 = vmatpush.bf16.msra.mxu0 %v11688_v42 }
 0xaf5   : > { %v6549_v55 = vpop.f32.mrf.mxu2 }
 0xaf6   : > { %v6972_v48 = vmul.f32 0.2, %v6814_v1  ;;  %v6550_v31 = vadd.f32 %v6549_v55, %v14207_v16  ;;  %v6638_v30 = vpop.f32.mrf.mxu3  ;;  %v15491_v55 = vld [vmem:[#allocation64_spill] sm:$0xff] }
 0xaf7   : > { %v6729_v61 = vpop.f32.mrf.mxu0 }
 0xaf8   : > { %v6639_v27 = vadd.f32 %v6638_v30, %v6550_v31  ;;  %v6818_v54 = vpop.f32.mrf.mxu1  ;;  %v7228_v44 = vmax.f32 %v6814_v1, %v6972_v48  ;;  %v15492_v48 = vld [vmem:[#allocation85_spill] sm:$0xff]  ;;  %v15493_v31 = vld [vmem:[#allocation56_spill] sm:$0xff] }
 0xaf9   : > { %v15494_v30 = vld [vmem:[#allocation101_spill] sm:$0xff] }
 0xafa   : > { %v6728_v2 = vadd.f32 %v6727_v23, %v6639_v27  ;;  %v14268_v53 = vpack.c.bf16 %v7228_v44, %v7220_v21 }
 0xafc   : > { %v6817_v37 = vadd.f32 %v6816_v40, %v6728_v2  ;;  %v11696_v2 = vld [vmem:[#allocation14 + $0x1f0] sm:$0xff] }
 0xafd   : > { %v6551_v22 = vpop.f32.mrf.mxu2  ;;  %8641 = vmatpush.bf16.msra.mxu1 %v11696_v2  ;;  %v15501_v2 = vld [vmem:[#allocation72_spill] sm:$0xff] }
 0xafe   : > { %v6552_v24 = vadd.f32 %v6551_v22, %v14207_v16  ;;  %v6640_v46 = vpop.f32.mrf.mxu3  ;;  %v6980_v13 = vmul.f32 0.2, %v6817_v37 }
 0xaff   : > { %v6732_v0 = vpop.f32.mrf.mxu0 }
 0xb00   : > { %v6641_v60 = vadd.f32 %v6640_v46, %v6552_v24  ;;  %v6821_v58 = vpop.f32.mrf.mxu1  ;;  %v7236_v10 = vmax.f32 %v6817_v37, %v6980_v13 }
 0xb02   : > { %v6730_v47 = vadd.f32 %v6729_v61, %v6641_v60  ;;  %8025 = vmatmul.bf16.vlgmr.msrb.gmra.mxu2 %v15487_v19  ;;  %8203 = vmatmul.bf16.vlgmr.msrb.gmra.mxu0 %v15488_v4 }
 0xb03   : > { %8114 = vmatmul.bf16.vlgmr.msrb.gmra.mxu3 %v15489_v35  ;;  %8292 = vmatmul.bf16.vlgmr.msrb.gmra.mxu1 %v15490_v63 }
 0xb04   : > { %v6819_v51 = vadd.f32 %v6818_v54, %v6730_v47 }
 0xb05   : > { %v6554_v18 = vpop.f32.mrf.mxu2 }
 0xb06   : > { %v6988_v32 = vmul.f32 0.2, %v6819_v51  ;;  %v6555_v39 = vadd.f32 %v6554_v18, %v14207_v16  ;;  %v6643_v7 = vpop.f32.mrf.mxu3 }
 0xb07   : > { %v6734_v15 = vpop.f32.mrf.mxu0 }
 0xb08   : > { %v6644_v52 = vadd.f32 %v6643_v7, %v6555_v39  ;;  %v6823_v29 = vpop.f32.mrf.mxu1  ;;  %v7244_v28 = vmax.f32 %v6819_v51, %v6988_v32  ;;  %v15495_v32 = vld [vmem:[#allocation65_spill] sm:$0xff]  ;;  %v15496_v39 = vld [vmem:[#allocation86_spill] sm:$0xff]  ;;  %v15497_v7 = vld [vmem:[#allocation71_spill] sm:$0xff] }
 0xb0a   : > { %v6733_v34 = vadd.f32 %v6732_v0, %v6644_v52  ;;  %v14276_v43 = vpack.c.bf16 %v7244_v28, %v7236_v10 }
 0xb0c   : > { %v6822_v14 = vadd.f32 %v6821_v58, %v6733_v34  ;;  %v11671_v34 = vld [vmem:[#allocation14 + $0x128] sm:$0xff] }
 0xb0d   : > { %v6556_v41 = vpop.f32.mrf.mxu2  ;;  %8375 = vmatpush.bf16.msra.mxu2 %v11671_v34  ;;  %v15504_v34 = vld [vmem:[#allocation88_spill] sm:$0xff] }
 0xb0e   : > { %v6557_v59 = vadd.f32 %v6556_v41, %v14207_v16  ;;  %v6645_v23 = vpop.f32.mrf.mxu3  ;;  %v6996_v49 = vmul.f32 0.2, %v6822_v14 }
 0xb0f   : > { %v6737_v40 = vpop.f32.mrf.mxu0 }
 0xb10   : > { %v6646_v33 = vadd.f32 %v6645_v23, %v6557_v59  ;;  %v6826_v25 = vpop.f32.mrf.mxu1  ;;  %v7252_v46 = vmax.f32 %v6822_v14, %v6996_v49  ;;  %v11679_v14 = vld [vmem:[#allocation14 + $0x168] sm:$0xff] }
 0xb11   : > { %8464 = vmatpush.bf16.msra.mxu3 %v11679_v14  ;;  %v15505_v14 = vld [vmem:[#allocation60_spill] sm:$0xff] }
 0xb12   : > { %v6735_v1 = vadd.f32 %v6734_v15, %v6646_v33  ;;  %8030 = vmatmul.bf16.gmra.mxu2 %v15491_v55  ;;  %8208 = vmatmul.bf16.gmra.mxu0 %v15492_v48 }
 0xb13   : > { %8119 = vmatmul.bf16.gmra.mxu3 %v15493_v31  ;;  %8297 = vmatmul.bf16.gmra.mxu1 %v15494_v30  ;;  %v11687_v30 = vld [vmem:[#allocation14 + $0x1a8] sm:$0xff] }
 0xb14   : > { %v6824_v61 = vadd.f32 %v6823_v29, %v6735_v1  ;;  %8553 = vmatpush.bf16.msra.mxu0 %v11687_v30 }
 0xb15   : > { %v6559_v27 = vpop.f32.mrf.mxu2 }
 0xb16   : > { %v7004_v54 = vmul.f32 0.2, %v6824_v61  ;;  %v6560_v21 = vadd.f32 %v6559_v27, %v14207_v16  ;;  %v6648_v44 = vpop.f32.mrf.mxu3 }
 0xb17   : > { %v6739_v37 = vpop.f32.mrf.mxu0 }
 0xb18   : > { %v6649_v22 = vadd.f32 %v6648_v44, %v6560_v21  ;;  %v6828_v24 = vpop.f32.mrf.mxu1  ;;  %v7260_v0 = vmax.f32 %v6824_v61, %v7004_v54  ;;  %v15499_v21 = vld [vmem:[#allocation24_spill] sm:$0xff]  ;;  %v15500_v44 = vld [vmem:[#allocation87_spill] sm:$0xff] }
 0xb1a   : > { %v6738_v60 = vadd.f32 %v6737_v40, %v6649_v22  ;;  %v14284_v58 = vpack.c.bf16 %v7260_v0, %v7252_v46 }
 0xb1c   : > { %v6827_v47 = vadd.f32 %v6826_v25, %v6738_v60 }
 0xb1d   : > { %v6561_v19 = vpop.f32.mrf.mxu2 }
 0xb1e   : > { %v6562_v4 = vadd.f32 %v6561_v19, %v14207_v16  ;;  %v6650_v35 = vpop.f32.mrf.mxu3  ;;  %v7012_v56 = vmul.f32 0.2, %v6827_v47  ;;  %v11695_v19 = vld [vmem:[#allocation14 + $0x1e8] sm:$0xff] }
 0xb1f   : > { %v6742_v63 = vpop.f32.mrf.mxu0  ;;  %8642 = vmatpush.bf16.msra.mxu1 %v11695_v19  ;;  %v15507_v19 = vld [vmem:[#allocation25_spill] sm:$0xff] }
 0xb20   : > { %v6651_v13 = vadd.f32 %v6650_v35, %v6562_v4  ;;  %v6831_v51 = vpop.f32.mrf.mxu1  ;;  %v7268_v42 = vmax.f32 %v6827_v47, %v7012_v56 }
 0xb22   : > { %v6740_v18 = vadd.f32 %v6739_v37, %v6651_v13  ;;  %8035 = vmatmul.bf16.gmra.mxu2 %v15495_v32  ;;  %8213 = vmatmul.bf16.gmra.mxu0 %v15496_v39  ;;  %v15502_v37 = vld [vmem:[#allocation103_spill] sm:$0xff] }
 0xb23   : > { %8124 = vmatmul.bf16.gmra.mxu3 %v15497_v7  ;;  %8302 = vmatmul.bf16.gmra.mxu1 %v15498_v50 }
 0xb24   : > { %v6829_v15 = vadd.f32 %v6828_v24, %v6740_v18 }
 0xb25   : > { %v6564_v52 = vpop.f32.mrf.mxu2 }
 0xb26   : > { %v7020_v29 = vmul.f32 0.2, %v6829_v15  ;;  %v6565_v10 = vadd.f32 %v6564_v52, %v14207_v16  ;;  %v6653_v28 = vpop.f32.mrf.mxu3 }
 0xb27   : > { %v6744_v41 = vpop.f32.mrf.mxu0 }
 0xb28   : > { %v6654_v59 = vadd.f32 %v6653_v28, %v6565_v10  ;;  %v6833_v23 = vpop.f32.mrf.mxu1  ;;  %v7276_v40 = vmax.f32 %v6829_v15, %v7020_v29  ;;  %v15503_v28 = vld [vmem:[#allocation26_spill] sm:$0xff] }
 0xb2a   : > { %v6743_v33 = vadd.f32 %v6742_v63, %v6654_v59  ;;  %v14292_v25 = vpack.c.bf16 %v7276_v40, %v7268_v42 }
 0xb2c   : > { %v6832_v1 = vadd.f32 %v6831_v51, %v6743_v33 }
 0xb2d   : > { %v6566_v55 = vpop.f32.mrf.mxu2 }
 0xb2e   : > { %v6567_v48 = vadd.f32 %v6566_v55, %v14207_v16  ;;  %v6655_v31 = vpop.f32.mrf.mxu3  ;;  %v7028_v22 = vmul.f32 0.2, %v6832_v1  ;;  %v11670_v55 = vld [vmem:[#allocation14 + $0x120] sm:$0xff] }
 0xb2f   : > { %v6747_v49 = vpop.f32.mrf.mxu0  ;;  %8376 = vmatpush.bf16.msra.mxu2 %v11670_v55 }
 0xb30   : > { %v6656_v61 = vadd.f32 %v6655_v31, %v6567_v48  ;;  %v6836_v27 = vpop.f32.mrf.mxu1  ;;  %v7284_v13 = vmax.f32 %v6832_v1, %v7028_v22  ;;  %v11678_v48 = vld [vmem:[#allocation14 + $0x160] sm:$0xff] }
 0xb31   : > { %8465 = vmatpush.bf16.msra.mxu3 %v11678_v48  ;;  %v15511_v48 = vld [vmem:[#allocation30_spill] sm:$0xff] }
 0xb32   : > { %v6745_v54 = vadd.f32 %v6744_v41, %v6656_v61  ;;  %8040 = vmatmul.bf16.gmra.mxu2 %v15499_v21  ;;  %8218 = vmatmul.bf16.gmra.mxu0 %v15500_v44  ;;  %v15506_v41 = vld [vmem:[#allocation104_spill] sm:$0xff] }
 0xb33   : > { %8129 = vmatmul.bf16.gmra.mxu3 %v15501_v2  ;;  %8307 = vmatmul.bf16.gmra.mxu1 %v15502_v37 }
 0xb34   : > { %v6834_v24 = vadd.f32 %v6833_v23, %v6745_v54 }
 0xb35   : > { %v6569_v46 = vpop.f32.mrf.mxu2 }
 0xb36   : > { %v7036_v0 = vmul.f32 0.2, %v6834_v24  ;;  %v6570_v60 = vadd.f32 %v6569_v46, %v14207_v16  ;;  %v6658_v47 = vpop.f32.mrf.mxu3 }
 0xb37   : > { %v6749_v4 = vpop.f32.mrf.mxu0 }
 0xb38   : > { %v6659_v35 = vadd.f32 %v6658_v47, %v6570_v60  ;;  %v6838_v63 = vpop.f32.mrf.mxu1  ;;  %v7292_v51 = vmax.f32 %v6834_v24, %v7036_v0  ;;  %v11686_v24 = vld [vmem:[#allocation14 + $0x1a0] sm:$0xff] }
 0xb39   : > { %8554 = vmatpush.bf16.msra.mxu0 %v11686_v24  ;;  %v11677_v24 = vld [vmem:[#allocation14 + $0x158] sm:$0xff] }
 0xb3a   : > { %v6748_v18 = vadd.f32 %v6747_v49, %v6659_v35  ;;  %v14300_v32 = vpack.c.bf16 %v7292_v51, %v7284_v13  ;;  %v15509_v35 = vld [vmem:[#allocation73_spill] sm:$0xff]  ;;  %8466 = vmatpush.bf16.msra.mxu3 %v11677_v24 }
 0xb3c   : > { %v6837_v39 = vadd.f32 %v6836_v27, %v6748_v18 }
 0xb3d   : > { %v6571_v7 = vpop.f32.mrf.mxu2 }
 0xb3e   : > { %v6572_v50 = vadd.f32 %v6571_v7, %v14207_v16  ;;  %v6660_v56 = vpop.f32.mrf.mxu3  ;;  %v7044_v59 = vmul.f32 0.2, %v6837_v39 }
 0xb3f   : > { %v6752_v15 = vpop.f32.mrf.mxu0 }
 0xb40   : > { %v6661_v52 = vadd.f32 %v6660_v56, %v6572_v50  ;;  %v6841_v29 = vpop.f32.mrf.mxu1  ;;  %v7300_v61 = vmax.f32 %v6837_v39, %v7044_v59  ;;  %v11694_v56 = vld [vmem:[#allocation14 + $0x1e0] sm:$0xff] }
 0xb41   : > { %8643 = vmatpush.bf16.msra.mxu1 %v11694_v56 }
 0xb42   : > { %v6750_v10 = vadd.f32 %v6749_v4, %v6661_v52  ;;  %8045 = vmatmul.bf16.gmra.mxu2 %v15503_v28  ;;  %8223 = vmatmul.bf16.gmra.mxu0 %v15504_v34  ;;  %v15508_v4 = vld [vmem:[#allocation89_spill] sm:$0xff] }
 0xb43   : > { %8134 = vmatmul.bf16.gmra.mxu3 %v15505_v14  ;;  %8312 = vmatmul.bf16.gmra.mxu1 %v15506_v41 }
 0xb44   : > { %v6839_v23 = vadd.f32 %v6838_v63, %v6750_v10  ;;  %v15510_v63 = vld [vmem:[#allocation105_spill] sm:$0xff] }
 0xb45   : > { %v6574_v42 = vpop.f32.mrf.mxu2 }
 0xb46   : > { %v7052_v40 = vmul.f32 0.2, %v6839_v23  ;;  %v6575_v33 = vadd.f32 %v6574_v42, %v14207_v16  ;;  %v6663_v1 = vpop.f32.mrf.mxu3 }
 0xb47   : > { %v6754_v31 = vpop.f32.mrf.mxu0 }
 0xb48   : > { %v6664_v30 = vadd.f32 %v6663_v1, %v6575_v33  ;;  %v6843_v49 = vpop.f32.mrf.mxu1  ;;  %v7308_v27 = vmax.f32 %v6839_v23, %v7052_v40 }
 0xb4a   : > { %v6753_v54 = vadd.f32 %v6752_v15, %v6664_v30  ;;  %v14308_v21 = vpack.c.bf16 %v7308_v27, %v7300_v61  ;;  %v15513_v30 = vld [vmem:[#allocation74_spill] sm:$0xff] }
 0xb4c   : > { %v6842_v44 = vadd.f32 %v6841_v29, %v6753_v54 }
 0xb4d   : > { %v6576_v2 = vpop.f32.mrf.mxu2 }
 0xb4e   : > { %v6577_v37 = vadd.f32 %v6576_v2, %v14207_v16  ;;  %v6665_v22 = vpop.f32.mrf.mxu3  ;;  %v7060_v13 = vmul.f32 0.2, %v6842_v44 }
 0xb4f   : > { %v6757_v46 = vpop.f32.mrf.mxu0 }
 0xb50   : > { %v6666_v0 = vadd.f32 %v6665_v22, %v6577_v37  ;;  %v6846_v60 = vpop.f32.mrf.mxu1  ;;  %v7316_v10 = vmax.f32 %v6842_v44, %v7060_v13  ;;  %v11669_v22 = vld [vmem:[#allocation14 + $0x118] sm:$0xff] }
 0xb51   : > { %8377 = vmatpush.bf16.msra.mxu2 %v11669_v22 }
 0xb52   : > { %v6755_v47 = vadd.f32 %v6754_v31, %v6666_v0  ;;  %8050 = vmatmul.bf16.gmra.mxu2 %v15507_v19  ;;  %8228 = vmatmul.bf16.gmra.mxu0 %v15508_v4  ;;  %v15512_v31 = vld [vmem:[#allocation90_spill] sm:$0xff] }
 0xb53   : > { %8139 = vmatmul.bf16.gmra.mxu3 %v15509_v35  ;;  %8317 = vmatmul.bf16.gmra.mxu1 %v15510_v63  ;;  %v11685_v35 = vld [vmem:[#allocation14 + $0x198] sm:$0xff] }
 0xb54   : > { %v6844_v51 = vadd.f32 %v6843_v49, %v6755_v47  ;;  %v15514_v49 = vld [vmem:[#allocation106_spill] sm:$0xff]  ;;  %8555 = vmatpush.bf16.msra.mxu0 %v11685_v35  ;;  %v11668_v35 = vld [vmem:[#allocation14 + $0x110] sm:$0xff] }
 0xb55   : > { %v6579_v18 = vpop.f32.mrf.mxu2  ;;  %8378 = vmatpush.bf16.msra.mxu2 %v11668_v35 }
 0xb56   : > { %v7068_v39 = vmul.f32 0.2, %v6844_v51  ;;  %v6580_v7 = vadd.f32 %v6579_v18, %v14207_v16  ;;  %v6668_v50 = vpop.f32.mrf.mxu3 }
 0xb57   : > { %v6759_v15 = vpop.f32.mrf.mxu0 }
 0xb58   : > { %v6669_v52 = vadd.f32 %v6668_v50, %v6580_v7  ;;  %v6848_v29 = vpop.f32.mrf.mxu1  ;;  %v7324_v28 = vmax.f32 %v6844_v51, %v7068_v39 }
 0xb5a   : > { %v6758_v34 = vadd.f32 %v6757_v46, %v6669_v52  ;;  %v14316_v14 = vpack.c.bf16 %v7324_v28, %v7316_v10  ;;  %v15515_v52 = vld [vmem:[#allocation29_spill] sm:$0xff]  ;;  %v11693_v10 = vld [vmem:[#allocation14 + $0x1d8] sm:$0xff]  ;;  %v15517_v28 = vld [vmem:[#allocation75_spill] sm:$0xff] }
 0xb5b   : > { %8644 = vmatpush.bf16.msra.mxu1 %v11693_v10 }
 0xb5c   : > { %v6847_v41 = vadd.f32 %v6846_v60, %v6758_v34  ;;  %v15518_v34 = vld [vmem:[#allocation107_spill] sm:$0xff] }
 0xb5d   : > { %v6581_v59 = vpop.f32.mrf.mxu2 }
 0xb5e   : > { %v6582_v23 = vadd.f32 %v6581_v59, %v14207_v16  ;;  %v6670_v42 = vpop.f32.mrf.mxu3  ;;  %v7076_v61 = vmul.f32 0.2, %v6847_v41 }
 0xb5f   : > { %v6762_v40 = vpop.f32.mrf.mxu0 }
 0xb60   : > { %v6671_v33 = vadd.f32 %v6670_v42, %v6582_v23  ;;  %v6851_v1 = vpop.f32.mrf.mxu1  ;;  %v7332_v47 = vmax.f32 %v6847_v41, %v7076_v61 }
 0xb62   : > { %v6760_v55 = vadd.f32 %v6759_v15, %v6671_v33  ;;  %8055 = vmatmul.bf16.gmra.mxu2 %v15511_v48  ;;  %8233 = vmatmul.bf16.gmra.mxu0 %v15512_v31 }
 0xb63   : > { %8144 = vmatmul.bf16.gmra.mxu3 %v15513_v30  ;;  %8322 = vmatmul.bf16.gmra.mxu1 %v15514_v49 }
 0xb64   : > { %v6849_v27 = vadd.f32 %v6848_v29, %v6760_v55  ;;  %v15516_v29 = vld [vmem:[#allocation91_spill] sm:$0xff] }
 0xb65   : > { %v6584_v54 = vpop.f32.mrf.mxu2 }
 0xb66   : > { %v7084_v44 = vmul.f32 0.2, %v6849_v27  ;;  %v6585_v2 = vadd.f32 %v6584_v54, %v14207_v16  ;;  %v6673_v37 = vpop.f32.mrf.mxu3 }
 0xb67   : > { %v6764_v46 = vpop.f32.mrf.mxu0 }
 0xb68   : > { %v6674_v0 = vadd.f32 %v6673_v37, %v6585_v2  ;;  %v6853_v60 = vpop.f32.mrf.mxu1  ;;  %v7340_v19 = vmax.f32 %v6849_v27, %v7084_v44 }
 0xb6a   : > { %v6763_v4 = vadd.f32 %v6762_v40, %v6674_v0  ;;  %v14324_v63 = vpack.c.bf16 %v7340_v19, %v7332_v47  ;;  %v15519_v0 = vld [vmem:[#allocation33_spill] sm:$0xff]  ;;  %v15521_v19 = vld [vmem:[#allocation76_spill] sm:$0xff] }
 0xb6b   : > { %v14340_v47 = vld [vmem:[%s14995_s8] ss:$0 sm:$0xff] }
 0xb6c   : > { %v6852_v13 = vadd.f32 %v6851_v1, %v6763_v4  ;;  %v15522_v4 = vld [vmem:[#allocation108_spill] sm:$0xff] }
 0xb6d   : > { %v6586_v51 = vpop.f32.mrf.mxu2 }
 0xb6e   : > { %v6587_v18 = vadd.f32 %v6586_v51, %v14207_v16  ;;  %v6675_v39 = vpop.f32.mrf.mxu3  ;;  %v7092_v41 = vmul.f32 0.2, %v6852_v13 }
 0xb6f   : > { %v6767_v7 = vpop.f32.mrf.mxu0 }
 0xb70   : > { %v6676_v50 = vadd.f32 %v6675_v39, %v6587_v18  ;;  %v6856_v56 = vpop.f32.mrf.mxu1  ;;  %v7348_v31 = vmax.f32 %v6852_v13, %v7092_v41 }
 0xb72   : > { %v6765_v15 = vadd.f32 %v6764_v46, %v6676_v50  ;;  %8060 = vmatmul.bf16.gmra.mxu2 %v15515_v52  ;;  %8238 = vmatmul.bf16.gmra.mxu0 %v15516_v29 }
 0xb73   : > { %8149 = vmatmul.bf16.gmra.mxu3 %v15517_v28  ;;  %8327 = vmatmul.bf16.gmra.mxu1 %v15518_v34  ;;  %v11684_v34 = vld [vmem:[#allocation14 + $0x190] sm:$0xff] }
 0xb74   : > { %v6854_v59 = vadd.f32 %v6853_v60, %v6765_v15  ;;  %v15520_v60 = vld [vmem:[#allocation92_spill] sm:$0xff]  ;;  %8556 = vmatpush.bf16.msra.mxu0 %v11684_v34 }
 0xb75   : > { %v6589_v23 = vpop.f32.mrf.mxu2 }
 0xb76   : > { %v7100_v42 = vmul.f32 0.2, %v6854_v59  ;;  %v6590_v40 = vadd.f32 %v6589_v23, %v14207_v16  ;;  %v6678_v33 = vpop.f32.mrf.mxu3 }
 0xb77   : > { %v6769_v1 = vpop.f32.mrf.mxu0 }
 0xb78   : > { %v6679_v55 = vadd.f32 %v6678_v33, %v6590_v40  ;;  %v6858_v48 = vpop.f32.mrf.mxu1  ;;  %v7356_v30 = vmax.f32 %v6854_v59, %v7100_v42 }
 0xb7a   : > { %v6768_v49 = vadd.f32 %v6767_v7, %v6679_v55  ;;  %v14332_v61 = vpack.c.bf16 %v7356_v30, %v7348_v31  ;;  %v15523_v31 = vld [vmem:[#allocation66_spill] sm:$0xff]  ;;  %v15524_v30 = vld [vmem:[#allocation93_spill] sm:$0xff] }
 0xb7c   : > { %v6857_v27 = vadd.f32 %v6856_v56, %v6768_v49  ;;  %v11692_v49 = vld [vmem:[#allocation14 + $0x1d0] sm:$0xff] }
 0xb7d   : > { %v6591_v54 = vpop.f32.mrf.mxu2  ;;  %8645 = vmatpush.bf16.msra.mxu1 %v11692_v49 }
 0xb7e   : > { %v6592_v44 = vadd.f32 %v6591_v54, %v14207_v16  ;;  %v6680_v2 = vpop.f32.mrf.mxu3  ;;  %v11676_v16 = vld [vmem:[#allocation14 + $0x150] sm:$0xff]  ;;  %v7108_v13 = vmul.f32 0.2, %v6857_v27 }
 0xb7f   : > { %v8204_v37 = vpop.f32.mrf.mxu0  ;;  %8467 = vmatpush.bf16.msra.mxu3 %v11676_v16  ;;  %v15526_v54 = vld [vmem:[#allocation109_spill] sm:$0xff] }
 0xb80   : > { %v6681_v22 = vadd.f32 %v6680_v2, %v6592_v44  ;;  %v8293_v24 = vpop.f32.mrf.mxu1  ;;  %v7364_v29 = vmax.f32 %v6857_v27, %v7108_v13  ;;  %v15525_v27 = vld [vmem:[#allocation77_spill] sm:$0xff] }
 0xb82   : > { %v6770_v46 = vadd.f32 %v6769_v1, %v6681_v22  ;;  %8065 = vmatmul.bf16.gmra.mxu2 %v15519_v0  ;;  %8243 = vmatmul.bf16.gmra.mxu0 %v15520_v60 }
 0xb83   : > { %8154 = vmatmul.bf16.gmra.mxu3 %v15521_v19  ;;  %8332 = vmatmul.bf16.gmra.mxu1 %v15522_v4 }
 0xb84   : > { %v6859_v51 = vadd.f32 %v6858_v48, %v6770_v46 }
 0xb85   : > { %v8026_v18 = vpop.f32.mrf.mxu2 }
 0xb86   : > { %v7116_v39 = vmul.f32 0.2, %v6859_v51  ;;  %v8027_v7 = vadd.f32 %v14340_v47, %v8026_v18  ;;  %v8115_v50 = vpop.f32.mrf.mxu3 }
 0xb87   : > { %v8206_v56 = vpop.f32.mrf.mxu0 }
 0xb88   : > { %v8116_v15 = vadd.f32 %v8115_v50, %v8027_v7  ;;  %v8295_v52 = vpop.f32.mrf.mxu1  ;;  %v7372_v10 = vmax.f32 %v6859_v51, %v7116_v39  ;;  %v15527_v7 = vld [vmem:[#allocation48_spill] sm:$0xff]  ;;  %v15528_v50 = vld [vmem:[#allocation94_spill] sm:$0xff] }
 0xb8a   : > { %v8205_v28 = vadd.f32 %v8204_v37, %v8116_v15  ;;  %v14345_v41 = vpack.c.bf16 %v7372_v10, %v7364_v29  ;;  %v15530_v15 = vld [vmem:[#allocation110_spill] sm:$0xff]  ;;  %v11675_v29 = vld [vmem:[#allocation14 + $0x148] sm:$0xff] }
 0xb8b   : > { %8468 = vmatpush.bf16.msra.mxu3 %v11675_v29 }
 0xb8c   : > { %v14347_v59 = vadd.f32 %v8293_v24, %v8205_v28 }
 0xb8d   : > { %v8028_v23 = vpop.f32.mrf.mxu2 }
 0xb8e   : > { %v8029_v42 = vadd.f32 %v14340_v47, %v8028_v23  ;;  %v8117_v40 = vpop.f32.mrf.mxu3 }
 0xb8f   : > { %v8209_v33 = vpop.f32.mrf.mxu0 }
 0xb90   : > { %v8118_v1 = vadd.f32 %v8117_v40, %v8029_v42  ;;  %v8298_v55 = vpop.f32.mrf.mxu1 }
 0xb92   : > { %v8207_v48 = vadd.f32 %v8206_v56, %v8118_v1  ;;  %8070 = vmatmul.bf16.gmra.mxu2 %v15523_v31  ;;  %8248 = vmatmul.bf16.gmra.mxu0 %v15524_v30  ;;  %v15529_v56 = vld [vmem:[#allocation78_spill] sm:$0xff] }
 0xb93   : > { %8159 = vmatmul.bf16.gmra.mxu3 %v15525_v27  ;;  %8337 = vmatmul.bf16.gmra.mxu1 %v15526_v54 }
 0xb94   : > { %v14354_v44 = vadd.f32 %v8295_v52, %v8207_v48  ;;  %v11667_v52 = vld [vmem:[#allocation14 + $0x108] sm:$0xff] }
 0xb95   : > { %v8031_v2 = vpop.f32.mrf.mxu2  ;;  %8379 = vmatpush.bf16.msra.mxu2 %v11667_v52 }
 0xb96   : > { %v8032_v37 = vadd.f32 %v14340_v47, %v8031_v2  ;;  %v8120_v22 = vpop.f32.mrf.mxu3 }
 0xb97   : > { %v8211_v24 = vpop.f32.mrf.mxu0 }
 0xb98   : > { %v8121_v46 = vadd.f32 %v8120_v22, %v8032_v37  ;;  %v8300_v0 = vpop.f32.mrf.mxu1  ;;  %v15531_v22 = vld [vmem:[#allocation67_spill] sm:$0xff] }
 0xb9a   : > { %v8210_v60 = vadd.f32 %v8209_v33, %v8121_v46  ;;  %v11691_v46 = vld [vmem:[#allocation14 + $0x1c8] sm:$0xff] }
 0xb9b   : > { %8646 = vmatpush.bf16.msra.mxu1 %v11691_v46  ;;  %v11682_v46 = vld [vmem:[#allocation14 + $0x180] sm:$0xff] }
 0xb9c   : > { %v14357_v19 = vadd.f32 %v8298_v55, %v8210_v60  ;;  %v11683_v55 = vld [vmem:[#allocation14 + $0x188] sm:$0xff]  ;;  %v15534_v60 = vld [vmem:[#allocation111_spill] sm:$0xff] }
 0xb9d   : > { %v8033_v4 = vpop.f32.mrf.mxu2  ;;  %8557 = vmatpush.bf16.msra.mxu0 %v11683_v55  ;;  %v11666_v55 = vld [vmem:[#allocation14 + $0x100] sm:$0xff] }
 0xb9e   : > { %v8034_v35 = vadd.f32 %v14340_v47, %v8033_v4  ;;  %v8122_v16 = vpop.f32.mrf.mxu3  ;;  %8380 = vmatpush.bf16.msra.mxu2 %v11666_v55 }
 0xb9f   : > { %v8214_v13 = vpop.f32.mrf.mxu0 }
 0xba0   : > { %v8123_v51 = vadd.f32 %v8122_v16, %v8034_v35  ;;  %v8303_v18 = vpop.f32.mrf.mxu1 }
 0xba1   : > { %8558 = vmatpush.bf16.msra.mxu0 %v11682_v46 }
 0xba2   : > { %v8212_v39 = vadd.f32 %v8211_v24, %v8123_v51  ;;  %8075 = vmatmul.bf16.gmra.mxu2 %v15527_v7  ;;  %8253 = vmatmul.bf16.gmra.mxu0 %v15528_v50  ;;  %v15532_v24 = vld [vmem:[#allocation95_spill] sm:$0xff] }
 0xba3   : > { %8164 = vmatmul.bf16.gmra.mxu3 %v15529_v56  ;;  %8342 = vmatmul.bf16.gmra.mxu1 %v15530_v15 }
 0xba4   : > { %v14364_v10 = vadd.f32 %v8300_v0, %v8212_v39  ;;  %v15533_v0 = vld [vmem:[#allocation79_spill] sm:$0xff] }
 0xba5   : > { %v8036_v28 = vpop.f32.mrf.mxu2 }
 0xba6   : > { %v8037_v34 = vadd.f32 %v14340_v47, %v8036_v28  ;;  %v8125_v23 = vpop.f32.mrf.mxu3 }
 0xba7   : > { %v8216_v42 = vpop.f32.mrf.mxu0 }
 0xba8   : > { %v8126_v40 = vadd.f32 %v8125_v23, %v8037_v34  ;;  %v8305_v33 = vpop.f32.mrf.mxu1 }
 0xbaa   : > { %v8215_v1 = vadd.f32 %v8214_v13, %v8126_v40  ;;  %v15536_v40 = vld [vmem:[#allocation96_spill] sm:$0xff] }
 0xbac   : > { %v14367_v48 = vadd.f32 %v8303_v18, %v8215_v1  ;;  %v15538_v1 = vld [vmem:[#allocation112_spill] sm:$0xff] }
 0xbad   : > { %v8038_v31 = vpop.f32.mrf.mxu2 }
 0xbae   : > { %v8039_v30 = vadd.f32 %v14340_v47, %v8038_v31  ;;  %v8127_v49 = vpop.f32.mrf.mxu3  ;;  %v11674_v31 = vld [vmem:[#allocation14 + $0x140] sm:$0xff] }
 0xbaf   : > { %v8219_v27 = vpop.f32.mrf.mxu0  ;;  %8469 = vmatpush.bf16.msra.mxu3 %v11674_v31 }
 0xbb0   : > { %v8128_v54 = vadd.f32 %v8127_v49, %v8039_v30  ;;  %v8308_v2 = vpop.f32.mrf.mxu1 }
 0xbb2   : > { %v8217_v37 = vadd.f32 %v8216_v42, %v8128_v54  ;;  %8080 = vmatmul.bf16.gmra.mxu2 %v15531_v22  ;;  %8258 = vmatmul.bf16.gmra.mxu0 %v15532_v24  ;;  %v15535_v42 = vld [vmem:[#allocation51_spill] sm:$0xff] }
 0xbb3   : > { %8169 = vmatmul.bf16.gmra.mxu3 %v15533_v0  ;;  %8347 = vmatmul.bf16.gmra.mxu1 %v15534_v60 }
 0xbb4   : > { %v14374_v4 = vadd.f32 %v8305_v33, %v8217_v37  ;;  %v15537_v33 = vld [vmem:[#allocation80_spill] sm:$0xff] }
 0xbb5   : > { %v8041_v35 = vpop.f32.mrf.mxu2 }
 0xbb6   : > { %v8042_v16 = vadd.f32 %v14340_v47, %v8041_v35  ;;  %v8130_v13 = vpop.f32.mrf.mxu3 }
 0xbb7   : > { %v8221_v51 = vpop.f32.mrf.mxu0 }
 0xbb8   : > { %v8131_v18 = vadd.f32 %v8130_v13, %v8042_v16  ;;  %v8310_v39 = vpop.f32.mrf.mxu1 }
 0xbba   : > { %v8220_v7 = vadd.f32 %v8219_v27, %v8131_v18 }
 0xbbc   : > { %v14377_v50 = vadd.f32 %v8308_v2, %v8220_v7  ;;  %v15539_v7 = vld [vmem:[#allocation68_spill] sm:$0xff] }
 0xbbd   : > { %v8043_v56 = vpop.f32.mrf.mxu2 }
 0xbbe   : > { %v8044_v15 = vadd.f32 %v14340_v47, %v8043_v56  ;;  %v8132_v52 = vpop.f32.mrf.mxu3  ;;  %v15540_v56 = vld [vmem:[#allocation97_spill] sm:$0xff] }
 0xbbf   : > { %v8224_v29 = vpop.f32.mrf.mxu0 }
 0xbc0   : > { %v8133_v28 = vadd.f32 %v8132_v52, %v8044_v15  ;;  %v8313_v34 = vpop.f32.mrf.mxu1  ;;  %v11690_v15 = vld [vmem:[#allocation14 + $0x1c0] sm:$0xff]  ;;  %v15541_v52 = vld [vmem:[#allocation81_spill] sm:$0xff] }
 0xbc1   : > { %8647 = vmatpush.bf16.msra.mxu1 %v11690_v15 }
 0xbc2   : > { %v8222_v23 = vadd.f32 %v8221_v51, %v8133_v28  ;;  %8085 = vmatmul.bf16.gmra.mxu2 %v15535_v42  ;;  %8263 = vmatmul.bf16.gmra.mxu0 %v15536_v40 }
 0xbc3   : > { %8174 = vmatmul.bf16.gmra.mxu3 %v15537_v33  ;;  %8352 = vmatmul.bf16.gmra.mxu1 %v15538_v1 }
 0xbc4   : > { %v14384_v30 = vadd.f32 %v8310_v39, %v8222_v23 }
 0xbc5   : > { %v8046_v49 = vpop.f32.mrf.mxu2 }
 0xbc6   : > { %v8047_v27 = vadd.f32 %v14340_v47, %v8046_v49  ;;  %v8135_v54 = vpop.f32.mrf.mxu3 }
 0xbc7   : > { %v8226_v2 = vpop.f32.mrf.mxu0 }
 0xbc8   : > { %v8136_v37 = vadd.f32 %v8135_v54, %v8047_v27  ;;  %v8315_v22 = vpop.f32.mrf.mxu1 }
 0xbca   : > { %v8225_v24 = vadd.f32 %v8224_v29, %v8136_v37  ;;  %v15542_v29 = vld [vmem:[#allocation113_spill] sm:$0xff] }
 0xbcc   : > { %v14387_v0 = vadd.f32 %v8313_v34, %v8225_v24 }
 0xbcd   : > { %v8048_v60 = vpop.f32.mrf.mxu2 }
 0xbce   : > { %v8049_v35 = vadd.f32 %v14340_v47, %v8048_v60  ;;  %v8137_v16 = vpop.f32.mrf.mxu3  ;;  %v15544_v60 = vld [vmem:[#allocation98_spill] sm:$0xff] }
 0xbcf   : > { %v8229_v13 = vpop.f32.mrf.mxu0 }
 0xbd0   : > { %v8138_v51 = vadd.f32 %v8137_v16, %v8049_v35  ;;  %v8318_v18 = vpop.f32.mrf.mxu1  ;;  %v15545_v35 = vld [vmem:[#allocation82_spill] sm:$0xff] }
 0xbd1   : > { %v15546_v16 = vld [vmem:[#allocation114_spill] sm:$0xff] }
 0xbd2   : > { %v8227_v39 = vadd.f32 %v8226_v2, %v8138_v51  ;;  %8090 = vmatmul.bf16.gmra.mxu2 %v15539_v7  ;;  %8268 = vmatmul.bf16.gmra.mxu0 %v15540_v56 }
 0xbd3   : > { %8179 = vmatmul.bf16.gmra.mxu3 %v15541_v52  ;;  %8357 = vmatmul.bf16.gmra.mxu1 %v15542_v29 }
 0xbd4   : > { %v14394_v28 = vadd.f32 %v8315_v22, %v8227_v39  ;;  %v15543_v22 = vld [vmem:[#allocation69_spill] sm:$0xff] }
 0xbd5   : > { %v8051_v34 = vpop.f32.mrf.mxu2 }
 0xbd6   : > { %v8052_v23 = vadd.f32 %v14340_v47, %v8051_v34  ;;  %v8140_v42 = vpop.f32.mrf.mxu3 }
 0xbd7   : > { %v8231_v40 = vpop.f32.mrf.mxu0 }
 0xbd8   : > { %v8141_v33 = vadd.f32 %v8140_v42, %v8052_v23  ;;  %v8320_v1 = vpop.f32.mrf.mxu1 }
 0xbda   : > { %v8230_v55 = vadd.f32 %v8229_v13, %v8141_v33 }
 0xbdc   : > { %v14397_v31 = vadd.f32 %v8318_v18, %v8230_v55 }
 0xbdd   : > { %v8053_v49 = vpop.f32.mrf.mxu2 }
 0xbde   : > { %v8054_v27 = vadd.f32 %v14340_v47, %v8053_v49  ;;  %v8142_v54 = vpop.f32.mrf.mxu3 }
 0xbdf   : > { %v8234_v2 = vpop.f32.mrf.mxu0 }
 0xbe0   : > { %v8143_v37 = vadd.f32 %v8142_v54, %v8054_v27  ;;  %v8323_v24 = vpop.f32.mrf.mxu1  ;;  %v15548_v27 = vld [vmem:[#allocation99_spill] sm:$0xff] }
 0xbe1   : > { %v15549_v54 = vld [vmem:[#allocation83_spill] sm:$0xff] }
 0xbe2   : > { %v8232_v46 = vadd.f32 %v8231_v40, %v8143_v37  ;;  %8095 = vmatmul.bf16.gmra.mxu2 %v15543_v22  ;;  %8273 = vmatmul.bf16.gmra.mxu0 %v15544_v60  ;;  %v15550_v37 = vld [vmem:[#allocation115_spill] sm:$0xff] }
 0xbe3   : > { %8184 = vmatmul.bf16.gmra.mxu3 %v15545_v35  ;;  %8362 = vmatmul.bf16.gmra.mxu1 %v15546_v16 }
 0xbe4   : > { %v14404_v51 = vadd.f32 %v8320_v1, %v8232_v46  ;;  %v15547_v1 = vld [vmem:[#allocation70_spill] sm:$0xff] }
 0xbe5   : > { %v8056_v13 = vpop.f32.mrf.mxu2 }
 0xbe6   : > { %v8057_v18 = vadd.f32 %v14340_v47, %v8056_v13  ;;  %v8145_v39 = vpop.f32.mrf.mxu3 }
 0xbe7   : > { %v8236_v7 = vpop.f32.mrf.mxu0 }
 0xbe8   : > { %v8146_v56 = vadd.f32 %v8145_v39, %v8057_v18  ;;  %v8325_v15 = vpop.f32.mrf.mxu1 }
 0xbea   : > { %v8235_v52 = vadd.f32 %v8234_v2, %v8146_v56 }
 0xbec   : > { %v14407_v29 = vadd.f32 %v8323_v24, %v8235_v52 }
 0xbed   : > { %v8058_v34 = vpop.f32.mrf.mxu2 }
 0xbee   : > { %v8059_v23 = vadd.f32 %v14340_v47, %v8058_v34  ;;  %v8147_v42 = vpop.f32.mrf.mxu3 }
 0xbef   : > { %v8239_v40 = vpop.f32.mrf.mxu0 }
 0xbf0   : > { %v8148_v33 = vadd.f32 %v8147_v42, %v8059_v23  ;;  %v8328_v55 = vpop.f32.mrf.mxu1 }
 0xbf2   : > { %v8237_v49 = vadd.f32 %v8236_v7, %v8148_v33  ;;  %8100 = vmatmul.bf16.gmra.mxu2 %v15547_v1  ;;  %8278 = vmatmul.bf16.gmra.mxu0 %v15548_v27  ;;  %v15552_v33 = vld [vmem:[#allocation149_spill] sm:$0xff] }
 0xbf3   : > { %8189 = vmatmul.bf16.gmra.mxu3 %v15549_v54  ;;  %8367 = vmatmul.bf16.gmra.mxu1 %v15550_v37 }
 0xbf4   : > { %v14414_v46 = vadd.f32 %v8325_v15, %v8237_v49  ;;  %v15551_v15 = vld [vmem:[#allocation116_spill] sm:$0xff] }
 0xbf5   : > { %v8061_v2 = vpop.f32.mrf.mxu2  ;;  %v15553_v49 = vld [vmem:[#allocation132_spill] sm:$0xff] }
 0xbf6   : > { %v8062_v24 = vadd.f32 %v14340_v47, %v8061_v2  ;;  %v8150_v22 = vpop.f32.mrf.mxu3 }
 0xbf7   : > { %v8241_v60 = vpop.f32.mrf.mxu0 }
 0xbf8   : > { %v8151_v35 = vadd.f32 %v8150_v22, %v8062_v24  ;;  %v8330_v16 = vpop.f32.mrf.mxu1 }
 0xbfa   : > { %v8240_v13 = vadd.f32 %v8239_v40, %v8151_v35 }
 0xbfc   : > { %v14417_v18 = vadd.f32 %v8328_v55, %v8240_v13 }
 0xbfd   : > { %v8063_v39 = vpop.f32.mrf.mxu2 }
 0xbfe   : > { %v8064_v7 = vadd.f32 %v14340_v47, %v8063_v39  ;;  %v8152_v56 = vpop.f32.mrf.mxu3 }
 0xbff   : > { %v8244_v52 = vpop.f32.mrf.mxu0 }
 0xc00   : > { %v8153_v34 = vadd.f32 %v8152_v56, %v8064_v7  ;;  %v8333_v23 = vpop.f32.mrf.mxu1 }
 0xc02   : > { %v8242_v42 = vadd.f32 %v8241_v60, %v8153_v34  ;;  %8381 = vmatmul.bf16.vlgmr.msra.gmra.mxu2 %v15551_v15  ;;  %8559 = vmatmul.bf16.vlgmr.msra.gmra.mxu0 %v15552_v33  ;;  %v15555_v34 = vld [vmem:[#allocation150_spill] sm:$0xff] }
 0xc03   : > { %8470 = vmatmul.bf16.vlgmr.msra.gmra.mxu3 %v15553_v49  ;;  %8648 = vmatmul.bf16.vlgmr.msra.gmra.mxu1 %v14220_v38 }
 0xc04   : > { %v14424_v1 = vadd.f32 %v8330_v16, %v8242_v42  ;;  %v15554_v16 = vld [vmem:[#allocation117_spill] sm:$0xff] }
 0xc05   : > { %v8066_v40 = vpop.f32.mrf.mxu2  ;;  %v15556_v42 = vld [vmem:[#allocation133_spill] sm:$0xff] }
 0xc06   : > { %v8067_v55 = vadd.f32 %v14340_v47, %v8066_v40  ;;  %v8155_v27 = vpop.f32.mrf.mxu3 }
 0xc07   : > { %v8246_v54 = vpop.f32.mrf.mxu0 }
 0xc08   : > { %v8156_v37 = vadd.f32 %v8155_v27, %v8067_v55  ;;  %v8335_v2 = vpop.f32.mrf.mxu1 }
 0xc0a   : > { %v8245_v24 = vadd.f32 %v8244_v52, %v8156_v37 }
 0xc0c   : > { %v14427_v22 = vadd.f32 %v8333_v23, %v8245_v24 }
 0xc0d   : > { %v8068_v60 = vpop.f32.mrf.mxu2 }
 0xc0e   : > { %v8069_v35 = vadd.f32 %v14340_v47, %v8068_v60  ;;  %v8157_v13 = vpop.f32.mrf.mxu3 }
 0xc0f   : > { %v8249_v39 = vpop.f32.mrf.mxu0 }
 0xc10   : > { %v8158_v7 = vadd.f32 %v8157_v13, %v8069_v35  ;;  %v8338_v56 = vpop.f32.mrf.mxu1 }
 0xc12   : > { %v8247_v38 = vadd.f32 %v8246_v54, %v8158_v7  ;;  %8386 = vmatmul.bf16.gmra.mxu2 %v15554_v16  ;;  %8564 = vmatmul.bf16.gmra.mxu0 %v15555_v34  ;;  %v15559_v16 = vld [vmem:[#allocation134_spill] sm:$0xff] }
 0xc13   : > { %8475 = vmatmul.bf16.gmra.mxu3 %v15556_v42  ;;  %8653 = vmatmul.bf16.gmra.mxu1 %v14228_v9 }
 0xc14   : > { %v14434_v15 = vadd.f32 %v8335_v2, %v8247_v38  ;;  %v15557_v2 = vld [vmem:[#allocation118_spill] sm:$0xff]  ;;  %v15558_v38 = vld [vmem:[#allocation151_spill] sm:$0xff] }
 0xc15   : > { %v8071_v52 = vpop.f32.mrf.mxu2 }
 0xc16   : > { %v8072_v23 = vadd.f32 %v14340_v47, %v8071_v52  ;;  %v8160_v33 = vpop.f32.mrf.mxu3 }
 0xc17   : > { %v8251_v49 = vpop.f32.mrf.mxu0 }
 0xc18   : > { %v8161_v40 = vadd.f32 %v8160_v33, %v8072_v23  ;;  %v8340_v55 = vpop.f32.mrf.mxu1 }
 0xc1a   : > { %v8250_v27 = vadd.f32 %v8249_v39, %v8161_v40 }
 0xc1c   : > { %v14437_v37 = vadd.f32 %v8338_v56, %v8250_v27 }
 0xc1d   : > { %v8073_v54 = vpop.f32.mrf.mxu2 }
 0xc1e   : > { %v8074_v24 = vadd.f32 %v14340_v47, %v8073_v54  ;;  %v8162_v60 = vpop.f32.mrf.mxu3 }
 0xc1f   : > { %v8254_v35 = vpop.f32.mrf.mxu0 }
 0xc20   : > { %v8163_v13 = vadd.f32 %v8162_v60, %v8074_v24  ;;  %v8343_v7 = vpop.f32.mrf.mxu1 }
 0xc22   : > { %v8252_v9 = vadd.f32 %v8251_v49, %v8163_v13  ;;  %8391 = vmatmul.bf16.gmra.mxu2 %v15557_v2  ;;  %8569 = vmatmul.bf16.gmra.mxu0 %v15558_v38  ;;  %v15562_v38 = vld [vmem:[#allocation135_spill] sm:$0xff] }
 0xc23   : > { %8480 = vmatmul.bf16.gmra.mxu3 %v15559_v16  ;;  %8658 = vmatmul.bf16.gmra.mxu1 %v14236_v57 }
 0xc24   : > { %v14444_v34 = vadd.f32 %v8340_v55, %v8252_v9  ;;  %v15560_v55 = vld [vmem:[#allocation119_spill] sm:$0xff]  ;;  %v15561_v9 = vld [vmem:[#allocation152_spill] sm:$0xff] }
 0xc25   : > { %v8076_v39 = vpop.f32.mrf.mxu2 }
 0xc26   : > { %v8077_v56 = vadd.f32 %v14340_v47, %v8076_v39  ;;  %v8165_v42 = vpop.f32.mrf.mxu3 }
 0xc27   : > { %v8256_v52 = vpop.f32.mrf.mxu0 }
 0xc28   : > { %v8166_v23 = vadd.f32 %v8165_v42, %v8077_v56  ;;  %v8345_v33 = vpop.f32.mrf.mxu1 }
 0xc2a   : > { %v8255_v40 = vadd.f32 %v8254_v35, %v8166_v23 }
 0xc2c   : > { %v14447_v27 = vadd.f32 %v8343_v7, %v8255_v40 }
 0xc2d   : > { %v8078_v49 = vpop.f32.mrf.mxu2 }
 0xc2e   : > { %v8079_v54 = vadd.f32 %v14340_v47, %v8078_v49  ;;  %v8167_v24 = vpop.f32.mrf.mxu3 }
 0xc2f   : > { %v8259_v60 = vpop.f32.mrf.mxu0 }
 0xc30   : > { %v8168_v13 = vadd.f32 %v8167_v24, %v8079_v54  ;;  %v8348_v2 = vpop.f32.mrf.mxu1 }
 0xc32   : > { %v8257_v57 = vadd.f32 %v8256_v52, %v8168_v13  ;;  %8396 = vmatmul.bf16.gmra.mxu2 %v15560_v55  ;;  %8574 = vmatmul.bf16.gmra.mxu0 %v15561_v9 }
 0xc33   : > { %8485 = vmatmul.bf16.gmra.mxu3 %v15562_v38  ;;  %8663 = vmatmul.bf16.gmra.mxu1 %v14244_v17  ;;  %v15565_v38 = vld [vmem:[#allocation136_spill] sm:$0xff] }
 0xc34   : > { %v14454_v16 = vadd.f32 %v8345_v33, %v8257_v57  ;;  %v15563_v33 = vld [vmem:[#allocation120_spill] sm:$0xff]  ;;  %v15564_v57 = vld [vmem:[#allocation153_spill] sm:$0xff] }
 0xc35   : > { %v8081_v35 = vpop.f32.mrf.mxu2 }
 0xc36   : > { %v8082_v7 = vadd.f32 %v14340_v47, %v8081_v35  ;;  %v8170_v39 = vpop.f32.mrf.mxu3 }
 0xc37   : > { %v8261_v56 = vpop.f32.mrf.mxu0 }
 0xc38   : > { %v8171_v42 = vadd.f32 %v8170_v39, %v8082_v7  ;;  %v8350_v23 = vpop.f32.mrf.mxu1 }
 0xc3a   : > { %v8260_v40 = vadd.f32 %v8259_v60, %v8171_v42 }
 0xc3c   : > { %v14457_v49 = vadd.f32 %v8348_v2, %v8260_v40 }
 0xc3d   : > { %v8083_v52 = vpop.f32.mrf.mxu2 }
 0xc3e   : > { %v8084_v54 = vadd.f32 %v14340_v47, %v8083_v52  ;;  %v8172_v24 = vpop.f32.mrf.mxu3 }
 0xc3f   : > { %v8264_v13 = vpop.f32.mrf.mxu0 }
 0xc40   : > { %v8173_v55 = vadd.f32 %v8172_v24, %v8084_v54  ;;  %v8353_v9 = vpop.f32.mrf.mxu1 }
 0xc42   : > { %v8262_v17 = vadd.f32 %v8261_v56, %v8173_v55  ;;  %8401 = vmatmul.bf16.gmra.mxu2 %v15563_v33  ;;  %8579 = vmatmul.bf16.gmra.mxu0 %v15564_v57 }
 0xc43   : > { %8490 = vmatmul.bf16.gmra.mxu3 %v15565_v38  ;;  %8668 = vmatmul.bf16.gmra.mxu1 %v14252_v5 }
 0xc44   : > { %v14464_v35 = vadd.f32 %v8350_v23, %v8262_v17  ;;  %v15567_v23 = vld [vmem:[#allocation121_spill] sm:$0xff]  ;;  %v15568_v17 = vld [vmem:[#allocation28_spill] sm:$0xff] }
 0xc45   : > { %v8086_v60 = vpop.f32.mrf.mxu2 }
 0xc46   : > { %v8087_v2 = vadd.f32 %v14340_v47, %v8086_v60  ;;  %v8175_v7 = vpop.f32.mrf.mxu3  ;;  %v15569_v60 = vld [vmem:[#allocation137_spill] sm:$0xff] }
 0xc47   : > { %v8266_v39 = vpop.f32.mrf.mxu0 }
 0xc48   : > { %v8176_v42 = vadd.f32 %v8175_v7, %v8087_v2  ;;  %v8355_v40 = vpop.f32.mrf.mxu1 }
 0xc4a   : > { %v8265_v52 = vadd.f32 %v8264_v13, %v8176_v42 }
 0xc4c   : > { %v14467_v54 = vadd.f32 %v8353_v9, %v8265_v52 }
 0xc4d   : > { %v8088_v56 = vpop.f32.mrf.mxu2 }
 0xc4e   : > { %15566 = vst [vmem:[#allocation36_spill] sm:$0xff] %v14467_v54  ;;  %v8089_v24 = vadd.f32 %v14340_v47, %v8088_v56  ;;  %v8177_v55 = vpop.f32.mrf.mxu3 }
 0xc4f   : > { %v8269_v33 = vpop.f32.mrf.mxu0 }
 0xc50   : > { %v8178_v57 = vadd.f32 %v8177_v55, %v8089_v24  ;;  %v8358_v38 = vpop.f32.mrf.mxu1 }
 0xc52   : > { %v8267_v5 = vadd.f32 %v8266_v39, %v8178_v57  ;;  %8406 = vmatmul.bf16.gmra.mxu2 %v15567_v23  ;;  %8584 = vmatmul.bf16.gmra.mxu0 %v15568_v17 }
 0xc53   : > { %8495 = vmatmul.bf16.gmra.mxu3 %v15569_v60  ;;  %8673 = vmatmul.bf16.gmra.mxu1 %v14260_v62 }
 0xc54   : > { %v14474_v2 = vadd.f32 %v8355_v40, %v8267_v5  ;;  %v15571_v40 = vld [vmem:[#allocation122_spill] sm:$0xff] }
 0xc55   : > { %v8091_v13 = vpop.f32.mrf.mxu2  ;;  %v15572_v5 = vld [vmem:[#allocation62_spill] sm:$0xff] }
 0xc56   : > { %v8092_v9 = vadd.f32 %v14340_v47, %v8091_v13  ;;  %v8180_v7 = vpop.f32.mrf.mxu3  ;;  %v15573_v13 = vld [vmem:[#allocation138_spill] sm:$0xff] }
 0xc57   : > { %v8271_v42 = vpop.f32.mrf.mxu0 }
 0xc58   : > { %v8181_v52 = vadd.f32 %v8180_v7, %v8092_v9  ;;  %v8360_v56 = vpop.f32.mrf.mxu1 }
 0xc5a   : > { %v8270_v24 = vadd.f32 %v8269_v33, %v8181_v52 }
 0xc5c   : > { %v14477_v55 = vadd.f32 %v8358_v38, %v8270_v24 }
 0xc5d   : > { %v8093_v39 = vpop.f32.mrf.mxu2 }
 0xc5e   : > { %15570 = vst [vmem:[#allocation32_spill] sm:$0xff] %v14477_v55  ;;  %v8094_v57 = vadd.f32 %v14340_v47, %v8093_v39  ;;  %v8182_v23 = vpop.f32.mrf.mxu3 }
 0xc5f   : > { %v8274_v17 = vpop.f32.mrf.mxu0 }
 0xc60   : > { %v8183_v60 = vadd.f32 %v8182_v23, %v8094_v57  ;;  %v8363_v54 = vpop.f32.mrf.mxu1 }
 0xc62   : > { %v8272_v62 = vadd.f32 %v8271_v42, %v8183_v60  ;;  %8411 = vmatmul.bf16.gmra.mxu2 %v15571_v40  ;;  %8589 = vmatmul.bf16.gmra.mxu0 %v15572_v5 }
 0xc63   : > { %8500 = vmatmul.bf16.gmra.mxu3 %v15573_v13  ;;  %8678 = vmatmul.bf16.gmra.mxu1 %v14268_v53 }
 0xc64   : > { %v14484_v9 = vadd.f32 %v8360_v56, %v8272_v62  ;;  %v15574_v56 = vld [vmem:[#allocation123_spill] sm:$0xff] }
 0xc65   : > { %v8096_v33 = vpop.f32.mrf.mxu2  ;;  %v15575_v62 = vld [vmem:[#allocation139_spill] sm:$0xff] }
 0xc66   : > { %v8097_v38 = vadd.f32 %v14340_v47, %v8096_v33  ;;  %v8185_v7 = vpop.f32.mrf.mxu3 }
 0xc67   : > { %v8276_v52 = vpop.f32.mrf.mxu0 }
 0xc68   : > { %v8186_v24 = vadd.f32 %v8185_v7, %v8097_v38  ;;  %v8365_v39 = vpop.f32.mrf.mxu1 }
 0xc6a   : > { %v8275_v57 = vadd.f32 %v8274_v17, %v8186_v24 }
 0xc6c   : > { %v14487_v23 = vadd.f32 %v8363_v54, %v8275_v57 }
 0xc6d   : > { %v8098_v42 = vpop.f32.mrf.mxu2 }
 0xc6e   : > { %v8099_v60 = vadd.f32 %v14340_v47, %v8098_v42  ;;  %v8187_v40 = vpop.f32.mrf.mxu3 }
 0xc6f   : > { %v8279_v5 = vpop.f32.mrf.mxu0 }
 0xc70   : > { %v8188_v13 = vadd.f32 %v8187_v40, %v8099_v60  ;;  %v8368_v55 = vpop.f32.mrf.mxu1 }
 0xc72   : > { %v8277_v53 = vadd.f32 %v8276_v52, %v8188_v13  ;;  %8416 = vmatmul.bf16.gmra.mxu2 %v15574_v56  ;;  %8594 = vmatmul.bf16.gmra.mxu0 %v14145_v45 }
 0xc73   : > { %8505 = vmatmul.bf16.gmra.mxu3 %v15575_v62  ;;  %8683 = vmatmul.bf16.gmra.mxu1 %v14276_v43 }
 0xc74   : > { %v14494_v33 = vadd.f32 %v8365_v39, %v8277_v53  ;;  %v15576_v39 = vld [vmem:[#allocation124_spill] sm:$0xff] }
 0xc75   : > { %v8101_v54 = vpop.f32.mrf.mxu2  ;;  %v15577_v53 = vld [vmem:[#allocation140_spill] sm:$0xff] }
 0xc76   : > { %v8102_v17 = vadd.f32 %v14340_v47, %v8101_v54  ;;  %v8190_v38 = vpop.f32.mrf.mxu3 }
 0xc77   : > { %v8281_v7 = vpop.f32.mrf.mxu0 }
 0xc78   : > { %v8191_v24 = vadd.f32 %v8190_v38, %v8102_v17  ;;  %v8370_v57 = vpop.f32.mrf.mxu1 }
 0xc7a   : > { %v8280_v42 = vadd.f32 %v8279_v5, %v8191_v24 }
 0xc7c   : > { %v14497_v60 = vadd.f32 %v8368_v55, %v8280_v42 }
 0xc7d   : > { %v8103_v52 = vpop.f32.mrf.mxu2 }
 0xc7e   : > { %v8104_v40 = vadd.f32 %v14340_v47, %v8103_v52  ;;  %v8192_v45 = vpop.f32.mrf.mxu3 }
 0xc7f   : > { %v8560_v13 = vpop.f32.mrf.mxu0 }
 0xc80   : > { %v8193_v56 = vadd.f32 %v8192_v45, %v8104_v40  ;;  %v8649_v62 = vpop.f32.mrf.mxu1 }
 0xc82   : > { %v8282_v43 = vadd.f32 %v8281_v7, %v8193_v56  ;;  %8421 = vmatmul.bf16.gmra.mxu2 %v15576_v39  ;;  %8599 = vmatmul.bf16.gmra.mxu0 %v14153_v11 }
 0xc83   : > { %8510 = vmatmul.bf16.gmra.mxu3 %v15577_v53  ;;  %8688 = vmatmul.bf16.gmra.mxu1 %v14284_v58 }
 0xc84   : > { %v14504_v54 = vadd.f32 %v8370_v57, %v8282_v43  ;;  %v15578_v43 = vld [vmem:[#allocation125_spill] sm:$0xff] }
 0xc85   : > { %v8382_v55 = vpop.f32.mrf.mxu2 }
 0xc86   : > { %v8383_v5 = vadd.f32 %v8382_v55, %v14347_v59  ;;  %v8471_v17 = vpop.f32.mrf.mxu3  ;;  %v15579_v59 = vld [vmem:[#allocation141_spill] sm:$0xff] }
 0xc87   : > { %v8562_v47 = vpop.f32.mrf.mxu0 }
 0xc88   : > { %v8472_v38 = vadd.f32 %v8471_v17, %v8383_v5  ;;  %v8651_v24 = vpop.f32.mrf.mxu1 }
 0xc8a   : > { %v8561_v42 = vadd.f32 %v8560_v13, %v8472_v38 }
 0xc8c   : > { %v8650_v52 = vadd.f32 %v8649_v62, %v8561_v42 }
 0xc8d   : > { %v8384_v7 = vpop.f32.mrf.mxu2 }
 0xc8e   : > { %v11244_v40 = vmul.f32 -1.442695, %v8650_v52  ;;  %v8385_v45 = vadd.f32 %v8384_v7, %v14354_v44  ;;  %v8473_v11 = vpop.f32.mrf.mxu3 }
 0xc8f   : > { %v8565_v56 = vpop.f32.mrf.mxu0 }
 0xc90   : > { %11938 = vpow2.f32 %v11244_v40  ;;  %v8474_v39 = vadd.f32 %v8473_v11, %v8385_v45  ;;  %v8654_v58 = vpop.f32.mrf.mxu1 }
 0xc92   : > { %v8563_v57 = vadd.f32 %v8562_v47, %v8474_v39  ;;  %8426 = vmatmul.bf16.gmra.mxu2 %v15578_v43  ;;  %8604 = vmatmul.bf16.gmra.mxu0 %v14161_v12 }
 0xc93   : > { %8515 = vmatmul.bf16.gmra.mxu3 %v15579_v59  ;;  %8693 = vmatmul.bf16.gmra.mxu1 %v14292_v25 }
 0xc94   : > { %v8652_v13 = vadd.f32 %v8651_v24, %v8563_v57 }
 0xc95   : > { %v8387_v62 = vpop.f32.mrf.mxu2 }
 0xc96   : > { %v11939_v53 = vpop.eup %11938  ;;  %v11245_v55 = vmul.f32 -1.442695, %v8652_v13  ;;  %v8388_v44 = vadd.f32 %v8387_v62, %v14357_v19  ;;  %v8476_v5 = vpop.f32.mrf.mxu3  ;;  %v15581_v62 = vld [vmem:[#allocation142_spill] sm:$0xff] }
 0xc97   : > { %v14513_v17 = vadd.f32 1.0, %v11939_v53  ;;  %v8567_v38 = vpop.f32.mrf.mxu0 }
 0xc98   : > { %11940 = vpow2.f32 %v11245_v55  ;;  %v8477_v47 = vadd.f32 %v8476_v5, %v8388_v44  ;;  %v8656_v42 = vpop.f32.mrf.mxu1 }
 0xc99   : > { %11942 = vrcp.f32 %v14513_v17  ;;  %vm8862_vm1 = vweird.f32 %v14513_v17 }
 0xc9a   : > { %v8566_v12 = vadd.f32 %v8565_v56, %v8477_v47 }
 0xc9c   : > { %v8655_v52 = vadd.f32 %v8654_v58, %v8566_v12  ;;  %v15580_v58 = vld [vmem:[#allocation126_spill] sm:$0xff] }
 0xc9d   : > { %v8389_v7 = vpop.f32.mrf.mxu2 }
 0xc9e   : > { %v11941_v40 = vpop.eup %11940  ;;  %v11246_v25 = vmul.f32 -1.442695, %v8655_v52  ;;  %v8390_v24 = vadd.f32 %v8389_v7, %v14364_v10  ;;  %v8478_v45 = vpop.f32.mrf.mxu3 }
 0xc9f   : > { %v14517_v11 = vpop.eup %11942  ;;  %v8826_v19 = vadd.f32 1.0, %v11941_v40  ;;  %v8570_v39 = vpop.f32.mrf.mxu0 }
 0xca0   : > { %v8858_v57 = vmul.f32 %v14517_v11, %v14513_v17  ;;  %11944 = vpow2.f32 %v11246_v25  ;;  %v8479_v43 = vadd.f32 %v8478_v45, %v8390_v24  ;;  %v8659_v59 = vpop.f32.mrf.mxu1  ;;  %v8866_v25 = vand.u32 2147483647, %v14513_v17 }
 0xca1   : > { %11946 = vrcp.f32 %v8826_v19  ;;  %vm8863_vm0 = vweird.f32 %v14517_v11  ;;  %v8883_v45 = vand.u32 2147483648, %v8826_v19  ;;  %vm8877_vm5 = vweird.f32 %v8826_v19 }
 0xca2   : > { %v8859_v13 = vsub.f32 1.0, %v8858_v57  ;;  %v8568_v56 = vadd.f32 %v8567_v38, %v8479_v43  ;;  %8431 = vmatmul.bf16.gmra.mxu2 %v15580_v58  ;;  %8609 = vmatmul.bf16.gmra.mxu0 %v14169_v6  ;;  %v8881_v43 = vand.u32 2147483647, %v8826_v19  ;;  %vm14535_vm3 = vmor %vm8862_vm1, %vm8863_vm0  ;;  %vm14539_vm4 = vcmp.eq.f32.partialorder %v8866_v25, 8.507059e+37 }
 0xca3   : > { %8520 = vmatmul.bf16.gmra.mxu3 %v15581_v62  ;;  %8698 = vmatmul.bf16.gmra.mxu1 %v14300_v32 }
 0xca4   : > { %v8657_v10 = vadd.f32 %v8656_v42, %v8568_v56  ;;  %v8860_v44 = vmul.f32 %v14517_v11, %v8859_v13  ;;  %vm8882_vm7 = vcmp.eq.f32.partialorder %v8881_v43, 8.507059e+37 }
 0xca5   : > { %v8392_v53 = vpop.f32.mrf.mxu2 }
 0xca6   : > { %v11945_v55 = vpop.eup %11944  ;;  %v11247_v5 = vmul.f32 -1.442695, %v8657_v10  ;;  %v8393_v47 = vadd.f32 %v8392_v53, %v14367_v48  ;;  %v8481_v12 = vpop.f32.mrf.mxu3  ;;  %v8861_v32 = vadd.f32 %v14517_v11, %v8860_v44  ;;  %v8868_v48 = vand.u32 2147483648, %v14513_v17 }
 0xca7   : > { %v11947_v52 = vpop.eup %11946  ;;  %v14527_v7 = vadd.f32 1.0, %v11945_v55  ;;  %v8572_v38 = vpop.f32.mrf.mxu0 }
 0xca8   : > { %v8873_v40 = vmul.f32 %v11947_v52, %v8826_v19  ;;  %11948 = vpow2.f32 %v11247_v5  ;;  %v8661_v6 = vpop.f32.mrf.mxu1  ;;  %v8482_v24 = vadd.f32 %v8481_v12, %v8393_v47  ;;  %vm8878_vm2 = vweird.f32 %v11947_v52 }
 0xca9   : > { %11950 = vrcp.f32 %v14527_v7  ;;  %v8865_v53 = vsel %vm14535_vm3, %v14517_v11, %v8861_v32  ;;  %vm8879_vm6 = vmor %vm8877_vm5, %vm8878_vm2  ;;  %v8884_v47 = vor.u32 1.1754944e-38, %v8883_v45  ;;  %vm8892_vm8 = vweird.f32 %v14527_v7 }
 0xcaa   : > { %v8874_v42 = vsub.f32 1.0, %v8873_v40  ;;  %v8571_v13 = vadd.f32 %v8570_v39, %v8482_v24  ;;  %v8869_v39 = vor.u32 1.1754944e-38, %v8868_v48 }
 0xcac   : > { %v8875_v57 = vmul.f32 %v11947_v52, %v8874_v42  ;;  %v8660_v55 = vadd.f32 %v8659_v59, %v8571_v13  ;;  %v8870_v59 = vsel %vm14539_vm4, %v8869_v39, %v8865_v53  ;;  %v8896_v39 = vand.u32 2147483647, %v14527_v7 }
 0xcad   : > { %v8394_v62 = vpop.f32.mrf.mxu2 }
 0xcae   : > { %v11949_v10 = vpop.eup %11948  ;;  %v8876_v17 = vadd.f32 %v11947_v52, %v8875_v57  ;;  %v8483_v44 = vpop.f32.mrf.mxu3  ;;  %v8395_v40 = vadd.f32 %v8394_v62, %v14374_v4  ;;  %v11248_v32 = vmul.f32 -1.442695, %v8660_v55  ;;  %v15586_v57 = vld [vmem:[#allocation127_spill] sm:$0xff]  ;;  %vm8897_vm13 = vcmp.eq.f32.partialorder %v8896_v39, 8.507059e+37  ;;  %v15590_v39 = vld [vmem:[#allocation128_spill] sm:$0xff] }
 0xcaf   : > { %v14546_v5 = vpop.eup %11950  ;;  %v14548_v12 = vadd.f32 1.0, %v11949_v10  ;;  %v8575_v25 = vpop.f32.mrf.mxu0 }
 0xcb0   : > { %v8880_v42 = vsel %vm8879_vm6, %v11947_v52, %v8876_v17  ;;  %v8888_v11 = vmul.f32 %v14546_v5, %v14527_v7  ;;  %v8664_v19 = vpop.f32.mrf.mxu1  ;;  %v8484_v4 = vadd.f32 %v8483_v44, %v8395_v40  ;;  %v15587_v52 = vld [vmem:[#allocation143_spill] sm:$0xff]  ;;  %vm8893_vm9 = vweird.f32 %v14546_v5 }
 0xcb1   : > { %v8885_v24 = vsel %vm8882_vm7, %v8884_v47, %v8880_v42  ;;  %11952 = vrcp.f32 %v14548_v12  ;;  %vm14580_vm11 = vmor %vm8892_vm8, %vm8893_vm9  ;;  %vm8907_vm12 = vweird.f32 %v14548_v12 }
 0xcb2   : > { %v11702_v48 = vpack.c.bf16 %v8885_v24, %v8870_v59  ;;  %v8889_v45 = vsub.f32 1.0, %v8888_v11  ;;  %11954 = vpow2.f32 %v11248_v32  ;;  %8436 = vmatmul.bf16.gmra.mxu2 %v15586_v57  ;;  %8614 = vmatmul.bf16.gmra.mxu0 %v14177_v20  ;;  %v8573_v43 = vadd.f32 %v8572_v38, %v8484_v4 }
 0xcb3   : > { %8525 = vmatmul.bf16.gmra.mxu3 %v15587_v52  ;;  %8703 = vmatmul.bf16.gmra.mxu1 %v14308_v21  ;;  %v8911_v11 = vand.u32 2147483647, %v14548_v12  ;;  %v8913_v32 = vand.u32 2147483648, %v14548_v12 }
 0xcb4   : > { %11703 = vst [vmem:[%s14562_s23] sm:$0xff] %v11702_v48   ;;  %v8890_v56 = vmul.f32 %v14546_v5, %v8889_v45  ;;  %v8662_v53 = vadd.f32 %v8661_v6, %v8573_v43  ;;  %v8898_v6 = vand.u32 2147483648, %v14527_v7 }
 0xcb5   : > { %v8397_v13 = vpop.f32.mrf.mxu2  ;;  %v8914_v7 = vor.u32 1.1754944e-38, %v8913_v32  ;;  %vm8912_vm15 = vcmp.eq.f32.partialorder %v8911_v11, 8.507059e+37 }
 0xcb6   : > { %v8398_v58 = vadd.f32 %v8397_v13, %v14377_v50  ;;  %v8486_v62 = vpop.f32.mrf.mxu3  ;;  %v11249_v38 = vmul.f32 -1.442695, %v8662_v53  ;;  %v8891_v40 = vadd.f32 %v14546_v5, %v8890_v56 }
 0xcb7   : > { %v11953_v10 = vpop.eup %11952  ;;  %v8577_v20 = vpop.f32.mrf.mxu0 }
 0xcb8   : > { %v11955_v17 = vpop.eup %11954  ;;  %v8903_v55 = vmul.f32 %v11953_v10, %v14548_v12  ;;  %v8487_v44 = vadd.f32 %v8486_v62, %v8398_v58  ;;  %v8666_v21 = vpop.f32.mrf.mxu1  ;;  %vm8908_vm10 = vweird.f32 %v11953_v10  ;;  %v8895_v45 = vsel %vm14580_vm11, %v14546_v5, %v8891_v40 }
 0xcb9   : > { %v14570_v47 = vadd.f32 1.0, %v11955_v17  ;;  %vm8909_vm14 = vmor %vm8907_vm12, %vm8908_vm10 }
 0xcba   : > { %v8904_v50 = vsub.f32 1.0, %v8903_v55  ;;  %v8576_v42 = vadd.f32 %v8575_v25, %v8487_v44 }
 0xcbb   : > { %11956 = vrcp.f32 %v14570_v47  ;;  %vm8922_vm0 = vweird.f32 %v14570_v47 }
 0xcbc   : > { %v8905_v59 = vmul.f32 %v11953_v10, %v8904_v50  ;;  %11958 = vpow2.f32 %v11249_v38  ;;  %v8665_v24 = vadd.f32 %v8664_v19, %v8576_v42  ;;  %v8899_v19 = vor.u32 1.1754944e-38, %v8898_v6  ;;  %v15591_v38 = vld [vmem:[#allocation144_spill] sm:$0xff] }
 0xcbd   : > { %v8399_v25 = vpop.f32.mrf.mxu2 }
 0xcbe   : > { %v8906_v57 = vadd.f32 %v11953_v10, %v8905_v59  ;;  %v11250_v4 = vmul.f32 -1.442695, %v8665_v24  ;;  %v8400_v52 = vadd.f32 %v8399_v25, %v14384_v30  ;;  %v8488_v43 = vpop.f32.mrf.mxu3  ;;  %v8900_v53 = vsel %vm8897_vm13, %v8899_v19, %v8895_v45 }
 0xcbf   : > { %v8580_v13 = vpop.f32.mrf.mxu0 }
 0xcc0   : > { %v8910_v56 = vsel %vm8909_vm14, %v11953_v10, %v8906_v57  ;;  %11960 = vpow2.f32 %v11250_v4  ;;  %v8489_v12 = vadd.f32 %v8488_v43, %v8400_v52  ;;  %v8669_v58 = vpop.f32.mrf.mxu1 }
 0xcc1   : > { %v14589_v62 = vpop.eup %11956  ;;  %v8915_v5 = vsel %vm8912_vm15, %v8914_v7, %v8910_v56 }
 0xcc2   : > { %v11959_v17 = vpop.eup %11958  ;;  %v11707_v55 = vpack.c.bf16 %v8915_v5, %v8900_v53  ;;  %v8918_v30 = vmul.f32 %v14589_v62, %v14570_v47  ;;  %v8578_v44 = vadd.f32 %v8577_v20, %v8489_v12  ;;  %8441 = vmatmul.bf16.gmra.mxu2 %v15590_v39  ;;  %8619 = vmatmul.bf16.gmra.mxu0 %v14185_v8  ;;  %vm8923_vm1 = vweird.f32 %v14589_v62 }
 0xcc3   : > { %v8830_v10 = vadd.f32 1.0, %v11959_v17  ;;  %8530 = vmatmul.bf16.gmra.mxu3 %v15591_v38  ;;  %8708 = vmatmul.bf16.gmra.mxu1 %v14316_v14  ;;  %vm14619_vm3 = vmor %vm8922_vm0, %vm8923_vm1 }
 0xcc4   : > { %11779 = vst [vmem:[%s14562_s23 + $0x8] sm:$0xff] %v11707_v55   ;;  %v8667_v40 = vadd.f32 %v8666_v21, %v8578_v44  ;;  %v8919_v6 = vsub.f32 1.0, %v8918_v30 }
 0xcc5   : > { %11962 = vrcp.f32 %v8830_v10  ;;  %v8402_v50 = vpop.f32.mrf.mxu2  ;;  %v8943_v5 = vand.u32 2147483648, %v8830_v10  ;;  %vm8937_vm4 = vweird.f32 %v8830_v10 }
 0xcc6   : > { %v11961_v42 = vpop.eup %11960  ;;  %v11251_v11 = vmul.f32 -1.442695, %v8667_v40  ;;  %v8403_v32 = vadd.f32 %v8402_v50, %v14387_v0  ;;  %v8491_v59 = vpop.f32.mrf.mxu3  ;;  %v8920_v14 = vmul.f32 %v14589_v62, %v8919_v6  ;;  %v8926_v0 = vand.u32 2147483647, %v14570_v47  ;;  %v15594_v6 = vld [vmem:[#allocation129_spill] sm:$0xff] }
 0xcc7   : > { %v14599_v20 = vadd.f32 1.0, %v11961_v42  ;;  %v8582_v24 = vpop.f32.mrf.mxu0 }
 0xcc8   : > { %11964 = vpow2.f32 %v11251_v11  ;;  %v8492_v8 = vadd.f32 %v8491_v59, %v8403_v32  ;;  %v8671_v48 = vpop.f32.mrf.mxu1  ;;  %v8921_v43 = vadd.f32 %v14589_v62, %v8920_v14  ;;  %v15595_v32 = vld [vmem:[#allocation145_spill] sm:$0xff]  ;;  %vm8927_vm6 = vcmp.eq.f32.partialorder %v8926_v0, 8.507059e+37 }
 0xcc9   : > { %11966 = vrcp.f32 %v14599_v20  ;;  %vm8952_vm9 = vweird.f32 %v14599_v20 }
 0xcca   : > { %v8581_v25 = vadd.f32 %v8580_v13, %v8492_v8  ;;  %v8928_v13 = vand.u32 2147483648, %v14570_v47  ;;  %v8925_v38 = vsel %vm14619_vm3, %v14589_v62, %v8921_v43  ;;  %v8944_v47 = vor.u32 1.1754944e-38, %v8943_v5 }
 0xccb   : > { %v11963_v21 = vpop.eup %11962 }
 0xccc   : > { %v8933_v45 = vmul.f32 %v11963_v21, %v8830_v10  ;;  %v8670_v57 = vadd.f32 %v8669_v58, %v8581_v25  ;;  %v8941_v58 = vand.u32 2147483647, %v8830_v10  ;;  %vm8938_vm2 = vweird.f32 %v11963_v21 }
 0xccd   : > { %v8404_v4 = vpop.f32.mrf.mxu2  ;;  %v8929_v11 = vor.u32 1.1754944e-38, %v8928_v13  ;;  %vm8939_vm5 = vmor %vm8937_vm4, %vm8938_vm2 }
 0xcce   : > { %v11965_v52 = vpop.eup %11964  ;;  %v8934_v19 = vsub.f32 1.0, %v8933_v45  ;;  %v11252_v7 = vmul.f32 -1.442695, %v8670_v57  ;;  %v8405_v56 = vadd.f32 %v8404_v4, %v14394_v28  ;;  %v8493_v12 = vpop.f32.mrf.mxu3  ;;  %vm8942_vm7 = vcmp.eq.f32.partialorder %v8941_v58, 8.507059e+37 }
 0xccf   : > { %v14608_v53 = vpop.eup %11966  ;;  %v14611_v17 = vadd.f32 1.0, %v11965_v52  ;;  %v8585_v55 = vpop.f32.mrf.mxu0  ;;  %v8930_v62 = vsel %vm8927_vm6, %v8929_v11, %v8925_v38 }
 0xcd0   : > { %v8935_v30 = vmul.f32 %v11963_v21, %v8934_v19  ;;  %v8948_v44 = vmul.f32 %v14608_v53, %v14599_v20  ;;  %11968 = vpow2.f32 %v11252_v7  ;;  %v8674_v39 = vpop.f32.mrf.mxu1  ;;  %v8494_v42 = vadd.f32 %v8493_v12, %v8405_v56 }
 0xcd1   : > { %11970 = vrcp.f32 %v14611_v17  ;;  %vm8953_vm8 = vweird.f32 %v14608_v53  ;;  %v8958_v12 = vand.u32 2147483648, %v14599_v20  ;;  %v8973_v13 = vand.u32 2147483648, %v14611_v17 }
 0xcd2   : > { %v8936_v40 = vadd.f32 %v11963_v21, %v8935_v30  ;;  %v8949_v50 = vsub.f32 1.0, %v8948_v44  ;;  %8446 = vmatmul.bf16.gmra.mxu2 %v15594_v6  ;;  %8624 = vmatmul.bf16.gmra.mxu0 %v14193_v3  ;;  %v8583_v59 = vadd.f32 %v8582_v24, %v8494_v42  ;;  %v8971_v5 = vand.u32 2147483647, %v14611_v17  ;;  %vm14645_vm11 = vmor %vm8952_vm9, %vm8953_vm8 }
 0xcd3   : > { %8535 = vmatmul.bf16.gmra.mxu3 %v15595_v32  ;;  %8713 = vmatmul.bf16.gmra.mxu1 %v14324_v63  ;;  %vm8967_vm12 = vweird.f32 %v14611_v17  ;;  %v8974_v11 = vor.u32 1.1754944e-38, %v8973_v13 }
 0xcd4   : > { %v8940_v10 = vsel %vm8939_vm5, %v11963_v21, %v8936_v40  ;;  %v8950_v57 = vmul.f32 %v14608_v53, %v8949_v50  ;;  %v8672_v3 = vadd.f32 %v8671_v48, %v8583_v59  ;;  %vm8972_vm15 = vcmp.eq.f32.partialorder %v8971_v5, 8.507059e+37 }
 0xcd5   : > { %v8945_v8 = vsel %vm8942_vm7, %v8944_v47, %v8940_v10  ;;  %v8407_v14 = vpop.f32.mrf.mxu2 }
 0xcd6   : > { %v11969_v25 = vpop.eup %11968  ;;  %v11712_v45 = vpack.c.bf16 %v8945_v8, %v8930_v62  ;;  %v8408_v4 = vadd.f32 %v8407_v14, %v14397_v31  ;;  %v8496_v52 = vpop.f32.mrf.mxu3  ;;  %v11253_v0 = vmul.f32 -1.442695, %v8672_v3  ;;  %v8951_v7 = vadd.f32 %v14608_v53, %v8950_v57 }
 0xcd7   : > { %v11971_v43 = vpop.eup %11970  ;;  %v14633_v19 = vadd.f32 1.0, %v11969_v25  ;;  %v8587_v63 = vpop.f32.mrf.mxu0  ;;  %v8956_v31 = vand.u32 2147483647, %v14599_v20  ;;  %v15598_v25 = vld [vmem:[#allocation130_spill] sm:$0xff] }
 0xcd8   : > { %11780 = vst [vmem:[%s14562_s23 + $0x10] sm:$0xff] %v11712_v45   ;;  %v8963_v21 = vmul.f32 %v11971_v43, %v14611_v17  ;;  %v8676_v24 = vpop.f32.mrf.mxu1  ;;  %v8497_v48 = vadd.f32 %v8496_v52, %v8408_v4  ;;  %vm8968_vm10 = vweird.f32 %v11971_v43  ;;  %v8955_v38 = vsel %vm14645_vm11, %v14608_v53, %v8951_v7  ;;  %v15599_v45 = vld [vmem:[#allocation146_spill] sm:$0xff] }
 0xcd9   : > { %11972 = vrcp.f32 %v14633_v19  ;;  %vm8957_vm13 = vcmp.eq.f32.partialorder %v8956_v31, 8.507059e+37  ;;  %vm8969_vm14 = vmor %vm8967_vm12, %vm8968_vm10  ;;  %vm8982_vm0 = vweird.f32 %v14633_v19  ;;  %v8986_v5 = vand.u32 2147483647, %v14633_v19 }
 0xcda   : > { %v8964_v56 = vsub.f32 1.0, %v8963_v21  ;;  %11974 = vpow2.f32 %v11253_v0  ;;  %v8586_v30 = vadd.f32 %v8585_v55, %v8497_v48  ;;  %v8959_v55 = vor.u32 1.1754944e-38, %v8958_v12 }
 0xcdb   : > { %vm8987_vm5 = vcmp.eq.f32.partialorder %v8986_v5, 8.507059e+37 }
 0xcdc   : > { %v8965_v58 = vmul.f32 %v11971_v43, %v8964_v56  ;;  %v8675_v20 = vadd.f32 %v8674_v39, %v8586_v30  ;;  %v8960_v39 = vsel %vm8957_vm13, %v8959_v55, %v8955_v38  ;;  %v8988_v30 = vand.u32 2147483648, %v14633_v19 }
 0xcdd   : > { %v8409_v28 = vpop.f32.mrf.mxu2 }
 0xcde   : > { %v8966_v40 = vadd.f32 %v11971_v43, %v8965_v58  ;;  %v8410_v50 = vadd.f32 %v8409_v28, %v14404_v51  ;;  %v8498_v42 = vpop.f32.mrf.mxu3  ;;  %v11254_v53 = vmul.f32 -1.442695, %v8675_v20 }
 0xcdf   : > { %v14654_v6 = vpop.eup %11972  ;;  %v8590_v47 = vpop.f32.mrf.mxu0 }
 0xce0   : > { %v11975_v32 = vpop.eup %11974  ;;  %v8970_v10 = vsel %vm8969_vm14, %v11971_v43, %v8966_v40  ;;  %v8978_v17 = vmul.f32 %v14654_v6, %v14633_v19  ;;  %v8679_v59 = vpop.f32.mrf.mxu1  ;;  %v8499_v8 = vadd.f32 %v8498_v42, %v8410_v50  ;;  %11976 = vpow2.f32 %v11254_v53 }
 0xce1   : > { %v8975_v62 = vsel %vm8972_vm15, %v8974_v11, %v8970_v10  ;;  %v8834_v51 = vadd.f32 1.0, %v11975_v32  ;;  %vm8983_vm1 = vweird.f32 %v14654_v6 }
 0xce2   : > { %v11717_v14 = vpack.c.bf16 %v8975_v62, %v8960_v39  ;;  %8451 = vmatmul.bf16.gmra.mxu2 %v15598_v25  ;;  %8629 = vmatmul.bf16.gmra.mxu0 %v14201_v26  ;;  %v8979_v57 = vsub.f32 1.0, %v8978_v17  ;;  %v8588_v3 = vadd.f32 %v8587_v63, %v8499_v8  ;;  %vm14676_vm3 = vmor %vm8982_vm0, %vm8983_vm1  ;;  %v15602_v8 = vld [vmem:[#allocation131_spill] sm:$0xff] }
 0xce3   : > { %11978 = vrcp.f32 %v8834_v51  ;;  %8540 = vmatmul.bf16.gmra.mxu3 %v15599_v45  ;;  %8718 = vmatmul.bf16.gmra.mxu1 %v14332_v61  ;;  %v9001_v44 = vand.u32 2147483647, %v8834_v51  ;;  %v9003_v28 = vand.u32 2147483648, %v8834_v51  ;;  %vm8997_vm4 = vweird.f32 %v8834_v51  ;;  %v15603_v45 = vld [vmem:[#allocation148_spill] sm:$0xff] }
 0xce4   : > { %11781 = vst [vmem:[%s14562_s23 + $0x18] sm:$0xff] %v11717_v14   ;;  %v8677_v52 = vadd.f32 %v8676_v24, %v8588_v3  ;;  %v8980_v56 = vmul.f32 %v14654_v6, %v8979_v57 }
 0xce5   : > { %v8412_v4 = vpop.f32.mrf.mxu2  ;;  %v9004_v19 = vor.u32 1.1754944e-38, %v9003_v28  ;;  %vm9002_vm7 = vcmp.eq.f32.partialorder %v9001_v44, 8.507059e+37 }
 0xce6   : > { %v8413_v43 = vadd.f32 %v8412_v4, %v14407_v29  ;;  %v8501_v21 = vpop.f32.mrf.mxu3  ;;  %v11977_v7 = vpop.eup %11976  ;;  %v11255_v48 = vmul.f32 -1.442695, %v8677_v52  ;;  %v8981_v29 = vadd.f32 %v14654_v6, %v8980_v56 }
 0xce7   : > { %v8592_v0 = vpop.f32.mrf.mxu0  ;;  %v14665_v13 = vadd.f32 1.0, %v11977_v7 }
 0xce8   : > { %v8502_v31 = vadd.f32 %v8501_v21, %v8413_v43  ;;  %v8681_v26 = vpop.f32.mrf.mxu1  ;;  %11980 = vpow2.f32 %v11255_v48  ;;  %v8985_v32 = vsel %vm14676_vm3, %v14654_v6, %v8981_v29 }
 0xce9   : > { %v11979_v12 = vpop.eup %11978  ;;  %11982 = vrcp.f32 %v14665_v13  ;;  %vm9012_vm8 = vweird.f32 %v14665_v13 }
 0xcea   : > { %v8993_v58 = vmul.f32 %v11979_v12, %v8834_v51  ;;  %v8591_v61 = vadd.f32 %v8590_v47, %v8502_v31  ;;  %vm8998_vm2 = vweird.f32 %v11979_v12 }
 0xceb   : > { %vm8999_vm6 = vmor %vm8997_vm4, %vm8998_vm2 }
 0xcec   : > { %v8994_v63 = vsub.f32 1.0, %v8993_v58  ;;  %v8680_v24 = vadd.f32 %v8679_v59, %v8591_v61 }
 0xced   : > { %v8414_v38 = vpop.f32.mrf.mxu2 }
 0xcee   : > { %v8995_v40 = vmul.f32 %v11979_v12, %v8994_v63  ;;  %v11256_v20 = vmul.f32 -1.442695, %v8680_v24  ;;  %v8415_v50 = vadd.f32 %v8414_v38, %v14414_v46  ;;  %v8503_v42 = vpop.f32.mrf.mxu3  ;;  %v11981_v47 = vpop.eup %11980  ;;  %v8989_v46 = vor.u32 1.1754944e-38, %v8988_v30 }
 0xcef   : > { %v8595_v11 = vpop.f32.mrf.mxu0  ;;  %v14683_v59 = vpop.eup %11982  ;;  %v14686_v39 = vadd.f32 1.0, %v11981_v47  ;;  %v9016_v63 = vand.u32 2147483647, %v14665_v13  ;;  %v9018_v24 = vand.u32 2147483648, %v14665_v13 }
 0xcf0   : > { %v8996_v10 = vadd.f32 %v11979_v12, %v8995_v40  ;;  %11984 = vpow2.f32 %v11256_v20  ;;  %v8504_v17 = vadd.f32 %v8503_v42, %v8415_v50  ;;  %v8684_v53 = vpop.f32.mrf.mxu1  ;;  %v9008_v51 = vmul.f32 %v14683_v59, %v14665_v13 }
 0xcf1   : > { %v8990_v14 = vsel %vm8987_vm5, %v8989_v46, %v8985_v32  ;;  %11986 = vrcp.f32 %v14686_v39  ;;  %vm9013_vm9 = vweird.f32 %v14683_v59  ;;  %v9031_v5 = vand.u32 2147483647, %v14686_v39 }
 0xcf2   : > { %v9000_v62 = vsel %vm8999_vm6, %v11979_v12, %v8996_v10  ;;  %v8593_v6 = vadd.f32 %v8592_v0, %v8504_v17  ;;  %8456 = vmatmul.bf16.gmra.mxu2 %v15602_v8  ;;  %8634 = vmatmul.bf16.gmra.mxu0 %v14212_v36  ;;  %v9009_v3 = vsub.f32 1.0, %v9008_v51  ;;  %v9033_v30 = vand.u32 2147483648, %v14686_v39  ;;  %vm14716_vm11 = vmor %vm9012_vm8, %vm9013_vm9 }
 0xcf3   : > { %v9005_v25 = vsel %vm9002_vm7, %v9004_v19, %v9000_v62  ;;  %8545 = vmatmul.bf16.gmra.mxu3 %v15603_v45  ;;  %8723 = vmatmul.bf16.gmra.mxu1 %v14345_v41  ;;  %vm9027_vm12 = vweird.f32 %v14686_v39  ;;  %vm9017_vm13 = vcmp.eq.f32.partialorder %v9016_v63, 8.507059e+37  ;;  %v9019_v13 = vor.u32 1.1754944e-38, %v9018_v24 }
 0xcf4   : > { %v11722_v57 = vpack.c.bf16 %v9005_v25, %v8990_v14  ;;  %v8682_v4 = vadd.f32 %v8681_v26, %v8593_v6  ;;  %v9010_v48 = vmul.f32 %v14683_v59, %v9009_v3  ;;  %vm9032_vm15 = vcmp.eq.f32.partialorder %v9031_v5, 8.507059e+37 }
 0xcf5   : > { %v8417_v52 = vpop.f32.mrf.mxu2 }
 0xcf6   : > { %v11985_v43 = vpop.eup %11984  ;;  %11782 = vst [vmem:[%s14562_s23 + $0x20] sm:$0xff] %v11722_v57   ;;  %v11257_v21 = vmul.f32 -1.442695, %v8682_v4  ;;  %v8418_v0 = vadd.f32 %v8417_v52, %v14417_v18  ;;  %v8506_v7 = vpop.f32.mrf.mxu3  ;;  %v9011_v61 = vadd.f32 %v14683_v59, %v9010_v48 }
 0xcf7   : > { %v14697_v56 = vadd.f32 1.0, %v11985_v43  ;;  %v8597_v36 = vpop.f32.mrf.mxu0  ;;  %v11987_v58 = vpop.eup %11986 }
 0xcf8   : > { %11988 = vpow2.f32 %v11257_v21  ;;  %v8507_v31 = vadd.f32 %v8506_v7, %v8418_v0  ;;  %v8686_v12 = vpop.f32.mrf.mxu1  ;;  %v9023_v41 = vmul.f32 %v11987_v58, %v14686_v39  ;;  %vm9028_vm10 = vweird.f32 %v11987_v58 }
 0xcf9   : > { %11990 = vrcp.f32 %v14697_v56  ;;  %vm9029_vm14 = vmor %vm9027_vm12, %vm9028_vm10  ;;  %vm9042_vm1 = vweird.f32 %v14697_v56 }
 0xcfa   : > { %v8596_v26 = vadd.f32 %v8595_v11, %v8507_v31  ;;  %v9024_v18 = vsub.f32 1.0, %v9023_v41 }
 0xcfc   : > { %v8685_v29 = vadd.f32 %v8684_v53, %v8596_v26  ;;  %v9025_v38 = vmul.f32 %v11987_v58, %v9024_v18  ;;  %v9034_v53 = vor.u32 1.1754944e-38, %v9033_v30 }
 0xcfd   : > { %v8419_v44 = vpop.f32.mrf.mxu2 }
 0xcfe   : > { %v11989_v28 = vpop.eup %11988  ;;  %v11258_v40 = vmul.f32 -1.442695, %v8685_v29  ;;  %v8420_v20 = vadd.f32 %v8419_v44, %v14424_v1  ;;  %v8508_v50 = vpop.f32.mrf.mxu3  ;;  %v9015_v1 = vsel %vm14716_vm11, %v14683_v59, %v9011_v61  ;;  %v9026_v32 = vadd.f32 %v11987_v58, %v9025_v38 }
 0xcff   : > { %v14710_v42 = vpop.eup %11990  ;;  %v14721_v11 = vadd.f32 1.0, %v11989_v28  ;;  %v8600_v47 = vpop.f32.mrf.mxu0  ;;  %v9020_v62 = vsel %vm9017_vm13, %v9019_v13, %v9015_v1 }
 0xd00   : > { %v9038_v10 = vmul.f32 %v14710_v42, %v14697_v56  ;;  %11992 = vpow2.f32 %v11258_v40  ;;  %v8689_v17 = vpop.f32.mrf.mxu1  ;;  %v9030_v46 = vsel %vm9029_vm14, %v11987_v58, %v9026_v32  ;;  %v8509_v39 = vadd.f32 %v8508_v50, %v8420_v20 }
 0xd01   : > { %11994 = vrcp.f32 %v14721_v11  ;;  %v9035_v59 = vsel %vm9032_vm15, %v9034_v53, %v9030_v46  ;;  %vm9043_vm0 = vweird.f32 %v14710_v42  ;;  %v9063_v58 = vand.u32 2147483648, %v14721_v11 }
 0xd02   : > { %v9039_v19 = vsub.f32 1.0, %v9038_v10  ;;  %v11727_v51 = vpack.c.bf16 %v9035_v59, %v9020_v62  ;;  %v8598_v6 = vadd.f32 %v8597_v36, %v8509_v39  ;;  %v9061_v26 = vand.u32 2147483647, %v14721_v11  ;;  %vm14744_vm3 = vmor %vm9042_vm1, %vm9043_vm0 }
 0xd03   : > { %vm9057_vm4 = vweird.f32 %v14721_v11  ;;  %v9064_v38 = vor.u32 1.1754944e-38, %v9063_v58 }
 0xd04   : > { %11783 = vst [vmem:[%s14562_s23 + $0x28] sm:$0xff] %v11727_v51   ;;  %v9040_v25 = vmul.f32 %v14710_v42, %v9039_v19  ;;  %v8687_v45 = vadd.f32 %v8686_v12, %v8598_v6  ;;  %v9048_v12 = vand.u32 2147483648, %v14697_v56  ;;  %vm9062_vm7 = vcmp.eq.f32.partialorder %v9061_v26, 8.507059e+37 }
 0xd05   : > { %v8422_v8 = vpop.f32.mrf.mxu2 }
 0xd06   : > { %v11993_v14 = vpop.eup %11992  ;;  %v8423_v57 = vadd.f32 %v8422_v8, %v14427_v22  ;;  %v8511_v3 = vpop.f32.mrf.mxu3  ;;  %v11259_v0 = vmul.f32 -1.442695, %v8687_v45  ;;  %v9041_v36 = vadd.f32 %v14710_v42, %v9040_v25  ;;  %v9046_v22 = vand.u32 2147483647, %v14697_v56 }
 0xd07   : > { %v11995_v4 = vpop.eup %11994  ;;  %v14733_v52 = vadd.f32 1.0, %v11993_v14  ;;  %v8602_v43 = vpop.f32.mrf.mxu0  ;;  %v9049_v28 = vor.u32 1.1754944e-38, %v9048_v12 }
 0xd08   : > { %v9053_v21 = vmul.f32 %v11995_v4, %v14721_v11  ;;  %v8691_v7 = vpop.f32.mrf.mxu1  ;;  %v8512_v31 = vadd.f32 %v8511_v3, %v8423_v57  ;;  %vm9058_vm2 = vweird.f32 %v11995_v4  ;;  %v9045_v63 = vsel %vm14744_vm3, %v14710_v42, %v9041_v36 }
 0xd09   : > { %11996 = vrcp.f32 %v14733_v52  ;;  %vm9047_vm5 = vcmp.eq.f32.partialorder %v9046_v22, 8.507059e+37  ;;  %vm9059_vm6 = vmor %vm9057_vm4, %vm9058_vm2  ;;  %vm9072_vm8 = vweird.f32 %v14733_v52 }
 0xd0a   : > { %v9054_v48 = vsub.f32 1.0, %v9053_v21  ;;  %11998 = vpow2.f32 %v11259_v0  ;;  %v8601_v61 = vadd.f32 %v8600_v47, %v8512_v31  ;;  %v9050_v47 = vsel %vm9047_vm5, %v9049_v28, %v9045_v63 }
 0xd0b   : > { %v9076_v21 = vand.u32 2147483647, %v14733_v52  ;;  %v9078_v0 = vand.u32 2147483648, %v14733_v52 }
 0xd0c   : > { %v9055_v41 = vmul.f32 %v11995_v4, %v9054_v48  ;;  %v8690_v56 = vadd.f32 %v8689_v17, %v8601_v61 }
 0xd0d   : > { %v8424_v29 = vpop.f32.mrf.mxu2  ;;  %vm9077_vm13 = vcmp.eq.f32.partialorder %v9076_v21, 8.507059e+37 }
 0xd0e   : > { %v9056_v24 = vadd.f32 %v11995_v4, %v9055_v41  ;;  %v8425_v5 = vadd.f32 %v8424_v29, %v14434_v15  ;;  %v8513_v30 = vpop.f32.mrf.mxu3  ;;  %v11260_v42 = vmul.f32 -1.442695, %v8690_v56 }
 0xd0f   : > { %v14753_v44 = vpop.eup %11996  ;;  %v8605_v40 = vpop.f32.mrf.mxu0 }
 0xd10   : > { %v11999_v20 = vpop.eup %11998  ;;  %v9060_v50 = vsel %vm9059_vm6, %v11995_v4, %v9056_v24  ;;  %v9068_v55 = vmul.f32 %v14753_v44, %v14733_v52  ;;  %v8694_v11 = vpop.f32.mrf.mxu1  ;;  %v8514_v32 = vadd.f32 %v8513_v30, %v8425_v5  ;;  %12000 = vpow2.f32 %v11260_v42 }
 0xd11   : > { %v9065_v1 = vsel %vm9062_vm7, %v9064_v38, %v9060_v50  ;;  %v8840_v15 = vadd.f32 1.0, %v11999_v20  ;;  %vm9073_vm9 = vweird.f32 %v14753_v44 }
 0xd12   : > { %v11732_v10 = vpack.c.bf16 %v9065_v1, %v9050_v47  ;;  %v9069_v17 = vsub.f32 1.0, %v9068_v55  ;;  %v8603_v13 = vadd.f32 %v8602_v43, %v8514_v32  ;;  %vm14771_vm11 = vmor %vm9072_vm8, %vm9073_vm9 }
 0xd13   : > { %12002 = vrcp.f32 %v8840_v15  ;;  %v9093_v36 = vand.u32 2147483648, %v8840_v15  ;;  %vm9087_vm12 = vweird.f32 %v8840_v15 }
 0xd14   : > { %11784 = vst [vmem:[%s14562_s23 + $0x30] sm:$0xff] %v11732_v10   ;;  %v8692_v46 = vadd.f32 %v8691_v7, %v8603_v13  ;;  %v9070_v51 = vmul.f32 %v14753_v44, %v9069_v17  ;;  %v9091_v7 = vand.u32 2147483647, %v8840_v15 }
 0xd15   : > { %v8427_v53 = vpop.f32.mrf.mxu2  ;;  %v9094_v52 = vor.u32 1.1754944e-38, %v9093_v36 }
 0xd16   : > { %v8428_v19 = vadd.f32 %v8427_v53, %v14437_v37  ;;  %v8516_v39 = vpop.f32.mrf.mxu3  ;;  %v12001_v59 = vpop.eup %12000  ;;  %v11261_v6 = vmul.f32 -1.442695, %v8692_v46  ;;  %v9071_v37 = vadd.f32 %v14753_v44, %v9070_v51  ;;  %vm9092_vm15 = vcmp.eq.f32.partialorder %v9091_v7, 8.507059e+37 }
 0xd17   : > { %v8607_v62 = vpop.f32.mrf.mxu0  ;;  %v14760_v45 = vadd.f32 1.0, %v12001_v59 }
 0xd18   : > { %v8517_v8 = vadd.f32 %v8516_v39, %v8428_v19  ;;  %v8696_v14 = vpop.f32.mrf.mxu1  ;;  %12004 = vpow2.f32 %v11261_v6  ;;  %v9075_v18 = vsel %vm14771_vm11, %v14753_v44, %v9071_v37 }
 0xd19   : > { %v12003_v25 = vpop.eup %12002  ;;  %12006 = vrcp.f32 %v14760_v45  ;;  %vm9102_vm0 = vweird.f32 %v14760_v45  ;;  %v9106_v51 = vand.u32 2147483647, %v14760_v45  ;;  %v9108_v6 = vand.u32 2147483648, %v14760_v45 }
 0xd1a   : > { %v9083_v57 = vmul.f32 %v12003_v25, %v8840_v15  ;;  %v8606_v3 = vadd.f32 %v8605_v40, %v8517_v8  ;;  %vm9088_vm10 = vweird.f32 %v12003_v25 }
 0xd1b   : > { %vm9089_vm14 = vmor %vm9087_vm12, %vm9088_vm10  ;;  %vm9107_vm5 = vcmp.eq.f32.partialorder %v9106_v51, 8.507059e+37 }
 0xd1c   : > { %v9084_v4 = vsub.f32 1.0, %v9083_v57  ;;  %v8695_v43 = vadd.f32 %v8694_v11, %v8606_v3 }
 0xd1d   : > { %v8429_v48 = vpop.f32.mrf.mxu2 }
 0xd1e   : > { %v9085_v31 = vmul.f32 %v12003_v25, %v9084_v4  ;;  %v11262_v22 = vmul.f32 -1.442695, %v8695_v43  ;;  %v8430_v12 = vadd.f32 %v8429_v48, %v14444_v34  ;;  %v8518_v58 = vpop.f32.mrf.mxu3  ;;  %v12005_v61 = vpop.eup %12004  ;;  %v9079_v34 = vor.u32 1.1754944e-38, %v9078_v0 }
 0xd1f   : > { %v8610_v26 = vpop.f32.mrf.mxu0  ;;  %v14778_v56 = vpop.eup %12006  ;;  %v8842_v5 = vadd.f32 1.0, %v12005_v61 }
 0xd20   : > { %v9086_v29 = vadd.f32 %v12003_v25, %v9085_v31  ;;  %12008 = vpow2.f32 %v11262_v22  ;;  %v8519_v63 = vadd.f32 %v8518_v58, %v8430_v12  ;;  %v8699_v24 = vpop.f32.mrf.mxu1  ;;  %v9098_v28 = vmul.f32 %v14778_v56, %v14760_v45 }
 0xd21   : > { %v9080_v44 = vsel %vm9077_vm13, %v9079_v34, %v9075_v18  ;;  %12010 = vrcp.f32 %v8842_v5  ;;  %vm9103_vm1 = vweird.f32 %v14778_v56  ;;  %v9121_v8 = vand.u32 2147483647, %v8842_v5 }
 0xd22   : > { %v9090_v30 = vsel %vm9089_vm14, %v12003_v25, %v9086_v29  ;;  %v8608_v38 = vadd.f32 %v8607_v62, %v8519_v63  ;;  %v9099_v50 = vsub.f32 1.0, %v9098_v28  ;;  %vm14801_vm3 = vmor %vm9102_vm0, %vm9103_vm1  ;;  %vm9117_vm4 = vweird.f32 %v8842_v5 }
 0xd23   : > { %v9095_v40 = vsel %vm9092_vm15, %v9094_v52, %v9090_v30  ;;  %v9109_v45 = vor.u32 1.1754944e-38, %v9108_v6  ;;  %vm9122_vm7 = vcmp.eq.f32.partialorder %v9121_v8, 8.507059e+37 }
 0xd24   : > { %v11737_v20 = vpack.c.bf16 %v9095_v40, %v9080_v44  ;;  %v8697_v55 = vadd.f32 %v8696_v14, %v8608_v38  ;;  %v9100_v17 = vmul.f32 %v14778_v56, %v9099_v50  ;;  %v9123_v14 = vand.u32 2147483648, %v8842_v5 }
 0xd25   : > { %v8432_v42 = vpop.f32.mrf.mxu2 }
 0xd26   : > { %v12009_v11 = vpop.eup %12008  ;;  %11785 = vst [vmem:[%s14562_s23 + $0x38] sm:$0xff] %v11737_v20   ;;  %v11263_v47 = vmul.f32 -1.442695, %v8697_v55  ;;  %v8433_v1 = vadd.f32 %v8432_v42, %v14447_v27  ;;  %v8521_v15 = vpop.f32.mrf.mxu3  ;;  %v9101_v62 = vadd.f32 %v14778_v56, %v9100_v17  ;;  %v9124_v12 = vor.u32 1.1754944e-38, %v9123_v14 }
 0xd27   : > { %v14785_v32 = vadd.f32 1.0, %v12009_v11  ;;  %v8612_v10 = vpop.f32.mrf.mxu0  ;;  %v12011_v46 = vpop.eup %12010 }
 0xd28   : > { %12012 = vpow2.f32 %v11263_v47  ;;  %v8522_v13 = vadd.f32 %v8521_v15, %v8433_v1  ;;  %v8701_v53 = vpop.f32.mrf.mxu1  ;;  %v9113_v19 = vmul.f32 %v12011_v46, %v8842_v5  ;;  %vm9118_vm2 = vweird.f32 %v12011_v46 }
 0xd29   : > { %12014 = vrcp.f32 %v14785_v32  ;;  %v9105_v48 = vsel %vm14801_vm3, %v14778_v56, %v9101_v62  ;;  %vm9119_vm6 = vmor %vm9117_vm4, %vm9118_vm2  ;;  %vm9132_vm9 = vweird.f32 %v14785_v32  ;;  %v9138_v47 = vand.u32 2147483648, %v14785_v32 }
 0xd2a   : > { %v8611_v39 = vadd.f32 %v8610_v26, %v8522_v13  ;;  %v9114_v27 = vsub.f32 1.0, %v9113_v19  ;;  %v9110_v61 = vsel %vm9107_vm5, %v9109_v45, %v9105_v48 }
 0xd2c   : > { %v8700_v59 = vadd.f32 %v8699_v24, %v8611_v39  ;;  %v9115_v3 = vmul.f32 %v12011_v46, %v9114_v27 }
 0xd2d   : > { %v8434_v25 = vpop.f32.mrf.mxu2 }
 0xd2e   : > { %v12013_v57 = vpop.eup %12012  ;;  %v11264_v37 = vmul.f32 -1.442695, %v8700_v59  ;;  %v8435_v4 = vadd.f32 %v8434_v25, %v14454_v16  ;;  %v8523_v43 = vpop.f32.mrf.mxu3  ;;  %v9116_v16 = vadd.f32 %v12011_v46, %v9115_v3  ;;  %v9139_v59 = vor.u32 1.1754944e-38, %v9138_v47 }
 0xd2f   : > { %v14795_v21 = vpop.eup %12014  ;;  %v14805_v7 = vadd.f32 1.0, %v12013_v57  ;;  %v8615_v36 = vpop.f32.mrf.mxu0 }
 0xd30   : > { %v9128_v31 = vmul.f32 %v14795_v21, %v14785_v32  ;;  %12016 = vpow2.f32 %v11264_v37  ;;  %v8704_v22 = vpop.f32.mrf.mxu1  ;;  %v9120_v58 = vsel %vm9119_vm6, %v12011_v46, %v9116_v16  ;;  %v8524_v26 = vadd.f32 %v8523_v43, %v8435_v4  ;;  %v15614_v16 = vld [vmem:[#allocation36_spill] sm:$0xff] }
 0xd31   : > { %12018 = vrcp.f32 %v14805_v7  ;;  %v9125_v18 = vsel %vm9122_vm7, %v9124_v12, %v9120_v58  ;;  %vm9133_vm8 = vweird.f32 %v14795_v21  ;;  %v9153_v1 = vand.u32 2147483648, %v14805_v7 }
 0xd32   : > { %v9129_v41 = vsub.f32 1.0, %v9128_v31  ;;  %v11742_v29 = vpack.c.bf16 %v9125_v18, %v9110_v61  ;;  %v8613_v63 = vadd.f32 %v8612_v10, %v8524_v26  ;;  %v9151_v10 = vand.u32 2147483647, %v14805_v7  ;;  %vm14828_vm11 = vmor %vm9132_vm9, %vm9133_vm8 }
 0xd33   : > { %vm9147_vm12 = vweird.f32 %v14805_v7  ;;  %v9154_v51 = vor.u32 1.1754944e-38, %v9153_v1 }
 0xd34   : > { %11786 = vst [vmem:[%s14562_s23 + $0x40] sm:$0xff] %v11742_v29   ;;  %v9130_v34 = vmul.f32 %v14795_v21, %v9129_v41  ;;  %v8702_v52 = vadd.f32 %v8701_v53, %v8613_v63  ;;  %vm9152_vm15 = vcmp.eq.f32.partialorder %v9151_v10, 8.507059e+37 }
 0xd35   : > { %v8437_v24 = vpop.f32.mrf.mxu2 }
 0xd36   : > { %v12017_v56 = vpop.eup %12016  ;;  %v8438_v5 = vadd.f32 %v8437_v24, %v14457_v49  ;;  %v8526_v30 = vpop.f32.mrf.mxu3  ;;  %v11265_v20 = vmul.f32 -1.442695, %v8702_v52  ;;  %v9131_v55 = vadd.f32 %v14795_v21, %v9130_v34  ;;  %v9136_v49 = vand.u32 2147483647, %v14785_v32 }
 0xd37   : > { %v12019_v28 = vpop.eup %12018  ;;  %v14817_v38 = vadd.f32 1.0, %v12017_v56  ;;  %v8617_v44 = vpop.f32.mrf.mxu0 }
 0xd38   : > { %v9143_v40 = vmul.f32 %v12019_v28, %v14805_v7  ;;  %v8706_v50 = vpop.f32.mrf.mxu1  ;;  %v8527_v11 = vadd.f32 %v8526_v30, %v8438_v5  ;;  %vm9148_vm10 = vweird.f32 %v12019_v28  ;;  %v9135_v46 = vsel %vm14828_vm11, %v14795_v21, %v9131_v55 }
 0xd39   : > { %12020 = vrcp.f32 %v14817_v38  ;;  %vm9137_vm13 = vcmp.eq.f32.partialorder %v9136_v49, 8.507059e+37  ;;  %vm9149_vm14 = vmor %vm9147_vm12, %vm9148_vm10  ;;  %vm9162_vm0 = vweird.f32 %v14817_v38  ;;  %v9166_v5 = vand.u32 2147483647, %v14817_v38 }
 0xd3a   : > { %v9144_v42 = vsub.f32 1.0, %v9143_v40  ;;  %12022 = vpow2.f32 %v11265_v20  ;;  %v8616_v17 = vadd.f32 %v8615_v36, %v8527_v11  ;;  %v9140_v37 = vsel %vm9137_vm13, %v9139_v59, %v9135_v46 }
 0xd3b   : > { %v9168_v30 = vand.u32 2147483648, %v14817_v38  ;;  %vm9167_vm5 = vcmp.eq.f32.partialorder %v9166_v5, 8.507059e+37 }
 0xd3c   : > { %v9145_v15 = vmul.f32 %v12019_v28, %v9144_v42  ;;  %v8705_v32 = vadd.f32 %v8704_v22, %v8616_v17 }
 0xd3d   : > { %v8439_v53 = vpop.f32.mrf.mxu2 }
 0xd3e   : > { %v9146_v19 = vadd.f32 %v12019_v28, %v9145_v15  ;;  %v8440_v39 = vadd.f32 %v8439_v53, %v14464_v35  ;;  %v8528_v62 = vpop.f32.mrf.mxu3  ;;  %v11266_v57 = vmul.f32 -1.442695, %v8705_v32 }
 0xd3f   : > { %v14837_v27 = vpop.eup %12020  ;;  %v8620_v6 = vpop.f32.mrf.mxu0 }
 0xd40   : > { %v12023_v8 = vpop.eup %12022  ;;  %v9150_v14 = vsel %vm9149_vm14, %v12019_v28, %v9146_v19  ;;  %v9158_v25 = vmul.f32 %v14837_v27, %v14817_v38  ;;  %v8709_v3 = vpop.f32.mrf.mxu1  ;;  %v8529_v43 = vadd.f32 %v8528_v62, %v8440_v39  ;;  %12024 = vpow2.f32 %v11266_v57 }
 0xd41   : > { %v9155_v4 = vsel %vm9152_vm15, %v9154_v51, %v9150_v14  ;;  %v8846_v35 = vadd.f32 1.0, %v12023_v8  ;;  %vm9163_vm1 = vweird.f32 %v14837_v27 }
 0xd42   : > { %v11747_v21 = vpack.c.bf16 %v9155_v4, %v9140_v37  ;;  %v9159_v0 = vsub.f32 1.0, %v9158_v25  ;;  %v8618_v7 = vadd.f32 %v8617_v44, %v8529_v43  ;;  %vm14855_vm3 = vmor %vm9162_vm0, %vm9163_vm1  ;;  %v15617_v25 = vld [vmem:[#allocation32_spill] sm:$0xff] }
 0xd43   : > { %12026 = vrcp.f32 %v8846_v35  ;;  %v9181_v28 = vand.u32 2147483647, %v8846_v35  ;;  %v9183_v44 = vand.u32 2147483648, %v8846_v35  ;;  %vm9177_vm4 = vweird.f32 %v8846_v35 }
 0xd44   : > { %11787 = vst [vmem:[%s14562_s23 + $0x48] sm:$0xff] %v11747_v21   ;;  %v8707_v48 = vadd.f32 %v8706_v50, %v8618_v7  ;;  %v9160_v58 = vmul.f32 %v14837_v27, %v9159_v0 }
 0xd45   : > { %v8442_v36 = vpop.f32.mrf.mxu2  ;;  %v9184_v38 = vor.u32 1.1754944e-38, %v9183_v44  ;;  %vm9182_vm7 = vcmp.eq.f32.partialorder %v9181_v28, 8.507059e+37 }
 0xd46   : > { %v8443_v31 = vadd.f32 %v8442_v36, %v15614_v16  ;;  %v8531_v22 = vpop.f32.mrf.mxu3  ;;  %v12025_v12 = vpop.eup %12024  ;;  %v11267_v41 = vmul.f32 -1.442695, %v8707_v48  ;;  %v9161_v56 = vadd.f32 %v14837_v27, %v9160_v58 }
 0xd47   : > { %v8622_v45 = vpop.f32.mrf.mxu0  ;;  %v14844_v29 = vadd.f32 1.0, %v12025_v12 }
 0xd48   : > { %v8532_v26 = vadd.f32 %v8531_v22, %v8443_v31  ;;  %v8711_v61 = vpop.f32.mrf.mxu1  ;;  %12028 = vpow2.f32 %v11267_v41  ;;  %v9165_v1 = vsel %vm14855_vm3, %v14837_v27, %v9161_v56 }
 0xd49   : > { %v12027_v18 = vpop.eup %12026  ;;  %12030 = vrcp.f32 %v14844_v29  ;;  %vm9192_vm8 = vweird.f32 %v14844_v29  ;;  %v9196_v22 = vand.u32 2147483647, %v14844_v29 }
 0xd4a   : > { %v9173_v63 = vmul.f32 %v12027_v18, %v8846_v35  ;;  %v8621_v24 = vadd.f32 %v8620_v6, %v8532_v26  ;;  %vm9178_vm2 = vweird.f32 %v12027_v18 }
 0xd4b   : > { %vm9179_vm6 = vmor %vm9177_vm4, %vm9178_vm2  ;;  %vm9197_vm13 = vcmp.eq.f32.partialorder %v9196_v22, 8.507059e+37 }
 0xd4c   : > { %v9174_v34 = vsub.f32 1.0, %v9173_v63  ;;  %v8710_v52 = vadd.f32 %v8709_v3, %v8621_v24 }
 0xd4d   : > { %v8444_v40 = vpop.f32.mrf.mxu2 }
 0xd4e   : > { %v9175_v20 = vmul.f32 %v12027_v18, %v9174_v34  ;;  %v11268_v50 = vmul.f32 -1.442695, %v8710_v52  ;;  %v8445_v55 = vadd.f32 %v8444_v40, %v14474_v2  ;;  %v8533_v42 = vpop.f32.mrf.mxu3  ;;  %v12029_v47 = vpop.eup %12028  ;;  %v9169_v2 = vor.u32 1.1754944e-38, %v9168_v30 }
 0xd4f   : > { %v8625_v49 = vpop.f32.mrf.mxu0  ;;  %v14862_v17 = vpop.eup %12030  ;;  %v8848_v13 = vadd.f32 1.0, %v12029_v47 }
 0xd50   : > { %v9176_v15 = vadd.f32 %v12027_v18, %v9175_v20  ;;  %12032 = vpow2.f32 %v11268_v50  ;;  %v8534_v10 = vadd.f32 %v8533_v42, %v8445_v55  ;;  %v8714_v53 = vpop.f32.mrf.mxu1  ;;  %v9188_v19 = vmul.f32 %v14862_v17, %v14844_v29 }
 0xd51   : > { %v9170_v39 = vsel %vm9167_vm5, %v9169_v2, %v9165_v1  ;;  %12034 = vrcp.f32 %v8848_v13  ;;  %vm9193_vm9 = vweird.f32 %v14862_v17  ;;  %v9211_v12 = vand.u32 2147483647, %v8848_v13 }
 0xd52   : > { %v9180_v46 = vsel %vm9179_vm6, %v12027_v18, %v9176_v15  ;;  %v8623_v32 = vadd.f32 %v8622_v45, %v8534_v10  ;;  %v9189_v59 = vsub.f32 1.0, %v9188_v19  ;;  %v9198_v45 = vand.u32 2147483648, %v14844_v29  ;;  %vm14885_vm11 = vmor %vm9192_vm8, %vm9193_vm9 }
 0xd53   : > { %v9185_v62 = vsel %vm9182_vm7, %v9184_v38, %v9180_v46  ;;  %v9213_v58 = vand.u32 2147483648, %v8848_v13  ;;  %vm9207_vm12 = vweird.f32 %v8848_v13  ;;  %vm9212_vm15 = vcmp.eq.f32.partialorder %v9211_v12, 8.507059e+37 }
 0xd54   : > { %v11752_v27 = vpack.c.bf16 %v9185_v62, %v9170_v39  ;;  %v8712_v51 = vadd.f32 %v8711_v61, %v8623_v32  ;;  %v9190_v4 = vmul.f32 %v14862_v17, %v9189_v59  ;;  %v9199_v28 = vor.u32 1.1754944e-38, %v9198_v45 }
 0xd55   : > { %v8447_v6 = vpop.f32.mrf.mxu2  ;;  %v9214_v29 = vor.u32 1.1754944e-38, %v9213_v58 }
 0xd56   : > { %v12033_v8 = vpop.eup %12032  ;;  %11788 = vst [vmem:[%s14562_s23 + $0x50] sm:$0xff] %v11752_v27   ;;  %v11269_v14 = vmul.f32 -1.442695, %v8712_v51  ;;  %v8448_v57 = vadd.f32 %v8447_v6, %v15617_v25  ;;  %v8536_v3 = vpop.f32.mrf.mxu3  ;;  %v9191_v48 = vadd.f32 %v14862_v17, %v9190_v4 }
 0xd57   : > { %v14869_v37 = vadd.f32 1.0, %v12033_v8  ;;  %v12035_v43 = vpop.eup %12034  ;;  %v8627_v21 = vpop.f32.mrf.mxu0 }
 0xd58   : > { %12036 = vpow2.f32 %v11269_v14  ;;  %v8537_v35 = vadd.f32 %v8536_v3, %v8448_v57  ;;  %v9203_v0 = vmul.f32 %v12035_v43, %v8848_v13  ;;  %v8716_v36 = vpop.f32.mrf.mxu1  ;;  %vm9208_vm10 = vweird.f32 %v12035_v43 }
 0xd59   : > { %12038 = vrcp.f32 %v14869_v37  ;;  %v9195_v5 = vsel %vm14885_vm11, %v14862_v17, %v9191_v48  ;;  %vm9209_vm14 = vmor %vm9207_vm12, %vm9208_vm10  ;;  %vm9222_vm1 = vweird.f32 %v14869_v37  ;;  %v9228_v27 = vand.u32 2147483648, %v14869_v37 }
 0xd5a   : > { %v8626_v7 = vadd.f32 %v8625_v49, %v8537_v35  ;;  %v9204_v16 = vsub.f32 1.0, %v9203_v0  ;;  %v9200_v50 = vsel %vm9197_vm13, %v9199_v28, %v9195_v5 }
 0xd5b   : > { %v9229_v0 = vor.u32 1.1754944e-38, %v9228_v27 }
 0xd5c   : > { %v8715_v31 = vadd.f32 %v8714_v53, %v8626_v7  ;;  %v9205_v61 = vmul.f32 %v12035_v43, %v9204_v16 }
 0xd5d   : > { %v8449_v41 = vpop.f32.mrf.mxu2 }
 0xd5e   : > { %v12037_v26 = vpop.eup %12036  ;;  %v11270_v18 = vmul.f32 -1.442695, %v8715_v31  ;;  %v8450_v63 = vadd.f32 %v8449_v41, %v14484_v9  ;;  %v8538_v24 = vpop.f32.mrf.mxu3  ;;  %v9206_v30 = vadd.f32 %v12035_v43, %v9205_v61 }
 0xd5f   : > { %v14879_v56 = vpop.eup %12038  ;;  %v14889_v52 = vadd.f32 1.0, %v12037_v26  ;;  %v8630_v42 = vpop.f32.mrf.mxu0 }
 0xd60   : > { %v9218_v9 = vmul.f32 %v14879_v56, %v14869_v37  ;;  %12040 = vpow2.f32 %v11270_v18  ;;  %v9210_v44 = vsel %vm9209_vm14, %v12035_v43, %v9206_v30  ;;  %v8539_v20 = vadd.f32 %v8538_v24, %v8450_v63  ;;  %v8719_v47 = vpop.f32.mrf.mxu1 }
 0xd61   : > { %12042 = vrcp.f32 %v14889_v52  ;;  %v9215_v55 = vsel %vm9212_vm15, %v9214_v29, %v9210_v44  ;;  %vm9223_vm0 = vweird.f32 %v14879_v56  ;;  %v9243_v59 = vand.u32 2147483648, %v14889_v52 }
 0xd62   : > { %v9219_v40 = vsub.f32 1.0, %v9218_v9  ;;  %v11757_v11 = vpack.c.bf16 %v9215_v55, %v9200_v50  ;;  %v8628_v49 = vadd.f32 %v8627_v21, %v8539_v20  ;;  %v9241_v6 = vand.u32 2147483647, %v14889_v52  ;;  %vm14911_vm3 = vmor %vm9222_vm1, %vm9223_vm0 }
 0xd63   : > { %vm9237_vm4 = vweird.f32 %v14889_v52  ;;  %v9244_v7 = vor.u32 1.1754944e-38, %v9243_v59 }
 0xd64   : > { %11789 = vst [vmem:[%s14562_s23 + $0x58] sm:$0xff] %v11757_v11   ;;  %v9220_v10 = vmul.f32 %v14879_v56, %v9219_v40  ;;  %v8717_v17 = vadd.f32 %v8716_v36, %v8628_v49  ;;  %vm9242_vm7 = vcmp.eq.f32.partialorder %v9241_v6, 8.507059e+37 }
 0xd65   : > { %v8452_v1 = vpop.f32.mrf.mxu2 }
 0xd66   : > { %v12041_v15 = vpop.eup %12040  ;;  %v8453_v2 = vadd.f32 %v8452_v1, %v14487_v23  ;;  %v8541_v38 = vpop.f32.mrf.mxu3  ;;  %v11271_v19 = vmul.f32 -1.442695, %v8717_v17  ;;  %v9221_v32 = vadd.f32 %v14879_v56, %v9220_v10  ;;  %v9226_v23 = vand.u32 2147483647, %v14869_v37 }
 0xd67   : > { %v12043_v13 = vpop.eup %12042  ;;  %v14900_v53 = vadd.f32 1.0, %v12041_v15  ;;  %v8632_v25 = vpop.f32.mrf.mxu0 }
 0xd68   : > { %v9233_v46 = vmul.f32 %v12043_v13, %v14889_v52  ;;  %v8542_v62 = vadd.f32 %v8541_v38, %v8453_v2  ;;  %vm9238_vm2 = vweird.f32 %v12043_v13  ;;  %v9225_v3 = vsel %vm14911_vm3, %v14879_v56, %v9221_v32  ;;  %v8721_v36 = vpop.f32.mrf.mxu1 }
 0xd69   : > { %12044 = vrcp.f32 %v14900_v53  ;;  %vm9227_vm5 = vcmp.eq.f32.partialorder %v9226_v23, 8.507059e+37  ;;  %vm9239_vm6 = vmor %vm9237_vm4, %vm9238_vm2  ;;  %vm9252_vm8 = vweird.f32 %v14900_v53  ;;  %v9258_v11 = vand.u32 2147483648, %v14900_v53 }
 0xd6a   : > { %v9234_v39 = vsub.f32 1.0, %v9233_v46  ;;  %12046 = vpow2.f32 %v11271_v19  ;;  %v8631_v8 = vadd.f32 %v8630_v42, %v8542_v62  ;;  %v9230_v45 = vsel %vm9227_vm5, %v9229_v0, %v9225_v3 }
 0xd6b   : > { %v9256_v42 = vand.u32 2147483647, %v14900_v53  ;;  %v9259_v62 = vor.u32 1.1754944e-38, %v9258_v11 }
 0xd6c   : > { %v9235_v51 = vmul.f32 %v12043_v13, %v9234_v39  ;;  %v8720_v4 = vadd.f32 %v8719_v47, %v8631_v8 }
 0xd6d   : > { %v8454_v57 = vpop.f32.mrf.mxu2  ;;  %vm9257_vm13 = vcmp.eq.f32.partialorder %v9256_v42, 8.507059e+37 }
 0xd6e   : > { %v9236_v37 = vadd.f32 %v12043_v13, %v9235_v51  ;;  %v8455_v35 = vadd.f32 %v8454_v57, %v14494_v33  ;;  %v8543_v43 = vpop.f32.mrf.mxu3  ;;  %v11272_v22 = vmul.f32 -1.442695, %v8720_v4 }
 0xd6f   : > { %v14920_v21 = vpop.eup %12044  ;;  %v8635_v34 = vpop.f32.mrf.mxu0 }
 0xd70   : > { %v12047_v48 = vpop.eup %12046  ;;  %v9240_v16 = vsel %vm9239_vm6, %v12043_v13, %v9236_v37  ;;  %v9248_v31 = vmul.f32 %v14920_v21, %v14900_v53  ;;  %v8544_v58 = vadd.f32 %v8543_v43, %v8455_v35  ;;  %12048 = vpow2.f32 %v11272_v22  ;;  %v8724_v44 = vpop.f32.mrf.mxu1 }
 0xd71   : > { %v9245_v12 = vsel %vm9242_vm7, %v9244_v7, %v9240_v16  ;;  %v8852_v33 = vadd.f32 1.0, %v12047_v48  ;;  %vm9253_vm9 = vweird.f32 %v14920_v21 }
 0xd72   : > { %v11762_v41 = vpack.c.bf16 %v9245_v12, %v9230_v45  ;;  %v9249_v26 = vsub.f32 1.0, %v9248_v31  ;;  %v8633_v61 = vadd.f32 %v8632_v25, %v8544_v58  ;;  %vm14939_vm11 = vmor %vm9252_vm8, %vm9253_vm9 }
 0xd73   : > { %12050 = vrcp.f32 %v8852_v33  ;;  %v9271_v49 = vand.u32 2147483647, %v8852_v33  ;;  %v9273_v47 = vand.u32 2147483648, %v8852_v33  ;;  %vm9267_vm12 = vweird.f32 %v8852_v33 }
 0xd74   : > { %11790 = vst [vmem:[%s14562_s23 + $0x60] sm:$0xff] %v11762_v41   ;;  %v8722_v63 = vadd.f32 %v8721_v36, %v8633_v61  ;;  %v9250_v5 = vmul.f32 %v14920_v21, %v9249_v26 }
 0xd75   : > { %v8457_v18 = vpop.f32.mrf.mxu2  ;;  %vm9272_vm15 = vcmp.eq.f32.partialorder %v9271_v49, 8.507059e+37 }
 0xd76   : > { %v8458_v24 = vadd.f32 %v8457_v18, %v14497_v60  ;;  %v8546_v56 = vpop.f32.mrf.mxu3  ;;  %v12049_v52 = vpop.eup %12048  ;;  %v11273_v30 = vmul.f32 -1.442695, %v8722_v63  ;;  %v9251_v60 = vadd.f32 %v14920_v21, %v9250_v5 }
 0xd77   : > { %v14928_v29 = vadd.f32 1.0, %v12049_v52  ;;  %v8637_v23 = vpop.f32.mrf.mxu0 }
 0xd78   : > { %v8547_v9 = vadd.f32 %v8546_v56, %v8458_v24  ;;  %12052 = vpow2.f32 %v11273_v30  ;;  %v9255_v46 = vsel %vm14939_vm11, %v14920_v21, %v9251_v60  ;;  %v8726_v14 = vpop.f32.mrf.mxu1 }
 0xd79   : > { %v12051_v28 = vpop.eup %12050  ;;  %12054 = vrcp.f32 %v14928_v29  ;;  %v9260_v6 = vsel %vm9257_vm13, %v9259_v62, %v9255_v46  ;;  %vm9282_vm1 = vweird.f32 %v14928_v29  ;;  %v9288_v48 = vand.u32 2147483648, %v14928_v29 }
 0xd7a   : > { %v9263_v40 = vmul.f32 %v12051_v28, %v8852_v33  ;;  %v8636_v20 = vadd.f32 %v8635_v34, %v8547_v9  ;;  %vm9268_vm10 = vweird.f32 %v12051_v28  ;;  %v9286_v22 = vand.u32 2147483647, %v14928_v29 }
 0xd7b   : > { %vm9269_vm14 = vmor %vm9267_vm12, %vm9268_vm10  ;;  %v9289_v18 = vor.u32 1.1754944e-38, %v9288_v48 }
 0xd7c   : > { %v9264_v50 = vsub.f32 1.0, %v9263_v40  ;;  %v8725_v55 = vadd.f32 %v8724_v44, %v8636_v20  ;;  %vm9287_vm6 = vcmp.eq.f32.partialorder %v9286_v22, 8.507059e+37 }
 0xd7d   : > { %v8459_v1 = vpop.f32.mrf.mxu2 }
 0xd7e   : > { %v9265_v15 = vmul.f32 %v12051_v28, %v9264_v50  ;;  %v11274_v10 = vmul.f32 -1.442695, %v8725_v55  ;;  %v8460_v17 = vadd.f32 %v8459_v1, %v14504_v54  ;;  %v8548_v38 = vpop.f32.mrf.mxu3  ;;  %v12053_v13 = vpop.eup %12052  ;;  %v9274_v54 = vor.u32 1.1754944e-38, %v9273_v47 }
 0xd7f   : > { %v12055_v39 = vpop.eup %12054  ;;  %v8854_v53 = vadd.f32 1.0, %v12053_v13 }
 0xd80   : > { %v9266_v19 = vadd.f32 %v12051_v28, %v9265_v15  ;;  %12056 = vpow2.f32 %v11274_v10  ;;  %v8549_v32 = vadd.f32 %v8548_v38, %v8460_v17  ;;  %v9278_v59 = vmul.f32 %v12055_v39, %v14928_v29 }
 0xd81   : > { %12058 = vrcp.f32 %v8854_v53  ;;  %vm9283_vm0 = vweird.f32 %v12055_v39  ;;  %v9303_v16 = vand.u32 2147483648, %v8854_v53  ;;  %v9301_v12 = vand.u32 2147483647, %v8854_v53 }
 0xd82   : > { %v9270_v27 = vsel %vm9269_vm14, %v12051_v28, %v9266_v19  ;;  %v8638_v51 = vadd.f32 %v8637_v23, %v8549_v32  ;;  %v9279_v57 = vsub.f32 1.0, %v9278_v59  ;;  %vm9284_vm3 = vmor %vm9282_vm1, %vm9283_vm0  ;;  %vm9297_vm4 = vweird.f32 %v8854_v53 }
 0xd83   : > { %v9275_v8 = vsel %vm9272_vm15, %v9274_v54, %v9270_v27  ;;  %v9304_v63 = vor.u32 1.1754944e-38, %v9303_v16  ;;  %vm9302_vm7 = vcmp.eq.f32.partialorder %v9301_v12, 8.507059e+37 }
 0xd84   : > { %v11767_v25 = vpack.c.bf16 %v9275_v8, %v9260_v6  ;;  %v8727_v3 = vadd.f32 %v8726_v14, %v8638_v51  ;;  %v9280_v43 = vmul.f32 %v12055_v39, %v9279_v57 }
 0xd86   : > { %v12057_v37 = vpop.eup %12056  ;;  %11791 = vst [vmem:[%s14562_s23 + $0x68] sm:$0xff] %v11767_v25   ;;  %v11275_v4 = vmul.f32 -1.442695, %v8727_v3  ;;  %v9281_v7 = vadd.f32 %v12055_v39, %v9280_v43 }
 0xd87   : > { %v8855_v35 = vadd.f32 1.0, %v12057_v37  ;;  %v12059_v21 = vpop.eup %12058 }
 0xd88   : > { %12060 = vpow2.f32 %v11275_v4  ;;  %v9293_v0 = vmul.f32 %v12059_v21, %v8854_v53  ;;  %vm9298_vm2 = vweird.f32 %v12059_v21  ;;  %v9285_v41 = vsel %vm9284_vm3, %v12055_v39, %v9281_v7 }
 0xd89   : > { %12062 = vrcp.f32 %v8855_v35  ;;  %vm9299_vm5 = vmor %vm9297_vm4, %vm9298_vm2  ;;  %v9290_v34 = vsel %vm9287_vm6, %v9289_v18, %v9285_v41  ;;  %vm9312_vm9 = vweird.f32 %v8855_v35  ;;  %v9318_v40 = vand.u32 2147483648, %v8855_v35 }
 0xd8a   : > { %v9294_v36 = vsub.f32 1.0, %v9293_v0  ;;  %v9316_v60 = vand.u32 2147483647, %v8855_v35 }
 0xd8b   : > { %v9319_v49 = vor.u32 1.1754944e-38, %v9318_v40 }
 0xd8c   : > { %v9295_v45 = vmul.f32 %v12059_v21, %v9294_v36  ;;  %vm9317_vm14 = vcmp.eq.f32.partialorder %v9316_v60, 8.507059e+37 }
 0xd8e   : > { %v12061_v31 = vpop.eup %12060  ;;  %v9296_v26 = vadd.f32 %v12059_v21, %v9295_v45 }
 0xd8f   : > { %v12063_v33 = vpop.eup %12062  ;;  %v8856_v58 = vadd.f32 1.0, %v12061_v31 }
 0xd90   : > { %v9308_v61 = vmul.f32 %v12063_v33, %v8855_v35  ;;  %v9300_v24 = vsel %vm9299_vm5, %v12059_v21, %v9296_v26  ;;  %vm9313_vm8 = vweird.f32 %v12063_v33 }
 0xd91   : > { %12064 = vrcp.f32 %v8856_v58  ;;  %v9305_v52 = vsel %vm9302_vm7, %v9304_v63, %v9300_v24  ;;  %v9333_v20 = vand.u32 2147483648, %v8856_v58  ;;  %v9331_v55 = vand.u32 2147483647, %v8856_v58  ;;  %vm9314_vm11 = vmor %vm9312_vm9, %vm9313_vm8 }
 0xd92   : > { %v9309_v56 = vsub.f32 1.0, %v9308_v61  ;;  %v11772_v5 = vpack.c.bf16 %v9305_v52, %v9290_v34  ;;  %vm9327_vm12 = vweird.f32 %v8856_v58 }
 0xd93   : > { %v9334_v47 = vor.u32 1.1754944e-38, %v9333_v20  ;;  %vm9332_vm15 = vcmp.eq.f32.partialorder %v9331_v55, 8.507059e+37 }
 0xd94   : > { %11792 = vst [vmem:[%s14562_s23 + $0x70] sm:$0xff] %v11772_v5   ;;  %v9310_v30 = vmul.f32 %v12063_v33, %v9309_v56 }
 0xd96   : > { %v9311_v29 = vadd.f32 %v12063_v33, %v9310_v30 }
 0xd97   : > { %v12065_v9 = vpop.eup %12064 }
 0xd98   : > { %v9323_v28 = vmul.f32 %v12065_v9, %v8856_v58  ;;  %vm9328_vm10 = vweird.f32 %v12065_v9  ;;  %v9315_v42 = vsel %vm9314_vm11, %v12063_v33, %v9311_v29 }
 0xd99   : > { %vm9329_vm13 = vmor %vm9327_vm12, %vm9328_vm10  ;;  %v9320_v15 = vsel %vm9317_vm14, %v9319_v49, %v9315_v42 }
 0xd9a   : > { %v9324_v44 = vsub.f32 1.0, %v9323_v28 }
 0xd9c   : > { %v9325_v50 = vmul.f32 %v12065_v9, %v9324_v44 }
 0xd9e   : > { %v9326_v11 = vadd.f32 %v12065_v9, %v9325_v50 }
 0xda0   : > { %v9330_v1 = vsel %vm9329_vm13, %v12065_v9, %v9326_v11 }
 0xda1   : > { %v9335_v10 = vsel %vm9332_vm15, %v9334_v47, %v9330_v1 }
 0xda2   : > { %v11777_v17 = vpack.c.bf16 %v9335_v10, %v9320_v15 }
 0xda4   : > { %11793 = vst [vmem:[%s14562_s23 + $0x78] sm:$0xff] %v11777_v17  }
 0xda5   : > { %12340 = shalt.err (!%p12337_p9)
}
 0xda6   : > { %s12412_s3 = smov 64   ;;  %s12413_s23 = smov 4  }
 0xda7   : > { %11840 = dma.vmem_to_hbm [thread:$0]  (%p12563_p13), %s9415_s16, 2048, %s9417_s15, %s9402_s19, %s12412_s3, %s12412_s3, %s12413_s23  }
 0xda8 PF: > { %s9431_s22 = sand.u32 1, %s12383_s30   ;;  %p15624_p10 = scmp.ge.s32.totalorder %s12395_s12, 2 }
 0xda9   : > { %s9432_s1 = scalar_lea.sflag [#allocation4], %s9431_s22 }
 0xdaa   : > { %p11869_p11 = pnand %p15624_p10, %p12568_p4 }
 0xdac   : > { %p11870_p0 = pneg %p11869_p11 }
 0xdae   : > { %12378 = dma.done.wait (%p11870_p0), %s9432_s1, 2048  }
 0xdaf   : > { %12380 = vsyncadd (%p11870_p0), %s9432_s1, 4294965248  ;;  %p26_p2 = scmp.ge.s32.totalorder %s12543_s28, 4   ;;  %s15625_s30 = smov %s12387_s10 }
 0xdb0   : > { %s15626_s10 = smov %s12391_s11  ;;  %s15627_s11 = smov %s12555_s13 }
 0xdb1   : > { %s15628_s12 = smov %s12543_s28  ;;  %28 = sbr.rel (!%p26_p2) target bundleno = 13 (0xd), region = 129 }
 0xdb6   :  { %9438 = vsyncpa [#allocation3], 1 }
 0xdb7   :  { %9440 = vsyncpa [#allocation3 + $0x1], 1 }
 0xdb8   :  { %9441 = vsyncpa [#allocation6], 1 }
 0xdb9   :  { %9442 = vsyncpa [#allocation9], 1 }
 0xdba   :  { %9443 = vsyncpa [#allocation12], 1 }
 0xdbb   :  { %9444 = vsyncpa [#allocation15], 1 }
 0xdbc   :  { %9445 = vsyncpa [#allocation4], 1 }
 0xdbd   :  { %9447 = vsyncpa [#allocation4 + $0x1], 1 }

</bundles_post_ra>
